<compile_context>
chip_gen: v7x
topology: tpu7x:2x2x1
jax: 0.10.0
libtpu: 0.0.40
codegen_flags: <defaults>
</compile_context>

<pallas_src>
import functools

import jax
import jax.numpy as jnp
import numpy as np
from jax.experimental import pallas as pl
from jax.experimental.pallas import tpu as pltpu


# Model constants (fixed by the PyTorch module definition).
KSIZE = 5          # conv kernel size (both convs)
C1_OUT = 20        # conv1 out channels
C2_OUT = 50        # conv2 out channels
POOL_HW = 4        # AdaptiveMaxPool2d(4)
FC1_OUT = 500
FC1_OUT_PAD = 512  # fc1 output padded to a lane-dense width (multiple of 128)
CLS_PAD = 128      # logits padded to one full lane tile
MAX_B_TILE = 8     # images per grid step (cap)


# ---------------------------------------------------------------------------
# Fused forward kernel (B_TILE images per grid step)
# ---------------------------------------------------------------------------

def _fused_forward_kernel(x_ref, t1_ref, b1_ref, t2_ref, b2_ref,
                          wf1_ref, bf1_ref, wf2_ref, bf2_ref,
                          logits_ref, embs_ref, *,
                          B, WC, OH1, PH1, PW1, OH2, PH2, PW2, k2h, k2w):
    f32, bf16 = jnp.float32, jnp.bfloat16
    seg1 = PW1 * C1_OUT                     # pooled conv1 row width (lanes)
    seg2 = PW2 * C2_OUT                     # pooled conv2 row width (lanes)

    x = x_ref[...]                                                   # (B, H, W*C) f32

    # ---- conv1 + 2x2/2 max pool : one MXU matmul vs width-Toeplitz ---------
    # Rows are (b, oh); columns of t1 are ordered (dh? no -> dw, pw, oc), so the
    # width half of the pool is two lane-block maxima and the height half is a
    # sublane-pair max after regrouping rows.
    lhs1 = jnp.concatenate([x[:, ki:ki + OH1, :] for ki in range(KSIZE)], axis=-1)
    lhs1 = lhs1.reshape(B * OH1, KSIZE * WC).astype(bf16)
    y1 = jnp.dot(lhs1, t1_ref[...], preferred_element_type=f32)      # (B*OH1, 2*seg1)
    y1 = jnp.max(y1.reshape(B, PH1, 2, 2 * seg1), axis=2)            # pool rows (dh)
    p1 = jnp.maximum(y1[..., :seg1], y1[..., seg1:])                 # pool cols (dw)
    p1 = jnp.maximum(p1 + b1_ref[...], 0.0)                          # bias + ReLU (f32)

    # ---- conv2 + AdaptiveMaxPool2d(4) : one MXU matmul vs width-Toeplitz ---
    lhs2 = jnp.concatenate([p1[:, ki:ki + OH2, :] for ki in range(KSIZE)], axis=-1)
    lhs2 = lhs2.reshape(B * OH2, KSIZE * seg1).astype(bf16)
    y2 = jnp.dot(lhs2, t2_ref[...], preferred_element_type=f32)      # (B*OH2, k2w*seg2)
    y2 = jnp.max(y2.reshape(B, PH2, k2h, k2w * seg2), axis=2)        # pool rows
    p2 = y2[..., :seg2]
    for j in range(1, k2w):                                          # pool cols
        p2 = jnp.maximum(p2, y2[..., j * seg2:(j + 1) * seg2])
    p2 = jnp.maximum(p2 + b2_ref[...], 0.0)                          # (B, PH2, seg2)

    # ---- fc1 + ReLU : PH2 accumulating matmuls (M=B, K=seg2) ----------------
    # wf1 rows were pre-permuted to (h, w, c) so PyTorch's NCHW flatten is
    # folded into the weight; outputs are zero-padded to 512 lanes.
    facc = jnp.zeros((B, FC1_OUT_PAD), f32)
    for h in range(PH2):
        facc = facc + jnp.dot(p2[:, h, :].astype(bf16), wf1_ref[h],
                              preferred_element_type=f32)
    embs = jnp.maximum(facc + bf1_ref[...], 0.0)                     # (B, 512)

    # ---- fc2 : single matmul, lane-dense padded logits ----------------------
    logits = jnp.dot(embs.astype(bf16), wf2_ref[...],
                     preferred_element_type=f32) + bf2_ref[...]      # (B, 128)

    embs_ref[0] = embs
    logits_ref[0] = logits


# ---------------------------------------------------------------------------
# One-time parameter re-layout (hoisted out of the forward)
# ---------------------------------------------------------------------------

def prepare_params(params, height=28, width=28):
    p = {k: np.asarray(v, np.float32) for k, v in params.items()}
    C = int(p["conv1_w"].shape[1])
    classes = int(p["fc2_w"].shape[0])
    H, W = int(height), int(width)
    WC = W * C

    OH1, OW1 = H - KSIZE + 1, W - KSIZE + 1
    assert OH1 % 2 == 0 and OW1 % 2 == 0, "odd conv1 output size unsupported"
    PH1, PW1 = OH1 // 2, OW1 // 2
    OH2, OW2 = PH1 - KSIZE + 1, PW1 - KSIZE + 1
    # TODO(synk): AdaptiveMaxPool2d with non-divisible (overlapping) windows is
    # not implemented; MNIST-style 28x28 inputs hit the uniform-window case.
    assert OH2 >= POOL_HW and OW2 >= POOL_HW
    assert OH2 % POOL_HW == 0 and OW2 % POOL_HW == 0, (OH2, OW2)
    k2w = OW2 // POOL_HW
    PH2 = PW2 = POOL_HW

    # conv1 width-Toeplitz: rows (ki, w_in, c), columns (dw, pw, oc) so the
    # fused 2x2 max pool over width is two lane-block maxima in the kernel.
    w1 = p["conv1_w"]                                        # (20, C, 5, 5)
    t1 = np.zeros((KSIZE * WC, 2 * PW1 * C1_OUT), np.float32)
    for ki in range(KSIZE):
        for dw in range(2):
            for pw in range(PW1):
                ow = 2 * pw + dw
                col = (dw * PW1 + pw) * C1_OUT
                for kj in range(KSIZE):
                    row = ki * WC + (ow + kj) * C
                    t1[row:row + C, col:col + C1_OUT] = w1[:, :, ki, kj].T

    # conv2 width-Toeplitz: rows (ki, pw1, cin), columns (dw2, pw2, oc) so the
    # adaptive max pool over width is k2w lane-block maxima in the kernel.
    w2 = p["conv2_w"]                                        # (50, 20, 5, 5)
    t2 = np.zeros((KSIZE * PW1 * C1_OUT, k2w * PW2 * C2_OUT), np.float32)
    for ki in range(KSIZE):
        for dw in range(k2w):
            for pw2 in range(PW2):
                ow = k2w * pw2 + dw
                col = (dw * PW2 + pw2) * C2_OUT
                for kj in range(KSIZE):
                    row = ki * PW1 * C1_OUT + (ow + kj) * C1_OUT
                    t2[row:row + C1_OUT, col:col + C2_OUT] = w2[:, :, ki, kj].T

    # Conv biases tiled over the pooled width (added once, after pooling).
    b1t = np.tile(p["conv1_b"], PW1).reshape(1, PW1 * C1_OUT)
    b2t = np.tile(p["conv2_b"], PW2).reshape(1, PW2 * C2_OUT)

    # fc1: fold PyTorch's (c, h, w) flatten into the weight; rows per pooled
    # row h are ordered (w, c); outputs zero-padded to 512 lanes.
    wf1_core = p["fc1_w"].reshape(FC1_OUT, C2_OUT, PH2, PW2).transpose(2, 3, 1, 0)
    wf1 = np.zeros((PH2, PW2 * C2_OUT, FC1_OUT_PAD), np.float32)
    wf1[:, :, :FC1_OUT] = wf1_core.reshape(PH2, PW2 * C2_OUT, FC1_OUT)
    bf1 = np.zeros((1, FC1_OUT_PAD), np.float32)
    bf1[0, :FC1_OUT] = p["fc1_b"]

    # fc2: (classes, 500) -> (512, 128) zero-padded; outputs sliced outside.
    wf2 = np.zeros((FC1_OUT_PAD, CLS_PAD), np.float32)
    wf2[:FC1_OUT, :classes] = p["fc2_w"].T
    bf2 = np.zeros((1, CLS_PAD), np.float32)
    bf2[0, :classes] = p["fc2_b"]

    weights = dict(
        t1=jnp.asarray(t1, jnp.bfloat16),
        b1=jnp.asarray(b1t, jnp.float32),
        t2=jnp.asarray(t2, jnp.bfloat16),
        b2=jnp.asarray(b2t, jnp.float32),
        wf1=jnp.asarray(wf1, jnp.bfloat16),
        bf1=jnp.asarray(bf1, jnp.float32),
        wf2=jnp.asarray(wf2, jnp.bfloat16),
        bf2=jnp.asarray(bf2, jnp.float32),
    )
    return {"weights": weights, "classes": classes,
            "channels": C, "height": H, "width": W}


# ---------------------------------------------------------------------------
# Forward wrapper
# ---------------------------------------------------------------------------

@functools.partial(jax.jit, static_argnames=("classes",))
def _small_forward_jit(weights, x_nchw, *, classes):
    N, C, H, W = x_nchw.shape
    WC = W * C
    OH1, OW1 = H - KSIZE + 1, W - KSIZE + 1
    assert OH1 % 2 == 0 and OW1 % 2 == 0, "odd conv1 output size unsupported"
    PH1, PW1 = OH1 // 2, OW1 // 2
    OH2, OW2 = PH1 - KSIZE + 1, PW1 - KSIZE + 1
    assert OH2 % POOL_HW == 0 and OW2 % POOL_HW == 0, (OH2, OW2)
    k2h, k2w = OH2 // POOL_HW, OW2 // POOL_HW
    PH2 = PW2 = POOL_HW
    assert weights["t1"].shape == (KSIZE * WC, 2 * PW1 * C1_OUT), \
        "prepare_params() was built for a different input size"

    x = jnp.transpose(x_nchw, (0, 2, 3, 1)).reshape(N, H, WC).astype(jnp.float32)

    # Images per grid step; keep >= 2 grid steps when N >= 2 (v7x megacore).
    b_tile = max(1, min(MAX_B_TILE, pl.cdiv(N, 2)))
    n_pad = pl.cdiv(N, b_tile) * b_tile
    if n_pad != N:
        x = jnp.pad(x, ((0, n_pad - N), (0, 0), (0, 0)))
    steps = n_pad // b_tile

    kernel = functools.partial(
        _fused_forward_kernel, B=b_tile, WC=WC, OH1=OH1, PH1=PH1, PW1=PW1,
        OH2=OH2, PH2=PH2, PW2=PW2, k2h=k2h, k2w=k2w)

    def const_spec(shape):
        return pl.BlockSpec(shape, lambda i, _n=len(shape): (0,) * _n)

    grid_spec = pltpu.PrefetchScalarGridSpec(
        num_scalar_prefetch=0,
        grid=(steps,),                                  # one batch tile per step
        in_specs=[
            pl.BlockSpec((b_tile, H, WC), lambda i: (i, 0, 0)),
            const_spec(weights["t1"].shape),
            const_spec(weights["b1"].shape),
            const_spec(weights["t2"].shape),
            const_spec(weights["b2"].shape),
            const_spec(weights["wf1"].shape),
            const_spec(weights["bf1"].shape),
            const_spec(weights["wf2"].shape),
            const_spec(weights["bf2"].shape),
        ],
        out_specs=[
            pl.BlockSpec((1, b_tile, CLS_PAD), lambda i: (i, 0, 0)),
            pl.BlockSpec((1, b_tile, FC1_OUT_PAD), lambda i: (i, 0, 0)),
        ],
    )

    logits_pad, embs_pad = pl.pallas_call(
        kernel,
        grid_spec=grid_spec,
        out_shape=(
            jax.ShapeDtypeStruct((steps, b_tile, CLS_PAD), jnp.float32),
            jax.ShapeDtypeStruct((steps, b_tile, FC1_OUT_PAD), jnp.float32),
        ),
        compiler_params=pltpu.CompilerParams(
            dimension_semantics=("parallel",)),         # shard batch tiles across cores
    )(x, weights["t1"], weights["b1"], weights["t2"], weights["b2"],
      weights["wf1"], weights["bf1"], weights["wf2"], weights["bf2"])

    logits = logits_pad.reshape(n_pad, CLS_PAD)[:N, :classes]
    embs = embs_pad.reshape(n_pad, FC1_OUT_PAD)[:N, :FC1_OUT]
    return logits, embs


def small_forward(prepared, x_nchw, feat=False):
    logits, embs = _small_forward_jit(prepared["weights"], x_nchw,
                                      classes=prepared["classes"])
    return (logits, embs) if feat else logits


# ---------------------------------------------------------------------------
# Pure-XLA reference (same bf16 matmul-input quantization, f32 accumulation)
# ---------------------------------------------------------------------------

def _reference_forward(params, x_nchw):
    f32, bf16 = jnp.float32, jnp.bfloat16

    def conv(x, w, b):
        y = jax.lax.conv_general_dilated(
            x.astype(bf16), jnp.asarray(w, f32).astype(bf16), (1, 1), "VALID",
            dimension_numbers=("NCHW", "OIHW", "NCHW"),
            preferred_element_type=f32)
        return y + jnp.asarray(b, f32).reshape(1, -1, 1, 1)

    def maxpool(x, k):
        return jax.lax.reduce_window(x, -jnp.inf, jax.lax.max,
                                     (1, 1, k, k), (1, 1, k, k), "VALID")

    x = x_nchw.astype(f32)
    y = jnp.maximum(conv(x, params["conv1_w"], params["conv1_b"]), 0.0)
    y = maxpool(y, 2)
    y = jnp.maximum(conv(y, params["conv2_w"], params["conv2_b"]), 0.0)
    k = y.shape[2] // POOL_HW
    feat = maxpool(y, k)
    flat = feat.reshape(feat.shape[0], -1)
    embs = jnp.maximum(
        jnp.dot(flat.astype(bf16),
                jnp.asarray(params["fc1_w"], f32).T.astype(bf16),
                preferred_element_type=f32) + jnp.asarray(params["fc1_b"], f32), 0.0)
    logits = jnp.dot(embs.astype(bf16),
                     jnp.asarray(params["fc2_w"], f32).T.astype(bf16),
                     preferred_element_type=f32) + jnp.asarray(params["fc2_b"], f32)
    return logits, embs


# ---------------------------------------------------------------------------
# Deterministic synthetic parameters (shapes match the PyTorch module)
# ---------------------------------------------------------------------------

def init_params(key, channels, classes):
    ks = jax.random.split(key, 8)

    def u(k, shape, fan_in):
        bound = 1.0 / float(fan_in) ** 0.5
        return jax.random.uniform(k, shape, jnp.float32, -bound, bound)

    fc1_in = POOL_HW * POOL_HW * C2_OUT
    return {
        "conv1_w": u(ks[0], (C1_OUT, channels, KSIZE, KSIZE), channels * KSIZE * KSIZE),
        "conv1_b": u(ks[1], (C1_OUT,), channels * KSIZE * KSIZE),
        "conv2_w": u(ks[2], (C2_OUT, C1_OUT, KSIZE, KSIZE), C1_OUT * KSIZE * KSIZE),
        "conv2_b": u(ks[3], (C2_OUT,), C1_OUT * KSIZE * KSIZE),
        "fc1_w":   u(ks[4], (FC1_OUT, fc1_in), fc1_in),
        "fc1_b":   u(ks[5], (FC1_OUT,), fc1_in),
        "fc2_w":   u(ks[6], (classes, FC1_OUT), FC1_OUT),
        "fc2_b":   u(ks[7], (classes,), FC1_OUT),
    }


# ---------------------------------------------------------------------------
# Main
# ---------------------------------------------------------------------------

if __name__ == "__main__":
    key = jax.random.PRNGKey(0)
    k_param, k_x = jax.random.split(key)

    batch, channels, spatial, classes = 8, 1, 28, 10   # MNIST-like
    params = init_params(k_param, channels, classes)
    prepared = prepare_params(params, height=spatial, width=spatial)
    x = jax.random.normal(k_x, (batch, channels, spatial, spatial), jnp.float32)

    logits, embs = small_forward(prepared, x, feat=True)
    jax.block_until_ready((logits, embs))
    assert logits.shape == (batch, classes), logits.shape
    assert embs.shape == (batch, FC1_OUT), embs.shape
    assert bool(jnp.all(jnp.isfinite(logits)))
    assert bool(jnp.all(jnp.isfinite(embs)))

    # Compare against a plain-XLA reference that uses the same bf16 matmul
    # inputs with f32 accumulation (only accumulation order differs).
    ref_logits, ref_embs = _reference_forward(params, x)
    l_scale = float(jnp.max(jnp.abs(ref_logits))) + 1e-6
    e_scale = float(jnp.max(jnp.abs(ref_embs))) + 1e-6
    l_err = float(jnp.max(jnp.abs(logits - ref_logits)))
    e_err = float(jnp.max(jnp.abs(embs - ref_embs)))
    assert l_err <= 0.02 * l_scale + 0.02, ("logits mismatch", l_err, l_scale)
    assert e_err <= 0.02 * e_scale + 0.02, ("embs mismatch", e_err, e_scale)

    logits_only = small_forward(prepared, x, feat=False)
    jax.block_until_ready(logits_only)
    assert logits_only.shape == (batch, classes)

    print("KERNEL_OK")
</pallas_src>

<mosaic_0001>
module attributes {stable_mosaic.version = 11 : i64} {
  func.func @_fused_forward_kernel(%arg0: i32, %arg1: memref<4x28x28xf32, #tpu.memory_space<vmem>>, %arg2: memref<140x480xbf16, #tpu.memory_space<vmem>>, %arg3: memref<1x240xf32, #tpu.memory_space<vmem>>, %arg4: memref<1200x400xbf16, #tpu.memory_space<vmem>>, %arg5: memref<1x200xf32, #tpu.memory_space<vmem>>, %arg6: memref<4x200x512xbf16, #tpu.memory_space<vmem>>, %arg7: memref<1x512xf32, #tpu.memory_space<vmem>>, %arg8: memref<512x128xbf16, #tpu.memory_space<vmem>>, %arg9: memref<1x128xf32, #tpu.memory_space<vmem>>, %arg10: memref<1x4x128xf32, #tpu.memory_space<vmem>>, %arg11: memref<1x4x512xf32, #tpu.memory_space<vmem>>) attributes {dimension_semantics = [#tpu.dimension_semantics<parallel>], iteration_bounds = array<i64: 2>, scalar_prefetch = 0 : i64, scratch_operands = 0 : i64, tpu.core_type = #tpu.core_type<tc>, window_params = [{transform_indices = @transform_0, window_bounds = array<i64: 4, 28, 28>}, {pipeline_mode = #tpu.pipeline_mode<synchronous>, transform_indices = @transform_1, window_bounds = array<i64: 140, 480>}, {pipeline_mode = #tpu.pipeline_mode<synchronous>, transform_indices = @transform_2, window_bounds = array<i64: 1, 240>}, {pipeline_mode = #tpu.pipeline_mode<synchronous>, transform_indices = @transform_3, window_bounds = array<i64: 1200, 400>}, {pipeline_mode = #tpu.pipeline_mode<synchronous>, transform_indices = @transform_4, window_bounds = array<i64: 1, 200>}, {pipeline_mode = #tpu.pipeline_mode<synchronous>, transform_indices = @transform_5, window_bounds = array<i64: 4, 200, 512>}, {pipeline_mode = #tpu.pipeline_mode<synchronous>, transform_indices = @transform_6, window_bounds = array<i64: 1, 512>}, {pipeline_mode = #tpu.pipeline_mode<synchronous>, transform_indices = @transform_7, window_bounds = array<i64: 512, 128>}, {pipeline_mode = #tpu.pipeline_mode<synchronous>, transform_indices = @transform_8, window_bounds = array<i64: 1, 128>}, {transform_indices = @transform_9, window_bounds = array<i64: 1, 4, 128>}, {transform_indices = @transform_10, window_bounds = array<i64: 1, 4, 512>}]} {
    %c0 = arith.constant 0 : index
    %c0_0 = arith.constant 0 : index
    %c0_1 = arith.constant 0 : index
    %0 = vector.load %arg1[%c0, %c0_0, %c0_1] : memref<4x28x28xf32, #tpu.memory_space<vmem>>, vector<4x28x28xf32>
    %1 = vector.extract_strided_slice %0 {offsets = [0, 0, 0], sizes = [4, 24, 28], strides = [1, 1, 1]} : vector<4x28x28xf32> to vector<4x24x28xf32>
    %2 = vector.extract_strided_slice %0 {offsets = [0, 1, 0], sizes = [4, 24, 28], strides = [1, 1, 1]} : vector<4x28x28xf32> to vector<4x24x28xf32>
    %3 = vector.extract_strided_slice %0 {offsets = [0, 2, 0], sizes = [4, 24, 28], strides = [1, 1, 1]} : vector<4x28x28xf32> to vector<4x24x28xf32>
    %4 = vector.extract_strided_slice %0 {offsets = [0, 3, 0], sizes = [4, 24, 28], strides = [1, 1, 1]} : vector<4x28x28xf32> to vector<4x24x28xf32>
    %5 = vector.extract_strided_slice %0 {offsets = [0, 4, 0], sizes = [4, 24, 28], strides = [1, 1, 1]} : vector<4x28x28xf32> to vector<4x24x28xf32>
    %6 = tpu.concatenate %1, %2, %3, %4, %5 in 2 : vector<4x24x28xf32>, vector<4x24x28xf32>, vector<4x24x28xf32>, vector<4x24x28xf32>, vector<4x24x28xf32> -> vector<4x24x140xf32>
    %7 = vector.shape_cast %6 : vector<4x24x140xf32> to vector<96x140xf32>
    %8 = arith.truncf %7 : vector<96x140xf32> to vector<96x140xbf16>
    %c0_2 = arith.constant 0 : index
    %c0_3 = arith.constant 0 : index
    %9 = vector.load %arg2[%c0_2, %c0_3] : memref<140x480xbf16, #tpu.memory_space<vmem>>, vector<140x480xbf16>
    %cst = arith.constant dense<0.000000e+00> : vector<96x480xf32>
    %10 = tpu.matmul %8, %9, %cst {dimension_numbers = #tpu.dot_dimension_numbers<[1], [0], [0], [1], [0, 0, 1, 1], [], []>} : vector<96x140xbf16>, vector<140x480xbf16>, vector<96x480xf32> -> vector<96x480xf32>
    %11 = vector.shape_cast %10 : vector<96x480xf32> to vector<4x12x2x480xf32>
    %cst_4 = arith.constant dense<0xFF800000> : vector<4x12x480xf32>
    %12 = vector.multi_reduction <maximumf>, %11, %cst_4 [2] : vector<4x12x2x480xf32> to vector<4x12x480xf32>
    %13 = vector.extract_strided_slice %12 {offsets = [0, 0, 0], sizes = [4, 12, 240], strides = [1, 1, 1]} : vector<4x12x480xf32> to vector<4x12x240xf32>
    %14 = vector.extract_strided_slice %12 {offsets = [0, 0, 240], sizes = [4, 12, 240], strides = [1, 1, 1]} : vector<4x12x480xf32> to vector<4x12x240xf32>
    %15 = arith.maximumf %13, %14 : vector<4x12x240xf32>
    %c0_5 = arith.constant 0 : index
    %c0_6 = arith.constant 0 : index
    %16 = vector.load %arg3[%c0_5, %c0_6] : memref<1x240xf32, #tpu.memory_space<vmem>>, vector<1x240xf32>
    %17 = vector.shape_cast %16 : vector<1x240xf32> to vector<1x1x240xf32>
    %18 = vector.broadcast %17 : vector<1x1x240xf32> to vector<4x12x240xf32>
    %19 = arith.addf %15, %18 : vector<4x12x240xf32>
    %cst_7 = arith.constant 0.000000e+00 : f32
    %20 = vector.broadcast %cst_7 : f32 to vector<4x12x240xf32>
    %21 = arith.maximumf %19, %20 : vector<4x12x240xf32>
    %22 = vector.extract_strided_slice %21 {offsets = [0, 0, 0], sizes = [4, 8, 240], strides = [1, 1, 1]} : vector<4x12x240xf32> to vector<4x8x240xf32>
    %23 = vector.extract_strided_slice %21 {offsets = [0, 1, 0], sizes = [4, 8, 240], strides = [1, 1, 1]} : vector<4x12x240xf32> to vector<4x8x240xf32>
    %24 = vector.extract_strided_slice %21 {offsets = [0, 2, 0], sizes = [4, 8, 240], strides = [1, 1, 1]} : vector<4x12x240xf32> to vector<4x8x240xf32>
    %25 = vector.extract_strided_slice %21 {offsets = [0, 3, 0], sizes = [4, 8, 240], strides = [1, 1, 1]} : vector<4x12x240xf32> to vector<4x8x240xf32>
    %26 = vector.extract_strided_slice %21 {offsets = [0, 4, 0], sizes = [4, 8, 240], strides = [1, 1, 1]} : vector<4x12x240xf32> to vector<4x8x240xf32>
    %27 = tpu.concatenate %22, %23, %24, %25, %26 in 2 : vector<4x8x240xf32>, vector<4x8x240xf32>, vector<4x8x240xf32>, vector<4x8x240xf32>, vector<4x8x240xf32> -> vector<4x8x1200xf32>
    %28 = vector.shape_cast %27 : vector<4x8x1200xf32> to vector<32x1200xf32>
    %29 = arith.truncf %28 : vector<32x1200xf32> to vector<32x1200xbf16>
    %c0_8 = arith.constant 0 : index
    %c0_9 = arith.constant 0 : index
    %30 = vector.load %arg4[%c0_8, %c0_9] : memref<1200x400xbf16, #tpu.memory_space<vmem>>, vector<1200x400xbf16>
    %cst_10 = arith.constant dense<0.000000e+00> : vector<32x400xf32>
    %31 = tpu.matmul %29, %30, %cst_10 {dimension_numbers = #tpu.dot_dimension_numbers<[1], [0], [0], [1], [0, 0, 1, 1], [], []>} : vector<32x1200xbf16>, vector<1200x400xbf16>, vector<32x400xf32> -> vector<32x400xf32>
    %32 = vector.shape_cast %31 : vector<32x400xf32> to vector<4x4x2x400xf32>
    %cst_11 = arith.constant dense<0xFF800000> : vector<4x4x400xf32>
    %33 = vector.multi_reduction <maximumf>, %32, %cst_11 [2] : vector<4x4x2x400xf32> to vector<4x4x400xf32>
    %34 = vector.extract_strided_slice %33 {offsets = [0, 0, 0], sizes = [4, 4, 200], strides = [1, 1, 1]} : vector<4x4x400xf32> to vector<4x4x200xf32>
    %35 = vector.extract_strided_slice %33 {offsets = [0, 0, 200], sizes = [4, 4, 200], strides = [1, 1, 1]} : vector<4x4x400xf32> to vector<4x4x200xf32>
    %36 = arith.maximumf %34, %35 : vector<4x4x200xf32>
    %c0_12 = arith.constant 0 : index
    %c0_13 = arith.constant 0 : index
    %37 = vector.load %arg5[%c0_12, %c0_13] : memref<1x200xf32, #tpu.memory_space<vmem>>, vector<1x200xf32>
    %38 = vector.shape_cast %37 : vector<1x200xf32> to vector<1x1x200xf32>
    %39 = vector.broadcast %38 : vector<1x1x200xf32> to vector<4x4x200xf32>
    %40 = arith.addf %36, %39 : vector<4x4x200xf32>
    %cst_14 = arith.constant 0.000000e+00 : f32
    %41 = vector.broadcast %cst_14 : f32 to vector<4x4x200xf32>
    %42 = arith.maximumf %40, %41 : vector<4x4x200xf32>
    %cst_15 = arith.constant 0.000000e+00 : f32
    %43 = vector.broadcast %cst_15 : f32 to vector<4x512xf32>
    %44 = vector.extract_strided_slice %42 {offsets = [0, 0, 0], sizes = [4, 1, 200], strides = [1, 1, 1]} : vector<4x4x200xf32> to vector<4x1x200xf32>
    %45 = vector.shape_cast %44 : vector<4x1x200xf32> to vector<4x200xf32>
    %46 = arith.truncf %45 : vector<4x200xf32> to vector<4x200xbf16>
    %c0_16 = arith.constant 0 : index
    %c0_17 = arith.constant 0 : index
    %c0_18 = arith.constant 0 : index
    %47 = vector.load %arg6[%c0_16, %c0_17, %c0_18] : memref<4x200x512xbf16, #tpu.memory_space<vmem>>, vector<1x200x512xbf16>
    %48 = vector.shape_cast %47 : vector<1x200x512xbf16> to vector<200x512xbf16>
    %cst_19 = arith.constant dense<0.000000e+00> : vector<4x512xf32>
    %49 = tpu.matmul %46, %48, %cst_19 {dimension_numbers = #tpu.dot_dimension_numbers<[1], [0], [0], [1], [0, 0, 1, 1], [], []>} : vector<4x200xbf16>, vector<200x512xbf16>, vector<4x512xf32> -> vector<4x512xf32>
    %50 = arith.addf %43, %49 : vector<4x512xf32>
    %51 = vector.extract_strided_slice %42 {offsets = [0, 1, 0], sizes = [4, 1, 200], strides = [1, 1, 1]} : vector<4x4x200xf32> to vector<4x1x200xf32>
    %52 = vector.shape_cast %51 : vector<4x1x200xf32> to vector<4x200xf32>
    %53 = arith.truncf %52 : vector<4x200xf32> to vector<4x200xbf16>
    %c1 = arith.constant 1 : index
    %c0_20 = arith.constant 0 : index
    %c0_21 = arith.constant 0 : index
    %54 = vector.load %arg6[%c1, %c0_20, %c0_21] : memref<4x200x512xbf16, #tpu.memory_space<vmem>>, vector<1x200x512xbf16>
    %55 = vector.shape_cast %54 : vector<1x200x512xbf16> to vector<200x512xbf16>
    %cst_22 = arith.constant dense<0.000000e+00> : vector<4x512xf32>
    %56 = tpu.matmul %53, %55, %cst_22 {dimension_numbers = #tpu.dot_dimension_numbers<[1], [0], [0], [1], [0, 0, 1, 1], [], []>} : vector<4x200xbf16>, vector<200x512xbf16>, vector<4x512xf32> -> vector<4x512xf32>
    %57 = arith.addf %50, %56 : vector<4x512xf32>
    %58 = vector.extract_strided_slice %42 {offsets = [0, 2, 0], sizes = [4, 1, 200], strides = [1, 1, 1]} : vector<4x4x200xf32> to vector<4x1x200xf32>
    %59 = vector.shape_cast %58 : vector<4x1x200xf32> to vector<4x200xf32>
    %60 = arith.truncf %59 : vector<4x200xf32> to vector<4x200xbf16>
    %c2 = arith.constant 2 : index
    %c0_23 = arith.constant 0 : index
    %c0_24 = arith.constant 0 : index
    %61 = vector.load %arg6[%c2, %c0_23, %c0_24] : memref<4x200x512xbf16, #tpu.memory_space<vmem>>, vector<1x200x512xbf16>
    %62 = vector.shape_cast %61 : vector<1x200x512xbf16> to vector<200x512xbf16>
    %cst_25 = arith.constant dense<0.000000e+00> : vector<4x512xf32>
    %63 = tpu.matmul %60, %62, %cst_25 {dimension_numbers = #tpu.dot_dimension_numbers<[1], [0], [0], [1], [0, 0, 1, 1], [], []>} : vector<4x200xbf16>, vector<200x512xbf16>, vector<4x512xf32> -> vector<4x512xf32>
    %64 = arith.addf %57, %63 : vector<4x512xf32>
    %65 = vector.extract_strided_slice %42 {offsets = [0, 3, 0], sizes = [4, 1, 200], strides = [1, 1, 1]} : vector<4x4x200xf32> to vector<4x1x200xf32>
    %66 = vector.shape_cast %65 : vector<4x1x200xf32> to vector<4x200xf32>
    %67 = arith.truncf %66 : vector<4x200xf32> to vector<4x200xbf16>
    %c3 = arith.constant 3 : index
    %c0_26 = arith.constant 0 : index
    %c0_27 = arith.constant 0 : index
    %68 = vector.load %arg6[%c3, %c0_26, %c0_27] : memref<4x200x512xbf16, #tpu.memory_space<vmem>>, vector<1x200x512xbf16>
    %69 = vector.shape_cast %68 : vector<1x200x512xbf16> to vector<200x512xbf16>
    %cst_28 = arith.constant dense<0.000000e+00> : vector<4x512xf32>
    %70 = tpu.matmul %67, %69, %cst_28 {dimension_numbers = #tpu.dot_dimension_numbers<[1], [0], [0], [1], [0, 0, 1, 1], [], []>} : vector<4x200xbf16>, vector<200x512xbf16>, vector<4x512xf32> -> vector<4x512xf32>
    %71 = arith.addf %64, %70 : vector<4x512xf32>
    %c0_29 = arith.constant 0 : index
    %c0_30 = arith.constant 0 : index
    %72 = vector.load %arg7[%c0_29, %c0_30] : memref<1x512xf32, #tpu.memory_space<vmem>>, vector<1x512xf32>
    %73 = vector.broadcast %72 : vector<1x512xf32> to vector<4x512xf32>
    %74 = arith.addf %71, %73 : vector<4x512xf32>
    %cst_31 = arith.constant 0.000000e+00 : f32
    %75 = vector.broadcast %cst_31 : f32 to vector<4x512xf32>
    %76 = arith.maximumf %74, %75 : vector<4x512xf32>
    %77 = arith.truncf %76 : vector<4x512xf32> to vector<4x512xbf16>
    %c0_32 = arith.constant 0 : index
    %c0_33 = arith.constant 0 : index
    %78 = vector.load %arg8[%c0_32, %c0_33] : memref<512x128xbf16, #tpu.memory_space<vmem>>, vector<512x128xbf16>
    %cst_34 = arith.constant dense<0.000000e+00> : vector<4x128xf32>
    %79 = tpu.matmul %77, %78, %cst_34 {dimension_numbers = #tpu.dot_dimension_numbers<[1], [0], [0], [1], [0, 0, 1, 1], [], []>} : vector<4x512xbf16>, vector<512x128xbf16>, vector<4x128xf32> -> vector<4x128xf32>
    %c0_35 = arith.constant 0 : index
    %c0_36 = arith.constant 0 : index
    %80 = vector.load %arg9[%c0_35, %c0_36] : memref<1x128xf32, #tpu.memory_space<vmem>>, vector<1x128xf32>
    %81 = vector.broadcast %80 : vector<1x128xf32> to vector<4x128xf32>
    %82 = arith.addf %79, %81 : vector<4x128xf32>
    %c0_37 = arith.constant 0 : index
    %c0_38 = arith.constant 0 : index
    %c0_39 = arith.constant 0 : index
    %83 = vector.load %arg11[%c0_37, %c0_38, %c0_39] : memref<1x4x512xf32, #tpu.memory_space<vmem>>, vector<1x4x512xf32>
    %84 = vector.shape_cast %83 : vector<1x4x512xf32> to vector<4x512xf32>
    %85 = vector.shape_cast %76 : vector<4x512xf32> to vector<1x4x512xf32>
    tpu.vector_store %arg11[%c0_37, %c0_38, %c0_39], %85 {strides = array<i32>} : memref<1x4x512xf32, #tpu.memory_space<vmem>>, vector<1x4x512xf32>,
    %c0_40 = arith.constant 0 : index
    %c0_41 = arith.constant 0 : index
    %c0_42 = arith.constant 0 : index
    %86 = vector.load %arg10[%c0_40, %c0_41, %c0_42] : memref<1x4x128xf32, #tpu.memory_space<vmem>>, vector<1x4x128xf32>
    %87 = vector.shape_cast %86 : vector<1x4x128xf32> to vector<4x128xf32>
    %88 = vector.shape_cast %82 : vector<4x128xf32> to vector<1x4x128xf32>
    tpu.vector_store %arg10[%c0_40, %c0_41, %c0_42], %88 {strides = array<i32>} : memref<1x4x128xf32, #tpu.memory_space<vmem>>, vector<1x4x128xf32>,
    return
  }
  func.func @transform_0(%arg0: i32) -> (i32, i32, i32) {
    %c0_i32 = arith.constant 0 : i32
    %c0_i32_0 = arith.constant 0 : i32
    %c0_i32_1 = arith.constant 0 : i32
    return %arg0, %c0_i32, %c0_i32_0 : i32, i32, i32
  }
  func.func @transform_1(%arg0: i32) -> (i32, i32) {
    %c0_i32 = arith.constant 0 : i32
    %c0_i32_0 = arith.constant 0 : i32
    %c0_i32_1 = arith.constant 0 : i32
    return %c0_i32, %c0_i32_0 : i32, i32
  }
  func.func @transform_2(%arg0: i32) -> (i32, i32) {
    %c0_i32 = arith.constant 0 : i32
    %c0_i32_0 = arith.constant 0 : i32
    %c0_i32_1 = arith.constant 0 : i32
    return %c0_i32, %c0_i32_0 : i32, i32
  }
  func.func @transform_3(%arg0: i32) -> (i32, i32) {
    %c0_i32 = arith.constant 0 : i32
    %c0_i32_0 = arith.constant 0 : i32
    %c0_i32_1 = arith.constant 0 : i32
    return %c0_i32, %c0_i32_0 : i32, i32
  }
  func.func @transform_4(%arg0: i32) -> (i32, i32) {
    %c0_i32 = arith.constant 0 : i32
    %c0_i32_0 = arith.constant 0 : i32
    %c0_i32_1 = arith.constant 0 : i32
    return %c0_i32, %c0_i32_0 : i32, i32
  }
  func.func @transform_5(%arg0: i32) -> (i32, i32, i32) {
    %c0_i32 = arith.constant 0 : i32
    %c0_i32_0 = arith.constant 0 : i32
    %c0_i32_1 = arith.constant 0 : i32
    %c0_i32_2 = arith.constant 0 : i32
    return %c0_i32, %c0_i32_0, %c0_i32_1 : i32, i32, i32
  }
  func.func @transform_6(%arg0: i32) -> (i32, i32) {
    %c0_i32 = arith.constant 0 : i32
    %c0_i32_0 = arith.constant 0 : i32
    %c0_i32_1 = arith.constant 0 : i32
    return %c0_i32, %c0_i32_0 : i32, i32
  }
  func.func @transform_7(%arg0: i32) -> (i32, i32) {
    %c0_i32 = arith.constant 0 : i32
    %c0_i32_0 = arith.constant 0 : i32
    %c0_i32_1 = arith.constant 0 : i32
    return %c0_i32, %c0_i32_0 : i32, i32
  }
  func.func @transform_8(%arg0: i32) -> (i32, i32) {
    %c0_i32 = arith.constant 0 : i32
    %c0_i32_0 = arith.constant 0 : i32
    %c0_i32_1 = arith.constant 0 : i32
    return %c0_i32, %c0_i32_0 : i32, i32
  }
  func.func @transform_9(%arg0: i32) -> (i32, i32, i32) {
    %c0_i32 = arith.constant 0 : i32
    %c0_i32_0 = arith.constant 0 : i32
    %c0_i32_1 = arith.constant 0 : i32
    return %arg0, %c0_i32, %c0_i32_0 : i32, i32, i32
  }
  func.func @transform_10(%arg0: i32) -> (i32, i32, i32) {
    %c0_i32 = arith.constant 0 : i32
    %c0_i32_0 = arith.constant 0 : i32
    %c0_i32_1 = arith.constant 0 : i32
    return %arg0, %c0_i32, %c0_i32_0 : i32, i32, i32
  }
}

</mosaic_0001>

<bundles_post_ra>
// kernel: _small_forward_jit.1
= control target key start
LH: loop header
LB: loop body
LE: loop exit
PB: predicated region body
PF: predicated region fallthrough
CT: control target
= control target key end

     0   :  { %16 = vsyncpa [#allocation3], 0  ;;  %s20409_s0 = inlined_call_operand.vmem [shape: f32[8,28,28], index: 0, kind: input, shape index: {}]   ;;  %s20410_s1 = inlined_call_operand.vmem [shape: bf16[140,480], index: 1, kind: input, shape index: {}]   ;;  %s20411_s2 = inlined_call_operand.vmem [shape: f32[1,240], index: 2, kind: input, shape index: {}]   ;;  %s20412_s3 = inlined_call_operand.vmem [shape: bf16[1200,400], index: 3, kind: input, shape index: {}]   ;;  %s20413_s4 = inlined_call_operand.vmem [shape: f32[1,200], index: 4, kind: input, shape index: {}]   ;;  %s20414_s5 = inlined_call_operand.vmem [shape: bf16[4,200,512], index: 5, kind: input, shape index: {}]   ;;  %s20415_s6 = inlined_call_operand.vmem [shape: f32[1,512], index: 6, kind: input, shape index: {}]   ;;  %s20416_s7 = inlined_call_operand.vmem [shape: bf16[512,128], index: 7, kind: input, shape index: {}]   ;;  %s20417_s8 = inlined_call_operand.vmem [shape: f32[1,128], index: 8, kind: input, shape index: {}]   ;;  %s20418_s9 = inlined_call_operand.hbm [shape: f32[2,4,128], index: 9, kind: output, shape index: {0}]   ;;  %s20419_s10 = inlined_call_operand.vmem [shape: f32[2,4,512], index: 10, kind: output, shape index: {1}]  }
   0x1   :  { %18 = vsyncpa [#allocation3 + $0x1], 0  ;;  %s13785_s13 = smov 0   ;;  %s13787_s14 = smov 0  }
   0x2   :  { %s13789_s15 = smov 0   ;;  %s13791_s16 = smov 0  }
   0x3 LB: > { %s13806_s17 = sadd.s32 4294967295, %s13718_s16   ;;  %s11607_s18 = sadd.s32 4294967294, %s13718_s16   ;;  %s13718_s16 = sphi %s13791_s16, %s21465_s16   ;;  %s13714_s15 = sphi %s13789_s15, %s21464_s15   ;;  %s13710_s14 = sphi %s13787_s14, %s21463_s14   ;;  %s13706_s13 = sphi %s13785_s13, %s21462_s13  }
   0x4   : > { %s13810_s19 = sadd.s32 1, %s13718_s16   ;;  %s225_s20 = sadd.s32 1, %s13714_s15 }
   0x5   : > { %s222_s21 = ssub.s32 %s13718_s16, %s13810_s19  ;;  %p235_p0 = scmp.ne.s32.totalorder %s13714_s15, %s13710_s14 }
   0x6   : > { %p223_p1 = scmp.eq.s32.totalorder %s222_s21, 0  ;;  %p236_p2 = scmp.eq.s32.totalorder %s13806_s17, 1 }
   0x7   : > { %p241_p3 = scmp.ne.s32.totalorder %s13710_s14, %s13706_s13  ;;  %p242_p4 = scmp.eq.s32.totalorder %s11607_s18, 1 }
   0x8   : > { %s13821_s22 = scalar_select %p223_p1, %s13714_s15, %s225_s20  }
   0x9   : > { %p13823_p5 = por %p236_p2, %p235_p0  ;;  %p13827_p6 = por %p242_p4, %p241_p3 }
   0xa   : > { %20707 = sst [smem:[#allocation5_spill]] %s13821_s22  ;;  %p11610_p7 = scmp.ge.s32.totalorder %s13718_s16, 1 }
   0xb   : > { %p320_p8 = scmp.lt.s32.totalorder %s13718_s16, 3 }
   0xd   : > { %p321_p9 = pnand %p11610_p7, %p320_p8 }
   0xf   : > { %324 = sbr.rel (%p321_p9) target bundleno = 2270 (0x8de), region = 56 }
  0x16   : > { %s11612_s25 = sshll.u32 %s13806_s17, 2  ;;  %v12804_v0 = vld [vmem:[%s20410_s1 + $0x4] ss:$16 sps:$4 sm:$0xff]   ;;  %v12806_v1 = vld [vmem:[%s20410_s1 + $0xc] ss:$16 sps:$4 sm:$0xff]   ;;  %vm409_vm0 = vcmask 1046528  }
  0x17   : > { %p365_p10 = scmp.lt.s32.totalorder %s11612_s25, 7  ;;  %976 = vmatprep.subr.bf16.mxu0 %v12804_v0  ;;  %v12808_v2 = vld [vmem:[%s20410_s1] ss:$16 sps:$4 sm:$0xff]   ;;  %v12809_v3 = vld [vmem:[%s20410_s1 + $0x8] ss:$16 sps:$4 sm:$0xff]   ;;  %1069 = vmatprep.subr.bf16.mxu1 %v12806_v1  ;;  %vm539_vm1 = vcmask 1044480  }
  0x18   : > { %v12810_v4 = vld [vmem:[%s20410_s1 + $0x24] ss:$16 sps:$4 sm:$0xff]   ;;  %977 = vmatpush1.bf16.msra.mxu0 %v12808_v2  ;;  %1070 = vmatpush1.bf16.msra.mxu1 %v12809_v3  ;;  %v12812_v5 = vld [vmem:[%s20410_s1 + $0x2c] ss:$16 sps:$4 sm:$0xff]   ;;  %v12814_v6 = vld [vmem:[%s20410_s1 + $0x20] ss:$16 sps:$4 sm:$0xff]  }
  0x19   : > { %s21467_s25 = smov (!%p365_p10, %s11612_s25), 7  ;;  %978 = vmatprep.subr.bf16.mxu0 %v12810_v4  ;;  %v12815_v7 = vld [vmem:[%s20410_s1 + $0x28] ss:$16 sps:$4 sm:$0xff]   ;;  %vm474_vm2 = vcmask 1045504   ;;  %vm604_vm3 = vcmask 1043456   ;;  %1071 = vmatprep.subr.bf16.mxu1 %v12812_v5  ;;  %s20420_s11 = smov 28  }
  0x1a   : > { %s12446_s26 = sshll.u32 %s21467_s25, 5  ;;  %v12816_v30 = vld [vmem:[%s20410_s1 + $0x44] ss:$16 sps:$4 sm:$0xff]   ;;  %v12818_v31 = vld [vmem:[%s20410_s1 + $0x4c] ss:$16 sps:$4 sm:$0xff]   ;;  %s13721_s25 = smov 84  }
  0x1b   : > { %s13858_s12 = scalar_lea.vmem %s20409_s0, %s12446_s26  ;;  %v12820_v36 = vld [vmem:[%s20410_s1 + $0x40] ss:$16 sps:$4 sm:$0xff]   ;;  %v12821_v37 = vld [vmem:[%s20410_s1 + $0x48] ss:$16 sps:$4 sm:$0xff]   ;;  %v12822_v48 = vld [vmem:[%s20410_s1 + $0x64] ss:$16 sps:$4 sm:$0xff]  }
  0x1c   : > { %v377_v8 = vld [vmem:[%s13858_s12] sm:$0xff]  ;;  %v378_v9 = vld [vmem:[%s13858_s12 + $0x8] sm:$0xff]  ;;  %v13866_v10 = vld [vmem:[%s13858_s12 + $0x10] sm:$0xff]  ;;  %979 = vmatpush1.bf16.msra.mxu0 %v12814_v6  ;;  %1072 = vmatpush1.bf16.msra.mxu1 %v12815_v7  ;;  %s13722_s22 = smov 56   ;;  %s13723_s20 = smov 112   ;;  %vm669_vm4 = vcmask 228352  }
  0x1d   : > { %v410_v11 = vrot.slane %v377_v8, 1  ;;  %v411_v12 = vrot.slane %v378_v9, 1  ;;  %v413_v13 = vrot.slane %v13866_v10, 1  ;;  %v540_v14 = vrot.slane %v377_v8, 3  ;;  %v13871_v19 = vld [vmem:[%s13858_s12 + $0x18] sm:$0xf]  ;;  %980 = vmatprep.subr.bf16.mxu0 %v12816_v30  ;;  %1073 = vmatprep.subr.bf16.mxu1 %v12818_v31 }
  0x1e   : > { %v541_v15 = vrot.slane %v378_v9, 3  ;;  %v543_v16 = vrot.slane %v13866_v10, 3  ;;  %v475_v17 = vrot.slane %v377_v8, 2  ;;  %v476_v18 = vrot.slane %v378_v9, 2  ;;  %v13877_v24 = vld [vmem:[%s13858_s12 + $0x20] sm:$0xff]  ;;  %v13880_v25 = vld [vmem:[%s13858_s12 + $0x28] sm:$0xff] }
  0x1f   : > { %v412_v20 = vsel %vm409_vm0, %v410_v11, %v411_v12  ;;  %v414_v21 = vsel %vm409_vm0, %v411_v12, %v413_v13  ;;  %v478_v22 = vrot.slane %v13866_v10, 2  ;;  %v605_v23 = vrot.slane %v377_v8, 4  ;;  %v13906_v42 = vld [vmem:[%s13858_s12 + $0x30] sm:$0xff]  ;;  %v13914_v47 = vld [vmem:[%s13858_s12 + $0x38] sm:$0xf]  ;;  %v13962_v12 = vld [vmem:[%s13858_s12 + $0x40] sm:$0xff] }
  0x20   : > { %v12604_v26 = vpack.i.bf16 %v414_v21, %v412_v20  ;;  %v542_v27 = vsel %vm539_vm1, %v540_v14, %v541_v15  ;;  %v544_v28 = vsel %vm539_vm1, %v541_v15, %v543_v16  ;;  %v477_v29 = vsel %vm474_vm2, %v475_v17, %v476_v18  ;;  %981 = vmatpush1.bf16.msra.mxu0 %v12820_v36  ;;  %v12824_v53 = vld [vmem:[%s20410_s1 + $0x6c] ss:$16 sps:$4 sm:$0xff]   ;;  %v12826_v54 = vld [vmem:[%s20410_s1 + $0x60] ss:$16 sps:$4 sm:$0xff]   ;;  %v12827_v59 = vld [vmem:[%s20410_s1 + $0x68] ss:$16 sps:$4 sm:$0xff]  }
  0x21   : > { %v12614_v32 = vpack.i.bf16 %v544_v28, %v542_v27  ;;  %v479_v33 = vsel %vm474_vm2, %v476_v18, %v478_v22  ;;  %v606_v34 = vrot.slane %v378_v9, 4  ;;  %v608_v35 = vrot.slane %v13866_v10, 4  ;;  %1074 = vmatpush1.bf16.msra.mxu1 %v12821_v37  ;;  %982 = vmatprep.subr.bf16.mxu0 %v12822_v48  ;;  %v12828_v60 = vld [vmem:[%s20410_s1 + $0x84] ss:$16 sps:$4 sm:$0xff]   ;;  %v12830_v5 = vld [vmem:[%s20410_s1 + $0x8c] ss:$16 sps:$4 sm:$0xff]  }
  0x22   : > { %12605 = vrot.lane.b32.xlu0 %v12604_v26, %s20420_s11  ;;  %v12609_v38 = vpack.i.bf16 %v479_v33, %v477_v29  ;;  %v415_v39 = vrot.slane %v13871_v19, 1  ;;  %v417_v40 = vrot.slane %v13877_v24, 1  ;;  %v418_v41 = vrot.slane %v13880_v25, 1  ;;  %1075 = vmatprep.subr.bf16.mxu1 %v12824_v53  ;;  %v12832_v6 = vld [vmem:[%s20410_s1 + $0x80] ss:$16 sps:$4 sm:$0xff]   ;;  %s13727_s30 = smov 80  }
  0x23   : > { %12615 = vrot.lane.b32.xlu1 %v12614_v32, %s13721_s25  ;;  %v607_v43 = vsel %vm604_vm3, %v605_v23, %v606_v34  ;;  %v609_v44 = vsel %vm604_vm3, %v606_v34, %v608_v35  ;;  %v480_v45 = vrot.slane %v13871_v19, 2  ;;  %v482_v46 = vrot.slane %v13877_v24, 2  ;;  %v12833_v11 = vld [vmem:[%s20410_s1 + $0x88] ss:$16 sps:$4 sm:$0xff]   ;;  %v12834_v17 = vld [vmem:[%s20410_s1 + $0xa4] ss:$16 sps:$4 sm:$0xff]  }
  0x24   : > { %v12619_v49 = vpack.i.bf16 %v609_v44, %v607_v43  ;;  %v416_v50 = vsel %vm409_vm0, %v413_v13, %v415_v39  ;;  %v419_v51 = vsel %vm409_vm0, %v417_v40, %v418_v41  ;;  %v483_v52 = vrot.slane %v13880_v25, 2  ;;  %983 = vmatpush1.bf16.msra.mxu0 %v12826_v54  ;;  %v13965_v13 = vld [vmem:[%s13858_s12 + $0x48] sm:$0xff]  ;;  %v12838_v26 = vld [vmem:[%s20410_s1 + $0xa0] ss:$16 sps:$4 sm:$0xff]   ;;  %v12840_v31 = vld [vmem:[%s20410_s1 + $0xc4] ss:$16 sps:$4 sm:$0xff]  }
  0x25   : > { %v12624_v55 = vpack.i.bf16 %v419_v51, %v416_v50  ;;  %v481_v56 = vsel %vm474_vm2, %v478_v22, %v480_v45  ;;  %v545_v57 = vrot.slane %v13871_v19, 3  ;;  %v547_v58 = vrot.slane %v13877_v24, 3  ;;  %1076 = vmatpush1.bf16.msra.mxu1 %v12827_v59  ;;  %984 = vmatprep.subr.bf16.mxu0 %v12828_v60  ;;  %v12836_v21 = vld [vmem:[%s20410_s1 + $0xac] ss:$16 sps:$4 sm:$0xff]   ;;  %v12839_v27 = vld [vmem:[%s20410_s1 + $0xa8] ss:$16 sps:$4 sm:$0xff]  }
  0x26   : > { %12610 = vrot.lane.b32.xlu0 %v12609_v38, %s13722_s22  ;;  %v484_v61 = vsel %vm474_vm2, %v482_v46, %v483_v52  ;;  %v548_v62 = vrot.slane %v13880_v25, 3  ;;  %v610_v63 = vrot.slane %v13871_v19, 4  ;;  %v612_v0 = vrot.slane %v13877_v24, 4  ;;  %1077 = vmatprep.subr.bf16.mxu1 %v12830_v5  ;;  %v12842_v36 = vld [vmem:[%s20410_s1 + $0xcc] ss:$16 sps:$4 sm:$0xff]   ;;  %p371_p11 = scmp.lt.s32.totalorder %s13806_s17, 1 }
  0x27   : > { %12620 = vrot.lane.b32.xlu1 %v12619_v49, %s13723_s20  ;;  %v12629_v1 = vpack.i.bf16 %v484_v61, %v481_v56  ;;  %v546_v2 = vsel %vm539_vm1, %v543_v16, %v545_v57  ;;  %v613_v3 = vrot.slane %v13880_v25, 4  ;;  %v420_v4 = vrot.slane %v13906_v42, 1  ;;  %v13970_v16 = vld [vmem:[%s13858_s12 + $0x50] sm:$0xff]  ;;  %v12845_v45 = vld [vmem:[%s20410_s1 + $0xc8] ss:$16 sps:$4 sm:$0xff]   ;;  %s12443_s18 = sshll.u32 %s13806_s17, 6 }
  0x28   : > { %v549_v7 = vsel %vm539_vm1, %v547_v58, %v548_v62  ;;  %v611_v8 = vsel %vm604_vm3, %v608_v35, %v610_v63  ;;  %v422_v9 = vrot.slane %v13914_v47, 1  ;;  %v485_v10 = vrot.slane %v13906_v42, 2  ;;  %985 = vmatpush1.bf16.msra.mxu0 %v12832_v6  ;;  %v12846_v50 = vld [vmem:[%s20410_s1 + $0xe4] ss:$16 sps:$4 sm:$0xff]   ;;  %v12850_v60 = vld [vmem:[%s20410_s1 + $0xe0] ss:$16 sps:$4 sm:$0xff]   ;;  %s20367_s26 = scalar_lea.hbm %s20418_s9, %s12443_s18 }
  0x29   : > { %v614_v14 = vsel %vm604_vm3, %v612_v0, %v613_v3  ;;  %v487_v15 = vrot.slane %v13914_v47, 2  ;;  %v12634_v18 = vpack.i.bf16 %v549_v7, %v546_v2  ;;  %v421_v19 = vsel %vm409_vm0, %v418_v41, %v420_v4  ;;  %1078 = vmatpush1.bf16.msra.mxu1 %v12833_v11  ;;  %986 = vmatprep.subr.bf16.mxu0 %v12834_v17  ;;  %v12844_v41 = vld [vmem:[%s20410_s1 + $0xc0] ss:$16 sps:$4 sm:$0xff]   ;;  %v12851_v61 = vld [vmem:[%s20410_s1 + $0xe8] ss:$16 sps:$4 sm:$0xff]  }
  0x2a   : > { %12625 = vrot.lane.b32.xlu0 %v12624_v55, %s20420_s11  ;;  %v550_v20 = vrot.slane %v13906_v42, 3  ;;  %v12639_v22 = vpack.i.bf16 %v614_v14, %v611_v8  ;;  %v423_v23 = vsel %vm409_vm0, %v420_v4, %v422_v9  ;;  %v552_v24 = vrot.slane %v13914_v47, 3  ;;  %1079 = vmatprep.subr.bf16.mxu1 %v12836_v21  ;;  %v12848_v55 = vld [vmem:[%s20410_s1 + $0xec] ss:$16 sps:$4 sm:$0xff]   ;;  %v389_v0 = vld [vmem:[%s13858_s12 + $0x60] sm:$0xff]  ;;  %v391_v21 = vld [vmem:[%s13858_s12 + $0x70] sm:$0xff] }
  0x2b   : > { %12630 = vrot.lane.b32.xlu1 %v12629_v1, %s13722_s22  ;;  %v615_v25 = vrot.slane %v13906_v42, 4  ;;  %v486_v28 = vsel %vm474_vm2, %v483_v52, %v485_v10  ;;  %v488_v29 = vsel %vm474_vm2, %v485_v10, %v487_v15  ;;  %v617_v30 = vrot.slane %v13914_v47, 4  ;;  %v12852_v63 = vld [vmem:[%s20410_s1 + $0x104] ss:$16 sps:$4 sm:$0x3f]   ;;  %v14061_v7 = vld [vmem:[%s13858_s12 + $0x68] sm:$0xff] }
  0x2c   : > { %v551_v32 = vsel %vm539_vm1, %v548_v62, %v550_v20  ;;  %v553_v33 = vsel %vm539_vm1, %v550_v20, %v552_v24  ;;  %v424_v34 = vrot.slane %v13962_v12, 1  ;;  %v425_v35 = vrot.slane %v13965_v13, 1  ;;  %987 = vmatpush1.bf16.msra.mxu0 %v12838_v26  ;;  %v12854_v1 = vld [vmem:[%s20410_s1 + $0x10c] ss:$16 sps:$4 sm:$0x3f]  }
  0x2d   : > { %v12644_v37 = vpack.i.bf16 %v423_v23, %v421_v19  ;;  %v427_v38 = vrot.slane %v13970_v16, 1  ;;  %v489_v39 = vrot.slane %v13962_v12, 2  ;;  %v490_v40 = vrot.slane %v13965_v13, 2  ;;  %1080 = vmatpush1.bf16.msra.mxu1 %v12839_v27  ;;  %988 = vmatprep.subr.bf16.mxu0 %v12840_v31  ;;  %v12856_v2 = vld [vmem:[%s20410_s1 + $0x100] ss:$16 sps:$4 sm:$0x3f]  }
  0x2e   : > { %12635 = vrot.lane.b32.xlu0 %v12634_v18, %s13721_s25  ;;  %v12649_v42 = vpack.i.bf16 %v488_v29, %v486_v28  ;;  %v616_v43 = vsel %vm604_vm3, %v613_v3, %v615_v25  ;;  %v492_v44 = vrot.slane %v13970_v16, 2  ;;  %v12654_v46 = vpack.i.bf16 %v553_v33, %v551_v32  ;;  %1081 = vmatprep.subr.bf16.mxu1 %v12842_v36  ;;  %v12857_v5 = vld [vmem:[%s20410_s1 + $0x108] ss:$16 sps:$4 sm:$0x3f]  }
  0x2f   : > { %12640 = vrot.lane.b32.xlu1 %v12639_v22, %s13723_s20  ;;  %v618_v47 = vsel %vm604_vm3, %v615_v25, %v617_v30  ;;  %v554_v48 = vrot.slane %v13962_v12, 3  ;;  %v555_v49 = vrot.slane %v13965_v13, 3  ;;  %v426_v51 = vsel %vm409_vm0, %v424_v34, %v425_v35  ;;  %v388_v6 = vld [vmem:[%s13858_s12 + $0x58] sm:$0xf] }
  0x30   : > { %v557_v52 = vrot.slane %v13970_v16, 3  ;;  %v619_v53 = vrot.slane %v13962_v12, 4  ;;  %v620_v54 = vrot.slane %v13965_v13, 4  ;;  %v428_v56 = vsel %vm409_vm0, %v425_v35, %v427_v38  ;;  %989 = vmatpush1.bf16.msra.mxu0 %v12844_v41  ;;  %v392_v26 = vld [vmem:[%s13858_s12 + $0x78] sm:$0xf] }
  0x31   : > { %v491_v57 = vsel %vm474_vm2, %v489_v39, %v490_v40  ;;  %v493_v58 = vsel %vm474_vm2, %v490_v40, %v492_v44  ;;  %v622_v59 = vrot.slane %v13970_v16, 4  ;;  %v12659_v62 = vpack.i.bf16 %v618_v47, %v616_v43  ;;  %1082 = vmatpush1.bf16.msra.mxu1 %v12845_v45  ;;  %990 = vmatprep.subr.bf16.mxu0 %v12846_v50 }
  0x32   : > { %12645 = vrot.lane.b32.xlu0 %v12644_v37, %s20420_s11  ;;  %v12664_v3 = vpack.i.bf16 %v428_v56, %v426_v51  ;;  %v12669_v4 = vpack.i.bf16 %v493_v58, %v491_v57  ;;  %1083 = vmatprep.subr.bf16.mxu1 %v12848_v55  ;;  %v556_v8 = vsel %vm539_vm1, %v554_v48, %v555_v49  ;;  %v429_v9 = vrot.slane %v388_v6, 1  ;;  %s20710_s11 = smov 28  }
  0x33   : > { %12650 = vrot.lane.b32.xlu1 %v12649_v42, %s13722_s22  ;;  %v431_v10 = vrot.slane %v389_v0, 1  ;;  %v432_v11 = vrot.slane %v14061_v7, 1  ;;  %v558_v12 = vsel %vm539_vm1, %v555_v49, %v557_v52  ;;  %v621_v13 = vsel %vm604_vm3, %v619_v53, %v620_v54 }
  0x34   : > { %v623_v14 = vsel %vm604_vm3, %v620_v54, %v622_v59  ;;  %v494_v15 = vrot.slane %v388_v6, 2  ;;  %991 = vmatpush1.bf16.msra.mxu0 %v12850_v60  ;;  %v496_v17 = vrot.slane %v389_v0, 2  ;;  %v497_v18 = vrot.slane %v14061_v7, 2 }
  0x35   : > { %1084 = vmatpush1.bf16.msra.mxu1 %v12851_v61  ;;  %11653 = vmatprep.subr.msk.bf16.mxu0 %vm474_vm2, %v12852_v63  ;;  %v965_v19 = vsel %vm474_vm2, %v12856_v2, 0  ;;  %v971_v20 = vsel %vm474_vm2, %v12857_v5, 0  ;;  %v12674_v22 = vpack.i.bf16 %v558_v12, %v556_v8  ;;  %v12679_v23 = vpack.i.bf16 %v623_v14, %v621_v13  ;;  %v13644_v8 = vld [vmem:[%s13858_s12 + $0x8] sm:$0xff] }
  0x36   : > { %12655 = vrot.lane.b32.xlu0 %v12654_v46, %s13721_s25  ;;  %11660 = vmatprep.subr.msk.bf16.mxu1 %vm474_vm2, %v12854_v1  ;;  %v430_v24 = vsel %vm409_vm0, %v427_v38, %v429_v9  ;;  %v433_v25 = vsel %vm409_vm0, %v431_v10, %v432_v11  ;;  %v495_v27 = vsel %vm474_vm2, %v492_v44, %v494_v15  ;;  %v559_v28 = vrot.slane %v388_v6, 3  ;;  %v13645_v10 = vld [vmem:[%s13858_s12] sm:$0xff] }
  0x37   : > { %12660 = vrot.lane.b32.xlu1 %v12659_v62, %s13723_s20  ;;  %v561_v29 = vrot.slane %v389_v0, 3  ;;  %v562_v30 = vrot.slane %v14061_v7, 3  ;;  %v498_v31 = vsel %vm474_vm2, %v496_v17, %v497_v18  ;;  %v624_v32 = vrot.slane %v388_v6, 4 }
  0x38   : > { %993 = vmatpush1.bf16.msra.mxu0 %v965_v19  ;;  %v626_v33 = vrot.slane %v389_v0, 4  ;;  %v627_v34 = vrot.slane %v14061_v7, 4  ;;  %v12684_v35 = vpack.i.bf16 %v433_v25, %v430_v24  ;;  %v434_v36 = vrot.slane %v391_v21, 1 }
  0x39   : > { %1086 = vmatpush1.bf16.msra.mxu1 %v971_v20  ;;  %v12689_v37 = vpack.i.bf16 %v498_v31, %v495_v27  ;;  %v560_v38 = vsel %vm539_vm1, %v557_v52, %v559_v28  ;;  %v563_v39 = vsel %vm539_vm1, %v561_v29, %v562_v30  ;;  %v436_v40 = vrot.slane %v392_v26, 1  ;;  %v13646_v29 = vld [vmem:[%s13858_s12 + $0x20] sm:$0xff]  ;;  %v13647_v31 = vld [vmem:[%s13858_s12 + $0x10] sm:$0xff] }
  0x3a   : > { %12665 = vrot.lane.b32.xlu0 %v12664_v3, %s20710_s11  ;;  %v625_v41 = vsel %vm604_vm3, %v622_v59, %v624_v32  ;;  %v628_v42 = vsel %vm604_vm3, %v626_v33, %v627_v34  ;;  %v499_v43 = vrot.slane %v391_v21, 2  ;;  %v501_v44 = vrot.slane %v392_v26, 2 }
  0x3b   : > { %12670 = vrot.lane.b32.xlu1 %v12669_v4, %s13722_s22  ;;  %v12694_v45 = vpack.i.bf16 %v563_v39, %v560_v38  ;;  %v435_v46 = vsel %vm409_vm0, %v432_v11, %v434_v36  ;;  %v12699_v47 = vpack.i.bf16 %v628_v42, %v625_v41  ;;  %v437_v48 = vsel %vm409_vm0, %v434_v36, %v436_v40 }
  0x3c   : > { %v564_v49 = vrot.slane %v391_v21, 3  ;;  %v566_v50 = vrot.slane %v392_v26, 3  ;;  %v500_v16 = vsel %vm474_vm2, %v497_v18, %v499_v43  ;;  %v502_v51 = vsel %vm474_vm2, %v499_v43, %v501_v44 }
  0x3d   : > { %v629_v52 = vrot.slane %v391_v21, 4  ;;  %v631_v53 = vrot.slane %v392_v26, 4  ;;  %v12704_v54 = vpack.i.bf16 %v437_v48, %v435_v46  ;;  %v12709_v55 = vpack.i.bf16 %v502_v51, %v500_v16 }
  0x3e   : > { %12675 = vrot.lane.b32.xlu0 %v12674_v22, %s13721_s25  ;;  %v565_v56 = vsel %vm539_vm1, %v562_v30, %v564_v49  ;;  %v567_v57 = vsel %vm539_vm1, %v564_v49, %v566_v50  ;;  %vm682_vm5 = vcmask 457728   ;;  %vm695_vm6 = vcmask 687104  }
  0x3f   : > { %12680 = vrot.lane.b32.xlu1 %v12679_v23, %s13723_s20  ;;  %v630_v58 = vsel %vm604_vm3, %v627_v34, %v629_v52  ;;  %v632_v59 = vsel %vm604_vm3, %v629_v52, %v631_v53  ;;  %v12714_v60 = vpack.i.bf16 %v567_v57, %v565_v56  ;;  %vm708_vm7 = vcmask 916480   ;;  %v13648_v52 = vld [vmem:[%s13858_s12 + $0x30] sm:$0xff] }
  0x40   : > { %v12719_v61 = vpack.i.bf16 %v632_v59, %v630_v58  ;;  %vm945_vm8 = vcmask 97280   ;;  %vm2650_vm9 = vcmask 1041408   ;;  %vm2672_vm10 = vcmask 779264  }
  0x41   : > { %vm4428_vm11 = vcmask 130048   ;;  %vm4986_vm12 = vcmask 1041409   ;;  %vm4989_vm13 = vcmask 1042434   ;;  %vm4992_vm14 = vcmask 1043459  }
  0x42   : > { %12685 = vrot.lane.b32.xlu0 %v12684_v35, %s20710_s11  ;;  %vm4995_vm15 = vcmask 1044484   ;;  %vm4998_vm0 = vcmask 1045509   ;;  %vm5001_vm1 = vcmask 1046534   ;;  %vm5004_vm2 = vcmask 1047559  }
  0x43   : > { %12690 = vrot.lane.b32.xlu1 %v12689_v37, %s13722_s22 }
  0x46   : > { %12695 = vrot.lane.b32.xlu0 %v12694_v45, %s13721_s25 }
  0x47   : > { %12700 = vrot.lane.b32.xlu1 %v12699_v47, %s13723_s20 }
  0x4a   : > { %12705 = vrot.lane.b32.xlu0 %v12704_v54, %s20710_s11  ;;  %v13649_v54 = vld [vmem:[%s13858_s12 + $0x28] sm:$0xff]  ;;  %s13726_s11 = smov 96  }
  0x4b   : > { %12710 = vrot.lane.b32.xlu1 %v12709_v55, %s13722_s22 }
  0x4e   : > { %12715 = vrot.lane.b32.xlu0 %v12714_v60, %s13721_s25 }
  0x4f   : > { %12720 = vrot.lane.b32.xlu1 %v12719_v61, %s13723_s20 }
  0x94   : > { %v12606_v62 = vpop.permute.xlu0 %12605 }
  0x95   : > { %v12616_v63 = vpop.permute.xlu1 %12615  ;;  %v12608_v0 = vunpack.i.h.bf16 %v12606_v62  ;;  %v12607_v1 = vunpack.i.l.bf16 %v12606_v62 }
  0x96   : > { %v12618_v3 = vunpack.i.h.bf16 %v12616_v63  ;;  %v12617_v4 = vunpack.i.l.bf16 %v12616_v63 }
  0x97   : > { %v671_v9 = vsel %vm669_vm4, %v13644_v8, %v12608_v0  ;;  %v670_v11 = vsel %vm669_vm4, %v13645_v10, %v12607_v1 }
  0x98   : > { %v12611_v2 = vpop.permute.xlu0 %12610 }
  0x99   : > { %v12613_v5 = vunpack.i.h.bf16 %v12611_v2  ;;  %v12612_v6 = vunpack.i.l.bf16 %v12611_v2  ;;  %v12621_v7 = vpop.permute.xlu1 %12620 }
  0x9a   : > { %v12623_v12 = vunpack.i.h.bf16 %v12621_v7  ;;  %v12622_v13 = vunpack.i.l.bf16 %v12621_v7 }
  0x9b   : > { %v683_v14 = vsel %vm682_vm5, %v670_v11, %v12612_v6  ;;  %v684_v15 = vsel %vm682_vm5, %v671_v9, %v12613_v5 }
  0x9c   : > { %v722_v17 = vpack.c.bf16 %v12623_v12, %v12622_v13  ;;  %v696_v18 = vsel %vm695_vm6, %v683_v14, %v12617_v4  ;;  %v697_v19 = vsel %vm695_vm6, %v684_v15, %v12618_v3  ;;  %v12626_v20 = vpop.permute.xlu0 %12625  ;;  %v13651_v14 = vld [vmem:[%s13858_s12 + $0x40] sm:$0xff] }
  0x9d   : > { %v709_v21 = vsel %vm708_vm7, %v696_v18, %v12622_v13  ;;  %v710_v22 = vsel %vm708_vm7, %v697_v19, %v12623_v12  ;;  %v12628_v23 = vunpack.i.h.bf16 %v12626_v20  ;;  %v12627_v24 = vunpack.i.l.bf16 %v12626_v20  ;;  %v12631_v25 = vpop.permute.xlu1 %12630  ;;  %v13650_v12 = vld [vmem:[%s13858_s12 + $0x48] sm:$0xff] }
  0x9e   : > { %11654 = vmatprep.mubr.msk.bf16.mxu0 %vm945_vm8, %v722_v17  ;;  %11661 = vmatprep.mubr.msk.bf16.mxu1 %vm945_vm8, %v722_v17  ;;  %v721_v26 = vpack.c.bf16 %v710_v22, %v709_v21  ;;  %v12633_v27 = vunpack.i.h.bf16 %v12631_v25  ;;  %v12632_v28 = vunpack.i.l.bf16 %v12631_v25 }
  0x9f   : > { %v673_v30 = vsel %vm669_vm4, %v13646_v29, %v12628_v23  ;;  %v672_v32 = vsel %vm669_vm4, %v13647_v31, %v12627_v24 }
  0xa0   : > { %1009 = vmatmul.mubr.bf16.vlgmr.msra.gmra.mrb[0].mxu0 %v721_v26  ;;  %1102 = vmatmul.mubr.bf16.vlgmr.msra.gmra.mrb[0].mxu1 %v721_v26  ;;  %v685_v33 = vsel %vm682_vm5, %v672_v32, %v12632_v28  ;;  %v686_v34 = vsel %vm682_vm5, %v673_v30, %v12633_v27  ;;  %v12636_v35 = vpop.permute.xlu0 %12635 }
  0xa1   : > { %v12638_v36 = vunpack.i.h.bf16 %v12636_v35  ;;  %v12637_v37 = vunpack.i.l.bf16 %v12636_v35  ;;  %v12641_v38 = vpop.permute.xlu1 %12640 }
  0xa2   : > { %v12643_v39 = vunpack.i.h.bf16 %v12641_v38  ;;  %v12642_v40 = vunpack.i.l.bf16 %v12641_v38 }
  0xa3   : > { %v698_v41 = vsel %vm695_vm6, %v685_v33, %v12637_v37  ;;  %v699_v42 = vsel %vm695_vm6, %v686_v34, %v12638_v36  ;;  %v13652_v37 = vld [vmem:[%s13858_s12 + $0x60] sm:$0xff] }
  0xa4   : > { %v724_v43 = vpack.c.bf16 %v12643_v39, %v12642_v40  ;;  %v711_v44 = vsel %vm708_vm7, %v698_v41, %v12642_v40  ;;  %v712_v45 = vsel %vm708_vm7, %v699_v42, %v12643_v39  ;;  %v12646_v46 = vpop.permute.xlu0 %12645  ;;  %v13653_v39 = vld [vmem:[%s13858_s12 + $0x50] sm:$0xff] }
  0xa5   : > { %v723_v47 = vpack.c.bf16 %v712_v45, %v711_v44  ;;  %v12648_v48 = vunpack.i.h.bf16 %v12646_v46  ;;  %v12647_v49 = vunpack.i.l.bf16 %v12646_v46  ;;  %v12651_v50 = vpop.permute.xlu1 %12650 }
  0xa6   : > { %11655 = vmatprep.mubr.msk.bf16.mxu0 %vm945_vm8, %v724_v43  ;;  %11662 = vmatprep.mubr.msk.bf16.mxu1 %vm945_vm8, %v724_v43  ;;  %v12653_v16 = vunpack.i.h.bf16 %v12651_v50  ;;  %v12652_v51 = vunpack.i.l.bf16 %v12651_v50 }
  0xa7   : > { %v675_v53 = vsel %vm669_vm4, %v13648_v52, %v12648_v48  ;;  %v674_v55 = vsel %vm669_vm4, %v13649_v54, %v12647_v49 }
  0xa8   : > { %1019 = vmatmul.mubr.bf16.gmra.mrb[4].mxu0 %v723_v47  ;;  %1112 = vmatmul.mubr.bf16.gmra.mrb[4].mxu1 %v723_v47  ;;  %v687_v56 = vsel %vm682_vm5, %v674_v55, %v12652_v51  ;;  %v688_v57 = vsel %vm682_vm5, %v675_v53, %v12653_v16  ;;  %v12656_v58 = vpop.permute.xlu0 %12655 }
  0xa9   : > { %v12658_v59 = vunpack.i.h.bf16 %v12656_v58  ;;  %v12657_v60 = vunpack.i.l.bf16 %v12656_v58  ;;  %v12661_v61 = vpop.permute.xlu1 %12660 }
  0xaa   : > { %v12663_v62 = vunpack.i.h.bf16 %v12661_v61  ;;  %v12662_v63 = vunpack.i.l.bf16 %v12661_v61 }
  0xab   : > { %v700_v0 = vsel %vm695_vm6, %v687_v56, %v12657_v60  ;;  %v701_v1 = vsel %vm695_vm6, %v688_v57, %v12658_v59  ;;  %v13654_v60 = vld [vmem:[%s13858_s12 + $0x70] sm:$0xff] }
  0xac   : > { %v726_v2 = vpack.c.bf16 %v12663_v62, %v12662_v63  ;;  %v713_v3 = vsel %vm708_vm7, %v700_v0, %v12662_v63  ;;  %v714_v4 = vsel %vm708_vm7, %v701_v1, %v12663_v62  ;;  %v12666_v5 = vpop.permute.xlu0 %12665  ;;  %v13655_v62 = vld [vmem:[%s13858_s12 + $0x68] sm:$0xff]  ;;  %s13725_s12 = smov 16  }
  0xad   : > { %v725_v6 = vpack.c.bf16 %v714_v4, %v713_v3  ;;  %v12668_v7 = vunpack.i.h.bf16 %v12666_v5  ;;  %v12667_v8 = vunpack.i.l.bf16 %v12666_v5  ;;  %v12671_v9 = vpop.permute.xlu1 %12670 }
  0xae   : > { %11656 = vmatprep.mubr.msk.bf16.mxu0 %vm945_vm8, %v726_v2  ;;  %11663 = vmatprep.mubr.msk.bf16.mxu1 %vm945_vm8, %v726_v2  ;;  %v12673_v10 = vunpack.i.h.bf16 %v12671_v9  ;;  %v12672_v11 = vunpack.i.l.bf16 %v12671_v9 }
  0xaf   : > { %v677_v13 = vsel %vm669_vm4, %v13650_v12, %v12668_v7  ;;  %v676_v15 = vsel %vm669_vm4, %v13651_v14, %v12667_v8  ;;  %v13724_v14 = vmov 1983009808  }
  0xb0   : > { %1029 = vmatmul.mubr.bf16.gmra.mrb[8].mxu0 %v725_v6  ;;  %1122 = vmatmul.mubr.bf16.gmra.mrb[8].mxu1 %v725_v6  ;;  %v689_v17 = vsel %vm682_vm5, %v676_v15, %v12672_v11  ;;  %v690_v18 = vsel %vm682_vm5, %v677_v13, %v12673_v10  ;;  %v12676_v19 = vpop.permute.xlu0 %12675  ;;  %v1215_v15 = vunpack.c.l.s4 %v13724_v14 }
  0xb1   : > { %v12678_v20 = vunpack.i.h.bf16 %v12676_v19  ;;  %v12677_v21 = vunpack.i.l.bf16 %v12676_v19  ;;  %v12681_v22 = vpop.permute.xlu1 %12680 }
  0xb2   : > { %v12683_v23 = vunpack.i.h.bf16 %v12681_v22  ;;  %v12682_v24 = vunpack.i.l.bf16 %v12681_v22 }
  0xb3   : > { %v702_v25 = vsel %vm695_vm6, %v689_v17, %v12677_v21  ;;  %v703_v26 = vsel %vm695_vm6, %v690_v18, %v12678_v20  ;;  %v1217_v17 = vlaneseq  ;;  %v1216_v18 = vunpack.c.0.s8 %v1215_v15 }
  0xb4   : > { %v728_v27 = vpack.c.bf16 %v12683_v23, %v12682_v24  ;;  %v715_v28 = vsel %vm708_vm7, %v702_v25, %v12682_v24  ;;  %v716_v29 = vsel %vm708_vm7, %v703_v26, %v12683_v23  ;;  %v12686_v30 = vpop.permute.xlu0 %12685 }
  0xb5   : > { %v727_v31 = vpack.c.bf16 %v716_v29, %v715_v28  ;;  %v12688_v32 = vunpack.i.h.bf16 %v12686_v30  ;;  %v12687_v33 = vunpack.i.l.bf16 %v12686_v30  ;;  %v12691_v34 = vpop.permute.xlu1 %12690  ;;  %v14191_v19 = vshrl.u32 %v1217_v17, 7 }
  0xb6   : > { %11657 = vmatprep.mubr.msk.bf16.mxu0 %vm945_vm8, %v728_v27  ;;  %11664 = vmatprep.mubr.msk.bf16.mxu1 %vm945_vm8, %v728_v27  ;;  %v12693_v35 = vunpack.i.h.bf16 %v12691_v34  ;;  %v12692_v36 = vunpack.i.l.bf16 %v12691_v34 }
  0xb7   : > { %v679_v38 = vsel %vm669_vm4, %v13652_v37, %v12688_v32  ;;  %v678_v40 = vsel %vm669_vm4, %v13653_v39, %v12687_v33  ;;  %20711 = vst [vmem:[#allocation6_spill] sm:$0xff] %v14191_v19  ;;  %v14194_v22 = vsub.s32 %v1216_v18, %v14191_v19 }
  0xb8   : > { %1039 = vmatmul.mubr.bf16.gmra.mrb[12].mxu0 %v727_v31  ;;  %1132 = vmatmul.mubr.bf16.gmra.mrb[12].mxu1 %v727_v31  ;;  %v691_v41 = vsel %vm682_vm5, %v678_v40, %v12692_v36  ;;  %v692_v42 = vsel %vm682_vm5, %v679_v38, %v12693_v35  ;;  %v12696_v43 = vpop.permute.xlu0 %12695 }
  0xb9   : > { %v12698_v44 = vunpack.i.h.bf16 %v12696_v43  ;;  %v12697_v45 = vunpack.i.l.bf16 %v12696_v43  ;;  %v12701_v46 = vpop.permute.xlu1 %12700  ;;  %20712 = vst [vmem:[#allocation7_spill] sm:$0xff] %v14194_v22 }
  0xba   : > { %v12703_v47 = vunpack.i.h.bf16 %v12701_v46  ;;  %v12702_v48 = vunpack.i.l.bf16 %v12701_v46 }
  0xbb   : > { %v704_v49 = vsel %vm695_vm6, %v691_v41, %v12697_v45  ;;  %v705_v50 = vsel %vm695_vm6, %v692_v42, %v12698_v44 }
  0xbc   : > { %v730_v16 = vpack.c.bf16 %v12703_v47, %v12702_v48  ;;  %v717_v51 = vsel %vm708_vm7, %v704_v49, %v12702_v48  ;;  %v718_v52 = vsel %vm708_vm7, %v705_v50, %v12703_v47  ;;  %v12706_v53 = vpop.permute.xlu0 %12705 }
  0xbd   : > { %v729_v54 = vpack.c.bf16 %v718_v52, %v717_v51  ;;  %v12708_v55 = vunpack.i.h.bf16 %v12706_v53  ;;  %v12707_v56 = vunpack.i.l.bf16 %v12706_v53  ;;  %v12711_v57 = vpop.permute.xlu1 %12710 }
  0xbe   : > { %11658 = vmatprep.mubr.msk.bf16.mxu0 %vm945_vm8, %v730_v16  ;;  %11665 = vmatprep.mubr.msk.bf16.mxu1 %vm945_vm8, %v730_v16  ;;  %v12713_v58 = vunpack.i.h.bf16 %v12711_v57  ;;  %v12712_v59 = vunpack.i.l.bf16 %v12711_v57 }
  0xbf   : > { %v681_v61 = vsel %vm669_vm4, %v13654_v60, %v12708_v55  ;;  %v680_v63 = vsel %vm669_vm4, %v13655_v62, %v12707_v56  ;;  %vm5400_vm4 = vcmask 785408  }
  0xc0   : > { %1049 = vmatmul.mubr.bf16.gmra.mrb[16].mxu0 %v729_v54  ;;  %1142 = vmatmul.mubr.bf16.gmra.mrb[16].mxu1 %v729_v54  ;;  %v693_v0 = vsel %vm682_vm5, %v680_v63, %v12712_v59  ;;  %v694_v1 = vsel %vm682_vm5, %v681_v61, %v12713_v58  ;;  %v12716_v2 = vpop.permute.xlu0 %12715 }
  0xc1   : > { %v12718_v3 = vunpack.i.h.bf16 %v12716_v2  ;;  %v12717_v4 = vunpack.i.l.bf16 %v12716_v2  ;;  %v12721_v5 = vpop.permute.xlu1 %12720 }
  0xc2   : > { %v12723_v6 = vunpack.i.h.bf16 %v12721_v5  ;;  %v12722_v7 = vunpack.i.l.bf16 %v12721_v5 }
  0xc3   : > { %v706_v8 = vsel %vm695_vm6, %v693_v0, %v12717_v4  ;;  %v707_v9 = vsel %vm695_vm6, %v694_v1, %v12718_v3  ;;  %vm5553_vm6 = vcmask 654336  }
  0xc4   : > { %v732_v10 = vpack.c.bf16 %v12723_v6, %v12722_v7  ;;  %v719_v11 = vsel %vm708_vm7, %v706_v8, %v12722_v7  ;;  %v720_v12 = vsel %vm708_vm7, %v707_v9, %v12723_v6 }
  0xc5   : > { %v731_v13 = vpack.c.bf16 %v720_v12, %v719_v11 }
  0xc6   : > { %11659 = vmatprep.mubr.msk.bf16.mxu0 %vm945_vm8, %v732_v10  ;;  %11666 = vmatprep.mubr.msk.bf16.mxu1 %vm945_vm8, %v732_v10  ;;  %vm7559_vm8 = vcmask 392192  }
  0xc8   : > { %1059 = vmatmul.mubr.bf16.gmra.mrb[20].mxu0 %v731_v13  ;;  %1152 = vmatmul.mubr.bf16.gmra.mrb[20].mxu1 %v731_v13 }
 0x173   : > { %v1010_v20 = vpop.f32.mrb[0].mxu0  ;;  %v1103_v21 = vpop.f32.mrb[0].mxu1 }
 0x174   : > { %v1012_v23 = vpop.f32.mrb[1].mxu0  ;;  %v1105_v24 = vpop.f32.mrb[1].mxu1 }
 0x175   : > { %v1210_v25 = vcombine.low %v1010_v20, %v1012_v23  ;;  %v1211_v26 = vcombine.high %v1010_v20, %v1012_v23  ;;  %v1212_v27 = vcombine.low %v1103_v21, %v1105_v24  ;;  %v1213_v28 = vcombine.high %v1103_v21, %v1105_v24  ;;  %v1014_v29 = vpop.f32.mrb[2].mxu0  ;;  %v1107_v30 = vpop.f32.mrb[2].mxu1 }
 0x176   : > { %v1016_v31 = vpop.f32.mrb[3].mxu0  ;;  %v1109_v32 = vpop.f32.mrb[3].mxu1 }
 0x177   : > { %v14197_v33 = vrot.slane %v1210_v25, %v14194_v22  ;;  %v1227_v34 = vrot.slane %v1211_v26, %v14194_v22  ;;  %v14201_v35 = vrot.slane %v1212_v27, %v14194_v22  ;;  %v1241_v36 = vrot.slane %v1213_v28, %v14194_v22 }
 0x178   : > { %v1246_v37 = vcombine.low %v1014_v29, %v1016_v31  ;;  %v1247_v38 = vcombine.high %v1014_v29, %v1016_v31  ;;  %v1248_v39 = vcombine.low %v1107_v30, %v1109_v32  ;;  %v1249_v40 = vcombine.high %v1107_v30, %v1109_v32 }
 0x179   : > { %v1243_v42 = vcombine.high %v14197_v33, %v14201_v35  ;;  %v1244_v43 = vcombine.low %v1227_v34, %v1241_v36  ;;  %v1245_v44 = vcombine.high %v1227_v34, %v1241_v36  ;;  %v11667_v45 = vcombine.low %v14201_v35, %v14201_v35 }
 0x17a   : > { %v11668_v46 = vcombine.high %v14201_v35, %v14201_v35  ;;  %v11669_v47 = vcombine.low %v1241_v36, %v1241_v36  ;;  %v11670_v48 = vcombine.high %v1241_v36, %v1241_v36  ;;  %v14213_v49 = vrot.slane %v1246_v37, %v14194_v22 }
 0x17b   : > { %v14216_v50 = vrot.slane %v1247_v38, %v14194_v22  ;;  %v14219_v16 = vrot.slane %v1248_v39, %v14194_v22  ;;  %v14222_v51 = vrot.slane %v1249_v40, %v14194_v22  ;;  %v1020_v52 = vpop.f32.mrb[4].mxu0  ;;  %v1113_v53 = vpop.f32.mrb[4].mxu1  ;;  %v14228_v55 = vrot.slane %v11667_v45, %v14194_v22 }
 0x17c   : > { %v14225_v54 = vrot.slane %v11669_v47, %v14194_v22  ;;  %v14231_v56 = vrot.slane %v11670_v48, %v14194_v22  ;;  %v14234_v57 = vrot.slane %v1244_v43, %v14194_v22  ;;  %v1022_v58 = vpop.f32.mrb[5].mxu0  ;;  %v1115_v59 = vpop.f32.mrb[5].mxu1  ;;  %v14261_v11 = vrot.slane %v11668_v46, %v14194_v22 }
 0x17d   : > { %v14244_v0 = vpop.f32.mrb[6].mxu0  ;;  %v14246_v1 = vpop.f32.mrb[6].mxu1  ;;  %v2665_v5 = vsel %vm2650_vm9, %v14228_v55, -inf  ;;  %v14265_v13 = vrot.slane %v1245_v44, %v14194_v22  ;;  %v1282_v14 = vcombine.low %v1020_v52, %v1022_v58  ;;  %v1283_v15 = vcombine.high %v1020_v52, %v1022_v58 }
 0x17e   : > { %v14248_v2 = vpop.f32.mrb[7].mxu1  ;;  %v14250_v3 = vpop.f32.mrb[7].mxu0  ;;  %v2722_v4 = vsel %vm2650_vm9, %v14225_v54, -inf  ;;  %v2750_v6 = vsel %vm2650_vm9, %v14231_v56, -inf  ;;  %v1691_v7 = vcombine.high %v14234_v57, %v14234_v57  ;;  %v2666_v9 = vrot.slane %v2665_v5, 4 }
 0x17f   : > { %v2723_v8 = vrot.slane %v2722_v4, 4  ;;  %v2751_v10 = vrot.slane %v2750_v6, 4  ;;  %20713 = vst [vmem:[#allocation8_spill] sm:$0xff] %v14265_v13  ;;  %v2694_v23 = vsel %vm2650_vm9, %v14261_v11, -inf  ;;  %v1708_v24 = vcombine.high %v14265_v13, %v14265_v13 }
 0x180   : > { %v2715_v12 = vsel %vm2650_vm9, %v1691_v7, -inf  ;;  %v2667_v18 = vmax.f32 %v2665_v5, %v2666_v9  ;;  %v14272_v25 = vrot.slane %v1282_v14, %v14194_v22  ;;  %v14275_v26 = vrot.slane %v1283_v15, %v14194_v22 }
 0x181   : > { %v2724_v17 = vmax.f32 %v2722_v4, %v2723_v8  ;;  %v2752_v20 = vmax.f32 %v2750_v6, %v2751_v10  ;;  %v2716_v21 = vrot.slane %v2715_v12, 4  ;;  %v2695_v37 = vrot.slane %v2694_v23, 4 }
 0x182   : > { %v2668_v30 = vrot.slane %v2667_v18, 2  ;;  %v2743_v38 = vsel %vm2650_vm9, %v1708_v24, -inf  ;;  %v1284_v39 = vcombine.low %v1113_v53, %v1115_v59  ;;  %v1285_v40 = vcombine.high %v1113_v53, %v1115_v59 }
 0x183   : > { %v14277_v27 = vpop.f32.mrb[8].mxu0  ;;  %v14279_v28 = vpop.f32.mrb[8].mxu1  ;;  %v2725_v29 = vrot.slane %v2724_v17, 2  ;;  %v2753_v31 = vrot.slane %v2752_v20, 2  ;;  %v2717_v32 = vmax.f32 %v2715_v12, %v2716_v21  ;;  %v2696_v4 = vmax.f32 %v2694_v23, %v2695_v37 }
 0x184   : > { %v14281_v34 = vpop.f32.mrb[9].mxu0  ;;  %v14283_v36 = vpop.f32.mrb[9].mxu1  ;;  %v2669_v46 = vmax.f32 %v2667_v18, %v2668_v30  ;;  %v2744_v5 = vrot.slane %v2743_v38, 4  ;;  %v14295_v6 = vrot.slane %v1284_v39, %v14194_v22  ;;  %v14298_v7 = vrot.slane %v1285_v40, %v14194_v22 }
 0x185   : > { %v14286_v43 = vpop.f32.mrb[10].mxu0  ;;  %v14288_v44 = vpop.f32.mrb[10].mxu1  ;;  %v2726_v45 = vmax.f32 %v2724_v17, %v2725_v29  ;;  %v2754_v47 = vmax.f32 %v2752_v20, %v2753_v31  ;;  %v2718_v48 = vrot.slane %v2717_v32, 2  ;;  %v11671_v53 = vcombine.low %v14219_v16, %v14219_v16 }
 0x186   : > { %v14290_v52 = vpop.f32.mrb[11].mxu1  ;;  %v14292_v58 = vpop.f32.mrb[11].mxu0  ;;  %v2670_v8 = vrot.slane %v2669_v46, 1  ;;  %v2697_v10 = vrot.slane %v2696_v4, 2  ;;  %v2745_v12 = vmax.f32 %v2743_v38, %v2744_v5 }
 0x187   : > { %v2727_v59 = vrot.slane %v2726_v45, 1  ;;  %v2719_v9 = vmax.f32 %v2717_v32, %v2718_v48  ;;  %v2755_v20 = vrot.slane %v2754_v47, 1  ;;  %v14327_v5 = vrot.slane %v11671_v53, %v14194_v22 }
 0x188   : > { %v2671_v18 = vmax.f32 %v2669_v46, %v2670_v8  ;;  %v2698_v23 = vmax.f32 %v2696_v4, %v2697_v10  ;;  %v2746_v24 = vrot.slane %v2745_v12, 2  ;;  %v14348_v53 = vrot.slane %v1243_v42, %v14194_v22 }
 0x189   : > { %v2728_v17 = vmax.f32 %v2726_v45, %v2727_v59  ;;  %v2720_v21 = vrot.slane %v2719_v9, 1  ;;  %v2756_v48 = vmax.f32 %v2754_v47, %v2755_v20  ;;  %v1320_v59 = vcombine.low %v14246_v1, %v14248_v2 }
 0x18a   : > { %4142 = vrot.lane.b32.xlu0 %v2671_v18, %s13725_s12  ;;  %v2699_v39 = vrot.slane %v2698_v23, 1  ;;  %v2747_v40 = vmax.f32 %v2745_v12, %v2746_v24  ;;  %v1321_v12 = vcombine.high %v14246_v1, %v14248_v2  ;;  %v11672_v18 = vcombine.high %v14219_v16, %v14219_v16  ;;  %20715 = vst [vmem:[#allocation10_spill] sm:$0xff] %v14348_v53 }
 0x18b   : > { %v14310_v31 = vpop.f32.mrb[12].mxu0  ;;  %v14312_v32 = vpop.f32.mrb[12].mxu1  ;;  %4154 = vrot.lane.b32.xlu1 %v2728_v17, %s13725_s12  ;;  %v14324_v4 = vmax.f32 %v2719_v9, %v2720_v21  ;;  %v2778_v47 = vsel %vm2650_vm9, %v14327_v5, -inf  ;;  %v14351_v1 = vrot.slane %v1320_v59, %v14194_v22  ;;  %v1318_v2 = vcombine.low %v14244_v0, %v14250_v3 }
 0x18c   : > { %v14316_v37 = vpop.f32.mrb[13].mxu1  ;;  %v14318_v38 = vpop.f32.mrb[13].mxu0  ;;  %v2748_v17 = vrot.slane %v2747_v40, 1  ;;  %v2700_v9 = vmax.f32 %v2698_v23, %v2699_v39  ;;  %v2779_v20 = vrot.slane %v2778_v47, 4  ;;  %v14358_v24 = vrot.slane %v1321_v12, %v14194_v22 }
 0x18d   : > { %v14320_v45 = vpop.f32.mrb[14].mxu0  ;;  %v14322_v46 = vpop.f32.mrb[14].mxu1  ;;  %20714 = vst [vmem:[#allocation9_spill] sm:$0xff] %v14324_v4  ;;  %v1319_v42 = vcombine.high %v14244_v0, %v14250_v3  ;;  %v14365_v23 = vrot.slane %v1318_v2, %v14194_v22  ;;  %v14375_v59 = vrot.slane %v11672_v18, %v14194_v22  ;;  %v1675_v0 = vcombine.high %v14261_v11, %v14261_v11 }
 0x18e   : > { %v14331_v8 = vpop.f32.mrb[15].mxu0  ;;  %v14333_v10 = vpop.f32.mrb[15].mxu1  ;;  %4152 = vrot.lane.b32.xlu0 %v14324_v4, %s13725_s12  ;;  %v14355_v21 = vmax.f32 %v2747_v40, %v2748_v17  ;;  %v2780_v30 = vmax.f32 %v2778_v47, %v2779_v20  ;;  %v11673_v11 = vcombine.low %v14222_v51, %v14222_v51  ;;  %v11674_v12 = vcombine.high %v14222_v51, %v14222_v51 }
 0x18f   : > { %4160 = vrot.lane.b32.xlu1 %v2756_v48, %s13725_s12  ;;  %v1674_v48 = vcombine.high %v14348_v53, %v14348_v53  ;;  %v14372_v40 = vrot.slane %v1319_v42, %v14194_v22  ;;  %v2806_v18 = vsel %vm2650_vm9, %v14375_v59, -inf  ;;  %v2701_v2 = vsel %vm2672_vm10, %v1675_v0, -inf }
 0x190   : > { %20716 = vst [vmem:[#allocation11_spill] sm:$0xff] %v14355_v21  ;;  %v2781_v3 = vrot.slane %v2780_v30, 2  ;;  %v2807_v29 = vrot.slane %v2806_v18, 4  ;;  %v2702_v14 = vrot.slane %v2701_v2, 4  ;;  %v14406_v60 = vrot.slane %v11674_v12, %v14194_v22 }
 0x191   : > { %v2687_v39 = vsel %vm2650_vm9, %v1674_v48, -inf  ;;  %v1709_v47 = vcombine.high %v14231_v56, %v14231_v56 }
 0x192   : > { %4158 = vrot.lane.b32.xlu0 %v14355_v21, %s13725_s12  ;;  %v2688_v17 = vrot.slane %v2687_v39, 4  ;;  %v2782_v48 = vmax.f32 %v2780_v30, %v2781_v3  ;;  %v2808_v63 = vmax.f32 %v2806_v18, %v2807_v29  ;;  %v2703_v62 = vmax.f32 %v2701_v2, %v2702_v14 }
 0x193   : > { %4148 = vrot.lane.b32.xlu1 %v2700_v9, %s13725_s12  ;;  %v14401_v3 = vrot.slane %v11673_v11, %v14194_v22  ;;  %v14416_v12 = vpop.f32.mrb[16].mxu0 }
 0x194   : > { %v2689_v42 = vmax.f32 %v2687_v39, %v2688_v17  ;;  %v2783_v9 = vrot.slane %v2782_v48, 1  ;;  %v1692_v17 = vcombine.high %v14225_v54, %v14225_v54  ;;  %v2809_v61 = vrot.slane %v2808_v63, 2  ;;  %20717 = vst [vmem:[#allocation12_spill] sm:$0xff] %v14416_v12  ;;  %v14436_v53 = vpop.f32.mrb[17].mxu0 }
 0x195   : > { %v2704_v15 = vrot.slane %v2703_v62, 2  ;;  %v2834_v14 = vsel %vm2650_vm9, %v14401_v3, -inf  ;;  %v14442_v13 = vpop.f32.mrb[18].mxu0 }
 0x196   : > { %v2690_v20 = vrot.slane %v2689_v42, 2  ;;  %v2784_v30 = vmax.f32 %v2782_v48, %v2783_v9  ;;  %v2729_v9 = vsel %vm2672_vm10, %v1692_v17, -inf  ;;  %v2810_v54 = vmax.f32 %v2808_v63, %v2809_v61  ;;  %v14418_v48 = vpop.f32.mrb[16].mxu1  ;;  %20722 = vst [vmem:[#allocation16_spill] sm:$0xff] %v14442_v13 }
 0x197   : > { %v2705_v18 = vmax.f32 %v2703_v62, %v2704_v15  ;;  %v2835_v2 = vrot.slane %v2834_v14, 4  ;;  %v2730_v11 = vrot.slane %v2729_v9, 4  ;;  %v14426_v0 = vpop.f32.mrb[17].mxu1 }
 0x198   : > { %v2691_v39 = vmax.f32 %v2689_v42, %v2690_v20  ;;  %4166 = vrot.lane.b32.xlu1 %v2784_v30, %s13725_s12  ;;  %v1658_v20 = vcombine.high %v14228_v55, %v14228_v55  ;;  %v2862_v42 = vsel %vm2650_vm9, %v14406_v60, -inf  ;;  %v2757_v30 = vsel %vm2672_vm10, %v1709_v47, -inf }
 0x199   : > { %v2811_v55 = vrot.slane %v2810_v54, 1  ;;  %v2706_v61 = vrot.slane %v2705_v18, 1  ;;  %v2836_v62 = vmax.f32 %v2834_v14, %v2835_v2  ;;  %v2731_v63 = vmax.f32 %v2729_v9, %v2730_v11  ;;  %v14438_v14 = vpop.f32.mrb[18].mxu1 }
 0x19a   : > { %v2692_v29 = vrot.slane %v2691_v39, 1  ;;  %v2673_v17 = vsel %vm2672_vm10, %v1658_v20, -inf  ;;  %v2863_v15 = vrot.slane %v2862_v42, 4  ;;  %v2758_v41 = vrot.slane %v2757_v30, 4  ;;  %20721 = vst [vmem:[#allocation15_spill] sm:$0xff] %v14438_v14  ;;  %v14444_v12 = vpop.f32.mrb[19].mxu1 }
 0x19b   : > { %v2812_v47 = vmax.f32 %v2810_v54, %v2811_v55  ;;  %v2707_v20 = vmax.f32 %v2705_v18, %v2706_v61  ;;  %v2837_v4 = vrot.slane %v2836_v62, 2  ;;  %v2732_v19 = vrot.slane %v2731_v63, 2  ;;  %20723 = vst [vmem:[#allocation17_spill] sm:$0xff] %v14444_v12 }
 0x19c   : > { %v14420_v56 = vmax.f32 %v2691_v39, %v2692_v29  ;;  %v2674_v39 = vrot.slane %v2673_v17, 4  ;;  %v20719_v29 = vcombine.low %v14197_v33, %v14201_v35  ;;  %v2864_v9 = vmax.f32 %v2862_v42, %v2863_v15  ;;  %v14455_v42 = vpop.f32.mrb[19].mxu0 }
 0x19d   : > { %v2759_v2 = vmax.f32 %v2757_v30, %v2758_v41  ;;  %4172 = vrot.lane.b32.xlu1 %v2812_v47, %s13725_s12  ;;  %v2838_v33 = vmax.f32 %v2836_v62, %v2837_v4  ;;  %v2733_v35 = vmax.f32 %v2731_v63, %v2732_v19  ;;  %v1743_v54 = vcombine.high %v14375_v59, %v14375_v59 }
 0x19e   : > { %20718 = vst [vmem:[#allocation13_spill] sm:$0xff] %v14420_v56  ;;  %4146 = vrot.lane.b32.xlu0 %v14420_v56, %s13725_s12  ;;  %v14434_v21 = vrot.slane %v20719_v29, %v14194_v22  ;;  %v2675_v11 = vmax.f32 %v2673_v17, %v2674_v39  ;;  %v20724_v18 = vcombine.low %v14213_v49, %v14219_v16  ;;  %20726 = vst [vmem:[#allocation19_spill] sm:$0xff] %v14455_v42 }
 0x19f   : > { %v2865_v30 = vrot.slane %v2864_v9, 2  ;;  %v2760_v17 = vrot.slane %v2759_v2, 2  ;;  %v2839_v4 = vrot.slane %v2838_v33, 1  ;;  %v2734_v19 = vrot.slane %v2733_v35, 1 }
 0x1a0   : > { %20720 = vst [vmem:[#allocation14_spill] sm:$0xff] %v14434_v21  ;;  %v1657_v56 = vcombine.high %v14434_v21, %v14434_v21  ;;  %v14453_v41 = vrot.slane %v20724_v18, %v14194_v22  ;;  %v2676_v55 = vrot.slane %v2675_v11, 2  ;;  %v2813_v59 = vsel %vm2672_vm10, %v1743_v54, -inf }
 0x1a1   : > { %v2866_v63 = vmax.f32 %v2864_v9, %v2865_v30  ;;  %v2761_v15 = vmax.f32 %v2759_v2, %v2760_v17  ;;  %v2814_v29 = vrot.slane %v2813_v59, 4  ;;  %v2840_v47 = vmax.f32 %v2838_v33, %v2839_v4 }
 0x1a2   : > { %20725 = vst [vmem:[#allocation18_spill] sm:$0xff] %v14453_v41  ;;  %4150 = vrot.lane.b32.xlu0 %v2707_v20, %s13725_s12  ;;  %v2658_v61 = vsel %vm2650_vm9, %v1657_v56, -inf  ;;  %v2677_v39 = vmax.f32 %v2675_v11, %v2676_v55  ;;  %v2735_v18 = vmax.f32 %v2733_v35, %v2734_v19  ;;  %v1725_v20 = vcombine.high %v14453_v41, %v14453_v41 }
 0x1a3   : > { %v2659_v62 = vrot.slane %v2658_v61, 4  ;;  %v2867_v14 = vrot.slane %v2866_v63, 1  ;;  %v2762_v12 = vrot.slane %v2761_v15, 1  ;;  %v2815_v42 = vmax.f32 %v2813_v59, %v2814_v29  ;;  %4178 = vrot.lane.b32.xlu1 %v2840_v47, %s13725_s12 }
 0x1a4   : > { %v2678_v13 = vrot.slane %v2677_v39, 1  ;;  %v2771_v9 = vsel %vm2650_vm9, %v1725_v20, -inf  ;;  %v20727_v2 = vcombine.low %v14295_v6, %v14295_v6  ;;  %v20728_v33 = vcombine.high %v14213_v49, %v14219_v16 }
 0x1a5   : > { %v2660_v21 = vmax.f32 %v2658_v61, %v2659_v62  ;;  %v2868_v54 = vmax.f32 %v2866_v63, %v2867_v14  ;;  %v2763_v30 = vmax.f32 %v2761_v15, %v2762_v12  ;;  %v2816_v55 = vrot.slane %v2815_v42, 2 }
 0x1a6   : > { %4156 = vrot.lane.b32.xlu0 %v2735_v18, %s13725_s12  ;;  %v14469_v11 = vrot.slane %v20727_v2, %v14194_v22  ;;  %v14475_v35 = vrot.slane %v20728_v33, %v14194_v22  ;;  %v2679_v17 = vmax.f32 %v2677_v39, %v2678_v13  ;;  %v2772_v4 = vrot.slane %v2771_v9, 4 }
 0x1a7   : > { %v2661_v56 = vrot.slane %v2660_v21, 2  ;;  %v2817_v59 = vmax.f32 %v2815_v42, %v2816_v55  ;;  %v20730_v49 = vcombine.low %v14358_v24, %v14358_v24  ;;  %v20731_v13 = vcombine.low %v14216_v50, %v14222_v51  ;;  %4184 = vrot.lane.b32.xlu1 %v2868_v54, %s13725_s12 }
 0x1a8   : > { %20729 = vst [vmem:[#allocation20_spill] sm:$0xff] %v14475_v35  ;;  %v2890_v19 = vsel %vm2650_vm9, %v14469_v11, -inf  ;;  %v1742_v62 = vcombine.high %v14475_v35, %v14475_v35  ;;  %v2773_v14 = vmax.f32 %v2771_v9, %v2772_v4  ;;  %v20733_v63 = vcombine.high %v14358_v24, %v14358_v24 }
 0x1a9   : > { %v2662_v61 = vmax.f32 %v2660_v21, %v2661_v56  ;;  %v2891_v29 = vrot.slane %v2890_v19, 4  ;;  %v14485_v16 = vrot.slane %v20730_v49, %v14194_v22  ;;  %v14491_v21 = vrot.slane %v20731_v13, %v14194_v22 }
 0x1aa   : > { %4162 = vrot.lane.b32.xlu0 %v2763_v30, %s13725_s12  ;;  %v2799_v42 = vsel %vm2650_vm9, %v1742_v62, -inf  ;;  %v14500_v15 = vrot.slane %v20733_v63, %v14194_v22  ;;  %v2818_v39 = vrot.slane %v2817_v59, 1  ;;  %v2774_v2 = vrot.slane %v2773_v14, 2 }
 0x1ab   : > { %20732 = vst [vmem:[#allocation21_spill] sm:$0xff] %v14491_v21  ;;  %v2663_v12 = vrot.slane %v2662_v61, 1  ;;  %v2892_v47 = vmax.f32 %v2890_v19, %v2891_v29  ;;  %v2800_v18 = vrot.slane %v2799_v42, 4  ;;  %v3058_v20 = vsel %vm2650_vm9, %v14485_v16, -inf  ;;  %4144 = vrot.lane.b32.xlu1 %v2679_v17, %s13725_s12 }
 0x1ac   : > { %v3059_v33 = vrot.slane %v3058_v20, 4  ;;  %v1759_v9 = vcombine.high %v14491_v21, %v14491_v21  ;;  %v2819_v54 = vmax.f32 %v2817_v59, %v2818_v39  ;;  %v3086_v4 = vsel %vm2650_vm9, %v14500_v15, -inf }
 0x1ad   : > { %v14504_v56 = vmax.f32 %v2662_v61, %v2663_v12  ;;  %v2893_v30 = vrot.slane %v2892_v47, 2  ;;  %v2801_v55 = vmax.f32 %v2799_v42, %v2800_v18  ;;  %v2775_v19 = vmax.f32 %v2773_v14, %v2774_v2 }
 0x1ae   : > { %v3060_v62 = vmax.f32 %v3058_v20, %v3059_v33  ;;  %v2827_v61 = vsel %vm2650_vm9, %v1759_v9, -inf  ;;  %v3087_v29 = vrot.slane %v3086_v4, 4  ;;  %v20735_v59 = vcombine.high %v14216_v50, %v14222_v51 }
 0x1af   : > { %20734 = vst [vmem:[#allocation22_spill] sm:$0xff] %v14504_v56  ;;  %4140 = vrot.lane.b32.xlu0 %v14504_v56, %s13725_s12  ;;  %v2894_v49 = vmax.f32 %v2892_v47, %v2893_v30  ;;  %v2802_v13 = vrot.slane %v2801_v55, 2  ;;  %v2828_v12 = vrot.slane %v2827_v61, 4  ;;  %v2776_v63 = vrot.slane %v2775_v19, 1  ;;  %4174 = vrot.lane.b32.xlu1 %v2819_v54, %s13725_s12 }
 0x1b0   : > { %v14518_v42 = vrot.slane %v20735_v59, %v14194_v22  ;;  %v3061_v39 = vrot.slane %v3060_v62, 2  ;;  %v3088_v17 = vmax.f32 %v3086_v4, %v3087_v29  ;;  %v1354_v18 = vcombine.low %v14277_v27, %v14281_v34 }
 0x1b1   : > { %v2895_v14 = vrot.slane %v2894_v49, 1  ;;  %v2803_v20 = vmax.f32 %v2801_v55, %v2802_v13  ;;  %v2829_v2 = vmax.f32 %v2827_v61, %v2828_v12  ;;  %v14525_v33 = vmax.f32 %v2775_v19, %v2776_v63 }
 0x1b2   : > { %20736 = vst [vmem:[#allocation23_spill] sm:$0xff] %v14518_v42  ;;  %v1776_v47 = vcombine.high %v14518_v42, %v14518_v42  ;;  %v3062_v9 = vmax.f32 %v3060_v62, %v3061_v39  ;;  %v3089_v50 = vrot.slane %v3088_v17, 2  ;;  %v1355_v51 = vcombine.high %v14277_v27, %v14281_v34 }
 0x1b3   : > { %20737 = vst [vmem:[#allocation24_spill] sm:$0xff] %v14525_v33  ;;  %v11680_v30 = vcombine.high %v14351_v1, %v14351_v1  ;;  %v2804_v4 = vrot.slane %v2803_v20, 1  ;;  %v2830_v29 = vrot.slane %v2829_v2, 2  ;;  %4164 = vrot.lane.b32.xlu0 %v14525_v33, %s13725_s12  ;;  %v2896_v61 = vmax.f32 %v2894_v49, %v2895_v14 }
 0x1b4   : > { %v2855_v55 = vsel %vm2650_vm9, %v1776_v47, -inf  ;;  %v3063_v13 = vrot.slane %v3062_v9, 1  ;;  %v3090_v54 = vmax.f32 %v3088_v17, %v3089_v50  ;;  %v14537_v59 = vrot.slane %v1354_v18, %v14194_v22 }
 0x1b5   : > { %v2856_v19 = vrot.slane %v2855_v55, 4  ;;  %v14534_v12 = vmax.f32 %v2803_v20, %v2804_v4  ;;  %v2831_v62 = vmax.f32 %v2829_v2, %v2830_v29  ;;  %v1356_v27 = vcombine.low %v14279_v28, %v14283_v36  ;;  %4190 = vrot.lane.b32.xlu1 %v2896_v61, %s13725_s12 }
 0x1b6   : > { %v3064_v34 = vmax.f32 %v3062_v9, %v3063_v13  ;;  %v14543_v39 = vrot.slane %v1355_v51, %v14194_v22  ;;  %v1357_v49 = vcombine.high %v14279_v28, %v14283_v36  ;;  %v14551_v18 = vrot.slane %v11680_v30, %v14194_v22 }
 0x1b7   : > { %20738 = vst [vmem:[#allocation25_spill] sm:$0xff] %v14534_v12  ;;  %v2857_v63 = vmax.f32 %v2855_v55, %v2856_v19  ;;  %v2832_v17 = vrot.slane %v2831_v62, 1  ;;  %v14548_v14 = vrot.slane %v1356_v27, %v14194_v22  ;;  %v1392_v20 = vcombine.low %v14288_v44, %v14290_v52  ;;  %4170 = vrot.lane.b32.xlu0 %v14534_v12, %s13725_s12 }
 0x1b8   : > { %v3091_v2 = vrot.slane %v3090_v54, 1  ;;  %v14558_v9 = vrot.slane %v1357_v49, %v14194_v22  ;;  %v1393_v28 = vcombine.high %v14288_v44, %v14290_v52  ;;  %v3030_v44 = vsel %vm2650_vm9, %v14551_v18, -inf }
 0x1b9   : > { %v2858_v47 = vrot.slane %v2857_v63, 2  ;;  %4226 = vrot.lane.b32.xlu1 %v3064_v34, %s13725_s12  ;;  %v14567_v51 = vmax.f32 %v2831_v62, %v2832_v17  ;;  %v3031_v61 = vrot.slane %v3030_v44, 4  ;;  %v1726_v13 = vcombine.high %v14327_v5, %v14327_v5 }
 0x1ba   : > { %v3092_v52 = vmax.f32 %v3090_v54, %v3091_v2  ;;  %v14580_v19 = vrot.slane %v1392_v20, %v14194_v22  ;;  %v14583_v62 = vrot.slane %v1393_v28, %v14194_v22  ;;  %v1390_v27 = vcombine.low %v14286_v43, %v14292_v58 }
 0x1bb   : > { %20739 = vst [vmem:[#allocation26_spill] sm:$0xff] %v14567_v51  ;;  %v2859_v30 = vmax.f32 %v2857_v63, %v2858_v47  ;;  %4176 = vrot.lane.b32.xlu0 %v14567_v51, %s13725_s12  ;;  %v1391_v34 = vcombine.high %v14286_v43, %v14292_v58  ;;  %v11679_v54 = vcombine.low %v14351_v1, %v14351_v1  ;;  %v2785_v49 = vsel %vm2672_vm10, %v1726_v13, -inf }
 0x1bc   : > { %v3032_v5 = vmax.f32 %v3030_v44, %v3031_v61  ;;  %v14596_v17 = vrot.slane %v1390_v27, %v14194_v22  ;;  %v2786_v58 = vrot.slane %v2785_v49, 4  ;;  %v14611_v44 = vpop.f32.mrb[20].mxu0  ;;  %v1760_v27 = vcombine.high %v14401_v3, %v14401_v3 }
 0x1bd   : > { %v2860_v55 = vrot.slane %v2859_v30, 1  ;;  %4232 = vrot.lane.b32.xlu1 %v3092_v52, %s13725_s12  ;;  %v14599_v20 = vrot.slane %v1391_v34, %v14194_v22  ;;  %20741 = vst [vmem:[#allocation28_spill] sm:$0xff] %v14611_v44  ;;  %v14613_v52 = vpop.f32.mrb[20].mxu1  ;;  %v14616_v13 = vrot.slane %v11679_v54, %v14194_v22  ;;  %v20742_v29 = vcombine.high %v14365_v23, %v14351_v1 }
 0x1be   : > { %v3033_v43 = vrot.slane %v3032_v5, 2  ;;  %v2787_v61 = vmax.f32 %v2785_v49, %v2786_v58  ;;  %v14620_v34 = vpop.f32.mrb[21].mxu1  ;;  %v20746_v54 = vcombine.high %v14372_v40, %v14358_v24  ;;  %v11676_v50 = vcombine.high %v14295_v6, %v14295_v6 }
 0x1bf   : > { %v14592_v63 = vmax.f32 %v2859_v30, %v2860_v55  ;;  %v14626_v4 = vrot.slane %v20742_v29, %v14194_v22  ;;  %v20744_v30 = vcombine.low %v14372_v40, %v14358_v24  ;;  %v3002_v58 = vsel %vm2650_vm9, %v14616_v13, -inf }
 0x1c0   : > { %v3034_v55 = vmax.f32 %v3032_v5, %v3033_v43  ;;  %v14638_v49 = vrot.slane %v20746_v54, %v14194_v22  ;;  %v2788_v43 = vrot.slane %v2787_v61, 2  ;;  %v2841_v29 = vsel %vm2672_vm10, %v1760_v27, -inf }
 0x1c1   : > { %20740 = vst [vmem:[#allocation27_spill] sm:$0xff] %v14592_v63  ;;  %4182 = vrot.lane.b32.xlu0 %v14592_v63, %s13725_s12  ;;  %20743 = vst [vmem:[#allocation29_spill] sm:$0xff] %v14626_v4  ;;  %v14632_v5 = vrot.slane %v20744_v30, %v14194_v22  ;;  %v3003_v30 = vrot.slane %v3002_v58, 4  ;;  %v2842_v47 = vrot.slane %v2841_v29, 4  ;;  %v1777_v40 = vcombine.high %v14406_v60, %v14406_v60 }
 0x1c2   : > { %20747 = vst [vmem:[#allocation31_spill] sm:$0xff] %v14638_v49  ;;  %v3035_v3 = vrot.slane %v3034_v55, 1  ;;  %v2789_v28 = vmax.f32 %v2787_v61, %v2788_v43  ;;  %v14653_v54 = vsel %vm2650_vm9, %v14234_v57, -inf  ;;  %v20748_v57 = vcombine.high %v14272_v25, %v14295_v6 }
 0x1c3   : > { %20745 = vst [vmem:[#allocation30_spill] sm:$0xff] %v14632_v5  ;;  %v3004_v43 = vmax.f32 %v3002_v58, %v3003_v30  ;;  %v2843_v2 = vmax.f32 %v2841_v29, %v2842_v47  ;;  %v2869_v60 = vsel %vm2672_vm10, %v1777_v40, -inf  ;;  %v1879_v61 = vcombine.high %v14551_v18, %v14551_v18  ;;  %v14676_v58 = vpop.f32.mrb[22].mxu1 }
 0x1c4   : > { %v3036_v36 = vmax.f32 %v3034_v55, %v3035_v3  ;;  %v2790_v3 = vrot.slane %v2789_v28, 1  ;;  %v14667_v24 = vrot.slane %v20748_v57, %v14194_v22  ;;  %v2870_v63 = vrot.slane %v2869_v60, 4  ;;  %20752 = vst [vmem:[#allocation35_spill] sm:$0xff] %v14676_v58 }
 0x1c5   : > { %v14670_v55 = vrot.slane %v11676_v50, %v14194_v22  ;;  %v3005_v47 = vrot.slane %v3004_v43, 2  ;;  %v2844_v29 = vrot.slane %v2843_v2, 2  ;;  %v1896_v40 = vcombine.high %v14485_v16, %v14485_v16 }
 0x1c6   : > { %4220 = vrot.lane.b32.xlu1 %v3036_v36, %s13725_s12  ;;  %20749 = vst [vmem:[#allocation32_spill] sm:$0xff] %v14667_v24  ;;  %v2791_v27 = vmax.f32 %v2789_v28, %v2790_v3  ;;  %v14674_v36 = vpop.f32.mrb[21].mxu0  ;;  %v1810_v30 = vcombine.high %v14667_v24, %v14667_v24  ;;  %v14684_v3 = vpop.f32.mrb[23].mxu1  ;;  %v2871_v18 = vmax.f32 %v2869_v60, %v2870_v63  ;;  %v3037_v51 = vsel %vm2672_vm10, %v1879_v61, -inf }
 0x1c7   : > { %20750 = vst [vmem:[#allocation33_spill] sm:$0xff] %v14670_v55  ;;  %20751 = vst [vmem:[#allocation34_spill] sm:$0xff] %v14674_v36  ;;  %v14682_v28 = vpop.f32.mrb[22].mxu0  ;;  %v2918_v57 = vsel %vm2650_vm9, %v14670_v55, -inf  ;;  %v3006_v33 = vmax.f32 %v3004_v43, %v3005_v47  ;;  %v2845_v24 = vmax.f32 %v2843_v2, %v2844_v29  ;;  %v3038_v56 = vrot.slane %v3037_v51, 4 }
 0x1c8   : > { %20753 = vst [vmem:[#allocation36_spill] sm:$0xff] %v14682_v28  ;;  %20754 = vst [vmem:[#allocation37_spill] sm:$0xff] %v14684_v3  ;;  %4168 = vrot.lane.b32.xlu0 %v2791_v27, %s13725_s12  ;;  %v2911_v42 = vsel %vm2650_vm9, %v1810_v30, -inf  ;;  %v2919_v16 = vrot.slane %v2918_v57, 4  ;;  %v2872_v12 = vrot.slane %v2871_v18, 2  ;;  %v3065_v35 = vsel %vm2672_vm10, %v1896_v40, -inf }
 0x1c9   : > { %v2912_v21 = vrot.slane %v2911_v42, 4  ;;  %v3007_v41 = vrot.slane %v3006_v33, 1  ;;  %v2846_v50 = vrot.slane %v2845_v24, 1  ;;  %v3066_v27 = vrot.slane %v3065_v35, 4  ;;  %v14700_v43 = vpop.f32.mrb[23].mxu0 }
 0x1ca   : > { %v2920_v28 = vmax.f32 %v2918_v57, %v2919_v16  ;;  %v2873_v63 = vmax.f32 %v2871_v18, %v2872_v12  ;;  %v3039_v58 = vmax.f32 %v3037_v51, %v3038_v56  ;;  %v20755_v61 = vcombine.low %v14272_v25, %v14295_v6 }
 0x1cb   : > { %v2913_v60 = vmax.f32 %v2911_v42, %v2912_v21  ;;  %v3008_v47 = vmax.f32 %v3006_v33, %v3007_v41  ;;  %v2847_v29 = vmax.f32 %v2845_v24, %v2846_v50  ;;  %v3067_v3 = vmax.f32 %v3065_v35, %v3066_v27 }
 0x1cc   : > { %v14698_v2 = vrot.slane %v20755_v61, %v14194_v22  ;;  %v2921_v30 = vrot.slane %v2920_v28, 2  ;;  %v2874_v40 = vrot.slane %v2873_v63, 1  ;;  %v3040_v36 = vrot.slane %v3039_v58, 2 }
 0x1cd   : > { %v2914_v44 = vrot.slane %v2913_v60, 2  ;;  %4214 = vrot.lane.b32.xlu1 %v3008_v47, %s13725_s12  ;;  %4180 = vrot.lane.b32.xlu0 %v2847_v29, %s13725_s12  ;;  %v3068_v25 = vrot.slane %v3067_v3, 2  ;;  %v1913_v6 = vcombine.high %v14500_v15, %v14500_v15  ;;  %v1794_v41 = vcombine.high %v14469_v11, %v14469_v11 }
 0x1ce   : > { %v1793_v12 = vcombine.high %v14698_v2, %v14698_v2  ;;  %v2922_v21 = vmax.f32 %v2920_v28, %v2921_v30  ;;  %v2875_v56 = vmax.f32 %v2873_v63, %v2874_v40  ;;  %v3041_v42 = vmax.f32 %v3039_v58, %v3040_v36 }
 0x1cf   : > { %v2915_v35 = vmax.f32 %v2913_v60, %v2914_v44  ;;  %v3069_v24 = vmax.f32 %v3067_v3, %v3068_v25  ;;  %v3093_v18 = vsel %vm2672_vm10, %v1913_v6, -inf  ;;  %v2897_v27 = vsel %vm2672_vm10, %v1794_v41, -inf }
 0x1d0   : > { %v2883_v33 = vsel %vm2650_vm9, %v1793_v12, -inf  ;;  %v2923_v51 = vrot.slane %v2922_v21, 1  ;;  %v3042_v16 = vrot.slane %v3041_v42, 1  ;;  %v3094_v28 = vrot.slane %v3093_v18, 4 }
 0x1d1   : > { %v2884_v50 = vrot.slane %v2883_v33, 4  ;;  %v2916_v57 = vrot.slane %v2915_v35, 1  ;;  %v11685_v15 = vcombine.low %v14558_v9, %v14558_v9  ;;  %4186 = vrot.lane.b32.xlu0 %v2875_v56, %s13725_s12  ;;  %v2898_v36 = vrot.slane %v2897_v27, 4 }
 0x1d2   : > { %v2924_v11 = vmax.f32 %v2922_v21, %v2923_v51  ;;  %v3070_v63 = vrot.slane %v3069_v24, 1  ;;  %v3095_v3 = vmax.f32 %v3093_v18, %v3094_v28  ;;  %v20757_v60 = vcombine.low %v14548_v14, %v14548_v14 }
 0x1d3   : > { %v2885_v44 = vmax.f32 %v2883_v33, %v2884_v50  ;;  %v14716_v58 = vmax.f32 %v2915_v35, %v2916_v57  ;;  %v3043_v47 = vmax.f32 %v3041_v42, %v3042_v16  ;;  %v2899_v30 = vmax.f32 %v2897_v27, %v2898_v36 }
 0x1d4   : > { %v14722_v61 = vrot.slane %v20757_v60, %v14194_v22  ;;  %v20758_v40 = vcombine.high %v14632_v5, %v14632_v5  ;;  %v3096_v21 = vrot.slane %v3095_v3, 2  ;;  %v20759_v41 = vcombine.high %v14548_v14, %v14548_v14 }
 0x1d5   : > { %20756 = vst [vmem:[#allocation38_spill] sm:$0xff] %v14716_v58  ;;  %v2886_v29 = vrot.slane %v2885_v44, 2  ;;  %4194 = vrot.lane.b32.xlu1 %v14716_v58, %s13725_s12  ;;  %4196 = vrot.lane.b32.xlu0 %v2924_v11, %s13725_s12  ;;  %v2900_v42 = vrot.slane %v2899_v30, 2  ;;  %v20760_v51 = vcombine.high %v14638_v49, %v14638_v49  ;;  %v3071_v11 = vmax.f32 %v3069_v24, %v3070_v63 }
 0x1d6   : > { %v3051_v12 = vsel %vm2650_vm9, %v20758_v40, -inf  ;;  %v3114_v25 = vsel %vm2650_vm9, %v14722_v61, -inf  ;;  %v14736_v56 = vrot.slane %v20759_v41, %v14194_v22  ;;  %v3097_v18 = vmax.f32 %v3095_v3, %v3096_v21 }
 0x1d7   : > { %v3052_v6 = vrot.slane %v3051_v12, 4  ;;  %v2887_v35 = vmax.f32 %v2885_v44, %v2886_v29  ;;  %v3115_v33 = vrot.slane %v3114_v25, 4  ;;  %v3079_v50 = vsel %vm2650_vm9, %v20760_v51, -inf }
 0x1d8   : > { %v3142_v16 = vsel %vm2650_vm9, %v14736_v56, -inf  ;;  %v3080_v28 = vrot.slane %v3079_v50, 4  ;;  %v2901_v36 = vmax.f32 %v2899_v30, %v2900_v42  ;;  %v14747_v41 = vrot.slane %v11685_v15, %v14194_v22 }
 0x1d9   : > { %v3053_v57 = vmax.f32 %v3051_v12, %v3052_v6  ;;  %v2888_v27 = vrot.slane %v2887_v35, 1  ;;  %v3116_v60 = vmax.f32 %v3114_v25, %v3115_v33  ;;  %v3143_v40 = vrot.slane %v3142_v16, 4  ;;  %4222 = vrot.lane.b32.xlu1 %v3043_v47, %s13725_s12 }
 0x1da   : > { %v3081_v29 = vmax.f32 %v3079_v50, %v3080_v28  ;;  %v2902_v3 = vrot.slane %v2901_v36, 1  ;;  %v3098_v6 = vrot.slane %v3097_v18, 1  ;;  %v3170_v30 = vsel %vm2650_vm9, %v14747_v41, -inf }
 0x1db   : > { %v3054_v44 = vrot.slane %v3053_v57, 2  ;;  %v14749_v58 = vmax.f32 %v2887_v35, %v2888_v27  ;;  %v3117_v12 = vrot.slane %v3116_v60, 2  ;;  %v3144_v21 = vmax.f32 %v3142_v16, %v3143_v40 }
 0x1dc   : > { %v3082_v49 = vrot.slane %v3081_v29, 2  ;;  %v11686_v47 = vcombine.high %v14558_v9, %v14558_v9  ;;  %v3171_v63 = vrot.slane %v3170_v30, 4  ;;  %v20762_v42 = vcombine.high %v14626_v4, %v14626_v4 }
 0x1dd   : > { %20761 = vst [vmem:[#allocation39_spill] sm:$0xff] %v14749_v58  ;;  %v3055_v51 = vmax.f32 %v3053_v57, %v3054_v44  ;;  %4188 = vrot.lane.b32.xlu0 %v14749_v58, %s13725_s12  ;;  %v3118_v24 = vmax.f32 %v3116_v60, %v3117_v12  ;;  %v3145_v15 = vrot.slane %v3144_v21, 2  ;;  %4228 = vrot.lane.b32.xlu1 %v3071_v11, %s13725_s12 }
 0x1de   : > { %v3083_v35 = vmax.f32 %v3081_v29, %v3082_v49  ;;  %v3023_v33 = vsel %vm2650_vm9, %v20762_v42, -inf  ;;  %v1428_v50 = vcombine.low %v14312_v32, %v14316_v37  ;;  %v2903_v57 = vmax.f32 %v2901_v36, %v2902_v3 }
 0x1df   : > { %v3056_v25 = vrot.slane %v3055_v51, 1  ;;  %v3146_v16 = vmax.f32 %v3144_v21, %v3145_v15  ;;  %v3172_v28 = vmax.f32 %v3170_v30, %v3171_v63  ;;  %v3024_v27 = vrot.slane %v3023_v33, 4 }
 0x1e0   : > { %v3099_v40 = vmax.f32 %v3097_v18, %v3098_v6  ;;  %v3119_v60 = vrot.slane %v3118_v24, 1  ;;  %v3084_v44 = vrot.slane %v3083_v35, 1  ;;  %v1429_v11 = vcombine.high %v14312_v32, %v14316_v37 }
 0x1e1   : > { %v20763_v49 = vcombine.low %v14275_v26, %v14298_v7  ;;  %v11678_v12 = vcombine.high %v14298_v7, %v14298_v7  ;;  %4192 = vrot.lane.b32.xlu0 %v2903_v57, %s13725_s12  ;;  %v3173_v36 = vrot.slane %v3172_v28, 2  ;;  %v3025_v3 = vmax.f32 %v3023_v33, %v3024_v27 }
 0x1e2   : > { %v20765_v18 = vcombine.low %v14298_v7, %v14298_v7  ;;  %v20767_v32 = vcombine.high %v14275_v26, %v14298_v7  ;;  %v20769_v6 = vcombine.low %v14365_v23, %v14351_v1  ;;  %4234 = vrot.lane.b32.xlu1 %v3099_v40, %s13725_s12  ;;  %v14794_v15 = vmax.f32 %v3055_v51, %v3056_v25 }
 0x1e3   : > { %v14770_v29 = vrot.slane %v20763_v49, %v14194_v22  ;;  %v3147_v63 = vrot.slane %v3146_v16, 1  ;;  %v3026_v42 = vrot.slane %v3025_v3, 2  ;;  %v14797_v33 = vrot.slane %v1428_v50, %v14194_v22 }
 0x1e4   : > { %v14779_v21 = vrot.slane %v20765_v18, %v14194_v22  ;;  %v14785_v37 = vrot.slane %v20767_v32, %v14194_v22  ;;  %v14791_v30 = vrot.slane %v20769_v6, %v14194_v22  ;;  %20771 = vst [vmem:[#allocation44_spill] sm:$0xff] %v14794_v15  ;;  %v14800_v57 = vrot.slane %v11686_v47, %v14194_v22 }
 0x1e5   : > { %20764 = vst [vmem:[#allocation40_spill] sm:$0xff] %v14770_v29  ;;  %v3120_v26 = vmax.f32 %v3118_v24, %v3119_v60  ;;  %v14802_v7 = vmax.f32 %v3083_v35, %v3084_v44  ;;  %v3174_v27 = vmax.f32 %v3172_v28, %v3173_v36  ;;  %v1862_v1 = vcombine.high %v14616_v13, %v14616_v13 }
 0x1e6   : > { %20766 = vst [vmem:[#allocation41_spill] sm:$0xff] %v14779_v21  ;;  %20768 = vst [vmem:[#allocation42_spill] sm:$0xff] %v14785_v37  ;;  %4224 = vrot.lane.b32.xlu0 %v14794_v15, %s13725_s12  ;;  %v3027_v23 = vmax.f32 %v3025_v3, %v3026_v42  ;;  %v14809_v51 = vrot.slane %v1429_v11, %v14194_v22  ;;  %v3198_v25 = vsel %vm2650_vm9, %v14800_v57, -inf }
 0x1e7   : > { %20770 = vst [vmem:[#allocation43_spill] sm:$0xff] %v14791_v30  ;;  %20772 = vst [vmem:[#allocation45_spill] sm:$0xff] %v14802_v7  ;;  %v1426_v47 = vcombine.low %v14310_v31, %v14318_v38  ;;  %4238 = vrot.lane.b32.xlu1 %v3120_v26, %s13725_s12  ;;  %v3199_v24 = vrot.slane %v3198_v25, 4  ;;  %v3009_v35 = vsel %vm2672_vm10, %v1862_v1, -inf  ;;  %v1427_v13 = vcombine.high %v14310_v31, %v14318_v38 }
 0x1e8   : > { %v1462_v50 = vcombine.low %v14320_v45, %v14331_v8  ;;  %v3148_v28 = vmax.f32 %v3146_v16, %v3147_v63  ;;  %v3028_v40 = vrot.slane %v3027_v23, 1  ;;  %v3010_v60 = vrot.slane %v3009_v35, 4 }
 0x1e9   : > { %v14822_v44 = vrot.slane %v1426_v47, %v14194_v22  ;;  %v3175_v11 = vrot.slane %v3174_v27, 1  ;;  %v3200_v49 = vmax.f32 %v3198_v25, %v3199_v24  ;;  %v14825_v36 = vrot.slane %v1427_v13, %v14194_v22 }
 0x1ea   : > { %v1463_v3 = vcombine.high %v14320_v45, %v14331_v8  ;;  %v11688_v31 = vcombine.high %v14580_v19, %v14580_v19  ;;  %4230 = vrot.lane.b32.xlu0 %v14802_v7, %s13725_s12  ;;  %v3011_v38 = vmax.f32 %v3009_v35, %v3010_v60  ;;  %v11689_v32 = vcombine.low %v14583_v62, %v14583_v62 }
 0x1eb   : > { %4244 = vrot.lane.b32.xlu1 %v3148_v28, %s13725_s12  ;;  %v3201_v6 = vrot.slane %v3200_v49, 2  ;;  %v14844_v63 = vmax.f32 %v3027_v23, %v3028_v40  ;;  %v14847_v26 = vrot.slane %v1462_v50, %v14194_v22  ;;  %v1464_v1 = vcombine.low %v14322_v46, %v14333_v10 }
 0x1ec   : > { %v3012_v42 = vrot.slane %v3011_v38, 2  ;;  %v3176_v25 = vmax.f32 %v3174_v27, %v3175_v11  ;;  %v14852_v24 = vrot.slane %v1463_v3, %v14194_v22  ;;  %v1465_v35 = vcombine.high %v14322_v46, %v14333_v10 }
 0x1ed   : > { %v3202_v47 = vmax.f32 %v3200_v49, %v3201_v6  ;;  %v14857_v13 = vrot.slane %v11678_v12, %v14194_v22  ;;  %v11690_v23 = vcombine.high %v14583_v62, %v14583_v62  ;;  %v14864_v28 = vrot.slane %v1464_v1, %v14194_v22 }
 0x1ee   : > { %4218 = vrot.lane.b32.xlu0 %v14844_v63, %s13725_s12  ;;  %v3013_v50 = vmax.f32 %v3011_v38, %v3012_v42  ;;  %v1861_v27 = vcombine.high %v14791_v30, %v14791_v30  ;;  %v11687_v40 = vcombine.low %v14580_v19, %v14580_v19  ;;  %v14872_v10 = vrot.slane %v1465_v35, %v14194_v22 }
 0x1ef   : > { %20773 = vst [vmem:[#allocation46_spill] sm:$0xff] %v14857_v13  ;;  %4250 = vrot.lane.b32.xlu1 %v3176_v25, %s13725_s12  ;;  %v3203_v46 = vrot.slane %v3202_v47, 1  ;;  %v14875_v12 = vrot.slane %v11688_v31, %v14194_v22  ;;  %v14882_v3 = vrot.slane %v11689_v32, %v14194_v22  ;;  %v14889_v31 = vrot.slane %v11690_v23, %v14194_v22 }
 0x1f0   : > { %v3014_v60 = vrot.slane %v3013_v50, 1  ;;  %v20776_v1 = vcombine.low %v14596_v17, %v14580_v19  ;;  %v20778_v32 = vcombine.high %v14596_v17, %v14580_v19  ;;  %v14911_v23 = vrot.slane %v11687_v40, %v14194_v22 }
 0x1f1   : > { %20774 = vst [vmem:[#allocation47_spill] sm:$0xff] %v14882_v3  ;;  %v3204_v38 = vmax.f32 %v3202_v47, %v3203_v46  ;;  %20775 = vst [vmem:[#allocation48_spill] sm:$0xff] %v14889_v31  ;;  %v20780_v46 = vcombine.low %v14599_v20, %v14583_v62  ;;  %v1930_v6 = vcombine.high %v14722_v61, %v14722_v61 }
 0x1f2   : > { %v14895_v25 = vrot.slane %v20776_v1, %v14194_v22  ;;  %v14901_v47 = vrot.slane %v20778_v32, %v14194_v22  ;;  %v3015_v35 = vmax.f32 %v3013_v50, %v3014_v60  ;;  %v2995_v1 = vsel %vm2650_vm9, %v1861_v27, -inf }
 0x1f3   : > { %v14907_v42 = vrot.slane %v20780_v46, %v14194_v22  ;;  %4256 = vrot.lane.b32.xlu1 %v3204_v38, %s13725_s12  ;;  %v2996_v19 = vrot.slane %v2995_v1, 4  ;;  %v20782_v17 = vcombine.low %v14537_v59, %v14548_v14  ;;  %v1947_v60 = vcombine.high %v14736_v56, %v14736_v56 }
 0x1f4   : > { %20777 = vst [vmem:[#allocation49_spill] sm:$0xff] %v14895_v25  ;;  %20779 = vst [vmem:[#allocation50_spill] sm:$0xff] %v14901_v47  ;;  %4216 = vrot.lane.b32.xlu0 %v3015_v35, %s13725_s12  ;;  %v20784_v40 = vcombine.high %v14537_v59, %v14548_v14  ;;  %v3226_v61 = vsel %vm2650_vm9, %v14911_v23, -inf  ;;  %v3121_v38 = vsel %vm2672_vm10, %v1930_v6, -inf  ;;  %v1964_v32 = vcombine.high %v14747_v41, %v14747_v41 }
 0x1f5   : > { %20781 = vst [vmem:[#allocation51_spill] sm:$0xff] %v14907_v42  ;;  %v14921_v50 = vrot.slane %v20782_v17, %v14194_v22  ;;  %v20786_v35 = vcombine.low %v14543_v39, %v14558_v9  ;;  %v3227_v56 = vrot.slane %v3226_v61, 4  ;;  %v2997_v17 = vmax.f32 %v2995_v1, %v2996_v19 }
 0x1f6   : > { %v14929_v27 = vrot.slane %v20784_v40, %v14194_v22  ;;  %v3122_v49 = vrot.slane %v3121_v38, 4  ;;  %v3149_v14 = vsel %vm2672_vm10, %v1947_v60, -inf  ;;  %v3177_v40 = vsel %vm2672_vm10, %v1964_v32, -inf }
 0x1f7   : > { %20783 = vst [vmem:[#allocation52_spill] sm:$0xff] %v14921_v50  ;;  %v14940_v46 = vrot.slane %v20786_v35, %v14194_v22  ;;  %v1929_v59 = vcombine.high %v14921_v50, %v14921_v50  ;;  %v3228_v11 = vmax.f32 %v3226_v61, %v3227_v56  ;;  %v2998_v18 = vrot.slane %v2997_v17, 2 }
 0x1f8   : > { %20785 = vst [vmem:[#allocation53_spill] sm:$0xff] %v14929_v27  ;;  %v1946_v6 = vcombine.high %v14929_v27, %v14929_v27  ;;  %v3123_v35 = vmax.f32 %v3121_v38, %v3122_v49  ;;  %v3150_v19 = vrot.slane %v3149_v14, 4  ;;  %v3178_v45 = vrot.slane %v3177_v40, 4 }
 0x1f9   : > { %20787 = vst [vmem:[#allocation54_spill] sm:$0xff] %v14940_v46  ;;  %v1963_v41 = vcombine.high %v14940_v46, %v14940_v46  ;;  %v3107_v8 = vsel %vm2650_vm9, %v1929_v59, -inf  ;;  %v3229_v31 = vrot.slane %v3228_v11, 2  ;;  %v2999_v60 = vmax.f32 %v2997_v17, %v2998_v18 }
 0x1fa   : > { %v3108_v1 = vrot.slane %v3107_v8, 4  ;;  %v3135_v16 = vsel %vm2650_vm9, %v1946_v6, -inf  ;;  %v3124_v37 = vrot.slane %v3123_v35, 2  ;;  %v3151_v21 = vmax.f32 %v3149_v14, %v3150_v19 }
 0x1fb   : > { %v3136_v13 = vrot.slane %v3135_v16, 4  ;;  %v3179_v32 = vmax.f32 %v3177_v40, %v3178_v45  ;;  %v3163_v29 = vsel %vm2650_vm9, %v1963_v41, -inf  ;;  %v3230_v46 = vmax.f32 %v3228_v11, %v3229_v31 }
 0x1fc   : > { %v3109_v3 = vmax.f32 %v3107_v8, %v3108_v1  ;;  %v3000_v61 = vrot.slane %v2999_v60, 1  ;;  %v3125_v56 = vmax.f32 %v3123_v35, %v3124_v37  ;;  %v20788_v38 = vcombine.high %v14599_v20, %v14583_v62 }
 0x1fd   : > { %v3137_v49 = vmax.f32 %v3135_v16, %v3136_v13  ;;  %v3152_v27 = vrot.slane %v3151_v21, 2  ;;  %v3164_v18 = vrot.slane %v3163_v29, 4  ;;  %v3231_v17 = vrot.slane %v3230_v46, 1 }
 0x1fe   : > { %v14957_v59 = vrot.slane %v20788_v38, %v14194_v22  ;;  %v3110_v6 = vrot.slane %v3109_v3, 2  ;;  %v14959_v50 = vmax.f32 %v2999_v60, %v3000_v61  ;;  %v3180_v45 = vrot.slane %v3179_v32, 2 }
 0x1ff   : > { %v3138_v8 = vrot.slane %v3137_v49, 2  ;;  %v1997_v11 = vcombine.high %v14895_v25, %v14895_v25  ;;  %v3126_v31 = vrot.slane %v3125_v56, 1  ;;  %v3165_v16 = vmax.f32 %v3163_v29, %v3164_v18 }
 0x200   : > { %20789 = vst [vmem:[#allocation55_spill] sm:$0xff] %v14957_v59  ;;  %20790 = vst [vmem:[#allocation56_spill] sm:$0xff] %v14959_v50  ;;  %v3111_v37 = vmax.f32 %v3109_v3, %v3110_v6  ;;  %v3232_v13 = vmax.f32 %v3230_v46, %v3231_v17  ;;  %4212 = vrot.lane.b32.xlu0 %v14959_v50, %s13725_s12  ;;  %v3153_v62 = vmax.f32 %v3151_v21, %v3152_v27 }
 0x201   : > { %v3139_v20 = vmax.f32 %v3137_v49, %v3138_v8  ;;  %v1981_v14 = vcombine.high %v14800_v57, %v14800_v57  ;;  %v2014_v40 = vcombine.high %v14901_v47, %v14901_v47  ;;  %v11693_v41 = vcombine.low %v14809_v51, %v14809_v51 }
 0x202   : > { %v3112_v35 = vrot.slane %v3111_v37, 1  ;;  %v3166_v1 = vrot.slane %v3165_v16, 2  ;;  %4262 = vrot.lane.b32.xlu1 %v3232_v13, %s13725_s12  ;;  %v3181_v29 = vmax.f32 %v3179_v32, %v3180_v45  ;;  %v20791_v21 = vcombine.high %v14543_v39, %v14558_v9 }
 0x203   : > { %v3205_v3 = vsel %vm2672_vm10, %v1981_v14, -inf  ;;  %v1998_v57 = vcombine.high %v14911_v23, %v14911_v23  ;;  %v3127_v46 = vmax.f32 %v3125_v56, %v3126_v31  ;;  %v3140_v60 = vrot.slane %v3139_v20, 1 }
 0x204   : > { %v14977_v27 = vrot.slane %v20791_v21, %v14194_v22  ;;  %v14981_v19 = vmax.f32 %v3111_v37, %v3112_v35  ;;  %v3167_v61 = vmax.f32 %v3165_v16, %v3166_v1  ;;  %v3154_v49 = vrot.slane %v3153_v62, 1 }
 0x205   : > { %v3206_v38 = vrot.slane %v3205_v3, 4  ;;  %v3233_v6 = vsel %vm2672_vm10, %v1998_v57, -inf  ;;  %v20794_v39 = vcombine.low %v14825_v36, %v14809_v51  ;;  %v3219_v56 = vsel %vm2650_vm9, %v1997_v11, -inf }
 0x206   : > { %20792 = vst [vmem:[#allocation57_spill] sm:$0xff] %v14977_v27  ;;  %20793 = vst [vmem:[#allocation58_spill] sm:$0xff] %v14981_v19  ;;  %v1980_v32 = vcombine.high %v14977_v27, %v14977_v27  ;;  %4236 = vrot.lane.b32.xlu0 %v14981_v19, %s13725_s12  ;;  %v3234_v23 = vrot.slane %v3233_v6, 4  ;;  %v1500_v18 = vcombine.low %v14418_v48, %v14426_v0  ;;  %4240 = vrot.lane.b32.xlu1 %v3127_v46, %s13725_s12 }
 0x207   : > { %v14990_v9 = vrot.slane %v20794_v39, %v14194_v22  ;;  %v3207_v17 = vmax.f32 %v3205_v3, %v3206_v38  ;;  %v3220_v45 = vrot.slane %v3219_v56, 4  ;;  %v1501_v31 = vcombine.high %v14418_v48, %v14426_v0 }
 0x208   : > { %v3191_v8 = vsel %vm2650_vm9, %v1980_v32, -inf  ;;  %v15001_v37 = vmax.f32 %v3139_v20, %v3140_v60  ;;  %v3168_v16 = vrot.slane %v3167_v61, 1  ;;  %v3235_v14 = vmax.f32 %v3233_v6, %v3234_v23 }
 0x209   : > { %20795 = vst [vmem:[#allocation59_spill] sm:$0xff] %v14990_v9  ;;  %v3192_v13 = vrot.slane %v3191_v8, 4  ;;  %v3155_v35 = vmax.f32 %v3153_v62, %v3154_v49  ;;  %v3182_v1 = vrot.slane %v3181_v29, 1  ;;  %v3208_v11 = vrot.slane %v3207_v17, 2 }
 0x20a   : > { %20796 = vst [vmem:[#allocation60_spill] sm:$0xff] %v15001_v37  ;;  %v3221_v21 = vmax.f32 %v3219_v56, %v3220_v45  ;;  %v2099_v57 = vcombine.high %v14990_v9, %v14990_v9  ;;  %4242 = vrot.lane.b32.xlu0 %v15001_v37, %s13725_s12  ;;  %v3236_v46 = vrot.slane %v3235_v14, 2  ;;  %v15008_v38 = vrot.slane %v11693_v41, %v14194_v22 }
 0x20b   : > { %v3193_v3 = vmax.f32 %v3191_v8, %v3192_v13  ;;  %v2031_v0 = vcombine.high %v14907_v42, %v14907_v42  ;;  %v2048_v48 = vcombine.high %v14957_v59, %v14957_v59  ;;  %4246 = vrot.lane.b32.xlu1 %v3155_v35, %s13725_s12  ;;  %v3209_v62 = vmax.f32 %v3207_v17, %v3208_v11  ;;  %v20801_v11 = vld [vmem:[#allocation12_spill] sm:$0xff] }
 0x20c   : > { %20797 = vst [vmem:[#allocation61_spill] sm:$0xff] %v15008_v38  ;;  %v3222_v20 = vrot.slane %v3221_v21, 2  ;;  %v15016_v60 = vsel %vm2650_vm9, %v2014_v40, -inf  ;;  %v15018_v49 = vmax.f32 %v3167_v61, %v3168_v16  ;;  %v3237_v6 = vmax.f32 %v3235_v14, %v3236_v46 }
 0x20d   : > { %v3194_v32 = vrot.slane %v3193_v3, 2  ;;  %v20799_v41 = vcombine.low %v14822_v44, %v14797_v33  ;;  %v3183_v23 = vmax.f32 %v3181_v29, %v3182_v1  ;;  %v3210_v56 = vrot.slane %v3209_v62, 1 }
 0x20e   : > { %20798 = vst [vmem:[#allocation62_spill] sm:$0xff] %v15018_v49  ;;  %v3223_v8 = vmax.f32 %v3221_v21, %v3222_v20  ;;  %4248 = vrot.lane.b32.xlu0 %v15018_v49, %s13725_s12  ;;  %v15029_v40 = vrot.slane %v1500_v18, %v14194_v22  ;;  %v3394_v61 = vsel %vm2650_vm9, %v15008_v38, -inf  ;;  %v3387_v45 = vsel %vm2650_vm9, %v2099_v57, -inf  ;;  %v20802_v57 = vld [vmem:[#allocation19_spill] sm:$0xff] }
 0x20f   : > { %v15024_v39 = vrot.slane %v20799_v41, %v14194_v22  ;;  %v3195_v17 = vmax.f32 %v3193_v3, %v3194_v32  ;;  %4252 = vrot.lane.b32.xlu1 %v3183_v23, %s13725_s12  ;;  %v3238_v16 = vrot.slane %v3237_v6, 1  ;;  %v15036_v13 = vrot.slane %v1501_v31, %v14194_v22  ;;  %v20803_v32 = vld [vmem:[#allocation16_spill] sm:$0xff] }
 0x210   : > { %v3395_v29 = vrot.slane %v3394_v61, 4  ;;  %v3388_v14 = vrot.slane %v3387_v45, 4  ;;  %v3211_v35 = vmax.f32 %v3209_v62, %v3210_v56  ;;  %v1498_v21 = vcombine.low %v20801_v11, %v14436_v53 }
 0x211   : > { %20800 = vst [vmem:[#allocation63_spill] sm:$0xff] %v15024_v39  ;;  %v3196_v1 = vrot.slane %v3195_v17, 1  ;;  %v1499_v18 = vcombine.high %v20801_v11, %v14436_v53  ;;  %v3224_v3 = vrot.slane %v3223_v8, 1  ;;  %v1534_v41 = vcombine.low %v20803_v32, %v20802_v57 }
 0x212   : > { %v3396_v46 = vmax.f32 %v3394_v61, %v3395_v29  ;;  %v3389_v20 = vmax.f32 %v3387_v45, %v3388_v14  ;;  %v15047_v31 = vrot.slane %v1498_v21, %v14194_v22  ;;  %v1535_v56 = vcombine.high %v20803_v32, %v20802_v57  ;;  %v20805_v45 = vld [vmem:[#allocation17_spill] sm:$0xff]  ;;  %v20806_v29 = vld [vmem:[#allocation15_spill] sm:$0xff] }
 0x213   : > { %v15044_v23 = vmax.f32 %v3195_v17, %v3196_v1  ;;  %v15050_v62 = vrot.slane %v1499_v18, %v14194_v22  ;;  %4258 = vrot.lane.b32.xlu1 %v3211_v35, %s13725_s12  ;;  %v3239_v53 = vmax.f32 %v3237_v6, %v3238_v16  ;;  %v1536_v14 = vcombine.low %v20806_v29, %v20805_v45 }
 0x214   : > { %v3397_v11 = vrot.slane %v3396_v46, 2  ;;  %v3390_v61 = vrot.slane %v3389_v20, 2  ;;  %v15068_v18 = vrot.slane %v1534_v41, %v14194_v22  ;;  %v1537_v57 = vcombine.high %v20806_v29, %v20805_v45 }
 0x215   : > { %20804 = vst [vmem:[#allocation12_spill] sm:$0xff] %v15044_v23  ;;  %4254 = vrot.lane.b32.xlu0 %v15044_v23, %s13725_s12  ;;  %v2065_v32 = vcombine.high %v15024_v39, %v15024_v39  ;;  %v20807_v17 = vcombine.high %v14825_v36, %v14809_v51  ;;  %v15080_v21 = vmax.f32 %v3223_v8, %v3224_v3  ;;  %v15093_v45 = vsel %vm2650_vm9, %v2031_v0, -inf }
 0x216   : > { %v3398_v16 = vmax.f32 %v3396_v46, %v3397_v11  ;;  %v3391_v35 = vmax.f32 %v3389_v20, %v3390_v61  ;;  %v15083_v46 = vrot.slane %v1535_v56, %v14194_v22  ;;  %v15087_v11 = vrot.slane %v1536_v14, %v14194_v22  ;;  %20810 = vst [vmem:[#allocation17_spill] sm:$0xff] %v15093_v45 }
 0x217   : > { %v15078_v1 = vrot.slane %v20807_v17, %v14194_v22  ;;  %20809 = vst [vmem:[#allocation16_spill] sm:$0xff] %v15080_v21  ;;  %4264 = vrot.lane.b32.xlu1 %v3239_v53, %s13725_s12  ;;  %v15090_v61 = vrot.slane %v1537_v57, %v14194_v22  ;;  %v15096_v36 = vsel %vm2650_vm9, %v2048_v48, -inf  ;;  %v11691_v8 = vcombine.low %v14797_v33, %v14797_v33  ;;  %v15121_v57 = vpop.permute.xlu1 %4154 }
 0x218   : > { %v3399_v20 = vrot.slane %v3398_v16, 1  ;;  %v3392_v41 = vrot.slane %v3391_v35, 1  ;;  %20811 = vst [vmem:[#allocation15_spill] sm:$0xff] %v15096_v36  ;;  %v11694_v3 = vcombine.high %v14809_v51, %v14809_v51  ;;  %v20812_v56 = vcombine.high %v14822_v44, %v14797_v33 }
 0x219   : > { %20808 = vst [vmem:[#allocation19_spill] sm:$0xff] %v15078_v1  ;;  %4260 = vrot.lane.b32.xlu0 %v15080_v21, %s13725_s12  ;;  %v2116_v14 = vcombine.high %v15078_v1, %v15078_v1  ;;  %v15117_v51 = vsel %vm2650_vm9, %v2065_v32, -inf  ;;  %v15134_v32 = vrot.slane %v11691_v8, %v14194_v22  ;;  %v2709_v29 = vrot.slane %v14653_v54, 4 }
 0x21a   : > { %v15108_v53 = vrot.slane %v20812_v56, %v14194_v22  ;;  %v3400_v0 = vmax.f32 %v3398_v16, %v3399_v20  ;;  %20814 = vst [vmem:[#allocation65_spill] sm:$0xff] %v15117_v51  ;;  %v15119_v17 = vmax.f32 %v3391_v35, %v3392_v41  ;;  %v11692_v41 = vcombine.high %v14797_v33, %v14797_v33 }
 0x21b   : > { %20816 = vst [vmem:[#allocation67_spill] sm:$0xff] %v15134_v32  ;;  %v11700_v16 = vcombine.high %v15029_v40, %v15029_v40  ;;  %v11695_v20 = vcombine.low %v14864_v28, %v14864_v28  ;;  %v15148_v8 = vrot.slane %v11694_v3, %v14194_v22  ;;  %v11701_v35 = vcombine.low %v15036_v13, %v15036_v13  ;;  %v15169_v36 = vpop.permute.xlu1 %4160 }
 0x21c   : > { %20813 = vst [vmem:[#allocation64_spill] sm:$0xff] %v15108_v53  ;;  %20815 = vst [vmem:[#allocation66_spill] sm:$0xff] %v15119_v17  ;;  %4298 = vrot.lane.b32.xlu1 %v3400_v0, %s13725_s12  ;;  %v2082_v0 = vcombine.high %v15108_v53, %v15108_v53  ;;  %v3415_v44 = vsel %vm2650_vm9, %v2116_v14, -inf  ;;  %v11702_v56 = vcombine.high %v15036_v13, %v15036_v13 }
 0x21d   : > { %4296 = vrot.lane.b32.xlu0 %v15119_v17, %s13725_s12  ;;  %20817 = vst [vmem:[#allocation68_spill] sm:$0xff] %v15148_v8  ;;  %v3422_v3 = vsel %vm2650_vm9, %v15148_v8, -inf  ;;  %v3416_v6 = vrot.slane %v3415_v44, 4  ;;  %v15167_v14 = vrot.slane %v11700_v16, %v14194_v22  ;;  %v2710_v39 = vmax.f32 %v14653_v54, %v2709_v29 }
 0x21e   : > { %v3423_v42 = vrot.slane %v3422_v3, 4  ;;  %v15173_v17 = vrot.slane %v11692_v41, %v14194_v22  ;;  %v3359_v45 = vsel %vm2650_vm9, %v2082_v0, -inf  ;;  %v15177_v47 = vrot.slane %v11701_v35, %v14194_v22 }
 0x21f   : > { %20818 = vst [vmem:[#allocation69_spill] sm:$0xff] %v15167_v14  ;;  %v3417_v48 = vmax.f32 %v3415_v44, %v3416_v6  ;;  %v3360_v16 = vrot.slane %v3359_v45, 4  ;;  %v15182_v55 = vrot.slane %v11702_v56, %v14194_v22  ;;  %v20821_v6 = vld [vmem:[#allocation8_spill] sm:$0xff]  ;;  %v20822_v44 = vcombine.high %v15047_v31, %v15029_v40 }
 0x220   : > { %20819 = vst [vmem:[#allocation70_spill] sm:$0xff] %v15177_v47  ;;  %v3424_v33 = vmax.f32 %v3422_v3, %v3423_v42  ;;  %v3366_v54 = vsel %vm2650_vm9, %v15173_v17, -inf  ;;  %v2736_v29 = vsel %vm2650_vm9, %v20821_v6, -inf  ;;  %v20824_v56 = vcombine.low %v15050_v62, %v15036_v13 }
 0x221   : > { %20820 = vst [vmem:[#allocation71_spill] sm:$0xff] %v15182_v55  ;;  %v3418_v53 = vrot.slane %v3417_v48, 2  ;;  %v15192_v35 = vrot.slane %v20822_v44, %v14194_v22  ;;  %v3367_v0 = vrot.slane %v3366_v54, 4  ;;  %v3361_v42 = vmax.f32 %v3359_v45, %v3360_v16  ;;  %v15206_v44 = vpop.permute.xlu0 %4142  ;;  %v15208_v16 = vpop.permute.xlu1 %4148 }
 0x222   : > { %v3425_v41 = vrot.slane %v3424_v33, 2  ;;  %v15198_v3 = vrot.slane %v20824_v56, %v14194_v22  ;;  %v2711_v55 = vrot.slane %v2710_v39, 2  ;;  %v2737_v47 = vrot.slane %v2736_v29, 4 }
 0x223   : > { %20823 = vst [vmem:[#allocation8_spill] sm:$0xff] %v15192_v35  ;;  %v3419_v59 = vmax.f32 %v3417_v48, %v3418_v53  ;;  %v20826_v6 = vcombine.high %v15050_v62, %v15036_v13  ;;  %v3368_v21 = vmax.f32 %v3366_v54, %v3367_v0  ;;  %v3362_v45 = vrot.slane %v3361_v42, 2 }
 0x224   : > { %20825 = vst [vmem:[#allocation72_spill] sm:$0xff] %v15198_v3  ;;  %v3426_v9 = vmax.f32 %v3424_v33, %v3425_v41  ;;  %v2738_v23 = vmax.f32 %v2736_v29, %v2737_v47  ;;  %v15211_v56 = vrot.slane %v11695_v20, %v14194_v22  ;;  %v20829_v53 = vcombine.low %v14847_v26, %v14864_v28 }
 0x225   : > { %v15204_v1 = vrot.slane %v20826_v6, %v14194_v22  ;;  %v3420_v14 = vrot.slane %v3419_v59, 1  ;;  %v2218_v13 = vcombine.high %v15192_v35, %v15192_v35  ;;  %v3369_v33 = vrot.slane %v3368_v21, 2 }
 0x226   : > { %20828 = vst [vmem:[#allocation74_spill] sm:$0xff] %v15211_v56  ;;  %v15217_v48 = vrot.slane %v20829_v53, %v14194_v22  ;;  %v3427_v62 = vrot.slane %v3426_v9, 1  ;;  %v3363_v54 = vmax.f32 %v3361_v42, %v3362_v45  ;;  %v20831_v41 = vcombine.low %v15047_v31, %v15029_v40  ;;  %v15245_v45 = vpop.permute.xlu1 %4166 }
 0x227   : > { %20827 = vst [vmem:[#allocation73_spill] sm:$0xff] %v15204_v1  ;;  %v15227_v20 = vmax.f32 %v3419_v59, %v3420_v14  ;;  %v2712_v29 = vmax.f32 %v2710_v39, %v2711_v55  ;;  %v3450_v0 = vsel %vm2650_vm9, %v15211_v56, -inf  ;;  %v3370_v53 = vmax.f32 %v3368_v21, %v3369_v33  ;;  %v20834_v59 = vld [vmem:[#allocation10_spill] sm:$0xff]  ;;  %v4153_v21 = vpop.permute.xlu0 %4152 }
 0x228   : > { %20830 = vst [vmem:[#allocation75_spill] sm:$0xff] %v15217_v48  ;;  %v15225_v47 = vrot.slane %v20831_v41, %v14194_v22  ;;  %v3428_v6 = vmax.f32 %v3426_v9, %v3427_v62  ;;  %v3364_v25 = vrot.slane %v3363_v54, 1  ;;  %v2739_v27 = vrot.slane %v2738_v23, 2 }
 0x229   : > { %20833 = vst [vmem:[#allocation77_spill] sm:$0xff] %v15227_v20  ;;  %v2235_v35 = vcombine.high %v15198_v3, %v15198_v3  ;;  %4302 = vrot.lane.b32.xlu0 %v15227_v20, %s13725_s12  ;;  %v3451_v42 = vrot.slane %v3450_v0, 4  ;;  %v2133_v31 = vcombine.high %v15217_v48, %v15217_v48  ;;  %v2680_v55 = vsel %vm2650_vm9, %v20834_v59, -inf }
 0x22a   : > { %20832 = vst [vmem:[#allocation76_spill] sm:$0xff] %v15225_v47  ;;  %v2252_v39 = vcombine.high %v15204_v1, %v15204_v1  ;;  %v15242_v9 = vsel %vm2650_vm9, %v2218_v13, -inf  ;;  %4304 = vrot.lane.b32.xlu1 %v3428_v6, %s13725_s12  ;;  %v3371_v14 = vrot.slane %v3370_v53, 1  ;;  %v2681_v62 = vrot.slane %v2680_v55, 4 }
 0x22b   : > { %20835 = vst [vmem:[#allocation10_spill] sm:$0xff] %v15242_v9  ;;  %v15247_v33 = vmax.f32 %v3363_v54, %v3364_v25  ;;  %v3452_v41 = vmax.f32 %v3450_v0, %v3451_v42  ;;  %v3443_v3 = vsel %vm2650_vm9, %v2133_v31, -inf  ;;  %v2713_v59 = vrot.slane %v2712_v29, 1  ;;  %v20839_v0 = vld [vmem:[#allocation6_spill] sm:$0xff] }
 0x22c   : > { %v3372_v20 = vmax.f32 %v3370_v53, %v3371_v14  ;;  %v2740_v48 = vmax.f32 %v2738_v23, %v2739_v27  ;;  %v3444_v1 = vrot.slane %v3443_v3, 4  ;;  %v15251_v13 = vsel %vm2650_vm9, %v2235_v35, -inf  ;;  %v15270_v53 = vld [vmem:[%s20411_s2] sm:$0x3] }
 0x22d   : > { %20836 = vst [vmem:[#allocation78_spill] sm:$0xff] %v15247_v33  ;;  %20837 = vst [vmem:[#allocation79_spill] sm:$0xff] %v15251_v13  ;;  %4290 = vrot.lane.b32.xlu0 %v15247_v33, %s13725_s12  ;;  %v3453_v6 = vrot.slane %v3452_v41, 2  ;;  %v2682_v49 = vmax.f32 %v2680_v55, %v2681_v62  ;;  %v1572_v37 = vcombine.low %v14613_v52, %v14620_v34  ;;  %v15260_v54 = vsel %vm2650_vm9, %v2252_v39, -inf  ;;  %v20853_v13 = vld [vmem:[#allocation28_spill] sm:$0xff] }
 0x22e   : > { %20838 = vst [vmem:[#allocation80_spill] sm:$0xff] %v15260_v54  ;;  %v15263_v27 = vsub.s32 0, %v20839_v0  ;;  %4292 = vrot.lane.b32.xlu1 %v3372_v20, %s13725_s12  ;;  %v3445_v23 = vmax.f32 %v3443_v3, %v3444_v1  ;;  %v4433_v42 = vsel %vm4428_vm11, %v4153_v21, %v15121_v57  ;;  %v1573_v55 = vcombine.high %v14613_v52, %v14620_v34  ;;  %v4159_v20 = vpop.permute.xlu0 %4158  ;;  %v15277_v3 = vpop.permute.xlu1 %4172  ;;  %v20852_v54 = vld [vmem:[#allocation34_spill] sm:$0xff] }
 0x22f   : > { %v3454_v31 = vmax.f32 %v3452_v41, %v3453_v6  ;;  %v2714_v14 = vmax.f32 %v2712_v29, %v2713_v59  ;;  %v2741_v62 = vrot.slane %v2740_v48, 1  ;;  %v11703_v25 = vcombine.low %v15087_v11, %v15087_v11 }
 0x230   : > { %20840 = vst [vmem:[#allocation81_spill] sm:$0xff] %v15263_v27  ;;  %v3446_v1 = vrot.slane %v3445_v23, 2  ;;  %v2683_v9 = vrot.slane %v2682_v49, 2  ;;  %v15284_v21 = vrot.slane %v15270_v53, %v15263_v27  ;;  %v20841_v29 = vcombine.high %v14864_v28, %v14864_v28 }
 0x231   : > { %v3455_v33 = vrot.slane %v3454_v31, 1  ;;  %v4625_v52 = vmax.f32 %v2714_v14, %v4433_v42  ;;  %v20843_v59 = vcombine.low %v15068_v18, %v15087_v11  ;;  %v4435_v35 = vsel %vm4428_vm11, %v4159_v20, %v15169_v36 }
 0x232   : > { %v3447_v34 = vmax.f32 %v3445_v23, %v3446_v1  ;;  %v15290_v41 = vrot.slane %v20841_v29, %v14194_v22  ;;  %v20845_v23 = vcombine.high %v14847_v26, %v14864_v28  ;;  %v11704_v14 = vcombine.high %v15087_v11, %v15087_v11 }
 0x233   : > { %v15296_v6 = vrot.slane %v20843_v59, %v14194_v22  ;;  %v3456_v39 = vmax.f32 %v3454_v31, %v3455_v33  ;;  %v20847_v1 = vcombine.high %v15068_v18, %v15087_v11  ;;  %v2742_v59 = vmax.f32 %v2740_v48, %v2741_v62 }
 0x234   : > { %20842 = vst [vmem:[#allocation82_spill] sm:$0xff] %v15290_v41  ;;  %v15304_v42 = vrot.slane %v20845_v23, %v14194_v22  ;;  %v3448_v27 = vrot.slane %v3447_v34, 1  ;;  %v11706_v31 = vcombine.high %v15090_v61, %v15090_v61  ;;  %v20849_v26 = vcombine.high %v15083_v46, %v15090_v61  ;;  %v15330_v23 = vpop.permute.xlu1 %4178 }
 0x235   : > { %20844 = vst [vmem:[#allocation83_spill] sm:$0xff] %v15296_v6  ;;  %v15312_v29 = vrot.slane %v20847_v1, %v14194_v22  ;;  %4310 = vrot.lane.b32.xlu1 %v3456_v39, %s13725_s12  ;;  %v2684_v20 = vmax.f32 %v2682_v49, %v2683_v9  ;;  %v4733_v18 = vadd.f32 %v15284_v21, %v4625_v52  ;;  %v3478_v62 = vsel %vm2650_vm9, %v15290_v41, -inf }
 0x236   : > { %20846 = vst [vmem:[#allocation84_spill] sm:$0xff] %v15304_v42  ;;  %v15322_v28 = vrot.slane %v20849_v26, %v14194_v22  ;;  %v4627_v11 = vmax.f32 %v2742_v59, %v4435_v35  ;;  %v15326_v48 = vmax.f32 %v3447_v34, %v3448_v27  ;;  %v1594_v1 = vrot.slane %v1572_v37, %v14194_v22  ;;  %v20854_v27 = vld [vmem:[#allocation37_spill] sm:$0xff]  ;;  %v20855_v35 = vld [vmem:[#allocation35_spill] sm:$0xff]  ;;  %v4147_v59 = vpop.permute.xlu0 %4146 }
 0x237   : > { %20848 = vst [vmem:[#allocation85_spill] sm:$0xff] %v15312_v29  ;;  %v3479_v33 = vrot.slane %v3478_v62, 4  ;;  %v2150_v26 = vcombine.high %v15304_v42, %v15304_v42  ;;  %v1570_v39 = vcombine.low %v20853_v13, %v20852_v54  ;;  %v15340_v49 = vrot.slane %v1573_v55, %v14194_v22 }
 0x238   : > { %20850 = vst [vmem:[#allocation86_spill] sm:$0xff] %v15322_v28  ;;  %20851 = vst [vmem:[#allocation87_spill] sm:$0xff] %v15326_v48  ;;  %4308 = vrot.lane.b32.xlu0 %v15326_v48, %s13725_s12  ;;  %v1571_v9 = vcombine.high %v20853_v13, %v20852_v54  ;;  %v1608_v52 = vcombine.low %v20855_v35, %v20854_v27  ;;  %v1609_v37 = vcombine.high %v20855_v35, %v20854_v27 }
 0x239   : > { %v2685_v34 = vrot.slane %v2684_v20, 1  ;;  %v3480_v42 = vmax.f32 %v3478_v62, %v3479_v33  ;;  %v3471_v19 = vsel %vm2650_vm9, %v2150_v26, -inf  ;;  %v1580_v6 = vrot.slane %v1570_v39, %v14194_v22  ;;  %v15363_v26 = vpop.permute.xlu1 %4184 }
 0x23a   : > { %v15351_v48 = vrot.slane %v11703_v25, %v14194_v22  ;;  %v15354_v55 = vrot.slane %v11704_v14, %v14194_v22  ;;  %v3472_v13 = vrot.slane %v3471_v19, 4  ;;  %v1587_v54 = vrot.slane %v1571_v9, %v14194_v22 }
 0x23b   : > { %v4735_v50 = vadd.f32 %v15284_v21, %v4627_v11  ;;  %v3481_v51 = vrot.slane %v3480_v42, 2  ;;  %v1602_v27 = vcombine.low %v1580_v6, %v1594_v1  ;;  %v1603_v35 = vcombine.high %v1580_v6, %v1594_v1 }
 0x23c   : > { %20856 = vst [vmem:[#allocation34_spill] sm:$0xff] %v15351_v48  ;;  %v15358_v30 = vmax.f32 %v4733_v18, 0.0  ;;  %v4431_v33 = vsel %vm4428_vm11, %v4147_v59, %v15208_v16  ;;  %v3473_v62 = vmax.f32 %v3471_v19, %v3472_v13  ;;  %v1604_v25 = vcombine.low %v1587_v54, %v15340_v49 }
 0x23d   : > { %v2686_v14 = vmax.f32 %v2684_v20, %v2685_v34  ;;  %v11707_v39 = vcombine.low %v1594_v1, %v1594_v1  ;;  %v3482_v48 = vmax.f32 %v3480_v42, %v3481_v51  ;;  %v1605_v9 = vcombine.high %v1587_v54, %v15340_v49 }
 0x23e   : > { %v15367_v11 = vrot.slane %v11706_v31, %v14194_v22  ;;  %v11708_v18 = vcombine.high %v1594_v1, %v1594_v1  ;;  %v3474_v58 = vrot.slane %v3473_v62, 2  ;;  %v15373_v59 = vmax.f32 %v4735_v50, 0.0 }
 0x23f   : > { %v4623_v13 = vmax.f32 %v2686_v14, %v4431_v33  ;;  %v3483_v4 = vrot.slane %v3482_v48, 1  ;;  %v5120_v31 = vrot.slane %v15358_v30, 7  ;;  %v15380_v34 = vrot.slane %v11707_v39, %v14194_v22 }
 0x240   : > { %20857 = vst [vmem:[#allocation28_spill] sm:$0xff] %v15367_v11  ;;  %20858 = vst [vmem:[#allocation37_spill] sm:$0xff] %v15373_v59  ;;  %v3475_v42 = vmax.f32 %v3473_v62, %v3474_v58  ;;  %v15385_v50 = vrot.slane %v11708_v18, %v14194_v22  ;;  %v11709_v33 = vcombine.low %v15340_v49, %v15340_v49  ;;  %v15391_v58 = vpop.permute.xlu1 %4144  ;;  %v5122_v39 = vrot.slane %v15373_v59, 6 }
 0x241   : > { %v3484_v54 = vmax.f32 %v3482_v48, %v3483_v4  ;;  %v11710_v14 = vcombine.high %v15340_v49, %v15340_v49  ;;  %v4731_v6 = vadd.f32 %v15284_v21, %v4623_v13  ;;  %v15398_v4 = vrot.slane %v1602_v27, %v14194_v22  ;;  %v20863_v27 = vld [vmem:[#allocation36_spill] sm:$0xff] }
 0x242   : > { %v3476_v51 = vrot.slane %v3475_v42, 1  ;;  %v5272_v48 = vrot.slane %v15373_v59, 7  ;;  %v15404_v49 = vrot.slane %v1603_v35, %v14194_v22  ;;  %v15407_v1 = vrot.slane %v1604_v25, %v14194_v22 }
 0x243   : > { %4316 = vrot.lane.b32.xlu1 %v3484_v54, %s13725_s12  ;;  %20859 = vst [vmem:[#allocation35_spill] sm:$0xff] %v15398_v4  ;;  %v15410_v19 = vrot.slane %v1608_v52, %v14194_v22  ;;  %v15413_v13 = vrot.slane %v1609_v37, %v14194_v22  ;;  %v1606_v54 = vcombine.low %v20863_v27, %v14700_v43 }
 0x244   : > { %v15401_v18 = vmax.f32 %v3475_v42, %v3476_v51  ;;  %20861 = vst [vmem:[#allocation89_spill] sm:$0xff] %v15404_v49  ;;  %20862 = vst [vmem:[#allocation90_spill] sm:$0xff] %v15407_v1  ;;  %v1607_v62 = vcombine.high %v20863_v27, %v14700_v43  ;;  %v15420_v51 = vrot.slane %v11709_v33, %v14194_v22  ;;  %v4827_v42 = vmax.f32 %v4731_v6, 0.0 }
 0x245   : > { %v15425_v35 = vrot.slane %v1605_v9, %v14194_v22  ;;  %v20866_v52 = vcombine.low %v14872_v10, %v14872_v10  ;;  %v20868_v25 = vcombine.low %v14852_v24, %v14872_v10  ;;  %v2337_v33 = vcombine.high %v15398_v4, %v15398_v4 }
 0x246   : > { %20860 = vst [vmem:[#allocation88_spill] sm:$0xff] %v15401_v18  ;;  %20864 = vst [vmem:[#allocation36_spill] sm:$0xff] %v15420_v51  ;;  %4314 = vrot.lane.b32.xlu0 %v15401_v18, %s13725_s12  ;;  %v15442_v27 = vrot.slane %v1606_v54, %v14194_v22  ;;  %v15445_v9 = vrot.slane %v1607_v62, %v14194_v22  ;;  %v2371_v20 = vcombine.high %v15407_v1, %v15407_v1  ;;  %v15455_v18 = vpop.permute.xlu1 %4174 }
 0x247   : > { %20865 = vst [vmem:[#allocation91_spill] sm:$0xff] %v15425_v35  ;;  %v15431_v37 = vrot.slane %v20866_v52, %v14194_v22  ;;  %v15437_v43 = vrot.slane %v20868_v25, %v14194_v22  ;;  %v2354_v52 = vcombine.high %v15404_v49, %v15404_v49  ;;  %v15466_v4 = vrot.slane %v11710_v14, %v14194_v22 }
 0x248   : > { %v2388_v41 = vcombine.high %v15425_v35, %v15425_v35  ;;  %v15473_v54 = vsel %vm4986_vm12, %v5272_v48, %v15358_v30  ;;  %v11711_v49 = vcombine.low %v15410_v19, %v15410_v19  ;;  %v11712_v1 = vcombine.high %v15410_v19, %v15410_v19 }
 0x249   : > { %20867 = vst [vmem:[#allocation92_spill] sm:$0xff] %v15431_v37  ;;  %20869 = vst [vmem:[#allocation93_spill] sm:$0xff] %v15437_v43  ;;  %v3506_v25 = vsel %vm2650_vm9, %v15431_v37, -inf  ;;  %v2167_v6 = vcombine.high %v15437_v43, %v15437_v43  ;;  %v4151_v43 = vpop.permute.xlu0 %4150  ;;  %v15480_v14 = vsub.s32 1, %v20839_v0  ;;  %v5121_v62 = vsel %vm4986_vm12, %v5120_v31, %v4827_v42 }
 0x24a   : > { %20870 = vst [vmem:[#allocation94_spill] sm:$0xff] %v15466_v4  ;;  %v3507_v56 = vrot.slane %v3506_v25, 4  ;;  %20871 = vst [vmem:[#allocation95_spill] sm:$0xff] %v15473_v54  ;;  %v15484_v35 = vsel %vm2650_vm9, %v2337_v33, -inf  ;;  %v15486_v7 = vrot.slane %v4827_v42, 7  ;;  %v15489_v48 = vsel %vm2650_vm9, %v2354_v52, -inf  ;;  %v15505_v33 = vpop.permute.xlu1 %4190 }
 0x24b   : > { %v3499_v8 = vsel %vm2650_vm9, %v2167_v6, -inf  ;;  %20872 = vst [vmem:[#allocation96_spill] sm:$0xff] %v15480_v14  ;;  %v15492_v54 = vsel %vm2650_vm9, %v2371_v20, -inf  ;;  %v4432_v5 = vsel %vm4428_vm11, %v15208_v16, %v4151_v43  ;;  %v15497_v0 = vsel %vm2650_vm9, %v2388_v41, -inf  ;;  %20875 = vst [vmem:[#allocation98_spill] sm:$0xff] %v15505_v33 }
 0x24c   : > { %v3508_v32 = vmax.f32 %v3506_v25, %v3507_v56  ;;  %v3500_v6 = vrot.slane %v3499_v8, 4  ;;  %v20873_v56 = vcombine.high %v14872_v10, %v14872_v10  ;;  %v15508_v52 = vsel %vm4989_vm13, %v5122_v39, %v5121_v62 }
 0x24d   : > { %20876 = vst [vmem:[#allocation99_spill] sm:$0xff] %v15508_v52  ;;  %v15512_v16 = vrot.slane %v11711_v49, %v14194_v22  ;;  %v15515_v41 = vrot.slane %v11712_v1, %v14194_v22  ;;  %v11713_v43 = vcombine.low %v15413_v13, %v15413_v13  ;;  %v15522_v25 = vrot.slane %v15270_v53, %v15480_v14  ;;  %v4157_v62 = vpop.permute.xlu0 %4156 }
 0x24e   : > { %v3509_v31 = vrot.slane %v3508_v32, 2  ;;  %v3501_v38 = vmax.f32 %v3499_v8, %v3500_v6  ;;  %v15503_v42 = vrot.slane %v20873_v56, %v14194_v22  ;;  %v20880_v6 = vld [vmem:[#allocation13_spill] sm:$0xff]  ;;  %v11714_v1 = vcombine.high %v15413_v13, %v15413_v13 }
 0x24f   : > { %20877 = vst [vmem:[#allocation100_spill] sm:$0xff] %v15512_v16  ;;  %20878 = vst [vmem:[#allocation101_spill] sm:$0xff] %v15515_v41  ;;  %v4624_v39 = vmax.f32 %v20880_v6, %v4432_v5  ;;  %v20881_v53 = vcombine.high %v14852_v24, %v14872_v10  ;;  %v20883_v5 = vcombine.low %v15029_v40, %v15029_v40  ;;  %v15555_v40 = vpop.permute.xlu1 %4226 }
 0x250   : > { %20874 = vst [vmem:[#allocation97_spill] sm:$0xff] %v15503_v42  ;;  %20879 = vst [vmem:[#allocation102_spill] sm:$0xff] %v15522_v25  ;;  %v3510_v20 = vmax.f32 %v3508_v32, %v3509_v31  ;;  %v3502_v52 = vrot.slane %v3501_v38, 2  ;;  %v3534_v8 = vsel %vm2650_vm9, %v15503_v42, -inf  ;;  %v4434_v49 = vsel %vm4428_vm11, %v15121_v57, %v4157_v62 }
 0x251   : > { %v15535_v14 = vrot.slane %v20881_v53, %v14194_v22  ;;  %v15541_v6 = vrot.slane %v20883_v5, %v14194_v22  ;;  %v3535_v56 = vrot.slane %v3534_v8, 4  ;;  %v15546_v41 = vrot.slane %v11713_v43, %v14194_v22  ;;  %20885 = vst [vmem:[#allocation104_spill] sm:$0xff] %v15555_v40  ;;  %v20887_v43 = vld [vmem:[#allocation9_spill] sm:$0xff] }
 0x252   : > { %v3511_v32 = vrot.slane %v3510_v20, 1  ;;  %v3503_v31 = vmax.f32 %v3501_v38, %v3502_v52  ;;  %v15549_v33 = vadd.f32 %v15522_v25, %v4624_v39  ;;  %v15558_v57 = vrot.slane %v11714_v1, %v14194_v22 }
 0x253   : > { %20882 = vst [vmem:[#allocation13_spill] sm:$0xff] %v15535_v14  ;;  %20884 = vst [vmem:[#allocation103_spill] sm:$0xff] %v15546_v41  ;;  %v2184_v24 = vcombine.high %v15535_v14, %v15535_v14  ;;  %v3562_v10 = vsel %vm2650_vm9, %v15541_v6, -inf  ;;  %v3536_v52 = vmax.f32 %v3534_v8, %v3535_v56  ;;  %v4626_v62 = vmax.f32 %v20887_v43, %v4434_v49 }
 0x254   : > { %v3512_v53 = vmax.f32 %v3510_v20, %v3511_v32  ;;  %v3504_v38 = vrot.slane %v3503_v31, 1  ;;  %v3563_v5 = vrot.slane %v3562_v10, 4  ;;  %20886 = vst [vmem:[#allocation105_spill] sm:$0xff] %v15558_v57  ;;  %v20888_v41 = vcombine.high %v15225_v47, %v15225_v47 }
 0x255   : > { %v3527_v39 = vsel %vm2650_vm9, %v2184_v24, -inf  ;;  %v3537_v20 = vrot.slane %v3536_v52, 2  ;;  %v20890_v49 = vcombine.low %v15442_v27, %v15410_v19  ;;  %v20892_v24 = vcombine.high %v15442_v27, %v15410_v19 }
 0x256   : > { %v3555_v14 = vsel %vm2650_vm9, %v20888_v41, -inf  ;;  %4322 = vrot.lane.b32.xlu1 %v3512_v53, %s13725_s12  ;;  %v15567_v15 = vmax.f32 %v3503_v31, %v3504_v38  ;;  %v3528_v32 = vrot.slane %v3527_v39, 4  ;;  %v3564_v8 = vmax.f32 %v3562_v10, %v3563_v5  ;;  %v20894_v5 = vld [vmem:[#allocation14_spill] sm:$0xff] }
 0x257   : > { %v15574_v1 = vrot.slane %v20890_v49, %v14194_v22  ;;  %v15580_v41 = vrot.slane %v20892_v24, %v14194_v22  ;;  %v3556_v53 = vrot.slane %v3555_v14, 4  ;;  %v3538_v31 = vmax.f32 %v3536_v52, %v3537_v20  ;;  %v15600_v20 = vpop.permute.xlu1 %4232 }
 0x258   : > { %20889 = vst [vmem:[#allocation9_spill] sm:$0xff] %v15567_v15  ;;  %4320 = vrot.lane.b32.xlu0 %v15567_v15, %s13725_s12  ;;  %v3529_v10 = vmax.f32 %v3527_v39, %v3528_v32  ;;  %v3565_v38 = vrot.slane %v3564_v8, 2  ;;  %v2651_v43 = vsel %vm2650_vm9, %v20894_v5, -inf  ;;  %v20895_v49 = vcombine.low %v15445_v9, %v15413_v13  ;;  %20899 = vst [vmem:[#allocation109_spill] sm:$0xff] %v15600_v20 }
 0x259   : > { %20891 = vst [vmem:[#allocation106_spill] sm:$0xff] %v15574_v1  ;;  %20893 = vst [vmem:[#allocation107_spill] sm:$0xff] %v15580_v41  ;;  %v20897_v19 = vcombine.high %v15445_v9, %v15413_v13  ;;  %v3557_v39 = vmax.f32 %v3555_v14, %v3556_v53  ;;  %v4734_v32 = vadd.f32 %v15522_v25, %v4626_v62  ;;  %v3539_v24 = vrot.slane %v3538_v31, 1  ;;  %v4163_v9 = vpop.permute.xlu0 %4162 }
 0x25a   : > { %v15590_v56 = vrot.slane %v20895_v49, %v14194_v22  ;;  %v3530_v5 = vrot.slane %v3529_v10, 2  ;;  %v3566_v57 = vmax.f32 %v3564_v8, %v3565_v38  ;;  %v20900_v49 = vmax.f32 %v15549_v33, 0.0 }
 0x25b   : > { %v15596_v27 = vrot.slane %v20897_v19, %v14194_v22  ;;  %v2405_v13 = vcombine.high %v15574_v1, %v15574_v1  ;;  %v3558_v19 = vrot.slane %v3557_v39, 2  ;;  %v2652_v47 = vrot.slane %v2651_v43, 4 }
 0x25c   : > { %20896 = vst [vmem:[#allocation14_spill] sm:$0xff] %v15590_v56  ;;  %v15605_v15 = vrot.slane %v20900_v49, 7  ;;  %v2422_v14 = vcombine.high %v15580_v41, %v15580_v41  ;;  %v3540_v53 = vmax.f32 %v3538_v31, %v3539_v24  ;;  %v3531_v52 = vmax.f32 %v3529_v10, %v3530_v5 }
 0x25d   : > { %20898 = vst [vmem:[#allocation108_spill] sm:$0xff] %v15596_v27  ;;  %v3567_v37 = vrot.slane %v3566_v57, 1  ;;  %v2439_v62 = vcombine.high %v15590_v56, %v15590_v56  ;;  %v3559_v8 = vmax.f32 %v3557_v39, %v3558_v19  ;;  %v2653_v38 = vmax.f32 %v2651_v43, %v2652_v47  ;;  %v15635_v19 = vpop.permute.xlu1 %4220 }
 0x25e   : > { %v20901_v49 = vcombine.low %v15090_v61, %v15090_v61  ;;  %v2456_v1 = vcombine.high %v15596_v27, %v15596_v27  ;;  %v15621_v40 = vmax.f32 %v4734_v32, 0.0  ;;  %4328 = vrot.lane.b32.xlu1 %v3540_v53, %s13725_s12  ;;  %v3532_v31 = vrot.slane %v3531_v52, 1 }
 0x25f   : > { %v20902_v10 = vcombine.low %v15083_v46, %v15090_v61  ;;  %v15631_v47 = vsel %vm2650_vm9, %v2405_v13, -inf  ;;  %v3568_v24 = vmax.f32 %v3566_v57, %v3567_v37  ;;  %v2654_v5 = vrot.slane %v2653_v38, 2  ;;  %v4141_v37 = vpop.permute.xlu0 %4140 }
 0x260   : > { %v15617_v20 = vrot.slane %v20901_v49, %v14194_v22  ;;  %v15637_v32 = vmax.f32 %v3531_v52, %v3532_v31  ;;  %v3560_v53 = vrot.slane %v3559_v8, 1  ;;  %v15644_v61 = vsel %vm2650_vm9, %v2422_v14, -inf  ;;  %v20907_v14 = vld [vmem:[#allocation18_spill] sm:$0xff] }
 0x261   : > { %v15628_v39 = vrot.slane %v20902_v10, %v14194_v22  ;;  %v15647_v13 = vsel %vm2650_vm9, %v2439_v62, -inf  ;;  %v2655_v10 = vmax.f32 %v2653_v38, %v2654_v5  ;;  %v15651_v52 = vsel %vm2650_vm9, %v2456_v1, -inf }
 0x262   : > { %20904 = vst [vmem:[#allocation111_spill] sm:$0xff] %v15637_v32  ;;  %v3730_v49 = vsel %vm2650_vm9, %v15617_v20, -inf  ;;  %20905 = vst [vmem:[#allocation112_spill] sm:$0xff] %v15647_v13  ;;  %4326 = vrot.lane.b32.xlu0 %v15637_v32, %s13725_s12  ;;  %4334 = vrot.lane.b32.xlu1 %v3568_v24, %s13725_s12  ;;  %v2764_v22 = vsel %vm2650_vm9, %v20907_v14, -inf  ;;  %v15659_v56 = vmax.f32 %v3559_v8, %v3560_v53  ;;  %v3758_v43 = vsel %vm2650_vm9, %v15367_v11, -inf }
 0x263   : > { %20903 = vst [vmem:[#allocation110_spill] sm:$0xff] %v15628_v39  ;;  %v2303_v46 = vcombine.high %v15628_v39, %v15628_v39  ;;  %v3731_v57 = vrot.slane %v3730_v49, 4  ;;  %20906 = vst [vmem:[#allocation113_spill] sm:$0xff] %v15651_v52  ;;  %v2656_v62 = vrot.slane %v2655_v10, 1  ;;  %v2765_v5 = vrot.slane %v2764_v22, 4  ;;  %v15683_v42 = vpop.permute.xlu0 %4164 }
 0x264   : > { %20908 = vst [vmem:[#allocation18_spill] sm:$0xff] %v15659_v56  ;;  %v4429_v1 = vsel %vm4428_vm11, %v4141_v37, %v15206_v44  ;;  %v2320_v24 = vcombine.high %v15322_v28, %v15322_v28  ;;  %v4430_v8 = vsel %vm4428_vm11, %v15206_v44, %v15391_v58  ;;  %v3759_v37 = vrot.slane %v3758_v43, 4 }
 0x265   : > { %v3723_v31 = vsel %vm2650_vm9, %v2303_v46, -inf  ;;  %v3732_v27 = vmax.f32 %v3730_v49, %v3731_v57  ;;  %v4436_v46 = vsel %vm4428_vm11, %v15169_v36, %v4163_v9  ;;  %v2657_v41 = vmax.f32 %v2655_v10, %v2656_v62  ;;  %v15669_v49 = vpop.permute.xlu1 %4214  ;;  %v20909_v57 = vld [vmem:[#allocation20_spill] sm:$0xff] }
 0x266   : > { %v3724_v38 = vrot.slane %v3723_v31, 4  ;;  %4332 = vrot.lane.b32.xlu0 %v15659_v56, %s13725_s12  ;;  %v2766_v53 = vmax.f32 %v2764_v22, %v2765_v5  ;;  %v2792_v28 = vsel %vm2650_vm9, %v20909_v57, -inf  ;;  %v3751_v9 = vsel %vm2650_vm9, %v2320_v24, -inf }
 0x267   : > { %v3733_v14 = vrot.slane %v3732_v27, 2  ;;  %v4621_v39 = vmax.f32 %v2657_v41, %v4429_v1  ;;  %v2793_v5 = vrot.slane %v2792_v28, 4  ;;  %v3760_v24 = vmax.f32 %v3758_v43, %v3759_v37 }
 0x268   : > { %v3725_v32 = vmax.f32 %v3723_v31, %v3724_v38  ;;  %v20910_v38 = vld [vmem:[#allocation11_spill] sm:$0xff]  ;;  %v2767_v13 = vrot.slane %v2766_v53, 2  ;;  %v5134_v37 = vrot.slane %v15621_v40, 7 }
 0x269   : > { %v3734_v11 = vmax.f32 %v3732_v27, %v3733_v14  ;;  %v4628_v56 = vmax.f32 %v20910_v38, %v4436_v46  ;;  %v4729_v22 = vadd.f32 %v15284_v21, %v4621_v39  ;;  %v20911_v27 = vld [vmem:[#allocation22_spill] sm:$0xff]  ;;  %v3752_v14 = vrot.slane %v3751_v9, 4  ;;  %v15688_v62 = vpop.permute.xlu1 %4194 }
 0x26a   : > { %v3726_v36 = vrot.slane %v3725_v32, 2  ;;  %v4622_v1 = vmax.f32 %v20911_v27, %v4430_v8  ;;  %v3761_v38 = vrot.slane %v3760_v24, 2  ;;  %v3702_v39 = vsel %vm2650_vm9, %v15354_v55, -inf }
 0x26b   : > { %v3735_v44 = vrot.slane %v3734_v11, 1  ;;  %v4825_v57 = vmax.f32 %v4729_v22, 0.0  ;;  %v4736_v46 = vadd.f32 %v15522_v25, %v4628_v56  ;;  %v3753_v52 = vmax.f32 %v3751_v9, %v3752_v14 }
 0x26c   : > { %v3727_v58 = vmax.f32 %v3725_v32, %v3726_v36  ;;  %v2794_v8 = vmax.f32 %v2792_v28, %v2793_v5  ;;  %v20913_v36 = vrot.slane %v15358_v30, 6  ;;  %v3762_v9 = vmax.f32 %v3760_v24, %v3761_v38  ;;  %v20915_v5 = vld [vmem:[#allocation21_spill] sm:$0xff] }
 0x26d   : > { %v3736_v10 = vmax.f32 %v3734_v11, %v3735_v44  ;;  %v4987_v32 = vsel %vm4986_vm12, %v15486_v7, %v4825_v57  ;;  %v3703_v11 = vrot.slane %v3702_v39, 4  ;;  %v3754_v22 = vrot.slane %v3753_v52, 2  ;;  %v15704_v44 = vpop.permute.xlu0 %4170 }
 0x26e   : > { %v3728_v31 = vrot.slane %v3727_v58, 1  ;;  %v15702_v56 = vsel %vm4989_vm13, %v20913_v36, %v4987_v32  ;;  %v4730_v27 = vadd.f32 %v15522_v25, %v4622_v1  ;;  %v2768_v7 = vmax.f32 %v2766_v53, %v2767_v13  ;;  %v15716_v32 = vpop.permute.xlu1 %4222 }
 0x26f   : > { %4370 = vrot.lane.b32.xlu1 %v3736_v10, %s13725_s12  ;;  %v3704_v10 = vmax.f32 %v3702_v39, %v3703_v11  ;;  %v2286_v28 = vcombine.high %v15312_v29, %v15312_v29  ;;  %v3763_v30 = vrot.slane %v3762_v9, 1  ;;  %v2820_v24 = vsel %vm2650_vm9, %v20915_v5, -inf }
 0x270   : > { %v15696_v43 = vmax.f32 %v3727_v58, %v3728_v31  ;;  %v15711_v31 = vmax.f32 %v4736_v46, 0.0  ;;  %v3755_v58 = vmax.f32 %v3753_v52, %v3754_v22  ;;  %v2795_v14 = vrot.slane %v2794_v8, 2 }
 0x271   : > { %v3705_v57 = vrot.slane %v3704_v10, 2  ;;  %v3695_v38 = vsel %vm2650_vm9, %v2286_v28, -inf  ;;  %v2821_v1 = vrot.slane %v2820_v24, 4  ;;  %v20916_v13 = vmax.f32 %v15549_v33, 0.0  ;;  %v15727_v29 = vpop.permute.xlu0 %4176 }
 0x272   : > { %20912 = vst [vmem:[#allocation20_spill] sm:$0xff] %v15696_v43  ;;  %4368 = vrot.lane.b32.xlu0 %v15696_v43, %s13725_s12  ;;  %20914 = vst [vmem:[#allocation11_spill] sm:$0xff] %v15711_v31  ;;  %v3764_v39 = vmax.f32 %v3762_v9, %v3763_v30  ;;  %v3756_v11 = vrot.slane %v3755_v58, 1  ;;  %v3696_v46 = vrot.slane %v3695_v38, 4  ;;  %v4826_v36 = vmax.f32 %v4730_v27, 0.0  ;;  %v20918_v30 = vld [vmem:[#allocation25_spill] sm:$0xff] }
 0x273   : > { %v5135_v53 = vsel %vm4986_vm12, %v5134_v37, %v20916_v13  ;;  %v4440_v52 = vsel %vm4428_vm11, %v15277_v3, %v15455_v18  ;;  %v2769_v22 = vrot.slane %v2768_v7, 1  ;;  %v3706_v5 = vmax.f32 %v3704_v10, %v3705_v57 }
 0x274   : > { %4376 = vrot.lane.b32.xlu1 %v3764_v39, %s13725_s12  ;;  %v15725_v28 = vmax.f32 %v3755_v58, %v3756_v11  ;;  %v3697_v41 = vmax.f32 %v3695_v38, %v3696_v46  ;;  %v2822_v43 = vmax.f32 %v2820_v24, %v2821_v1  ;;  %v3786_v33 = vsel %vm2650_vm9, %v15380_v34, -inf }
 0x275   : > { %v5136_v9 = vrot.slane %v15711_v31, 6  ;;  %v2796_v27 = vmax.f32 %v2794_v8, %v2795_v14  ;;  %v5286_v10 = vrot.slane %v15711_v31, 7  ;;  %v4632_v58 = vmax.f32 %v20918_v30, %v4440_v52  ;;  %v15747_v14 = vpop.permute.xlu1 %4228 }
 0x276   : > { %20917 = vst [vmem:[#allocation22_spill] sm:$0xff] %v15725_v28  ;;  %4374 = vrot.lane.b32.xlu0 %v15725_v28, %s13725_s12  ;;  %v3707_v24 = vrot.slane %v3706_v5, 1  ;;  %v3698_v57 = vrot.slane %v3697_v41, 2  ;;  %v5007_v38 = vsel %vm4986_vm12, %v15605_v15, %v4826_v36  ;;  %v4437_v1 = vsel %vm4428_vm11, %v15683_v42, %v15245_v45 }
 0x277   : > { %v3787_v13 = vrot.slane %v3786_v33, 4  ;;  %v20919_v39 = vrot.slane %v15484_v35, 4  ;;  %v2770_v11 = vmax.f32 %v2768_v7, %v2769_v22  ;;  %v2823_v30 = vrot.slane %v2822_v43, 2  ;;  %v15763_v22 = vpop.permute.xlu0 %4182 }
 0x278   : > { %v3708_v46 = vmax.f32 %v3706_v5, %v3707_v24  ;;  %v3699_v52 = vmax.f32 %v3697_v41, %v3698_v57  ;;  %v2797_v18 = vrot.slane %v2796_v27, 1  ;;  %v3814_v15 = vsel %vm2650_vm9, %v15385_v50, -inf  ;;  %v20923_v57 = vld [vmem:[#allocation23_spill] sm:$0xff] }
 0x279   : > { %v3781_v8 = vmax.f32 %v15484_v35, %v20919_v39  ;;  %v3788_v37 = vmax.f32 %v3786_v33, %v3787_v13  ;;  %v15752_v42 = vsel %vm4989_vm13, %v5136_v9, %v5135_v53  ;;  %v15756_v36 = vsel %vm4986_vm12, %v5286_v10, %v15621_v40 }
 0x27a   : > { %20920 = vst [vmem:[#allocation21_spill] sm:$0xff] %v15752_v42  ;;  %20921 = vst [vmem:[#allocation25_spill] sm:$0xff] %v15756_v36  ;;  %v20922_v35 = vrot.slane %v15621_v40, 6  ;;  %v4740_v41 = vadd.f32 %v15522_v25, %v4632_v58  ;;  %4364 = vrot.lane.b32.xlu1 %v3708_v46, %s13725_s12  ;;  %v4629_v5 = vmax.f32 %v2770_v11, %v4437_v1  ;;  %v3700_v33 = vrot.slane %v3699_v52, 1  ;;  %v15775_v11 = vpop.permute.xlu1 %4234 }
 0x27b   : > { %v3782_v28 = vrot.slane %v3781_v8, 2  ;;  %v3789_v24 = vrot.slane %v3788_v37, 2  ;;  %v2848_v53 = vsel %vm2650_vm9, %v20923_v57, -inf  ;;  %v2824_v9 = vmax.f32 %v2822_v43, %v2823_v30 }
 0x27c   : > { %v5009_v7 = vsel %vm4989_vm13, %v20922_v35, %v5007_v38  ;;  %v3815_v10 = vrot.slane %v3814_v15, 4  ;;  %v20924_v39 = vrot.slane %v15489_v48, 4  ;;  %v2798_v38 = vmax.f32 %v2796_v27, %v2797_v18 }
 0x27d   : > { %v3783_v13 = vmax.f32 %v3781_v8, %v3782_v28  ;;  %v4439_v58 = vsel %vm4428_vm11, %v15704_v44, %v15277_v3  ;;  %v15773_v46 = vmax.f32 %v3699_v52, %v3700_v33  ;;  %v3790_v1 = vmax.f32 %v3788_v37, %v3789_v24  ;;  %v4169_v52 = vpop.permute.xlu0 %4168 }
 0x27e   : > { %v3809_v40 = vmax.f32 %v15489_v48, %v20924_v39  ;;  %v2849_v36 = vrot.slane %v2848_v53, 4  ;;  %v3816_v57 = vmax.f32 %v3814_v15, %v3815_v10  ;;  %v4737_v8 = vadd.f32 %v15284_v21, %v4629_v5 }
 0x27f   : > { %20925 = vst [vmem:[#allocation23_spill] sm:$0xff] %v15773_v46  ;;  %v3784_v35 = vrot.slane %v3783_v13, 1  ;;  %4362 = vrot.lane.b32.xlu0 %v15773_v46, %s13725_s12  ;;  %v3791_v48 = vrot.slane %v3790_v1, 1  ;;  %v3842_v3 = vsel %vm2650_vm9, %v15420_v51, -inf  ;;  %v4631_v44 = vmax.f32 %v2798_v38, %v4439_v58 }
 0x280   : > { %v3810_v43 = vrot.slane %v3809_v40, 2  ;;  %v2825_v37 = vrot.slane %v2824_v9, 1  ;;  %v3817_v18 = vrot.slane %v3816_v57, 2  ;;  %v15784_v30 = vmax.f32 %v4740_v41, 0.0 }
 0x281   : > { %v3792_v15 = vmax.f32 %v3790_v1, %v3791_v48  ;;  %v15786_v33 = vmax.f32 %v3783_v13, %v3784_v35  ;;  %v3843_v24 = vrot.slane %v3842_v3, 4  ;;  %v2850_v10 = vmax.f32 %v2848_v53, %v2849_v36  ;;  %v15804_v53 = vpop.permute.xlu1 %4238  ;;  %v4181_v48 = vpop.permute.xlu0 %4180 }
 0x282   : > { %v3811_v27 = vmax.f32 %v3809_v40, %v3810_v43  ;;  %20926 = vst [vmem:[#allocation114_spill] sm:$0xff] %v15784_v30  ;;  %v3818_v5 = vmax.f32 %v3816_v57, %v3817_v18  ;;  %v20928_v28 = vrot.slane %v15492_v54, 4  ;;  %v20929_v42 = vrot.slane %v15711_v31, 5  ;;  %v20946_v31 = vld [vmem:[#allocation26_spill] sm:$0xff] }
 0x283   : > { %20927 = vst [vmem:[#allocation115_spill] sm:$0xff] %v15786_v33  ;;  %v15796_v40 = vmax.f32 %v4737_v8, 0.0  ;;  %v4441_v41 = vsel %vm4428_vm11, %v15727_v29, %v15330_v23  ;;  %4382 = vrot.lane.b32.xlu1 %v3792_v15, %s13725_s12  ;;  %4380 = vrot.lane.b32.xlu0 %v15786_v33, %s13725_s12  ;;  %v3844_v36 = vmax.f32 %v3842_v3, %v3843_v24  ;;  %v2851_v43 = vrot.slane %v2850_v10, 2 }
 0x284   : > { %v3812_v39 = vrot.slane %v3811_v27, 1  ;;  %v3837_v46 = vmax.f32 %v15492_v54, %v20928_v28  ;;  %v15794_v38 = vsel %vm4992_vm14, %v20929_v42, %v5009_v7  ;;  %v4739_v54 = vadd.f32 %v15284_v21, %v4631_v44 }
 0x285   : > { %20930 = vst [vmem:[#allocation116_spill] sm:$0xff] %v15794_v38  ;;  %20931 = vst [vmem:[#allocation117_spill] sm:$0xff] %v15796_v40  ;;  %v2826_v13 = vmax.f32 %v2824_v9, %v2825_v37  ;;  %v3819_v58 = vrot.slane %v3818_v5, 1  ;;  %v4438_v8 = vsel %vm4428_vm11, %v15245_v45, %v4169_v52  ;;  %v20933_v9 = vrot.slane %v15373_v59, 5  ;;  %v20941_v37 = vld [vmem:[#allocation32_spill] sm:$0xff] }
 0x286   : > { %v3838_v42 = vrot.slane %v3837_v46, 2  ;;  %v15810_v29 = vmax.f32 %v3811_v27, %v3812_v39  ;;  %v3845_v18 = vrot.slane %v3844_v36, 2  ;;  %v15825_v15 = vmax.f32 %v4739_v54, 0.0 }
 0x287   : > { %v4633_v57 = vmax.f32 %v2826_v13, %v4441_v41  ;;  %v3820_v28 = vmax.f32 %v3818_v5, %v3819_v58  ;;  %v15818_v3 = vsel %vm4992_vm14, %v20933_v9, %v15702_v56  ;;  %v3870_v52 = vsel %vm2650_vm9, %v15466_v4, -inf  ;;  %v20936_v56 = vld [vmem:[#allocation24_spill] sm:$0xff]  ;;  %v15834_v58 = vpop.permute.xlu1 %4244 }
 0x288   : > { %20932 = vst [vmem:[#allocation118_spill] sm:$0xff] %v15810_v29  ;;  %20934 = vst [vmem:[#allocation119_spill] sm:$0xff] %v15818_v3  ;;  %4386 = vrot.lane.b32.xlu0 %v15810_v29, %s13725_s12  ;;  %v3839_v45 = vmax.f32 %v3837_v46, %v3838_v42  ;;  %v4630_v24 = vmax.f32 %v20936_v56, %v4438_v8  ;;  %v3846_v5 = vmax.f32 %v3844_v36, %v3845_v18 }
 0x289   : > { %20935 = vst [vmem:[#allocation120_spill] sm:$0xff] %v15825_v15  ;;  %4388 = vrot.lane.b32.xlu1 %v3820_v28, %s13725_s12  ;;  %v3871_v39 = vrot.slane %v3870_v52, 4  ;;  %v20937_v41 = vrot.slane %v15497_v0, 4  ;;  %v4741_v54 = vadd.f32 %v15284_v21, %v4633_v57  ;;  %v2852_v35 = vmax.f32 %v2850_v10, %v2851_v43  ;;  %v4187_v57 = vpop.permute.xlu0 %4186 }
 0x28a   : > { %v3840_v28 = vrot.slane %v3839_v45, 1  ;;  %v3847_v46 = vrot.slane %v3846_v5, 1  ;;  %v3898_v8 = vsel %vm2650_vm9, %v15512_v16, -inf  ;;  %v4738_v10 = vadd.f32 %v15522_v25, %v4630_v24 }
 0x28b   : > { %v3865_v13 = vmax.f32 %v15497_v0, %v20937_v41  ;;  %v3872_v42 = vmax.f32 %v3870_v52, %v3871_v39  ;;  %v15845_v0 = vsel %vm4428_vm11, %v15763_v22, %v15363_v26  ;;  %v2853_v36 = vrot.slane %v2852_v35, 1 }
 0x28c   : > { %v15847_v56 = vmax.f32 %v3839_v45, %v3840_v28  ;;  %v3848_v43 = vmax.f32 %v3846_v5, %v3847_v46  ;;  %v3899_v18 = vrot.slane %v3898_v8, 4  ;;  %v15854_v9 = vmax.f32 %v4741_v54, 0.0 }
 0x28d   : > { %v3866_v1 = vrot.slane %v3865_v13, 2  ;;  %v3873_v52 = vrot.slane %v3872_v42, 2  ;;  %v20940_v24 = vrot.slane %v15631_v47, 4  ;;  %v2904_v7 = vsel %vm2650_vm9, %v20941_v37, -inf  ;;  %v15872_v27 = vpop.permute.xlu0 %4196 }
 0x28e   : > { %20938 = vst [vmem:[#allocation24_spill] sm:$0xff] %v15847_v56  ;;  %4392 = vrot.lane.b32.xlu0 %v15847_v56, %s13725_s12  ;;  %20939 = vst [vmem:[#allocation121_spill] sm:$0xff] %v15854_v9  ;;  %4394 = vrot.lane.b32.xlu1 %v3848_v43, %s13725_s12  ;;  %v3900_v46 = vmax.f32 %v3898_v8, %v3899_v18  ;;  %v15866_v54 = vmax.f32 %v4738_v10, 0.0  ;;  %v2854_v41 = vmax.f32 %v2852_v35, %v2853_v36  ;;  %v20955_v35 = vld [vmem:[#allocation61_spill] sm:$0xff]  ;;  %v20962_v56 = vld [vmem:[#allocation98_spill] sm:$0xff] }
 0x28f   : > { %v3867_v39 = vmax.f32 %v3865_v13, %v3866_v1  ;;  %v3874_v22 = vmax.f32 %v3872_v42, %v3873_v52  ;;  %v3893_v5 = vmax.f32 %v15631_v47, %v20940_v24  ;;  %v15860_v1 = vpop.permute.xlu1 %4250  ;;  %v4442_v42 = vsel %vm4428_vm11, %v15330_v23, %v4181_v48  ;;  %20944 = vst [vmem:[#allocation123_spill] sm:$0xff] %v15872_v27 }
 0x290   : > { %20942 = vst [vmem:[#allocation32_spill] sm:$0xff] %v15866_v54  ;;  %v3901_v47 = vrot.slane %v3900_v46, 2  ;;  %v2905_v13 = vrot.slane %v2904_v7, 4  ;;  %v3254_v37 = vsel %vm2650_vm9, %v14875_v12, -inf  ;;  %v20945_v23 = vrot.slane %v15016_v60, 4 }
 0x291   : > { %v3868_v45 = vrot.slane %v3867_v39, 1  ;;  %v3875_v43 = vrot.slane %v3874_v22, 1  ;;  %v3894_v24 = vrot.slane %v3893_v5, 2  ;;  %v4635_v44 = vmax.f32 %v2854_v41, %v15845_v0  ;;  %v15899_v41 = vpop.permute.xlu0 %4188 }
 0x292   : > { %v3249_v48 = vmax.f32 %v15016_v60, %v20945_v23  ;;  %v3902_v18 = vmax.f32 %v3900_v46, %v3901_v47  ;;  %v4634_v59 = vmax.f32 %v20946_v31, %v4442_v42  ;;  %v4456_v0 = vsel %vm4428_vm11, %v15635_v19, %v15716_v32 }
 0x293   : > { %v15870_v52 = vmax.f32 %v3867_v39, %v3868_v45  ;;  %v3876_v8 = vmax.f32 %v3874_v22, %v3875_v43  ;;  %v3895_v10 = vmax.f32 %v3893_v5, %v3894_v24  ;;  %v2906_v22 = vmax.f32 %v2904_v7, %v2905_v13  ;;  %v15886_v28 = vpop.permute.xlu1 %4256 }
 0x294   : > { %v3255_v45 = vrot.slane %v3254_v37, 4  ;;  %v3250_v43 = vrot.slane %v3249_v48, 2  ;;  %v3903_v60 = vrot.slane %v3902_v18, 1  ;;  %v4444_v24 = vsel %vm4428_vm11, %v15363_v26, %v4187_v57 }
 0x295   : > { %20943 = vst [vmem:[#allocation122_spill] sm:$0xff] %v15870_v52  ;;  %4398 = vrot.lane.b32.xlu0 %v15870_v52, %s13725_s12  ;;  %4400 = vrot.lane.b32.xlu1 %v3876_v8, %s13725_s12  ;;  %v3896_v23 = vrot.slane %v3895_v10, 1  ;;  %v2907_v31 = vrot.slane %v2906_v22, 2  ;;  %v2876_v39 = vsel %vm2650_vm9, %v14698_v2, -inf  ;;  %v20948_v26 = vcombine.high %v15173_v17, %v15173_v17 }
 0x296   : > { %v3256_v5 = vmax.f32 %v3254_v37, %v3255_v45  ;;  %v3251_v47 = vmax.f32 %v3249_v48, %v3250_v43  ;;  %v3904_v7 = vmax.f32 %v3902_v18, %v3903_v60  ;;  %v4743_v37 = vadd.f32 %v15284_v21, %v4635_v44  ;;  %v20949_v18 = vld [vmem:[#allocation27_spill] sm:$0xff] }
 0x297   : > { %v15894_v13 = vmax.f32 %v3895_v10, %v3896_v23  ;;  %v4742_v48 = vadd.f32 %v15522_v25, %v4634_v59  ;;  %v3373_v32 = vsel %vm2672_vm10, %v20948_v26, -inf  ;;  %v2287_v57 = vcombine.high %v15354_v55, %v15354_v55  ;;  %v20950_v59 = vld [vmem:[#allocation104_spill] sm:$0xff]  ;;  %v15919_v43 = vpop.permute.xlu1 %4262 }
 0x298   : > { %v3257_v42 = vrot.slane %v3256_v5, 2  ;;  %v3252_v8 = vrot.slane %v3251_v47, 1  ;;  %v4636_v10 = vmax.f32 %v20949_v18, %v4444_v24  ;;  %v4648_v2 = vmax.f32 %v14844_v63, %v4456_v0  ;;  %v4193_v0 = vpop.permute.xlu0 %4192 }
 0x299   : > { %20947 = vst [vmem:[#allocation26_spill] sm:$0xff] %v15894_v13  ;;  %4406 = vrot.lane.b32.xlu1 %v3904_v7, %s13725_s12  ;;  %4404 = vrot.lane.b32.xlu0 %v15894_v13, %s13725_s12  ;;  %v4458_v45 = vsel %vm4428_vm11, %v20950_v59, %v15747_v14  ;;  %v2877_v23 = vrot.slane %v2876_v39, 4  ;;  %v3374_v17 = vrot.slane %v3373_v32, 4  ;;  %v3709_v7 = vsel %vm2672_vm10, %v2287_v57, -inf  ;;  %v20953_v14 = vld [vmem:[#allocation44_spill] sm:$0xff] }
 0x29a   : > { %v3258_v44 = vmax.f32 %v3256_v5, %v3257_v42  ;;  %v15921_v60 = vmax.f32 %v3251_v47, %v3252_v8  ;;  %v2908_v55 = vmax.f32 %v2906_v22, %v2907_v31  ;;  %v3710_v24 = vrot.slane %v3709_v7, 4 }
 0x29b   : > { %v15925_v18 = vmax.f32 %v4743_v37, 0.0  ;;  %v4650_v5 = vmax.f32 %v20953_v14, %v4458_v45  ;;  %v3375_v47 = vmax.f32 %v3373_v32, %v3374_v17  ;;  %v15931_v42 = vmax.f32 %v4742_v48, 0.0  ;;  %v20957_v45 = vld [vmem:[#allocation30_spill] sm:$0xff] }
 0x29c   : > { %20951 = vst [vmem:[#allocation27_spill] sm:$0xff] %v15921_v60  ;;  %v3259_v36 = vrot.slane %v3258_v44, 1  ;;  %v3711_v57 = vmax.f32 %v3709_v7, %v3710_v24  ;;  %v20956_v22 = vcombine.high %v20955_v35, %v20955_v35  ;;  %v4744_v37 = vadd.f32 %v15522_v25, %v4636_v10  ;;  %v15961_v52 = vpop.permute.xlu0 %4224 }
 0x29d   : > { %20952 = vst [vmem:[#allocation104_spill] sm:$0xff] %v15925_v18  ;;  %4266 = vrot.lane.b32.xlu0 %v15921_v60, %s13725_s12  ;;  %20954 = vst [vmem:[#allocation44_spill] sm:$0xff] %v15931_v42  ;;  %v15939_v63 = vadd.f32 %v15522_v25, %v4648_v2  ;;  %v2878_v26 = vmax.f32 %v2876_v39, %v2877_v23  ;;  %v3376_v46 = vrot.slane %v3375_v47, 2  ;;  %v2909_v13 = vrot.slane %v2908_v55, 1  ;;  %v20969_v60 = vld [vmem:[#allocation39_spill] sm:$0xff] }
 0x29e   : > { %v3260_v8 = vmax.f32 %v3258_v44, %v3259_v36  ;;  %v3401_v31 = vsel %vm2672_vm10, %v20956_v22, -inf  ;;  %v3712_v32 = vrot.slane %v3711_v57, 2  ;;  %v3044_v36 = vsel %vm2650_vm9, %v20957_v45, -inf  ;;  %v15944_v44 = vpop.permute.xlu1 %4240 }
 0x29f   : > { %v3402_v48 = vrot.slane %v3401_v31, 4  ;;  %v20958_v10 = vrot.slane %v15784_v30, 7  ;;  %v4758_v39 = vadd.f32 %v15522_v25, %v4650_v5  ;;  %v3377_v23 = vmax.f32 %v3375_v47, %v3376_v46  ;;  %v20970_v30 = vld [vmem:[#allocation34_spill] sm:$0xff] }
 0x2a0   : > { %4268 = vrot.lane.b32.xlu1 %v3260_v8, %s13725_s12  ;;  %v3713_v24 = vmax.f32 %v3711_v57, %v3712_v32  ;;  %v15956_v8 = vmax.f32 %v4744_v37, 0.0  ;;  %v4447_v22 = vsel %vm4428_vm11, %v15688_v62, %v15872_v27  ;;  %v2879_v45 = vrot.slane %v2878_v26, 2  ;;  %v20961_v57 = vld [vmem:[#allocation109_spill] sm:$0xff] }
 0x2a1   : > { %v15951_v2 = vsel %vm4986_vm12, %v20958_v10, %v15866_v54  ;;  %v3403_v14 = vmax.f32 %v3401_v31, %v3402_v48  ;;  %v3045_v35 = vrot.slane %v3044_v36, 4  ;;  %v2910_v10 = vmax.f32 %v2908_v55, %v2909_v13 }
 0x2a2   : > { %20959 = vst [vmem:[#allocation61_spill] sm:$0xff] %v15951_v2  ;;  %20960 = vst [vmem:[#allocation30_spill] sm:$0xff] %v15956_v8  ;;  %v4852_v5 = vmax.f32 %v15939_v63, 0.0  ;;  %v3378_v46 = vrot.slane %v3377_v23, 1  ;;  %v3714_v47 = vrot.slane %v3713_v24, 1  ;;  %v15965_v7 = vmax.f32 %v4758_v39, 0.0  ;;  %v15971_v27 = vpop.permute.xlu1 %4246 }
 0x2a3   : > { %v4460_v31 = vsel %vm4428_vm11, %v20961_v57, %v15775_v11  ;;  %v3404_v37 = vrot.slane %v3403_v14, 2  ;;  %v4639_v32 = vmax.f32 %v2910_v10, %v4447_v22  ;;  %v2880_v63 = vmax.f32 %v2878_v26, %v2879_v45  ;;  %v15991_v45 = vpop.permute.xlu0 %4230 }
 0x2a4   : > { %v3379_v48 = vmax.f32 %v3377_v23, %v3378_v46  ;;  %v3715_v2 = vmax.f32 %v3713_v24, %v3714_v47  ;;  %v3046_v17 = vmax.f32 %v3044_v36, %v3045_v35  ;;  %v15975_v39 = vrot.slane %v4852_v5, 7  ;;  %v20963_v23 = vld [vmem:[#allocation45_spill] sm:$0xff]  ;;  %v20964_v36 = vld [vmem:[#allocation67_spill] sm:$0xff] }
 0x2a5   : > { %v15980_v11 = vsel %vm4428_vm11, %v15899_v41, %v20962_v56  ;;  %v4652_v24 = vmax.f32 %v20963_v23, %v4460_v31  ;;  %v3405_v22 = vmax.f32 %v3403_v14, %v3404_v37  ;;  %v5162_v46 = vrot.slane %v15965_v7, 7  ;;  %v20966_v23 = vld [vmem:[#allocation68_spill] sm:$0xff] }
 0x2a6   : > { %4294 = vrot.lane.b32.xlu1 %v3379_v48, %s13725_s12  ;;  %4366 = vrot.lane.b32.xlu0 %v3715_v2, %s13725_s12  ;;  %v4446_v26 = vsel %vm4428_vm11, %v20962_v56, %v4193_v0  ;;  %v3338_v35 = vsel %vm2650_vm9, %v20964_v36, -inf  ;;  %v4747_v41 = vadd.f32 %v15284_v21, %v4639_v32  ;;  %v20965_v2 = vld [vmem:[#allocation31_spill] sm:$0xff]  ;;  %v2881_v14 = vrot.slane %v2880_v63, 1  ;;  %v20968_v56 = vld [vmem:[#allocation29_spill] sm:$0xff]  ;;  %v16003_v33 = vpop.permute.xlu1 %4252 }
 0x2a7   : > { %v3406_v47 = vrot.slane %v3405_v22, 1  ;;  %v3339_v48 = vrot.slane %v3338_v35, 4  ;;  %v3072_v31 = vsel %vm2650_vm9, %v20965_v2, -inf  ;;  %v3047_v37 = vrot.slane %v3046_v17, 2 }
 0x2a8   : > { %v20967_v55 = vcombine.high %v20966_v23, %v20966_v23  ;;  %v3016_v0 = vsel %vm2650_vm9, %v20968_v56, -inf  ;;  %v4760_v13 = vadd.f32 %v15522_v25, %v4652_v24  ;;  %v4638_v3 = vmax.f32 %v20969_v60, %v4446_v26 }
 0x2a9   : > { %v3407_v10 = vmax.f32 %v3405_v22, %v3406_v47  ;;  %v3340_v29 = vmax.f32 %v3338_v35, %v3339_v48  ;;  %v3073_v2 = vrot.slane %v3072_v31, 4  ;;  %v3017_v38 = vrot.slane %v3016_v0, 4  ;;  %v4219_v48 = vpop.permute.xlu0 %4218 }
 0x2aa   : > { %v3429_v62 = vsel %vm2672_vm10, %v20967_v55, -inf  ;;  %v2270_v8 = vcombine.high %v20970_v30, %v20970_v30  ;;  %v16008_v23 = vmax.f32 %v4747_v41, 0.0  ;;  %v5163_v55 = vsel %vm4986_vm12, %v5162_v46, %v4852_v5  ;;  %v20973_v5 = vld [vmem:[#allocation74_spill] sm:$0xff] }
 0x2ab   : > { %v3430_v32 = vrot.slane %v3429_v62, 4  ;;  %4300 = vrot.lane.b32.xlu1 %v3407_v10, %s13725_s12  ;;  %v3341_v56 = vrot.slane %v3340_v29, 2  ;;  %v2882_v22 = vmax.f32 %v2880_v63, %v2881_v14  ;;  %v3048_v35 = vmax.f32 %v3046_v17, %v3047_v37 }
 0x2ac   : > { %20971 = vst [vmem:[#allocation109_spill] sm:$0xff] %v16008_v23  ;;  %v3018_v47 = vmax.f32 %v3016_v0, %v3017_v38  ;;  %v3681_v42 = vsel %vm2672_vm10, %v2270_v8, -inf  ;;  %v16013_v60 = vmax.f32 %v4760_v13, 0.0  ;;  %v4746_v41 = vadd.f32 %v15522_v25, %v4638_v3  ;;  %v16021_v8 = vpop.permute.xlu1 %4258 }
 0x2ad   : > { %v3431_v24 = vmax.f32 %v3429_v62, %v3430_v32  ;;  %v3342_v26 = vmax.f32 %v3340_v29, %v3341_v56  ;;  %v3682_v16 = vrot.slane %v3681_v42, 4  ;;  %v3074_v4 = vmax.f32 %v3072_v31, %v3073_v2 }
 0x2ae   : > { %20972 = vst [vmem:[#allocation98_spill] sm:$0xff] %v16013_v60  ;;  %v3019_v51 = vrot.slane %v3018_v47, 2  ;;  %v20974_v10 = vcombine.high %v20973_v5, %v20973_v5  ;;  %v4637_v17 = vmax.f32 %v2882_v22, %v15980_v11  ;;  %v3049_v13 = vrot.slane %v3048_v35, 1  ;;  %v4217_v22 = vpop.permute.xlu0 %4216 }
 0x2af   : > { %v3432_v54 = vrot.slane %v3431_v24, 2  ;;  %v3343_v38 = vrot.slane %v3342_v26, 1  ;;  %v3683_v46 = vmax.f32 %v3681_v42, %v3682_v16  ;;  %v3075_v11 = vrot.slane %v3074_v4, 2 }
 0x2b0   : > { %v3457_v62 = vsel %vm2672_vm10, %v20974_v10, -inf  ;;  %v3020_v14 = vmax.f32 %v3018_v47, %v3019_v51  ;;  %v4745_v16 = vadd.f32 %v15284_v21, %v4637_v17  ;;  %v5164_v42 = vrot.slane %v16013_v60, 6  ;;  %v20975_v17 = vld [vmem:[#allocation43_spill] sm:$0xff]  ;;  %v16038_v3 = vpop.permute.xlu1 %4264 }
 0x2b1   : > { %v3433_v63 = vmax.f32 %v3431_v24, %v3432_v54  ;;  %v3458_v37 = vrot.slane %v3457_v62, 4  ;;  %v3344_v31 = vmax.f32 %v3342_v26, %v3343_v38  ;;  %v3684_v32 = vrot.slane %v3683_v46, 2 }
 0x2b2   : > { %v5314_v24 = vrot.slane %v16013_v60, 7  ;;  %v3050_v47 = vmax.f32 %v3048_v35, %v3049_v13  ;;  %v4457_v26 = vsel %vm4428_vm11, %v15961_v52, %v20950_v59  ;;  %v3021_v5 = vrot.slane %v3020_v14, 1  ;;  %v20977_v59 = vld [vmem:[#allocation65_spill] sm:$0xff] }
 0x2b3   : > { %v3434_v0 = vrot.slane %v3433_v63, 1  ;;  %v3459_v54 = vmax.f32 %v3457_v62, %v3458_v37  ;;  %4286 = vrot.lane.b32.xlu1 %v3344_v31, %s13725_s12  ;;  %v3685_v51 = vmax.f32 %v3683_v46, %v3684_v32  ;;  %v4454_v62 = vsel %vm4428_vm11, %v15669_v49, %v4217_v22  ;;  %v20979_v32 = vld [vmem:[#allocation52_spill] sm:$0xff] }
 0x2b4   : > { %v2988_v37 = vsel %vm2650_vm9, %v20975_v17, -inf  ;;  %v16040_v29 = vmax.f32 %v4746_v41, 0.0  ;;  %v3076_v46 = vmax.f32 %v3074_v4, %v3075_v11  ;;  %v16043_v31 = vsel %vm4989_vm13, %v5164_v42, %v5163_v55  ;;  %v20980_v4 = vld [vmem:[#allocation56_spill] sm:$0xff] }
 0x2b5   : > { %v3460_v10 = vrot.slane %v3459_v54, 2  ;;  %v3435_v38 = vmax.f32 %v3433_v63, %v3434_v0  ;;  %v3686_v2 = vrot.slane %v3685_v51, 1  ;;  %v2989_v13 = vrot.slane %v2988_v37, 4 }
 0x2b6   : > { %20976 = vst [vmem:[#allocation45_spill] sm:$0xff] %v16040_v29  ;;  %v4649_v52 = vmax.f32 %v3050_v47, %v4457_v26  ;;  %v20978_v63 = vrot.slane %v20977_v59, 4  ;;  %v3100_v22 = vsel %vm2650_vm9, %v20979_v32, -inf  ;;  %v3022_v17 = vmax.f32 %v3020_v14, %v3021_v5  ;;  %v4213_v14 = vpop.permute.xlu0 %4212 }
 0x2b7   : > { %v3461_v35 = vmax.f32 %v3459_v54, %v3460_v10  ;;  %4306 = vrot.lane.b32.xlu1 %v3435_v38, %s13725_s12  ;;  %v4455_v41 = vsel %vm4428_vm11, %v4219_v48, %v15635_v19  ;;  %v4646_v11 = vmax.f32 %v20980_v4, %v4454_v62  ;;  %v2990_v54 = vmax.f32 %v2988_v37, %v2989_v13 }
 0x2b8   : > { %v3333_v0 = vmax.f32 %v20977_v59, %v20978_v63  ;;  %v3687_v10 = vmax.f32 %v3685_v51, %v3686_v2  ;;  %v3101_v47 = vrot.slane %v3100_v22, 4  ;;  %v16054_v26 = vmax.f32 %v4745_v16, 0.0  ;;  %v16063_v51 = vpop.permute.xlu1 %4298 }
 0x2b9   : > { %v3462_v55 = vrot.slane %v3461_v35, 1  ;;  %v16058_v38 = vsel %vm4986_vm12, %v5314_v24, %v15965_v7  ;;  %v3077_v63 = vrot.slane %v3076_v46, 1  ;;  %v4757_v5 = vadd.f32 %v15284_v21, %v4649_v52  ;;  %20983 = vst [vmem:[#allocation68_spill] sm:$0xff] %v16063_v51 }
 0x2ba   : > { %v3334_v42 = vrot.slane %v3333_v0, 2  ;;  %20981 = vst [vmem:[#allocation67_spill] sm:$0xff] %v16054_v26  ;;  %20982 = vst [vmem:[#allocation31_spill] sm:$0xff] %v16058_v38  ;;  %v4647_v19 = vmax.f32 %v3022_v17, %v4455_v41  ;;  %v2991_v48 = vrot.slane %v2990_v54, 2  ;;  %v4459_v24 = vsel %vm4428_vm11, %v15991_v45, %v20961_v57 }
 0x2bb   : > { %4360 = vrot.lane.b32.xlu1 %v3687_v10, %s13725_s12  ;;  %v3102_v37 = vmax.f32 %v3100_v22, %v3101_v47  ;;  %v16071_v13 = vadd.f32 %v15522_v25, %v4646_v11  ;;  %v3463_v52 = vmax.f32 %v3461_v35, %v3462_v55  ;;  %v3078_v41 = vmax.f32 %v3076_v46, %v3077_v63  ;;  %v4237_v11 = vpop.permute.xlu0 %4236 }
 0x2bc   : > { %v3335_v2 = vmax.f32 %v3333_v0, %v3334_v42  ;;  %v2992_v32 = vmax.f32 %v2990_v54, %v2991_v48  ;;  %v20984_v0 = vld [vmem:[#allocation83_spill] sm:$0xff]  ;;  %v20985_v42 = vld [vmem:[#allocation53_spill] sm:$0xff]  ;;  %v16077_v62 = vmax.f32 %v4757_v5, 0.0  ;;  %v16080_v59 = vadd.f32 %v15284_v21, %v4647_v19  ;;  %v16091_v19 = vpop.permute.xlu1 %4304 }
 0x2bd   : > { %v3103_v4 = vrot.slane %v3102_v37, 2  ;;  %v2269_v10 = vcombine.high %v20984_v0, %v20984_v0  ;;  %v3128_v16 = vsel %vm2650_vm9, %v20985_v42, -inf  ;;  %v4462_v45 = vsel %vm4428_vm11, %v15804_v53, %v15944_v44  ;;  %20987 = vst [vmem:[#allocation39_spill] sm:$0xff] %v16091_v19  ;;  %v20988_v44 = vld [vmem:[#allocation58_spill] sm:$0xff] }
 0x2be   : > { %v3336_v17 = vrot.slane %v3335_v2, 1  ;;  %v2993_v57 = vrot.slane %v2992_v32, 1  ;;  %v4651_v46 = vmax.f32 %v3078_v41, %v4459_v24  ;;  %v4453_v35 = vsel %vm4428_vm11, %v4213_v14, %v15669_v49  ;;  %v20989_v41 = vld [vmem:[#allocation92_spill] sm:$0xff] }
 0x2bf   : > { %4312 = vrot.lane.b32.xlu1 %v3463_v52, %s13725_s12  ;;  %v3104_v22 = vmax.f32 %v3102_v37, %v3103_v4  ;;  %v3667_v54 = vsel %vm2650_vm9, %v2269_v10, -inf  ;;  %v3129_v5 = vrot.slane %v3128_v16, 4  ;;  %v4654_v24 = vmax.f32 %v20988_v44, %v4462_v45 }
 0x2c0   : > { %v2994_v55 = vmax.f32 %v2992_v32, %v2993_v57  ;;  %v16089_v47 = vmax.f32 %v3335_v2, %v3336_v17  ;;  %v3668_v63 = vrot.slane %v3667_v54, 4  ;;  %v20990_v49 = vcombine.high %v20989_v41, %v20989_v41  ;;  %v16118_v48 = vpop.permute.xlu1 %4292 }
 0x2c1   : > { %v20582_v37 = vmax.f32 %v16080_v59, 0.0  ;;  %v3130_v17 = vmax.f32 %v3128_v16, %v3129_v5  ;;  %v4759_v4 = vadd.f32 %v15284_v21, %v4651_v46  ;;  %v4850_v10 = vmax.f32 %v16071_v13, 0.0 }
 0x2c2   : > { %20986 = vst [vmem:[#allocation29_spill] sm:$0xff] %v16089_v47  ;;  %v3513_v14 = vsel %vm2672_vm10, %v20990_v49, -inf  ;;  %v4645_v32 = vmax.f32 %v2994_v55, %v4453_v35  ;;  %v3669_v2 = vmax.f32 %v3667_v54, %v3668_v63  ;;  %v3105_v42 = vrot.slane %v3104_v22, 1  ;;  %v4243_v54 = vpop.permute.xlu0 %4242  ;;  %v20991_v63 = vld [vmem:[#allocation54_spill] sm:$0xff] }
 0x2c3   : > { %4284 = vrot.lane.b32.xlu1 %v16089_v47, %s13725_s12  ;;  %v3514_v57 = vrot.slane %v3513_v14, 4  ;;  %v5022_v45 = vrot.slane %v16077_v62, 6  ;;  %v4464_v35 = vsel %vm4428_vm11, %v15834_v58, %v15971_v27  ;;  %v4762_v55 = vadd.f32 %v15522_v25, %v4654_v24 }
 0x2c4   : > { %v4753_v44 = vadd.f32 %v15284_v21, %v4645_v32  ;;  %v3670_v41 = vrot.slane %v3669_v2, 2  ;;  %v3131_v49 = vrot.slane %v3130_v17, 2  ;;  %v3156_v46 = vsel %vm2650_vm9, %v20991_v63, -inf  ;;  %v12858_v63 = vld [vmem:[%s20412_s3] ss:$16 sps:$4 sm:$0xff]  }
 0x2c5   : > { %v3515_v16 = vmax.f32 %v3513_v14, %v3514_v57  ;;  %v5020_v13 = vrot.slane %v20582_v37, 7  ;;  %v4466_v32 = vsel %vm4428_vm11, %v15860_v1, %v16003_v33  ;;  %v16120_v27 = vmax.f32 %v4759_v4, 0.0  ;;  %v20993_v57 = vld [vmem:[#allocation60_spill] sm:$0xff] }
 0x2c6   : > { %v4849_v5 = vmax.f32 %v4753_v44, 0.0  ;;  %v3671_v52 = vmax.f32 %v3669_v2, %v3670_v41  ;;  %v3106_v24 = vmax.f32 %v3104_v22, %v3105_v42  ;;  %v4461_v14 = vsel %vm4428_vm11, %v4237_v11, %v15804_v53  ;;  %v12860_v2 = vld [vmem:[%s20412_s3 + $0x4] ss:$16 sps:$4 sm:$0xff]   ;;  %v12861_v22 = vld [vmem:[%s20412_s3 + $0x8] ss:$16 sps:$4 sm:$0xff]  }
 0x2c7   : > { %20992 = vst [vmem:[#allocation34_spill] sm:$0xff] %v16120_v27  ;;  %v4656_v56 = vmax.f32 %v20993_v57, %v4464_v35  ;;  %v3516_v41 = vrot.slane %v3515_v16, 2  ;;  %v3157_v4 = vrot.slane %v3156_v46, 4  ;;  %v5035_v53 = vsel %vm4986_vm12, %v15975_v39, %v4850_v10  ;;  %v20994_v35 = vld [vmem:[#allocation62_spill] sm:$0xff]  ;;  %7566 = vmatprep.subr.bf16.mxu0 %v12860_v2 }
 0x2c8   : > { %v5021_v33 = vsel %vm4986_vm12, %v5020_v13, %v4849_v5  ;;  %v3672_v44 = vrot.slane %v3671_v52, 1  ;;  %v3132_v42 = vmax.f32 %v3130_v17, %v3131_v49  ;;  %v4658_v57 = vmax.f32 %v20994_v35, %v4466_v32  ;;  %v12863_v13 = vld [vmem:[%s20412_s3 + $0xc] ss:$16 sps:$4 sm:$0xff]   ;;  %7567 = vmatpush1.bf16.msra.mxu0 %v12858_v63  ;;  %v16152_v49 = vpop.permute.xlu0 %4248  ;;  %v12866_v63 = vld [vmem:[%s20412_s3 + $0x24] ss:$16 sps:$4 sm:$0xff]  }
 0x2c9   : > { %v16138_v11 = vsel %vm4989_vm13, %v5022_v45, %v5021_v33  ;;  %v16144_v5 = vmax.f32 %v4762_v55, 0.0  ;;  %v4653_v37 = vmax.f32 %v3106_v24, %v4461_v14  ;;  %v3517_v47 = vmax.f32 %v3515_v16, %v3516_v41  ;;  %7831 = vmatprep.subr.bf16.mxu1 %v12863_v13  ;;  %v12864_v55 = vld [vmem:[%s20412_s3 + $0x20] ss:$16 sps:$4 sm:$0xff]   ;;  %v16161_v14 = vpop.permute.xlu1 %4310  ;;  %7568 = vmatprep.subr.bf16.mxu0 %v12866_v63  ;;  %v21008_v45 = vld [vmem:[#allocation12_spill] sm:$0xff] }
 0x2ca   : > { %v16146_v38 = vmax.f32 %v3671_v52, %v3672_v44  ;;  %v4764_v16 = vadd.f32 %v15522_v25, %v4656_v56  ;;  %v3158_v24 = vmax.f32 %v3156_v46, %v3157_v4  ;;  %20997 = vst [vmem:[#allocation65_spill] sm:$0xff] %v16161_v14  ;;  %7832 = vmatpush1.bf16.msra.mxu1 %v12861_v22  ;;  %v20998_v2 = vrot.slane %v15965_v7, 6  ;;  %v20999_v35 = vld [vmem:[#allocation97_spill] sm:$0xff]  ;;  %v12867_v4 = vld [vmem:[%s20412_s3 + $0x28] ss:$16 sps:$4 sm:$0xff]  }
 0x2cb   : > { %20995 = vst [vmem:[#allocation74_spill] sm:$0xff] %v16144_v5  ;;  %v3518_v32 = vrot.slane %v3517_v47, 1  ;;  %v3133_v44 = vrot.slane %v3132_v42, 1  ;;  %v4766_v41 = vadd.f32 %v15522_v25, %v4658_v57  ;;  %v21000_v56 = vcombine.high %v20999_v35, %v20999_v35  ;;  %v12869_v22 = vld [vmem:[%s20412_s3 + $0x2c] ss:$16 sps:$4 sm:$0xff]   ;;  %v21005_v57 = vld [vmem:[#allocation49_spill] sm:$0xff] }
 0x2cc   : > { %20996 = vst [vmem:[#allocation43_spill] sm:$0xff] %v16146_v38  ;;  %4356 = vrot.lane.b32.xlu1 %v16146_v38, %s13725_s12  ;;  %v16169_v33 = vsel %vm4989_vm13, %v20998_v2, %v5035_v53  ;;  %v4761_v53 = vadd.f32 %v15284_v21, %v4653_v37  ;;  %v4463_v35 = vsel %vm4428_vm11, %v4243_v54, %v15834_v58  ;;  %v16193_v7 = vmax.f32 %v4764_v16, 0.0  ;;  %v16198_v54 = vpop.permute.xlu0 %4254  ;;  %v21009_v38 = vld [vmem:[#allocation69_spill] sm:$0xff] }
 0x2cd   : > { %v3541_v46 = vsel %vm2672_vm10, %v21000_v56, -inf  ;;  %v3519_v13 = vmax.f32 %v3517_v47, %v3518_v32  ;;  %v21001_v56 = vld [vmem:[#allocation57_spill] sm:$0xff]  ;;  %v21002_v17 = vcombine.high %v15541_v6, %v15541_v6  ;;  %7833 = vmatprep.subr.bf16.mxu1 %v12869_v22  ;;  %7569 = vmatpush1.bf16.msra.mxu0 %v12864_v55  ;;  %v3159_v47 = vrot.slane %v3158_v24, 2 }
 0x2ce   : > { %v3542_v2 = vrot.slane %v3541_v46, 4  ;;  %v3184_v39 = vsel %vm2650_vm9, %v21001_v56, -inf  ;;  %21003 = vst [vmem:[#allocation52_spill] sm:$0xff] %v16193_v7  ;;  %7834 = vmatpush1.bf16.msra.mxu1 %v12867_v4  ;;  %v3134_v63 = vmax.f32 %v3132_v42, %v3133_v44  ;;  %v16196_v58 = vmax.f32 %v4766_v41, 0.0  ;;  %v12870_v41 = vld [vmem:[%s20412_s3 + $0x40] ss:$16 sps:$4 sm:$0xff]  }
 0x2cf   : > { %v3569_v52 = vsel %vm2672_vm10, %v21002_v17, -inf  ;;  %v3185_v32 = vrot.slane %v3184_v39, 4  ;;  %v3212_v6 = vsel %vm2650_vm9, %v21005_v57, -inf  ;;  %v16203_v55 = vmax.f32 %v4761_v53, 0.0 }
 0x2d0   : > { %4324 = vrot.lane.b32.xlu1 %v3519_v13, %s13725_s12  ;;  %v3543_v37 = vmax.f32 %v3541_v46, %v3542_v2  ;;  %21004 = vst [vmem:[#allocation56_spill] sm:$0xff] %v16196_v58  ;;  %v3570_v56 = vrot.slane %v3569_v52, 4  ;;  %v16205_v13 = vpop.permute.xlu1 %4316  ;;  %v4655_v4 = vmax.f32 %v3134_v63, %v4463_v35  ;;  %v3213_v44 = vrot.slane %v3212_v6, 4  ;;  %v12872_v2 = vld [vmem:[%s20412_s3 + $0x44] ss:$16 sps:$4 sm:$0xff]  }
 0x2d1   : > { %21006 = vst [vmem:[#allocation53_spill] sm:$0xff] %v16203_v55  ;;  %v3186_v22 = vmax.f32 %v3184_v39, %v3185_v32  ;;  %21007 = vst [vmem:[#allocation58_spill] sm:$0xff] %v16205_v13  ;;  %v3160_v39 = vmax.f32 %v3158_v24, %v3159_v47  ;;  %v4468_v32 = vsel %vm4428_vm11, %v15886_v28, %v16021_v8  ;;  %7570 = vmatprep.subr.bf16.mxu0 %v12872_v2  ;;  %v12875_v24 = vld [vmem:[%s20412_s3 + $0x4c] ss:$16 sps:$4 sm:$0xff]  }
 0x2d2   : > { %v3544_v16 = vrot.slane %v3543_v37, 2  ;;  %v3571_v42 = vmax.f32 %v3569_v52, %v3570_v56  ;;  %v12873_v52 = vld [vmem:[%s20412_s3 + $0x48] ss:$16 sps:$4 sm:$0xff]   ;;  %7571 = vmatpush1.bf16.msra.mxu0 %v12870_v41  ;;  %v4763_v53 = vadd.f32 %v15284_v21, %v4655_v4  ;;  %v4660_v63 = vmax.f32 %v21008_v45, %v4468_v32  ;;  %v4261_v56 = vpop.permute.xlu0 %4260  ;;  %7835 = vmatprep.subr.bf16.mxu1 %v12875_v24  ;;  %v21013_v45 = vld [vmem:[#allocation59_spill] sm:$0xff] }
 0x2d3   : > { %v3187_v57 = vrot.slane %v3186_v22, 2  ;;  %v3214_v10 = vmax.f32 %v3212_v6, %v3213_v44  ;;  %v3590_v0 = vsel %vm2650_vm9, %v21009_v38, -inf  ;;  %7836 = vmatpush1.bf16.msra.mxu1 %v12873_v52  ;;  %v4470_v4 = vsel %vm4428_vm11, %v15919_v43, %v16038_v3  ;;  %v21012_v52 = vld [vmem:[#allocation16_spill] sm:$0xff] }
 0x2d4   : > { %v3545_v46 = vmax.f32 %v3543_v37, %v3544_v16  ;;  %v3572_v17 = vrot.slane %v3571_v42, 2  ;;  %v3161_v37 = vrot.slane %v3160_v39, 1  ;;  %v16234_v47 = vpop.permute.xlu1 %4322  ;;  %v3591_v23 = vrot.slane %v3590_v0, 4 }
 0x2d5   : > { %v3188_v16 = vmax.f32 %v3186_v22, %v3187_v57  ;;  %21010 = vst [vmem:[#allocation92_spill] sm:$0xff] %v16234_v47  ;;  %v3215_v41 = vrot.slane %v3214_v10, 2  ;;  %v4768_v3 = vadd.f32 %v15522_v25, %v4660_v63  ;;  %v21014_v44 = vrot.slane %v15644_v61, 4 }
 0x2d6   : > { %v3546_v35 = vrot.slane %v3545_v46, 1  ;;  %v3573_v2 = vmax.f32 %v3571_v42, %v3572_v17  ;;  %v16242_v42 = vmax.f32 %v4763_v53, 0.0  ;;  %v3162_v57 = vmax.f32 %v3160_v39, %v3161_v37  ;;  %v16253_v38 = vpop.permute.xlu0 %4296  ;;  %v12878_v39 = vld [vmem:[%s20412_s3 + $0x64] ss:$16 sps:$4 sm:$0xff]  }
 0x2d7   : > { %v3189_v32 = vrot.slane %v3188_v16, 1  ;;  %v3216_v24 = vmax.f32 %v3214_v10, %v3215_v41  ;;  %v3592_v22 = vmax.f32 %v3590_v0, %v3591_v23  ;;  %v3380_v53 = vsel %vm2650_vm9, %v21013_v45, -inf  ;;  %v21015_v0 = vld [vmem:[#allocation19_spill] sm:$0xff]  ;;  %7572 = vmatprep.subr.bf16.mxu0 %v12878_v39 }
 0x2d8   : > { %v3547_v8 = vmax.f32 %v3545_v46, %v3546_v35  ;;  %v3574_v17 = vrot.slane %v3573_v2, 1  ;;  %21011 = vst [vmem:[#allocation54_spill] sm:$0xff] %v16242_v42  ;;  %v4465_v46 = vsel %vm4428_vm11, %v16152_v49, %v15860_v1  ;;  %v4662_v35 = vmax.f32 %v21012_v52, %v4470_v4  ;;  %v12876_v49 = vld [vmem:[%s20412_s3 + $0x60] ss:$16 sps:$4 sm:$0xff]   ;;  %v16266_v37 = vpop.permute.xlu1 %4328 }
 0x2d9   : > { %v3921_v1 = vmax.f32 %v15644_v61, %v21014_v44  ;;  %v4657_v10 = vmax.f32 %v3162_v57, %v4465_v46  ;;  %v3217_v63 = vrot.slane %v3216_v24, 1  ;;  %v3381_v23 = vrot.slane %v3380_v53, 4  ;;  %21016 = vst [vmem:[#allocation60_spill] sm:$0xff] %v16266_v37  ;;  %v12879_v61 = vld [vmem:[%s20412_s3 + $0x68] ss:$16 sps:$4 sm:$0xff]   ;;  %7573 = vmatpush1.bf16.msra.mxu0 %v12876_v49 }
 0x2da   : > { %4330 = vrot.lane.b32.xlu1 %v3547_v8, %s13725_s12  ;;  %v3575_v6 = vmax.f32 %v3573_v2, %v3574_v17  ;;  %v3408_v8 = vsel %vm2650_vm9, %v21015_v0, -inf  ;;  %v16271_v2 = vmax.f32 %v4768_v3, 0.0  ;;  %v4467_v4 = vsel %vm4428_vm11, %v16198_v54, %v15886_v28  ;;  %v12881_v17 = vld [vmem:[%s20412_s3 + $0x6c] ss:$16 sps:$4 sm:$0xff]   ;;  %v12882_v39 = vld [vmem:[%s20412_s3 + $0x80] ss:$16 sps:$4 sm:$0xff]  }
 0x2db   : > { %v3593_v41 = vrot.slane %v3592_v22, 2  ;;  %v3922_v45 = vrot.slane %v3921_v1, 2  ;;  %v4770_v44 = vadd.f32 %v15522_v25, %v4662_v35  ;;  %v4469_v46 = vsel %vm4428_vm11, %v4261_v56, %v15919_v43  ;;  %v21018_v57 = vld [vmem:[#allocation40_spill] sm:$0xff]  ;;  %7837 = vmatprep.subr.bf16.mxu1 %v12881_v17  ;;  %v12884_v35 = vld [vmem:[%s20412_s3 + $0x84] ss:$16 sps:$4 sm:$0xff]  }
 0x2dc   : > { %21017 = vst [vmem:[#allocation62_spill] sm:$0xff] %v16271_v2  ;;  %v3409_v3 = vrot.slane %v3408_v8, 4  ;;  %v1827_v52 = vcombine.high %v21018_v57, %v21018_v57  ;;  %v3190_v28 = vmax.f32 %v3188_v16, %v3189_v32  ;;  %v4765_v56 = vadd.f32 %v15284_v21, %v4657_v10  ;;  %7838 = vmatpush1.bf16.msra.mxu1 %v12879_v61  ;;  %v12885_v16 = vld [vmem:[%s20412_s3 + $0x88] ss:$16 sps:$4 sm:$0xff]   ;;  %v12887_v10 = vld [vmem:[%s20412_s3 + $0x8c] ss:$16 sps:$4 sm:$0xff]  }
 0x2dd   : > { %v3594_v54 = vmax.f32 %v3592_v22, %v3593_v41  ;;  %v3923_v0 = vmax.f32 %v3921_v1, %v3922_v45  ;;  %v3218_v25 = vmax.f32 %v3216_v24, %v3217_v63  ;;  %v16298_v1 = vpop.permute.xlu0 %4302  ;;  %7574 = vmatprep.subr.bf16.mxu0 %v12884_v35  ;;  %v16304_v63 = vmax.f32 %v4770_v44, 0.0  ;;  %v16306_v45 = vpop.permute.xlu1 %4334  ;;  %7839 = vmatprep.subr.bf16.mxu1 %v12887_v10  ;;  %v12888_v35 = vld [vmem:[%s20412_s3 + $0xa0] ss:$16 sps:$4 sm:$0xff]   ;;  %v12890_v43 = vld [vmem:[%s20412_s3 + $0xa4] ss:$16 sps:$4 sm:$0xff]  }
 0x2de   : > { %4336 = vrot.lane.b32.xlu1 %v3575_v6, %s13725_s12  ;;  %v3382_v6 = vmax.f32 %v3380_v53, %v3381_v23  ;;  %v2939_v49 = vsel %vm2650_vm9, %v1827_v52, -inf  ;;  %v4659_v32 = vmax.f32 %v3190_v28, %v4467_v4  ;;  %v3410_v41 = vmax.f32 %v3408_v8, %v3409_v3  ;;  %21020 = vst [vmem:[#allocation57_spill] sm:$0xff] %v16306_v45  ;;  %v21039_v57 = vld [vmem:[#allocation75_spill] sm:$0xff] }
 0x2df   : > { %v3595_v53 = vrot.slane %v3594_v54, 1  ;;  %v2940_v23 = vrot.slane %v2939_v49, 4  ;;  %21019 = vst [vmem:[#allocation97_spill] sm:$0xff] %v16304_v63  ;;  %v4661_v61 = vmax.f32 %v3218_v25, %v4469_v46  ;;  %7575 = vmatpush1.bf16.msra.mxu0 %v12882_v39  ;;  %v3924_v52 = vrot.slane %v3923_v0, 1  ;;  %v21026_v39 = vld [vmem:[#allocation64_spill] sm:$0xff] }
 0x2e0   : > { %v3383_v4 = vrot.slane %v3382_v6, 2  ;;  %v21021_v44 = vmax.f32 %v16080_v59, 0.0  ;;  %v21022_v25 = vrot.slane %v16077_v62, 7  ;;  %v21023_v46 = vrot.slane %v16013_v60, 5  ;;  %7840 = vmatpush1.bf16.msra.mxu1 %v12885_v16  ;;  %v12891_v59 = vld [vmem:[%s20412_s3 + $0xa8] ss:$16 sps:$4 sm:$0xff]   ;;  %7576 = vmatprep.subr.bf16.mxu0 %v12890_v43 }
 0x2e1   : > { %v3596_v17 = vmax.f32 %v3594_v54, %v3595_v53  ;;  %v2941_v28 = vmax.f32 %v2939_v49, %v2940_v23  ;;  %v16325_v54 = vmax.f32 %v4765_v56, 0.0  ;;  %v3352_v49 = vsel %vm2650_vm9, %v21026_v39, -inf  ;;  %v12893_v53 = vld [vmem:[%s20412_s3 + $0xac] ss:$16 sps:$4 sm:$0xff]  }
 0x2e2   : > { %v5149_v8 = vsel %vm4986_vm12, %v21022_v25, %v21021_v44  ;;  %v16323_v3 = vsel %vm4992_vm14, %v21023_v46, %v16169_v33  ;;  %v4767_v33 = vadd.f32 %v15284_v21, %v4659_v32  ;;  %v4769_v25 = vadd.f32 %v15284_v21, %v4661_v61  ;;  %7841 = vmatprep.subr.bf16.mxu1 %v12893_v53  ;;  %v16346_v32 = vpop.permute.xlu0 %4290  ;;  %v16352_v61 = vpop.permute.xlu1 %4370 }
 0x2e3   : > { %21024 = vst [vmem:[#allocation49_spill] sm:$0xff] %v16323_v3  ;;  %21025 = vst [vmem:[#allocation12_spill] sm:$0xff] %v16325_v54  ;;  %4340 = vrot.lane.b32.xlu1 %v3596_v17, %s13725_s12  ;;  %v2942_v56 = vrot.slane %v2941_v28, 2  ;;  %v3411_v46 = vrot.slane %v3410_v41, 2  ;;  %7577 = vmatpush1.bf16.msra.mxu0 %v12888_v35  ;;  %v16342_v39 = vmax.f32 %v3382_v6, %v3383_v4  ;;  %v3353_v24 = vrot.slane %v3352_v49, 4  ;;  %v21041_v3 = vld [vmem:[#allocation84_spill] sm:$0xff] }
 0x2e4   : > { %v16344_v23 = vmax.f32 %v3923_v0, %v3924_v52  ;;  %21028 = vst [vmem:[#allocation59_spill] sm:$0xff] %v16352_v61  ;;  %7842 = vmatpush1.bf16.msra.mxu1 %v12891_v59  ;;  %v16356_v4 = vmax.f32 %v4767_v33, 0.0  ;;  %v12894_v59 = vld [vmem:[%s20412_s3 + $0xc0] ss:$16 sps:$4 sm:$0xff]   ;;  %v12896_v33 = vld [vmem:[%s20412_s3 + $0xc4] ss:$16 sps:$4 sm:$0xff]  }
 0x2e5   : > { %v2943_v10 = vmax.f32 %v2941_v28, %v2942_v56  ;;  %v21030_v28 = vrot.slane %v16120_v27, 6  ;;  %v16364_v56 = vmax.f32 %v4769_v25, 0.0  ;;  %v16366_v44 = vmax.f32 %v3410_v41, %v3411_v46  ;;  %v12897_v41 = vld [vmem:[%s20412_s3 + $0xc8] ss:$16 sps:$4 sm:$0xff]   ;;  %v12899_v25 = vld [vmem:[%s20412_s3 + $0xcc] ss:$16 sps:$4 sm:$0xff]   ;;  %7578 = vmatprep.subr.bf16.mxu0 %v12896_v33 }
 0x2e6   : > { %21027 = vst [vmem:[#allocation16_spill] sm:$0xff] %v16344_v23  ;;  %21029 = vst [vmem:[#allocation19_spill] sm:$0xff] %v16356_v4  ;;  %v3385_v0 = vrot.slane %v16342_v39, 1  ;;  %v3354_v16 = vmax.f32 %v3352_v49, %v3353_v24  ;;  %v5130_v46 = vrot.slane %v15925_v18, 2  ;;  %v21033_v24 = vld [vmem:[#allocation99_spill] sm:$0xff]  ;;  %v21034_v49 = vrot.slane %v15796_v40, 5  ;;  %v16397_v22 = vpop.permute.xlu0 %4308  ;;  %7843 = vmatprep.subr.bf16.mxu1 %v12899_v25 }
 0x2e7   : > { %4410 = vrot.lane.b32.xlu1 %v16344_v23, %s13725_s12  ;;  %v2944_v52 = vrot.slane %v2943_v10, 1  ;;  %v5151_v35 = vsel %vm4989_vm13, %v21030_v28, %v5149_v8  ;;  %21031 = vst [vmem:[#allocation64_spill] sm:$0xff] %v16364_v56  ;;  %v5128_v8 = vrot.slane %v15854_v9, 3  ;;  %v5156_v28 = vrot.slane %v16325_v54, 3  ;;  %v16406_v23 = vpop.permute.xlu1 %4376  ;;  %7579 = vmatpush1.bf16.msra.mxu0 %v12894_v59 }
 0x2e8   : > { %v21035_v53 = vrot.slane %v16203_v55, 5  ;;  %v5158_v43 = vrot.slane %v16356_v4, 2  ;;  %v21036_v33 = vrot.slane %v15825_v15, 4  ;;  %21038 = vst [vmem:[#allocation99_spill] sm:$0xff] %v16406_v23  ;;  %7844 = vmatpush1.bf16.msra.mxu1 %v12897_v41  ;;  %v3436_v59 = vsel %vm2650_vm9, %v21039_v57, -inf }
 0x2e9   : > { %v16375_v6 = vmax.f32 %v2943_v10, %v2944_v52  ;;  %v5125_v10 = vsel %vm4992_vm14, %v21034_v49, %v21033_v24  ;;  %v5132_v52 = vrot.slane %v16054_v26, 1  ;;  %v5160_v49 = vrot.slane %v16364_v56, 1 }
 0x2ea   : > { %v5153_v17 = vsel %vm4992_vm14, %v21035_v53, %v5151_v35  ;;  %v5127_v60 = vsel %vm4995_vm15, %v21036_v33, %v5125_v10  ;;  %v3355_v35 = vrot.slane %v3354_v16, 2  ;;  %v12900_v10 = vld [vmem:[%s20412_s3 + $0xe0] ss:$16 sps:$4 sm:$0xff]   ;;  %v3413_v41 = vrot.slane %v16366_v44, 1  ;;  %v16441_v9 = vpop.permute.xlu0 %4314 }
 0x2eb   : > { %21032 = vst [vmem:[#allocation124_spill] sm:$0xff] %v16375_v6  ;;  %4200 = vrot.lane.b32.xlu1 %v16375_v6, %s13725_s12  ;;  %v21037_v6 = vrot.slane %v16242_v42, 4  ;;  %v5129_v53 = vsel %vm4998_vm0, %v5128_v8, %v5127_v60  ;;  %v12902_v60 = vld [vmem:[%s20412_s3 + $0xe4] ss:$16 sps:$4 sm:$0xff]   ;;  %v12903_v8 = vld [vmem:[%s20412_s3 + $0xe8] ss:$16 sps:$4 sm:$0xff]  }
 0x2ec   : > { %v5131_v33 = vsel %vm5001_vm1, %v5130_v46, %v5129_v53  ;;  %v21040_v53 = vcombine.high %v15617_v20, %v15617_v20  ;;  %v3464_v26 = vsel %vm2650_vm9, %v21041_v3, -inf  ;;  %7580 = vmatprep.subr.bf16.mxu0 %v12902_v60  ;;  %v12906_v20 = vld [vmem:[%s20412_s3 + $0x100] ss:$16 sps:$4 sm:$0xff]   ;;  %v12908_v3 = vld [vmem:[%s20412_s3 + $0x104] ss:$16 sps:$4 sm:$0xff]  }
 0x2ed   : > { %v5155_v24 = vsel %vm4995_vm15, %v21037_v6, %v5153_v17  ;;  %v2015_v6 = vcombine.high %v14875_v12, %v14875_v12  ;;  %v5133_v46 = vsel %vm5004_vm2, %v5132_v52, %v5131_v33  ;;  %v12905_v12 = vld [vmem:[%s20412_s3 + $0xec] ss:$16 sps:$4 sm:$0xff]   ;;  %v4481_v52 = vsel %vm4428_vm11, %v16253_v38, %v16063_v51  ;;  %7581 = vmatpush1.bf16.msra.mxu0 %v12900_v10  ;;  %v16456_v10 = vpop.permute.xlu1 %4364  ;;  %v12909_v60 = vld [vmem:[%s20412_s3 + $0x108] ss:$16 sps:$4 sm:$0xff]   ;;  %v12926_v51 = vld [vmem:[%s20412_s3 + $0x164] ss:$16 sps:$4 sm:$0xff]  }
 0x2ee   : > { %v5157_v25 = vsel %vm4998_vm0, %v5156_v28, %v5155_v24  ;;  %v3437_v28 = vrot.slane %v3436_v59, 4  ;;  %7845 = vmatprep.subr.bf16.mxu1 %v12905_v12  ;;  %v4483_v38 = vsel %vm4428_vm11, %v16298_v1, %v16091_v19  ;;  %7582 = vmatprep.subr.bf16.mxu0 %v12908_v3  ;;  %v21042_v19 = vrot.slane %v16120_v27, 7  ;;  %v21043_v3 = vld [vmem:[#allocation93_spill] sm:$0xff] }
 0x2ef   : > { %v5159_v17 = vsel %vm5001_vm1, %v5158_v43, %v5157_v25  ;;  %v3261_v24 = vsel %vm2672_vm10, %v2015_v6, -inf  ;;  %v3737_v25 = vsel %vm2672_vm10, %v21040_v53, -inf  ;;  %v3386_v6 = vmax.f32 %v16342_v39, %v3385_v0  ;;  %7846 = vmatpush1.bf16.msra.mxu1 %v12903_v8  ;;  %v12911_v39 = vld [vmem:[%s20412_s3 + $0x10c] ss:$16 sps:$4 sm:$0xff]   ;;  %v12914_v53 = vld [vmem:[%s20412_s3 + $0x124] ss:$16 sps:$4 sm:$0xff]  }
 0x2f0   : > { %v5161_v43 = vsel %vm5004_vm2, %v5160_v49, %v5159_v17  ;;  %v3356_v49 = vmax.f32 %v3354_v16, %v3355_v35  ;;  %v3262_v33 = vrot.slane %v3261_v24, 4  ;;  %v3738_v17 = vrot.slane %v3737_v25, 4  ;;  %7847 = vmatprep.subr.bf16.mxu1 %v12911_v39 }
 0x2f1   : > { %v12724_v57 = vpack.i.bf16 %v5161_v43, %v5133_v46  ;;  %v3465_v16 = vrot.slane %v3464_v26, 4  ;;  %v2066_v35 = vcombine.high %v20964_v36, %v20964_v36  ;;  %v3438_v46 = vmax.f32 %v3436_v59, %v3437_v28  ;;  %7583 = vmatpush1.bf16.msra.mxu0 %v12906_v20 }
 0x2f2   : > { %v3263_v1 = vmax.f32 %v3261_v24, %v3262_v33  ;;  %v3739_v43 = vmax.f32 %v3737_v25, %v3738_v17  ;;  %v4673_v36 = vmax.f32 %v3386_v6, %v4481_v52  ;;  %v16475_v24 = vsel %vm4986_vm12, %v21042_v19, %v16077_v62  ;;  %7584 = vmatprep.subr.bf16.mxu0 %v12914_v53 }
 0x2f3   : > { %12725 = vrot.lane.b32.xlu0 %v12724_v57, %s13723_s20  ;;  %v3414_v57 = vmax.f32 %v16366_v44, %v3413_v41  ;;  %v3345_v8 = vsel %vm2672_vm10, %v2066_v35, -inf  ;;  %v3357_v59 = vrot.slane %v3356_v49, 1  ;;  %v3466_v25 = vmax.f32 %v3464_v26, %v3465_v16  ;;  %v12912_v44 = vld [vmem:[%s20412_s3 + $0x120] ss:$16 sps:$4 sm:$0xff]   ;;  %v12917_v41 = vld [vmem:[%s20412_s3 + $0x12c] ss:$16 sps:$4 sm:$0xff]   ;;  %7848 = vmatpush1.bf16.msra.mxu1 %v12909_v60  ;;  %v16491_v16 = vpop.permute.xlu0 %4320 }
 0x2f4   : > { %v3264_v28 = vrot.slane %v3263_v1, 2  ;;  %v3740_v33 = vrot.slane %v3739_v43, 2  ;;  %v3346_v17 = vrot.slane %v3345_v8, 4  ;;  %v3492_v6 = vsel %vm2650_vm9, %v21043_v3, -inf  ;;  %v12915_v26 = vld [vmem:[%s20412_s3 + $0x128] ss:$16 sps:$4 sm:$0xff]   ;;  %7849 = vmatprep.subr.bf16.mxu1 %v12917_v41 }
 0x2f5   : > { %v4675_v52 = vmax.f32 %v3414_v57, %v4483_v38  ;;  %v4479_v62 = vsel %vm4428_vm11, %v16346_v32, %v16118_v48  ;;  %v3439_v20 = vrot.slane %v3438_v46, 2  ;;  %v3674_v38 = vsel %vm2650_vm9, %v20970_v30, -inf  ;;  %v12920_v35 = vld [vmem:[%s20412_s3 + $0x144] ss:$16 sps:$4 sm:$0xff]   ;;  %v16499_v3 = vpop.permute.xlu1 %4382  ;;  %v12923_v32 = vld [vmem:[%s20412_s3 + $0x14c] ss:$16 sps:$4 sm:$0xff]   ;;  %7585 = vmatpush1.bf16.msra.mxu0 %v12912_v44 }
 0x2f6   : > { %v3265_v19 = vmax.f32 %v3263_v1, %v3264_v28  ;;  %v4781_v60 = vadd.f32 %v15284_v21, %v4673_v36  ;;  %v3741_v39 = vmax.f32 %v3739_v43, %v3740_v33  ;;  %v3347_v57 = vmax.f32 %v3345_v8, %v3346_v17  ;;  %21044 = vst [vmem:[#allocation75_spill] sm:$0xff] %v16499_v3  ;;  %v12918_v41 = vld [vmem:[%s20412_s3 + $0x140] ss:$16 sps:$4 sm:$0xff]   ;;  %v12921_v17 = vld [vmem:[%s20412_s3 + $0x148] ss:$16 sps:$4 sm:$0xff]  }
 0x2f7   : > { %v3675_v53 = vrot.slane %v3674_v38, 4  ;;  %v3358_v1 = vmax.f32 %v3356_v49, %v3357_v59  ;;  %v3467_v12 = vrot.slane %v3466_v25, 2  ;;  %v3493_v30 = vrot.slane %v3492_v6, 4  ;;  %7850 = vmatpush1.bf16.msra.mxu1 %v12915_v26  ;;  %7586 = vmatprep.subr.bf16.mxu0 %v12920_v35 }
 0x2f8   : > { %v3266_v28 = vrot.slane %v3265_v19, 1  ;;  %v4783_v36 = vadd.f32 %v15284_v21, %v4675_v52  ;;  %v3742_v43 = vrot.slane %v3741_v39, 1  ;;  %v3348_v8 = vrot.slane %v3347_v57, 2  ;;  %7851 = vmatprep.subr.bf16.mxu1 %v12923_v32  ;;  %v12929_v52 = vld [vmem:[%s20412_s3 + $0x16c] ss:$16 sps:$4 sm:$0xff]  }
 0x2f9   : > { %v3676_v33 = vmax.f32 %v3674_v38, %v3675_v53  ;;  %v4671_v59 = vmax.f32 %v3358_v1, %v4479_v62  ;;  %v3440_v44 = vmax.f32 %v3438_v46, %v3439_v20  ;;  %v21045_v53 = vld [vmem:[#allocation13_spill] sm:$0xff]  ;;  %v16521_v62 = vmax.f32 %v4781_v60, 0.0  ;;  %v16524_v20 = vpop.permute.xlu0 %4326  ;;  %7587 = vmatpush1.bf16.msra.mxu0 %v12918_v41 }
 0x2fa   : > { %v3267_v0 = vmax.f32 %v3265_v19, %v3266_v28  ;;  %v3743_v26 = vmax.f32 %v3741_v39, %v3742_v43  ;;  %v3349_v38 = vmax.f32 %v3347_v57, %v3348_v8  ;;  %v3520_v4 = vsel %vm2650_vm9, %v21045_v53, -inf  ;;  %v12924_v39 = vld [vmem:[%s20412_s3 + $0x160] ss:$16 sps:$4 sm:$0xff]   ;;  %v21048_v28 = vld [vmem:[#allocation28_spill] sm:$0xff]  ;;  %7588 = vmatprep.subr.bf16.mxu0 %v12926_v51 }
 0x2fb   : > { %v3677_v35 = vrot.slane %v3676_v33, 2  ;;  %21046 = vst [vmem:[#allocation84_spill] sm:$0xff] %v16521_v62  ;;  %v3468_v46 = vmax.f32 %v3466_v25, %v3467_v12  ;;  %v3494_v19 = vmax.f32 %v3492_v6, %v3493_v30  ;;  %v16529_v57 = vmax.f32 %v4783_v36, 0.0  ;;  %v16534_v43 = vpop.permute.xlu1 %4388  ;;  %7852 = vmatpush1.bf16.msra.mxu1 %v12921_v17  ;;  %v12932_v36 = vld [vmem:[%s20412_s3 + $0x184] ss:$16 sps:$4 sm:$0xff]  }
 0x2fc   : > { %4270 = vrot.lane.b32.xlu1 %v3267_v0, %s13725_s12  ;;  %4372 = vrot.lane.b32.xlu0 %v3743_v26, %s13725_s12  ;;  %v3350_v32 = vrot.slane %v3349_v38, 1  ;;  %v2321_v60 = vcombine.high %v21048_v28, %v21048_v28  ;;  %21049 = vst [vmem:[#allocation13_spill] sm:$0xff] %v16534_v43  ;;  %v12927_v0 = vld [vmem:[%s20412_s3 + $0x168] ss:$16 sps:$4 sm:$0xff]   ;;  %v21050_v12 = vrot.slane %v16120_v27, 5  ;;  %v16546_v6 = vadd.f32 %v15284_v21, %v4671_v59 }
 0x2fd   : > { %21047 = vst [vmem:[#allocation93_spill] sm:$0xff] %v16529_v57  ;;  %v3678_v1 = vmax.f32 %v3676_v33, %v3677_v35  ;;  %v3441_v30 = vrot.slane %v3440_v44, 1  ;;  %v3521_v41 = vrot.slane %v3520_v4, 4  ;;  %7853 = vmatprep.subr.bf16.mxu1 %v12929_v52  ;;  %v12935_v8 = vld [vmem:[%s20412_s3 + $0x18c] ss:$16 sps:$4 sm:$0xff]   ;;  %v3469_v52 = vrot.slane %v3468_v46, 1  ;;  %7589 = vmatpush1.bf16.msra.mxu0 %v12924_v39 }
 0x2fe   : > { %v16543_v25 = vsel %vm4992_vm14, %v21050_v12, %v16138_v11  ;;  %v3351_v33 = vmax.f32 %v3349_v38, %v3350_v32  ;;  %v3765_v11 = vsel %vm2672_vm10, %v2321_v60, -inf  ;;  %v21052_v26 = vld [vmem:[#allocation76_spill] sm:$0xff]  ;;  %v3495_v53 = vrot.slane %v3494_v19, 2  ;;  %v12930_v28 = vld [vmem:[%s20412_s3 + $0x180] ss:$16 sps:$4 sm:$0xff]   ;;  %v16575_v38 = vpop.permute.xlu0 %4332  ;;  %7590 = vmatprep.subr.bf16.mxu0 %v12932_v36 }
 0x2ff   : > { %21051 = vst [vmem:[#allocation28_spill] sm:$0xff] %v16543_v25  ;;  %v3679_v17 = vrot.slane %v3678_v1, 1  ;;  %v3548_v59 = vsel %vm2650_vm9, %v21052_v26, -inf  ;;  %v5176_v12 = vrot.slane %v16521_v62, 7  ;;  %v5328_v32 = vrot.slane %v16529_v57, 7  ;;  %7854 = vmatpush1.bf16.msra.mxu1 %v12927_v0 }
 0x300   : > { %4288 = vrot.lane.b32.xlu0 %v3351_v33, %s13725_s12  ;;  %v3766_v60 = vrot.slane %v3765_v11, 4  ;;  %v12933_v26 = vld [vmem:[%s20412_s3 + $0x188] ss:$16 sps:$4 sm:$0xff]   ;;  %v4485_v39 = vsel %vm4428_vm11, %v16397_v22, %v16161_v14  ;;  %v4487_v35 = vsel %vm4428_vm11, %v16441_v9, %v16205_v13  ;;  %v3549_v49 = vrot.slane %v3548_v59, 4  ;;  %7855 = vmatprep.subr.bf16.mxu1 %v12935_v8  ;;  %v12938_v0 = vld [vmem:[%s20412_s3 + $0x1a4] ss:$16 sps:$4 sm:$0xff]   ;;  %v16586_v25 = vpop.permute.xlu1 %4394 }
 0x301   : > { %v2338_v33 = vcombine.high %v15380_v34, %v15380_v34  ;;  %v12941_v22 = vld [vmem:[%s20412_s3 + $0x1ac] ss:$16 sps:$4 sm:$0xff]   ;;  %v4875_v51 = vmax.f32 %v16546_v6, 0.0  ;;  %v3442_v27 = vmax.f32 %v3440_v44, %v3441_v30  ;;  %v3680_v9 = vmax.f32 %v3678_v1, %v3679_v17  ;;  %21053 = vst [vmem:[#allocation76_spill] sm:$0xff] %v16586_v25  ;;  %7591 = vmatpush1.bf16.msra.mxu0 %v12930_v28  ;;  %v12936_v8 = vld [vmem:[%s20412_s3 + $0x1a0] ss:$16 sps:$4 sm:$0xff]  }
 0x302   : > { %v3522_v13 = vmax.f32 %v3520_v4, %v3521_v41  ;;  %v3470_v14 = vmax.f32 %v3468_v46, %v3469_v52  ;;  %v3496_v56 = vmax.f32 %v3494_v19, %v3495_v53  ;;  %v3767_v34 = vmax.f32 %v3765_v11, %v3766_v60  ;;  %v21055_v4 = vld [vmem:[#allocation110_spill] sm:$0xff]  ;;  %7592 = vmatprep.subr.bf16.mxu0 %v12938_v0 }
 0x303   : > { %v3550_v36 = vmax.f32 %v3548_v59, %v3549_v49  ;;  %v16593_v54 = vsel %vm4986_vm12, %v5328_v32, %v16521_v62  ;;  %v3793_v44 = vsel %vm2672_vm10, %v2338_v33, -inf  ;;  %v3716_v1 = vsel %vm2650_vm9, %v21055_v4, -inf  ;;  %v21056_v46 = vld [vmem:[#allocation82_spill] sm:$0xff]  ;;  %7856 = vmatpush1.bf16.msra.mxu1 %v12933_v26  ;;  %v12944_v59 = vld [vmem:[%s20412_s3 + $0x1c4] ss:$16 sps:$4 sm:$0xff]  }
 0x304   : > { %21054 = vst [vmem:[#allocation125_spill] sm:$0xff] %v16593_v54  ;;  %4358 = vrot.lane.b32.xlu0 %v3680_v9, %s13725_s12  ;;  %v21057_v19 = vcombine.high %v21056_v46, %v21056_v46  ;;  %v12939_v6 = vld [vmem:[%s20412_s3 + $0x1a8] ss:$16 sps:$4 sm:$0xff]   ;;  %v5178_v30 = vrot.slane %v16529_v57, 6  ;;  %v4677_v41 = vmax.f32 %v3442_v27, %v4485_v39  ;;  %v4679_v17 = vmax.f32 %v3470_v14, %v4487_v35  ;;  %v12947_v52 = vld [vmem:[%s20412_s3 + $0x1cc] ss:$16 sps:$4 sm:$0xff]  }
 0x305   : > { %v16610_v11 = vsel %vm4428_vm11, %v16491_v16, %v16234_v47  ;;  %7857 = vmatprep.subr.bf16.mxu1 %v12941_v22  ;;  %v3523_v53 = vrot.slane %v3522_v13, 2  ;;  %v3768_v28 = vrot.slane %v3767_v34, 2  ;;  %v3794_v32 = vrot.slane %v3793_v44, 4  ;;  %v16619_v16 = vpop.permute.xlu0 %4368  ;;  %7593 = vmatpush1.bf16.msra.mxu0 %v12936_v8  ;;  %v12942_v39 = vld [vmem:[%s20412_s3 + $0x1c0] ss:$16 sps:$4 sm:$0xff]   ;;  %v21058_v9 = vld [vmem:[#allocation86_spill] sm:$0xff] }
 0x306   : > { %v3485_v49 = vsel %vm2672_vm10, %v21057_v19, -inf  ;;  %v3717_v27 = vrot.slane %v3716_v1, 4  ;;  %v5177_v14 = vsel %vm4986_vm12, %v5176_v12, %v4875_v51  ;;  %v3497_v35 = vrot.slane %v3496_v56, 1  ;;  %v12945_v12 = vld [vmem:[%s20412_s3 + $0x1c8] ss:$16 sps:$4 sm:$0xff]   ;;  %7594 = vmatprep.subr.bf16.mxu0 %v12944_v59 }
 0x307   : > { %v3551_v60 = vrot.slane %v3550_v36, 2  ;;  %v3486_v26 = vrot.slane %v3485_v49, 4  ;;  %v3769_v33 = vmax.f32 %v3767_v34, %v3768_v28  ;;  %v3795_v0 = vmax.f32 %v3793_v44, %v3794_v32  ;;  %v16626_v46 = vpop.permute.xlu1 %4400  ;;  %7858 = vmatpush1.bf16.msra.mxu1 %v12939_v6  ;;  %v12950_v44 = vld [vmem:[%s20412_s3 + $0x1e4] ss:$16 sps:$4 sm:$0xff]   ;;  %v12948_v59 = vld [vmem:[%s20412_s3 + $0x1e0] ss:$16 sps:$4 sm:$0xff]  }
 0x308   : > { %v3718_v22 = vmax.f32 %v3716_v1, %v3717_v27  ;;  %v3744_v4 = vsel %vm2650_vm9, %v21058_v9, -inf  ;;  %21059 = vst [vmem:[#allocation110_spill] sm:$0xff] %v16626_v46  ;;  %v16631_v19 = vrot.slane %v4875_v51, 7  ;;  %v4785_v8 = vadd.f32 %v15284_v21, %v4677_v41  ;;  %7859 = vmatprep.subr.bf16.mxu1 %v12947_v52  ;;  %v12953_v1 = vld [vmem:[%s20412_s3 + $0x1ec] ss:$16 sps:$4 sm:$0xff]  }
 0x309   : > { %v3487_v57 = vmax.f32 %v3485_v49, %v3486_v26  ;;  %v2355_v34 = vcombine.high %v15385_v50, %v15385_v50  ;;  %v4787_v6 = vadd.f32 %v15284_v21, %v4679_v17  ;;  %v3524_v51 = vmax.f32 %v3522_v13, %v3523_v53  ;;  %7595 = vmatpush1.bf16.msra.mxu0 %v12942_v39  ;;  %v12951_v13 = vld [vmem:[%s20412_s3 + $0x1e8] ss:$16 sps:$4 sm:$0xff]   ;;  %v16658_v39 = vpop.permute.xlu0 %4374 }
 0x30a   : > { %21060 = vst [vmem:[#allocation82_spill] sm:$0xff] %v16631_v19  ;;  %v3770_v28 = vrot.slane %v3769_v33, 1  ;;  %v3796_v32 = vrot.slane %v3795_v0, 2  ;;  %v3552_v41 = vmax.f32 %v3550_v36, %v3551_v60  ;;  %v3745_v27 = vrot.slane %v3744_v4, 4  ;;  %7596 = vmatprep.subr.bf16.mxu0 %v12950_v44 }
 0x30b   : > { %v3488_v49 = vrot.slane %v3487_v57, 2  ;;  %v3821_v50 = vsel %vm2672_vm10, %v2355_v34, -inf  ;;  %v3498_v52 = vmax.f32 %v3496_v56, %v3497_v35  ;;  %v3719_v54 = vrot.slane %v3718_v22, 2  ;;  %7860 = vmatpush1.bf16.msra.mxu1 %v12945_v12  ;;  %v12956_v56 = vld [vmem:[%s20412_s3 + $0x204] ss:$16 sps:$4 sm:$0xff]  }
 0x30c   : > { %v3771_v26 = vmax.f32 %v3769_v33, %v3770_v28  ;;  %v3797_v9 = vmax.f32 %v3795_v0, %v3796_v32  ;;  %v16651_v36 = vsel %vm4989_vm13, %v5178_v30, %v5177_v14  ;;  %v16653_v17 = vmax.f32 %v4785_v8, 0.0  ;;  %7861 = vmatprep.subr.bf16.mxu1 %v12953_v1  ;;  %v12959_v30 = vld [vmem:[%s20412_s3 + $0x20c] ss:$16 sps:$4 sm:$0xff]   ;;  %v21062_v34 = vld [vmem:[#allocation85_spill] sm:$0xff] }
 0x30d   : > { %v4491_v53 = vsel %vm4428_vm11, %v16524_v20, %v16266_v37  ;;  %v3489_v60 = vmax.f32 %v3487_v57, %v3488_v49  ;;  %v4681_v14 = vmax.f32 %v3498_v52, %v16610_v11  ;;  %v3525_v35 = vrot.slane %v3524_v51, 1  ;;  %v16668_v57 = vpop.permute.xlu1 %4406  ;;  %7597 = vmatpush1.bf16.msra.mxu0 %v12948_v59  ;;  %v21063_v37 = vld [vmem:[#allocation36_spill] sm:$0xff] }
 0x30e   : > { %4378 = vrot.lane.b32.xlu0 %v3771_v26, %s13725_s12  ;;  %v3798_v33 = vrot.slane %v3797_v9, 1  ;;  %v3822_v20 = vrot.slane %v3821_v50, 4  ;;  %21061 = vst [vmem:[#allocation86_spill] sm:$0xff] %v16668_v57  ;;  %v16670_v0 = vmax.f32 %v4787_v6, 0.0  ;;  %v3553_v12 = vrot.slane %v3552_v41, 1  ;;  %7619 = vmatprep.subr.bf16.mxu0 %v12956_v56 }
 0x30f   : > { %v3746_v8 = vmax.f32 %v3744_v4, %v3745_v27  ;;  %v3688_v44 = vsel %vm2650_vm9, %v21062_v34, -inf  ;;  %v3720_v28 = vmax.f32 %v3718_v22, %v3719_v54  ;;  %v3490_v32 = vrot.slane %v3489_v60, 1  ;;  %7862 = vmatpush1.bf16.msra.mxu1 %v12951_v13  ;;  %v16685_v13 = vpop.permute.xlu0 %4362 }
 0x310   : > { %v3799_v1 = vmax.f32 %v3797_v9, %v3798_v33  ;;  %v3823_v49 = vmax.f32 %v3821_v50, %v3822_v20  ;;  %v3689_v26 = vrot.slane %v3688_v44, 4  ;;  %v2372_v6 = vcombine.high %v21063_v37, %v21063_v37  ;;  %7884 = vmatprep.subr.bf16.mxu1 %v12959_v30 }
 0x311   : > { %v4789_v27 = vadd.f32 %v15284_v21, %v4681_v14  ;;  %v3526_v59 = vmax.f32 %v3524_v51, %v3525_v35  ;;  %v4493_v50 = vsel %vm4428_vm11, %v16575_v38, %v16306_v45  ;;  %v3747_v9 = vrot.slane %v3746_v8, 2 }
 0x312   : > { %4384 = vrot.lane.b32.xlu0 %v3799_v1, %s13725_s12  ;;  %v3824_v54 = vrot.slane %v3823_v49, 2  ;;  %v3849_v37 = vsel %vm2672_vm10, %v2372_v6, -inf  ;;  %v3554_v30 = vmax.f32 %v3552_v41, %v3553_v12  ;;  %v3721_v33 = vrot.slane %v3720_v28, 1  ;;  %v16688_v14 = vpop.permute.xlu1 %4268  ;;  %v21064_v1 = vld [vmem:[#allocation35_spill] sm:$0xff] }
 0x313   : > { %v4683_v56 = vmax.f32 %v3526_v59, %v4491_v53  ;;  %v3491_v20 = vmax.f32 %v3489_v60, %v3490_v32  ;;  %v3690_v35 = vmax.f32 %v3688_v44, %v3689_v26  ;;  %v3850_v34 = vrot.slane %v3849_v37, 4  ;;  %v21066_v53 = vld [vmem:[#allocation94_spill] sm:$0xff]  ;;  %v4381_v38 = vpop.permute.xlu0 %4380 }
 0x314   : > { %v3825_v51 = vmax.f32 %v3823_v49, %v3824_v54  ;;  %v3772_v4 = vsel %vm2650_vm9, %v21064_v1, -inf  ;;  %v16694_v22 = vmax.f32 %v4789_v27, 0.0  ;;  %v2389_v41 = vcombine.high %v21066_v53, %v21066_v53 }
 0x315   : > { %v4685_v60 = vmax.f32 %v3554_v30, %v4493_v50  ;;  %v3748_v12 = vmax.f32 %v3746_v8, %v3747_v9  ;;  %v3851_v49 = vmax.f32 %v3849_v37, %v3850_v34  ;;  %v4791_v44 = vadd.f32 %v15284_v21, %v4683_v56  ;;  %v21067_v9 = vld [vmem:[#allocation89_spill] sm:$0xff] }
 0x316   : > { %21065 = vst [vmem:[#allocation85_spill] sm:$0xff] %v16694_v22  ;;  %4318 = vrot.lane.b32.xlu0 %v3491_v20, %s13725_s12  ;;  %v3826_v32 = vrot.slane %v3825_v51, 1  ;;  %v4505_v26 = vsel %vm4428_vm11, %v16619_v16, %v16352_v61  ;;  %v3773_v6 = vrot.slane %v3772_v4, 4  ;;  %v3877_v59 = vsel %vm2672_vm10, %v2389_v41, -inf }
 0x317   : > { %v3722_v27 = vmax.f32 %v3720_v28, %v3721_v33  ;;  %v3691_v1 = vrot.slane %v3690_v35, 2  ;;  %v3852_v20 = vrot.slane %v3851_v49, 2  ;;  %v3878_v50 = vrot.slane %v3877_v59, 4 }
 0x318   : > { %v3827_v54 = vmax.f32 %v3825_v51, %v3826_v32  ;;  %v3800_v37 = vsel %vm2650_vm9, %v21067_v9, -inf  ;;  %v16708_v56 = vpop.permute.xlu1 %4294  ;;  %v4793_v30 = vadd.f32 %v15284_v21, %v4685_v60  ;;  %v3749_v28 = vrot.slane %v3748_v12, 1  ;;  %v21069_v9 = vld [vmem:[#allocation10_spill] sm:$0xff] }
 0x319   : > { %v4697_v34 = vmax.f32 %v3722_v27, %v4505_v26  ;;  %v3853_v33 = vmax.f32 %v3851_v49, %v3852_v20  ;;  %v3774_v51 = vmax.f32 %v3772_v4, %v3773_v6  ;;  %v3879_v41 = vmax.f32 %v3877_v59, %v3878_v50  ;;  %v21071_v26 = vld [vmem:[#allocation90_spill] sm:$0xff] }
 0x31a   : > { %4390 = vrot.lane.b32.xlu0 %v3827_v54, %s13725_s12  ;;  %v3801_v32 = vrot.slane %v3800_v37, 4  ;;  %v16714_v8 = vmax.f32 %v4791_v44, 0.0  ;;  %v3692_v52 = vmax.f32 %v3690_v35, %v3691_v1  ;;  %v21070_v11 = vrot.slane %v21069_v9, 4  ;;  %v16726_v44 = vpop.permute.xlu0 %4386 }
 0x31b   : > { %v3854_v16 = vrot.slane %v3853_v33, 1  ;;  %v3880_v45 = vrot.slane %v3879_v41, 2  ;;  %v3828_v27 = vsel %vm2650_vm9, %v21071_v26, -inf  ;;  %v16721_v54 = vmax.f32 %v4793_v30, 0.0  ;;  %v21074_v30 = vld [vmem:[#allocation100_spill] sm:$0xff]  ;;  %v21075_v26 = vld [vmem:[#allocation91_spill] sm:$0xff] }
 0x31c   : > { %21068 = vst [vmem:[#allocation36_spill] sm:$0xff] %v16714_v8  ;;  %v3585_v61 = vmax.f32 %v21069_v9, %v21070_v11  ;;  %v3802_v60 = vmax.f32 %v3800_v37, %v3801_v32  ;;  %v3750_v4 = vmax.f32 %v3748_v12, %v3749_v28  ;;  %v4507_v49 = vsel %vm4428_vm11, %v16658_v39, %v16406_v23 }
 0x31d   : > { %21072 = vst [vmem:[#allocation35_spill] sm:$0xff] %v16721_v54  ;;  %v4805_v6 = vadd.f32 %v15284_v21, %v4697_v34  ;;  %v3855_v59 = vmax.f32 %v3853_v33, %v3854_v16  ;;  %v3775_v11 = vrot.slane %v3774_v51, 2  ;;  %v3881_v1 = vmax.f32 %v3879_v41, %v3880_v45  ;;  %v16729_v20 = vpop.permute.xlu1 %4300 }
 0x31e   : > { %v3586_v35 = vrot.slane %v3585_v61, 2  ;;  %21073 = vst [vmem:[#allocation94_spill] sm:$0xff] %v16729_v20  ;;  %v3693_v50 = vrot.slane %v3692_v52, 1  ;;  %v3829_v32 = vrot.slane %v3828_v27, 4  ;;  %v2406_v12 = vcombine.high %v21074_v30, %v21074_v30  ;;  %v4393_v23 = vpop.permute.xlu0 %4392 }
 0x31f   : > { %4396 = vrot.lane.b32.xlu0 %v3855_v59, %s13725_s12  ;;  %v3882_v39 = vrot.slane %v3881_v1, 1  ;;  %v3803_v9 = vrot.slane %v3802_v60, 2  ;;  %v3856_v34 = vsel %vm2650_vm9, %v21075_v26, -inf  ;;  %v4699_v33 = vmax.f32 %v3750_v4, %v4507_v49 }
 0x320   : > { %v3587_v37 = vmax.f32 %v3585_v61, %v3586_v35  ;;  %v4503_v61 = vsel %vm4428_vm11, %v16685_v13, %v16456_v10  ;;  %v16742_v41 = vmax.f32 %v4805_v6, 0.0  ;;  %v3776_v35 = vmax.f32 %v3774_v51, %v3775_v11 }
 0x321   : > { %v3883_v30 = vmax.f32 %v3881_v1, %v3882_v39  ;;  %v3694_v59 = vmax.f32 %v3692_v52, %v3693_v50  ;;  %v3830_v28 = vmax.f32 %v3828_v27, %v3829_v32  ;;  %v3905_v47 = vsel %vm2672_vm10, %v2406_v12, -inf  ;;  %v21079_v50 = vld [vmem:[#allocation101_spill] sm:$0xff]  ;;  %v21080_v12 = vld [vmem:[#allocation106_spill] sm:$0xff] }
 0x322   : > { %21076 = vst [vmem:[#allocation89_spill] sm:$0xff] %v16742_v41  ;;  %v3588_v53 = vrot.slane %v3587_v37, 1  ;;  %v3857_v26 = vrot.slane %v3856_v34, 4  ;;  %v4509_v4 = vsel %vm4428_vm11, %v4381_v38, %v16499_v3  ;;  %v3804_v13 = vmax.f32 %v3802_v60, %v3803_v9 }
 0x323   : > { %4402 = vrot.lane.b32.xlu0 %v3883_v30, %s13725_s12  ;;  %v4807_v51 = vadd.f32 %v15284_v21, %v4699_v33  ;;  %v4695_v52 = vmax.f32 %v3694_v59, %v4503_v61  ;;  %v3906_v27 = vrot.slane %v3905_v47, 4  ;;  %v3777_v11 = vrot.slane %v3776_v35, 1  ;;  %v21083_v61 = vld [vmem:[#allocation50_spill] sm:$0xff] }
 0x324   : > { %v3858_v6 = vmax.f32 %v3856_v34, %v3857_v26  ;;  %v16753_v1 = vmax.f32 %v3587_v37, %v3588_v53  ;;  %v3926_v32 = vsel %vm2650_vm9, %v21079_v50, -inf  ;;  %v3884_v39 = vsel %vm2650_vm9, %v21080_v12, -inf  ;;  %v21081_v34 = vld [vmem:[#allocation33_spill] sm:$0xff] }
 0x325   : > { %v16750_v49 = vpop.permute.xlu1 %4286  ;;  %v3831_v30 = vrot.slane %v3830_v28, 2  ;;  %v3907_v60 = vmax.f32 %v3905_v47, %v3906_v27  ;;  %v3927_v9 = vrot.slane %v3926_v32, 4  ;;  %v3805_v45 = vrot.slane %v3804_v13, 1  ;;  %v4399_v47 = vpop.permute.xlu0 %4398 }
 0x326   : > { %21077 = vst [vmem:[#allocation10_spill] sm:$0xff] %v16750_v49  ;;  %21078 = vst [vmem:[#allocation90_spill] sm:$0xff] %v16753_v1  ;;  %v3885_v33 = vrot.slane %v3884_v39, 4  ;;  %v21082_v53 = vcombine.high %v21081_v34, %v21081_v34  ;;  %v3240_v59 = vsel %vm2650_vm9, %v21083_v61, -inf  ;;  %v16769_v26 = vadd.f32 %v15284_v21, %v4695_v52 }
 0x327   : > { %4338 = vrot.lane.b32.xlu0 %v16753_v1, %s13725_s12  ;;  %v3908_v12 = vrot.slane %v3907_v60, 2  ;;  %v3859_v16 = vrot.slane %v3858_v6, 2  ;;  %v3928_v27 = vmax.f32 %v3926_v32, %v3927_v9  ;;  %v3778_v38 = vmax.f32 %v3776_v35, %v3777_v11 }
 0x328   : > { %v2925_v37 = vsel %vm2672_vm10, %v21082_v53, -inf  ;;  %v3886_v3 = vmax.f32 %v3884_v39, %v3885_v33  ;;  %v3241_v1 = vrot.slane %v3240_v59, 4  ;;  %v16773_v49 = vmax.f32 %v4807_v51, 0.0 }
 0x329   : > { %v2926_v62 = vrot.slane %v2925_v37, 4  ;;  %v16771_v19 = vpop.permute.xlu1 %4306  ;;  %v4511_v34 = vsel %vm4428_vm11, %v16726_v44, %v16534_v43  ;;  %v3909_v53 = vmax.f32 %v3907_v60, %v3908_v12  ;;  %v3929_v61 = vrot.slane %v3928_v27, 2 }
 0x32a   : > { %21084 = vst [vmem:[#allocation100_spill] sm:$0xff] %v16771_v19  ;;  %21085 = vst [vmem:[#allocation91_spill] sm:$0xff] %v16773_v49  ;;  %v5204_v52 = vrot.slane %v16742_v41, 7  ;;  %v4701_v50 = vmax.f32 %v3778_v38, %v4509_v4  ;;  %v3806_v20 = vmax.f32 %v3804_v13, %v3805_v45  ;;  %v3832_v42 = vmax.f32 %v3830_v28, %v3831_v30  ;;  %v4405_v4 = vpop.permute.xlu0 %4404 }
 0x32b   : > { %v4899_v35 = vmax.f32 %v16769_v26, 0.0  ;;  %v3910_v11 = vrot.slane %v3909_v53, 1  ;;  %v3860_v32 = vmax.f32 %v3858_v6, %v3859_v16  ;;  %v3930_v39 = vmax.f32 %v3928_v27, %v3929_v61  ;;  %v21086_v6 = vld [vmem:[#allocation41_spill] sm:$0xff] }
 0x32c   : > { %v4703_v9 = vmax.f32 %v3806_v20, %v4511_v34  ;;  %v3887_v33 = vrot.slane %v3886_v3, 2  ;;  %v2927_v51 = vmax.f32 %v2925_v37, %v2926_v62  ;;  %v3242_v19 = vmax.f32 %v3240_v59, %v3241_v1 }
 0x32d   : > { %v5356_v44 = vrot.slane %v16773_v49, 7  ;;  %v4513_v60 = vsel %vm4428_vm11, %v4393_v23, %v16586_v25  ;;  %v3911_v12 = vmax.f32 %v3909_v53, %v3910_v11  ;;  %v3833_v45 = vrot.slane %v3832_v42, 1  ;;  %v16784_v30 = vpop.permute.xlu1 %4360 }
 0x32e   : > { %v3931_v28 = vrot.slane %v3930_v39, 1  ;;  %v3888_v13 = vmax.f32 %v3886_v3, %v3887_v33  ;;  %v2928_v38 = vrot.slane %v2927_v51, 2  ;;  %v4809_v20 = vadd.f32 %v15284_v21, %v4701_v50  ;;  %v21087_v33 = vld [vmem:[#allocation17_spill] sm:$0xff] }
 0x32f   : > { %4408 = vrot.lane.b32.xlu0 %v3911_v12, %s13725_s12  ;;  %v3861_v62 = vrot.slane %v3860_v32, 1  ;;  %v3243_v16 = vrot.slane %v3242_v19, 2  ;;  %v2946_v1 = vsel %vm2650_vm9, %v21086_v6, -inf  ;;  %v5205_v37 = vsel %vm4986_vm12, %v5204_v52, %v4899_v35 }
 0x330   : > { %v4811_v23 = vadd.f32 %v15284_v21, %v4703_v9  ;;  %v3889_v59 = vrot.slane %v3888_v13, 1  ;;  %v2929_v26 = vmax.f32 %v2927_v51, %v2928_v38  ;;  %v4515_v3 = vsel %vm4428_vm11, %v4399_v47, %v16626_v46  ;;  %v4267_v38 = vpop.permute.xlu0 %4266  ;;  %v21126_v46 = vld [vmem:[#allocation102_spill] sm:$0xff] }
 0x331   : > { %v3932_v27 = vmax.f32 %v3930_v39, %v3931_v28  ;;  %v3244_v34 = vmax.f32 %v3242_v19, %v3243_v16  ;;  %v2947_v53 = vrot.slane %v2946_v1, 4  ;;  %v3834_v50 = vmax.f32 %v3832_v42, %v3833_v45 }
 0x332   : > { %v4517_v61 = vsel %vm4428_vm11, %v4405_v4, %v16668_v57  ;;  %v2930_v11 = vrot.slane %v2929_v26, 1  ;;  %v21088_v12 = vrot.slane %v21087_v33, 4  ;;  %v16799_v52 = vmax.f32 %v4809_v20, 0.0  ;;  %v16805_v4 = vpop.permute.xlu1 %4312 }
 0x333   : > { %v3862_v9 = vmax.f32 %v3860_v32, %v3861_v62  ;;  %4412 = vrot.lane.b32.xlu0 %v3932_v27, %s13725_s12  ;;  %v3890_v51 = vmax.f32 %v3888_v13, %v3889_v59  ;;  %v2948_v47 = vmax.f32 %v2946_v1, %v2947_v53  ;;  %v5206_v19 = vrot.slane %v16773_v49, 6  ;;  %v21121_v49 = vld [vmem:[#allocation12_spill] sm:$0xff] }
 0x334   : > { %v3277_v55 = vmax.f32 %v21087_v33, %v21088_v12  ;;  %21089 = vst [vmem:[#allocation106_spill] sm:$0xff] %v16799_v52  ;;  %v16803_v39 = vmax.f32 %v4811_v23, 0.0  ;;  %v4705_v42 = vmax.f32 %v3834_v50, %v4513_v60  ;;  %v3245_v45 = vrot.slane %v3244_v34, 1 }
 0x335   : > { %v4707_v28 = vmax.f32 %v3862_v9, %v4515_v3  ;;  %v4709_v16 = vmax.f32 %v3890_v51, %v4517_v61  ;;  %v2931_v57 = vmax.f32 %v2929_v26, %v2930_v11  ;;  %v2949_v33 = vrot.slane %v2948_v47, 2  ;;  %v4367_v61 = vpop.permute.xlu0 %4366  ;;  %v21093_v9 = vld [vmem:[#allocation21_spill] sm:$0xff]  ;;  %v21094_v51 = vld [vmem:[#allocation32_spill] sm:$0xff] }
 0x336   : > { %21090 = vst [vmem:[#allocation33_spill] sm:$0xff] %v16803_v39  ;;  %v16809_v32 = vsel %vm4986_vm12, %v5356_v44, %v16742_v41  ;;  %v16811_v20 = vrot.slane %v4899_v35, 7  ;;  %v5207_v13 = vsel %vm4989_vm13, %v5206_v19, %v5205_v37  ;;  %v3278_v62 = vrot.slane %v3277_v55, 2 }
 0x337   : > { %21091 = vst [vmem:[#allocation50_spill] sm:$0xff] %v16809_v32  ;;  %v5208_v1 = vrot.slane %v16799_v52, 5  ;;  %4198 = vrot.lane.b32.xlu0 %v2931_v57, %s13725_s12  ;;  %v4471_v23 = vsel %vm4428_vm11, %v4267_v38, %v16688_v14  ;;  %v2950_v59 = vmax.f32 %v2948_v47, %v2949_v33  ;;  %v4813_v44 = vadd.f32 %v15284_v21, %v4705_v42 }
 0x338   : > { %21092 = vst [vmem:[#allocation41_spill] sm:$0xff] %v16811_v20  ;;  %v3246_v3 = vmax.f32 %v3244_v34, %v3245_v45  ;;  %v3279_v35 = vmax.f32 %v3277_v55, %v3278_v62  ;;  %v5210_v27 = vrot.slane %v16803_v39, 4  ;;  %v4815_v37 = vadd.f32 %v15284_v21, %v4707_v28  ;;  %v16830_v34 = vpop.permute.xlu1 %4284  ;;  %v21096_v45 = vld [vmem:[#allocation44_spill] sm:$0xff] }
 0x339   : > { %v4817_v53 = vadd.f32 %v15284_v21, %v4709_v16  ;;  %v2951_v50 = vrot.slane %v2950_v59, 1  ;;  %v21095_v38 = vrot.slane %v21094_v51, 5  ;;  %v5142_v28 = vrot.slane %v21096_v45, 3  ;;  %v21134_v39 = vld [vmem:[#allocation68_spill] sm:$0xff] }
 0x33a   : > { %v4663_v12 = vmax.f32 %v3246_v3, %v4471_v23  ;;  %v3280_v42 = vrot.slane %v3279_v35, 1  ;;  %v16834_v16 = vmax.f32 %v4813_v44, 0.0  ;;  %v16839_v33 = vsel %vm4428_vm11, %v16118_v48, %v16708_v56  ;;  %v21098_v23 = vld [vmem:[#allocation30_spill] sm:$0xff] }
 0x33b   : > { %v5139_v47 = vsel %vm4992_vm14, %v21095_v38, %v21093_v9  ;;  %v2952_v19 = vmax.f32 %v2950_v59, %v2951_v50  ;;  %v16843_v62 = vsel %vm4428_vm11, %v16456_v10, %v4367_v61  ;;  %v5144_v3 = vrot.slane %v21098_v23, 2  ;;  %v21101_v59 = vld [vmem:[#allocation114_spill] sm:$0xff] }
 0x33c   : > { %21097 = vst [vmem:[#allocation17_spill] sm:$0xff] %v16834_v16  ;;  %v16846_v9 = vmax.f32 %v4815_v37, 0.0  ;;  %v16848_v38 = vmax.f32 %v4817_v53, 0.0  ;;  %v21102_v44 = vrot.slane %v21101_v59, 4  ;;  %v5146_v55 = vrot.slane %v16040_v29, 1 }
 0x33d   : > { %4202 = vrot.lane.b32.xlu0 %v2952_v19, %s13725_s12  ;;  %v4771_v48 = vadd.f32 %v15284_v21, %v4663_v12  ;;  %v21103_v10 = vrot.slane %v16144_v5, 5  ;;  %v5170_v37 = vrot.slane %v16196_v58, 3  ;;  %v5172_v53 = vrot.slane %v16271_v2, 2 }
 0x33e   : > { %21099 = vst [vmem:[#allocation21_spill] sm:$0xff] %v16846_v9  ;;  %21100 = vst [vmem:[#allocation126_spill] sm:$0xff] %v16848_v38  ;;  %v5141_v50 = vsel %vm4995_vm15, %v21102_v44, %v5139_v47  ;;  %v16862_v61 = vmax.f32 %v3279_v35, %v3280_v42  ;;  %v21105_v11 = vrot.slane %v16193_v7, 4  ;;  %v5174_v44 = vrot.slane %v16304_v63, 1  ;;  %v16876_v42 = vpop.permute.xlu1 %4356 }
 0x33f   : > { %v5167_v56 = vsel %vm4992_vm14, %v21103_v10, %v16043_v31  ;;  %v5143_v19 = vsel %vm4998_vm0, %v5142_v28, %v5141_v50  ;;  %v21106_v31 = vrot.slane %v16653_v17, 5  ;;  %v5184_v35 = vrot.slane %v16694_v22, 3 }
 0x340   : > { %21104 = vst [vmem:[#allocation114_spill] sm:$0xff] %v16862_v61  ;;  %v5169_v47 = vsel %vm4995_vm15, %v21105_v11, %v5167_v56  ;;  %v5145_v12 = vsel %vm5001_vm1, %v5144_v3, %v5143_v19  ;;  %v21107_v3 = vrot.slane %v16670_v0, 4  ;;  %v5186_v56 = vrot.slane %v16714_v8, 2 }
 0x341   : > { %v5171_v26 = vsel %vm4998_vm0, %v5170_v37, %v5169_v47  ;;  %v5181_v10 = vsel %vm4992_vm14, %v21106_v31, %v16651_v36  ;;  %4272 = vrot.lane.b32.xlu0 %v16862_v61, %s13725_s12  ;;  %v5147_v11 = vsel %vm5004_vm2, %v5146_v55, %v5145_v12  ;;  %v5188_v36 = vrot.slane %v16721_v54, 1  ;;  %v21111_v61 = vld [vmem:[#allocation95_spill] sm:$0xff] }
 0x342   : > { %v5173_v28 = vsel %vm5001_vm1, %v5172_v53, %v5171_v26  ;;  %v5183_v50 = vsel %vm4995_vm15, %v21107_v3, %v5181_v10  ;;  %v5209_v19 = vsel %vm4992_vm14, %v5208_v1, %v5207_v13  ;;  %v5212_v47 = vrot.slane %v16834_v16, 3  ;;  %v21108_v10 = vld [vmem:[#allocation69_spill] sm:$0xff]  ;;  %v21133_v16 = vld [vmem:[#allocation94_spill] sm:$0xff] }
 0x343   : > { %v5175_v37 = vsel %vm5004_vm2, %v5174_v44, %v5173_v28  ;;  %v5211_v57 = vsel %vm4995_vm15, %v5210_v27, %v5209_v19  ;;  %v5214_v55 = vrot.slane %v16846_v9, 2  ;;  %v5216_v26 = vrot.slane %v16848_v38, 1  ;;  %v21109_v28 = vld [vmem:[#allocation47_spill] sm:$0xff] }
 0x344   : > { %v12734_v31 = vpack.i.bf16 %v5175_v37, %v5147_v11  ;;  %v5185_v53 = vsel %vm4998_vm0, %v5184_v35, %v5183_v50  ;;  %v5213_v12 = vsel %vm4998_vm0, %v5212_v47, %v5211_v57  ;;  %v2219_v44 = vcombine.high %v21108_v10, %v21108_v10  ;;  %v21110_v11 = vld [vmem:[#allocation70_spill] sm:$0xff]  ;;  %v16907_v47 = vpop.permute.xlu1 %4324 }
 0x345   : > { %v3282_v3 = vsel %vm2650_vm9, %v21109_v28, -inf  ;;  %v5187_v13 = vsel %vm5001_vm1, %v5186_v56, %v5185_v53  ;;  %v5215_v1 = vsel %vm5001_vm1, %v5214_v55, %v5213_v12  ;;  %v3618_v37 = vsel %vm2650_vm9, %v21110_v11, -inf  ;;  %v21119_v53 = vld [vmem:[#allocation54_spill] sm:$0xff] }
 0x346   : > { %12735 = vrot.lane.b32.xlu0 %v12734_v31, %s13723_s20  ;;  %v3283_v27 = vrot.slane %v3282_v3, 4  ;;  %v5189_v35 = vsel %vm5004_vm2, %v5188_v36, %v5187_v13  ;;  %v5217_v57 = vsel %vm5004_vm2, %v5216_v26, %v5215_v1  ;;  %v3597_v50 = vsel %vm2672_vm10, %v2219_v44, -inf }
 0x347   : > { %v3619_v19 = vrot.slane %v3618_v37, 4  ;;  %v12729_v10 = vpack.i.bf16 %v5217_v57, %v5189_v35  ;;  %v3598_v60 = vrot.slane %v3597_v50, 4  ;;  %v21112_v56 = vrot.slane %v15796_v40, 6  ;;  %v21117_v57 = vld [vmem:[#allocation78_spill] sm:$0xff] }
 0x348   : > { %v3284_v31 = vmax.f32 %v3282_v3, %v3283_v27  ;;  %v16914_v12 = vmax.f32 %v4771_v48, 0.0  ;;  %v21114_v26 = vrot.slane %v15825_v15, 5  ;;  %v5280_v3 = vrot.slane %v15925_v18, 3  ;;  %v21115_v27 = vld [vmem:[#allocation53_spill] sm:$0xff] }
 0x349   : > { %v5275_v55 = vsel %vm4989_vm13, %v21112_v56, %v21111_v61  ;;  %v3620_v36 = vmax.f32 %v3618_v37, %v3619_v19  ;;  %12730 = vrot.lane.b32.xlu1 %v12729_v10, %s13723_s20  ;;  %v3599_v13 = vmax.f32 %v3597_v50, %v3598_v60  ;;  %v21116_v35 = vrot.slane %v21115_v27, 6  ;;  %v21118_v37 = vld [vmem:[#allocation23_spill] sm:$0xff] }
 0x34a   : > { %21113 = vst [vmem:[#allocation69_spill] sm:$0xff] %v16914_v12  ;;  %v5277_v44 = vsel %vm4992_vm14, %v21114_v26, %v5275_v55  ;;  %v3285_v1 = vrot.slane %v3284_v31, 2  ;;  %v4672_v48 = vmax.f32 %v21117_v57, %v16839_v33  ;;  %v4696_v19 = vmax.f32 %v21118_v37, %v16843_v62  ;;  %v21123_v57 = vld [vmem:[#allocation121_spill] sm:$0xff] }
 0x34b   : > { %v5303_v61 = vsel %vm4989_vm13, %v21116_v35, %v16475_v24  ;;  %v3621_v56 = vrot.slane %v3620_v36, 2  ;;  %v21120_v55 = vrot.slane %v21119_v53, 5  ;;  %v3600_v50 = vrot.slane %v3599_v13, 2  ;;  %v21129_v24 = vld [vmem:[#allocation112_spill] sm:$0xff] }
 0x34c   : > { %v3286_v26 = vmax.f32 %v3284_v31, %v3285_v1  ;;  %v21122_v63 = vrot.slane %v21121_v49, 4  ;;  %v5312_v33 = vrot.slane %v16914_v12, 1  ;;  %v21124_v62 = vrot.slane %v21123_v57, 4  ;;  %v16941_v11 = vpop.permute.xlu1 %4330  ;;  %v21125_v31 = vld [vmem:[#allocation19_spill] sm:$0xff] }
 0x34d   : > { %v5305_v10 = vsel %vm4992_vm14, %v21120_v55, %v5303_v61  ;;  %v3622_v35 = vmax.f32 %v3620_v36, %v3621_v56  ;;  %v3601_v61 = vmax.f32 %v3599_v13, %v3600_v50  ;;  %v5308_v1 = vrot.slane %v21125_v31, 3 }
 0x34e   : > { %v5307_v29 = vsel %vm4995_vm15, %v21122_v63, %v5305_v10  ;;  %v5279_v37 = vsel %vm4995_vm15, %v21124_v62, %v5277_v44  ;;  %v3287_v55 = vrot.slane %v3286_v26, 1  ;;  %v16946_v25 = vadd.f32 %v21126_v46, %v4672_v48  ;;  %v21127_v10 = vld [vmem:[#allocation67_spill] sm:$0xff] }
 0x34f   : > { %v5281_v60 = vsel %vm4998_vm0, %v5280_v3, %v5279_v37  ;;  %v16949_v63 = vadd.f32 %v21126_v46, %v4696_v19  ;;  %v21128_v36 = vrot.slane %v21127_v10, 2  ;;  %v21130_v44 = vrot.slane %v21129_v24, 4  ;;  %v21131_v37 = vld [vmem:[#allocation79_spill] sm:$0xff]  ;;  %v21135_v10 = vld [vmem:[#allocation64_spill] sm:$0xff] }
 0x350   : > { %v3602_v13 = vrot.slane %v3601_v61, 1  ;;  %v3288_v50 = vmax.f32 %v3286_v26, %v3287_v55  ;;  %v5309_v3 = vsel %vm4998_vm0, %v5308_v1, %v5307_v29  ;;  %v21132_v43 = vrot.slane %v21131_v37, 4  ;;  %v21137_v26 = vld [vmem:[#allocation109_spill] sm:$0xff] }
 0x351   : > { %v5283_v56 = vsel %vm5001_vm1, %v21128_v36, %v5281_v60  ;;  %v3949_v62 = vmax.f32 %v21129_v24, %v21130_v44  ;;  %v4482_v19 = vsel %vm4428_vm11, %v21134_v39, %v21133_v16  ;;  %v3623_v41 = vrot.slane %v3622_v35, 1  ;;  %v21139_v16 = vld [vmem:[#allocation101_spill] sm:$0xff] }
 0x352   : > { %v3613_v48 = vmax.f32 %v21131_v37, %v21132_v43  ;;  %v21136_v52 = vrot.slane %v21135_v10, 2  ;;  %v3603_v32 = vmax.f32 %v3601_v61, %v3602_v13  ;;  %4274 = vrot.lane.b32.xlu1 %v3288_v50, %s13725_s12  ;;  %v21138_v24 = vrot.slane %v21137_v26, 1  ;;  %v21140_v13 = vld [vmem:[#allocation66_spill] sm:$0xff] }
 0x353   : > { %v3950_v36 = vrot.slane %v3949_v62, 2  ;;  %v1828_v39 = vcombine.high %v21086_v6, %v21086_v6  ;;  %v2423_v37 = vcombine.high %v21139_v16, %v21139_v16  ;;  %v4674_v50 = vmax.f32 %v21140_v13, %v4482_v19  ;;  %v21143_v13 = vld [vmem:[#allocation103_spill] sm:$0xff] }
 0x354   : > { %v5311_v60 = vsel %vm5001_vm1, %v21136_v52, %v5309_v3  ;;  %v5285_v29 = vsel %vm5004_vm2, %v21138_v24, %v5283_v56  ;;  %v3614_v43 = vrot.slane %v3613_v48, 2  ;;  %v16976_v52 = vpop.permute.xlu1 %4336  ;;  %4342 = vrot.lane.b32.xlu0 %v3603_v32, %s13725_s12  ;;  %v21141_v3 = vld [vmem:[#allocation63_spill] sm:$0xff]  ;;  %v21171_v12 = vrot.slane %v16144_v5, 4 }
 0x355   : > { %v5313_v55 = vsel %vm5004_vm2, %v5312_v33, %v5311_v60  ;;  %v3951_v44 = vmax.f32 %v3949_v62, %v3950_v36  ;;  %v3324_v33 = vsel %vm2650_vm9, %v21141_v3, -inf  ;;  %v3624_v60 = vmax.f32 %v3622_v35, %v3623_v41  ;;  %v21145_v3 = vld [vmem:[#allocation39_spill] sm:$0xff] }
 0x356   : > { %v12739_v1 = vpack.i.bf16 %v5313_v55, %v5285_v29  ;;  %v3615_v56 = vmax.f32 %v3613_v48, %v3614_v43  ;;  %v2953_v62 = vsel %vm2672_vm10, %v1828_v39, -inf  ;;  %v3933_v6 = vsel %vm2672_vm10, %v2423_v37, -inf  ;;  %v21142_v48 = vld [vmem:[#allocation46_spill] sm:$0xff]  ;;  %v21144_v37 = vld [vmem:[#allocation100_spill] sm:$0xff] }
 0x357   : > { %v3325_v36 = vrot.slane %v3324_v33, 4  ;;  %v3952_v24 = vrot.slane %v3951_v44, 1  ;;  %v2954_v55 = vrot.slane %v2953_v62, 4  ;;  %v3934_v16 = vrot.slane %v3933_v6, 4 }
 0x358   : > { %12740 = vrot.lane.b32.xlu1 %v12739_v1, %s13726_s11  ;;  %v3616_v29 = vrot.slane %v3615_v56, 1  ;;  %v2974_v43 = vsel %vm2650_vm9, %v21142_v48, -inf  ;;  %v3954_v41 = vsel %vm2650_vm9, %v21143_v13, -inf  ;;  %v4484_v1 = vsel %vm4428_vm11, %v21145_v3, %v21144_v37  ;;  %4346 = vrot.lane.b32.xlu0 %v3624_v60, %s13725_s12  ;;  %v17000_v26 = vpop.permute.xlu1 %4340  ;;  %v21149_v48 = vld [vmem:[#allocation42_spill] sm:$0xff]  ;;  %v21150_v60 = vld [vmem:[#allocation77_spill] sm:$0xff] }
 0x359   : > { %v3326_v32 = vmax.f32 %v3324_v33, %v3325_v36  ;;  %v4782_v33 = vadd.f32 %v21126_v46, %v4674_v50  ;;  %v2955_v36 = vmax.f32 %v2953_v62, %v2954_v55  ;;  %v3935_v19 = vmax.f32 %v3933_v6, %v3934_v16  ;;  %21147 = vst [vmem:[#allocation95_spill] sm:$0xff] %v17000_v26 }
 0x35a   : > { %v16997_v61 = vmax.f32 %v3615_v56, %v3616_v29  ;;  %v17002_v13 = vmax.f32 %v3951_v44, %v3952_v24  ;;  %v2975_v39 = vrot.slane %v2974_v43, 4  ;;  %v3955_v35 = vrot.slane %v3954_v41, 4 }
 0x35b   : > { %v3327_v10 = vrot.slane %v3326_v32, 2  ;;  %v1844_v37 = vcombine.high %v21149_v48, %v21149_v48  ;;  %v4676_v56 = vmax.f32 %v21150_v60, %v4484_v1  ;;  %v2956_v29 = vrot.slane %v2955_v36, 2  ;;  %v21151_v48 = vld [vmem:[#allocation10_spill] sm:$0xff] }
 0x35c   : > { %21146 = vst [vmem:[#allocation47_spill] sm:$0xff] %v16997_v61  ;;  %21148 = vst [vmem:[#allocation78_spill] sm:$0xff] %v17002_v13  ;;  %4344 = vrot.lane.b32.xlu1 %v16997_v61, %s13725_s12  ;;  %v3936_v3 = vrot.slane %v3935_v19, 2  ;;  %4416 = vrot.lane.b32.xlu0 %v17002_v13, %s13725_s12  ;;  %v2976_v62 = vmax.f32 %v2974_v43, %v2975_v39  ;;  %v3956_v6 = vmax.f32 %v3954_v41, %v3955_v35  ;;  %v17018_v39 = vpop.permute.xlu1 %4410 }
 0x35d   : > { %v3328_v50 = vmax.f32 %v3326_v32, %v3327_v10  ;;  %v2967_v44 = vsel %vm2650_vm9, %v1844_v37, -inf  ;;  %v2032_v24 = vcombine.high %v21109_v28, %v21109_v28  ;;  %v2957_v55 = vmax.f32 %v2955_v36, %v2956_v29 }
 0x35e   : > { %v3937_v16 = vmax.f32 %v3935_v19, %v3936_v3  ;;  %v2968_v26 = vrot.slane %v2967_v44, 4  ;;  %v4477_v1 = vsel %vm4428_vm11, %v16830_v34, %v21151_v48  ;;  %v2977_v60 = vrot.slane %v2976_v62, 2 }
 0x35f   : > { %v3329_v61 = vrot.slane %v3328_v50, 1  ;;  %v3957_v10 = vrot.slane %v3956_v6, 2  ;;  %v3289_v32 = vsel %vm2672_vm10, %v2032_v24, -inf  ;;  %v2958_v13 = vrot.slane %v2957_v55, 1 }
 0x360   : > { %v3938_v43 = vrot.slane %v3937_v16, 1  ;;  %v2969_v35 = vmax.f32 %v2967_v44, %v2968_v26  ;;  %v17020_v37 = vmax.f32 %v4782_v33, 0.0  ;;  %v2978_v28 = vmax.f32 %v2976_v62, %v2977_v60 }
 0x361   : > { %v3330_v41 = vmax.f32 %v3328_v50, %v3329_v61  ;;  %v3958_v19 = vmax.f32 %v3956_v6, %v3957_v10  ;;  %v3290_v36 = vrot.slane %v3289_v32, 4  ;;  %v2959_v29 = vmax.f32 %v2957_v55, %v2958_v13 }
 0x362   : > { %v3939_v3 = vmax.f32 %v3937_v16, %v3938_v43  ;;  %v2970_v20 = vrot.slane %v2969_v35, 2  ;;  %v21152_v34 = vmax.f32 %v16946_v25, 0.0  ;;  %v4784_v24 = vadd.f32 %v21126_v46, %v4676_v56  ;;  %v21154_v56 = vld [vmem:[#allocation65_spill] sm:$0xff] }
 0x363   : > { %v4669_v9 = vmax.f32 %v3330_v41, %v4477_v1  ;;  %v2979_v22 = vrot.slane %v2978_v28, 1  ;;  %v3959_v61 = vrot.slane %v3958_v19, 1  ;;  %v21153_v26 = vmax.f32 %v16949_v63, 0.0  ;;  %4204 = vrot.lane.b32.xlu0 %v2959_v29, %s13725_s12  ;;  %v17039_v41 = vpop.permute.xlu1 %4200 }
 0x364   : > { %v17024_v54 = vrot.slane %v21152_v34, 7  ;;  %4414 = vrot.lane.b32.xlu1 %v3939_v3, %s13725_s12  ;;  %v2971_v33 = vmax.f32 %v2969_v35, %v2970_v20  ;;  %v3291_v62 = vmax.f32 %v3289_v32, %v3290_v36  ;;  %v5190_v44 = vrot.slane %v17020_v37, 7  ;;  %21155 = vst [vmem:[#allocation23_spill] sm:$0xff] %v17039_v41  ;;  %v21169_v20 = vld [vmem:[#allocation57_spill] sm:$0xff] }
 0x365   : > { %v17029_v50 = vrot.slane %v21153_v26, 7  ;;  %v4777_v13 = vadd.f32 %v15284_v21, %v4669_v9  ;;  %v4486_v55 = vsel %vm4428_vm11, %v21154_v56, %v16805_v4  ;;  %v2980_v16 = vmax.f32 %v2978_v28, %v2979_v22  ;;  %v17041_v29 = vpop.permute.xlu0 %12725  ;;  %v21158_v4 = vld [vmem:[#allocation87_spill] sm:$0xff]  ;;  %v21159_v28 = vld [vmem:[#allocation82_spill] sm:$0xff]  ;;  %v21168_v9 = vld [vmem:[#allocation60_spill] sm:$0xff] }
 0x366   : > { %v3960_v60 = vmax.f32 %v3958_v19, %v3959_v61  ;;  %v2972_v10 = vrot.slane %v2971_v33, 1  ;;  %v3292_v43 = vrot.slane %v3291_v62, 2  ;;  %21156 = vst [vmem:[#allocation102_spill] sm:$0xff] %v17041_v29  ;;  %v17046_v35 = vmax.f32 %v4784_v24, 0.0  ;;  %v21161_v24 = vld [vmem:[#allocation84_spill] sm:$0xff] }
 0x367   : > { %v4873_v1 = vmax.f32 %v4777_v13, 0.0  ;;  %v4678_v22 = vmax.f32 %v21158_v4, %v4486_v55  ;;  %4208 = vrot.lane.b32.xlu0 %v2980_v16, %s13725_s12  ;;  %v21160_v61 = vmov %v21152_v34  ;;  %v21162_v13 = vrot.slane %v21161_v24, 6  ;;  %v21163_v55 = vld [vmem:[#allocation92_spill] sm:$0xff] }
 0x368   : > { %21157 = vst [vmem:[#allocation112_spill] sm:$0xff] %v17046_v35  ;;  %4418 = vrot.lane.b32.xlu1 %v3960_v60, %s13725_s12  ;;  %v3293_v3 = vmax.f32 %v3291_v62, %v3292_v43  ;;  %v5191_v26 = vsel %vm4986_vm12, %v5190_v44, %v21160_v61  ;;  %v17066_v4 = vmax.f32 %v2971_v33, %v2972_v10  ;;  %v21165_v60 = vld [vmem:[#allocation116_spill] sm:$0xff]  ;;  %v21166_v62 = vrot.slane %v21094_v51, 4 }
 0x369   : > { %v5049_v19 = vsel %vm4986_vm12, %v21159_v28, %v4873_v1  ;;  %v4490_v1 = vsel %vm4428_vm11, %v21163_v55, %v16907_v47  ;;  %v5016_v25 = vrot.slane %v21096_v45, 2  ;;  %v5192_v44 = vrot.slane %v17046_v35, 6 }
 0x36a   : > { %v17061_v56 = vsel %vm4989_vm13, %v21162_v13, %v5049_v19  ;;  %21164 = vst [vmem:[#allocation79_spill] sm:$0xff] %v17066_v4  ;;  %v3294_v16 = vrot.slane %v3293_v3, 1  ;;  %v5013_v43 = vsel %vm4995_vm15, %v21166_v62, %v21165_v60  ;;  %v5014_v28 = vrot.slane %v21101_v59, 3  ;;  %v21167_v60 = vld [vmem:[#allocation9_spill] sm:$0xff] }
 0x36b   : > { %v5018_v19 = vrot.slane %v21098_v23, 1  ;;  %v5042_v61 = vrot.slane %v16193_v7, 3  ;;  %v5342_v47 = vrot.slane %v17046_v35, 7  ;;  %v4786_v33 = vadd.f32 %v21126_v46, %v4678_v22 }
 0x36c   : > { %4206 = vrot.lane.b32.xlu1 %v17066_v4, %s13725_s12  ;;  %v5044_v55 = vrot.slane %v16196_v58, 2  ;;  %v4682_v62 = vmax.f32 %v21167_v60, %v4490_v1  ;;  %v4492_v36 = vsel %vm4428_vm11, %v21168_v9, %v16941_v11  ;;  %v4494_v32 = vsel %vm4428_vm11, %v21169_v20, %v16976_v52  ;;  %v21170_v4 = vld [vmem:[#allocation49_spill] sm:$0xff] }
 0x36d   : > { %v5015_v22 = vsel %vm4998_vm0, %v5014_v28, %v5013_v43  ;;  %v3295_v6 = vmax.f32 %v3293_v3, %v3294_v16  ;;  %v20652_v34 = vunpack.i.h.bf16 %v17041_v29  ;;  %v5041_v1 = vsel %vm4995_vm15, %v21171_v12, %v21170_v4  ;;  %v21173_v43 = vld [vmem:[#allocation119_spill] sm:$0xff] }
 0x36e   : > { %v4271_v24 = vpop.permute.xlu1 %4270  ;;  %v4373_v13 = vpop.permute.xlu0 %4372  ;;  %v5017_v10 = vsel %vm5001_vm1, %v5016_v25, %v5015_v22  ;;  %v5043_v9 = vsel %vm4998_vm0, %v5042_v61, %v5041_v1  ;;  %v5046_v52 = vrot.slane %v16271_v2, 1  ;;  %v21172_v3 = vunpack.i.l.bf16 %v17041_v29  ;;  %v21179_v22 = vld [vmem:[#allocation111_spill] sm:$0xff] }
 0x36f   : > { %v4472_v60 = vsel %vm4428_vm11, %v16688_v14, %v4271_v24  ;;  %v5019_v11 = vsel %vm5004_vm2, %v5018_v19, %v5017_v10  ;;  %v5045_v20 = vsel %vm5001_vm1, %v5044_v55, %v5043_v9  ;;  %v21174_v12 = vrot.slane %v15796_v40, 4  ;;  %v21175_v14 = vld [vmem:[#allocation28_spill] sm:$0xff] }
 0x370   : > { %4276 = vrot.lane.b32.xlu1 %v3295_v6, %s13725_s12  ;;  %v5723_v16 = vsel %vm708_vm7, %v5019_v11, %v21172_v3  ;;  %v21176_v25 = vrot.slane %v21115_v27, 4  ;;  %v5047_v19 = vsel %vm5004_vm2, %v5046_v52, %v5045_v20  ;;  %v21177_v6 = vrot.slane %v15825_v15, 3  ;;  %v21180_v11 = vld [vmem:[#allocation59_spill] sm:$0xff]  ;;  %v21223_v15 = vld [vmem:[#allocation13_spill] sm:$0xff] }
 0x371   : > { %v4996_v4 = vsel %vm4995_vm15, %v21174_v12, %v21173_v43  ;;  %v5003_v10 = vrot.slane %v15925_v18, 1  ;;  %v21178_v24 = vrot.slane %v21119_v53, 3  ;;  %v4684_v1 = vmax.f32 %v21179_v22, %v4492_v36  ;;  %v21182_v12 = vld [vmem:[#allocation18_spill] sm:$0xff] }
 0x372   : > { %v5027_v28 = vsel %vm4995_vm15, %v21176_v25, %v21175_v14  ;;  %v4999_v61 = vsel %vm4998_vm0, %v21177_v6, %v4996_v4  ;;  %v4506_v9 = vsel %vm4428_vm11, %v21180_v11, %v4373_v13  ;;  %v5724_v3 = vsel %vm708_vm7, %v5047_v19, %v20652_v34  ;;  %v4289_v43 = vpop.permute.xlu0 %4288  ;;  %v21183_v14 = vld [vmem:[#allocation27_spill] sm:$0xff]  ;;  %v21185_v11 = vld [vmem:[#allocation20_spill] sm:$0xff] }
 0x373   : > { %v5029_v55 = vsel %vm4998_vm0, %v21178_v24, %v5027_v28  ;;  %v21181_v52 = vrot.slane %v21121_v49, 2  ;;  %v4686_v4 = vmax.f32 %v21182_v12, %v4494_v32  ;;  %v4664_v25 = vmax.f32 %v21183_v14, %v4472_v60 }
 0x374   : > { %v5740_v6 = vpack.c.bf16 %v5724_v3, %v5723_v16  ;;  %v5032_v28 = vrot.slane %v21125_v31, 1  ;;  %v17136_v36 = vsel %vm4989_vm13, %v5192_v44, %v5191_v26  ;;  %v17138_v13 = vmax.f32 %v4786_v33, 0.0  ;;  %v12954_v26 = vld [vmem:[%s20412_s3 + $0x200] ss:$16 sps:$4 sm:$0xff]   ;;  %v12957_v44 = vld [vmem:[%s20412_s3 + $0x208] ss:$16 sps:$4 sm:$0xff]  }
 0x375   : > { %v5031_v20 = vsel %vm5001_vm1, %v21181_v52, %v5029_v55  ;;  %v4790_v24 = vadd.f32 %v21126_v46, %v4682_v62  ;;  %v21184_v19 = vrot.slane %v21123_v57, 2  ;;  %v4698_v32 = vmax.f32 %v21185_v11, %v4506_v9  ;;  %v21187_v9 = vld [vmem:[#allocation83_spill] sm:$0xff]  ;;  %v12965_v52 = vld [vmem:[%s20412_s3 + $0x22c] ss:$16 sps:$4 sm:$0xff]   ;;  %v21210_v57 = vld [vmem:[#allocation41_spill] sm:$0xff] }
 0x376   : > { %7598 = vmatprep.mubr.bf16.mxu0 %v5740_v6  ;;  %7863 = vmatprep.mubr.bf16.mxu1 %v5740_v6  ;;  %v5033_v16 = vsel %vm5004_vm2, %v5032_v28, %v5031_v20  ;;  %v17156_v33 = vsel %vm4986_vm12, %v5342_v47, %v17020_v37  ;;  %v4792_v62 = vadd.f32 %v21126_v46, %v4684_v1  ;;  %v12962_v3 = vld [vmem:[%s20412_s3 + $0x224] ss:$16 sps:$4 sm:$0xff]   ;;  %v21201_v49 = vrot.slane %v16670_v0, 5 }
 0x377   : > { %v5002_v22 = vsel %vm5001_vm1, %v21184_v19, %v4999_v61  ;;  %21186 = vst [vmem:[#allocation94_spill] sm:$0xff] %v17156_v33  ;;  %v4794_v20 = vadd.f32 %v21126_v46, %v4686_v4  ;;  %v4772_v12 = vadd.f32 %v21126_v46, %v4664_v25  ;;  %v4478_v47 = vsel %vm4428_vm11, %v21151_v48, %v4289_v43  ;;  %v12960_v4 = vld [vmem:[%s20412_s3 + $0x220] ss:$16 sps:$4 sm:$0xff]   ;;  %v12963_v48 = vld [vmem:[%s20412_s3 + $0x228] ss:$16 sps:$4 sm:$0xff]  }
 0x378   : > { %v5005_v60 = vsel %vm5004_vm2, %v5003_v10, %v5002_v22  ;;  %v3660_v10 = vsel %vm2650_vm9, %v21187_v9, -inf  ;;  %v17174_v19 = vmax.f32 %v4790_v24, 0.0  ;;  %v4359_v22 = vpop.permute.xlu0 %4358  ;;  %v4806_v25 = vadd.f32 %v21126_v46, %v4698_v32  ;;  %v12968_v43 = vld [vmem:[%s20412_s3 + $0x244] ss:$16 sps:$4 sm:$0xff]   ;;  %v21188_v24 = vld [vmem:[#allocation8_spill] sm:$0xff] }
 0x379   : > { %v5739_v61 = vpack.c.bf16 %v5033_v16, %v5005_v60  ;;  %v3661_v1 = vrot.slane %v3660_v10, 4  ;;  %v3576_v60 = vsel %vm2650_vm9, %v21188_v24, -inf  ;;  %v21189_v16 = vld [vmem:[#allocation107_spill] sm:$0xff]  ;;  %v17191_v32 = vmax.f32 %v4792_v62, 0.0 }
 0x37a   : > { %v17199_v34 = vmax.f32 %v4794_v20, 0.0  ;;  %v17201_v24 = vmax.f32 %v4772_v12, 0.0  ;;  %v4502_v62 = vsel %vm4428_vm11, %v4359_v22, %v16784_v30  ;;  %v17211_v20 = vmax.f32 %v4806_v25, 0.0  ;;  %v12969_v30 = vld [vmem:[%s20412_s3 + $0x248] ss:$16 sps:$4 sm:$0xff]   ;;  %v21193_v6 = vld [vmem:[#allocation43_spill] sm:$0xff] }
 0x37b   : > { %7599 = vmatmul.mubr.bf16.vlgmr.msra.gmra.mrb[24].mxu0 %v5739_v61  ;;  %7864 = vmatmul.mubr.bf16.vlgmr.msra.gmra.mrb[24].mxu1 %v5739_v61  ;;  %v3662_v11 = vmax.f32 %v3660_v10, %v3661_v1  ;;  %v3912_v61 = vsel %vm2650_vm9, %v21189_v16, -inf  ;;  %v12971_v10 = vld [vmem:[%s20412_s3 + $0x24c] ss:$16 sps:$4 sm:$0xff]   ;;  %v4694_v33 = vmax.f32 %v21193_v6, %v4502_v62  ;;  %v12975_v6 = vld [vmem:[%s20412_s3 + $0x268] ss:$16 sps:$4 sm:$0xff]  }
 0x37c   : > { %7620 = vmatpush1.bf16.msra.mxu0 %v12954_v26  ;;  %7885 = vmatpush1.bf16.msra.mxu1 %v12957_v44  ;;  %v21190_v26 = vld [vmem:[#allocation29_spill] sm:$0xff]  ;;  %v21191_v1 = vld [vmem:[#allocation40_spill] sm:$0xff]  ;;  %21192 = vst [vmem:[#allocation68_spill] sm:$0xff] %v17201_v24 }
 0x37d   : > { %v4670_v44 = vmax.f32 %v21190_v26, %v4478_v47  ;;  %7621 = vmatprep.subr.bf16.mxu0 %v12962_v3  ;;  %7886 = vmatprep.subr.bf16.mxu1 %v12965_v52  ;;  %v2932_v28 = vsel %vm2650_vm9, %v21191_v1, -inf  ;;  %v3663_v16 = vrot.slane %v3662_v11, 2  ;;  %v12966_v52 = vld [vmem:[%s20412_s3 + $0x240] ss:$16 sps:$4 sm:$0xff]   ;;  %v3577_v47 = vrot.slane %v3576_v60, 4 }
 0x37e   : > { %v3913_v26 = vrot.slane %v3912_v61, 4  ;;  %v2933_v9 = vrot.slane %v2932_v28, 4  ;;  %v12977_v25 = vld [vmem:[%s20412_s3 + $0x26c] ss:$16 sps:$4 sm:$0xff]   ;;  %v5218_v1 = vrot.slane %v17211_v20, 7 }
 0x37f   : > { %v3664_v12 = vmax.f32 %v3662_v11, %v3663_v16  ;;  %v4778_v55 = vadd.f32 %v21126_v46, %v4670_v44  ;;  %v3578_v62 = vmax.f32 %v3576_v60, %v3577_v47  ;;  %v21194_v11 = vld [vmem:[#allocation99_spill] sm:$0xff]  ;;  %v17246_v47 = vadd.f32 %v21126_v46, %v4694_v33 }
 0x380   : > { %7622 = vmatpush1.bf16.msra.mxu0 %v12960_v4  ;;  %7887 = vmatpush1.bf16.msra.mxu1 %v12963_v48  ;;  %v4379_v29 = vpop.permute.xlu0 %4378  ;;  %v12974_v4 = vld [vmem:[%s20412_s3 + $0x264] ss:$16 sps:$4 sm:$0xff]   ;;  %v3914_v14 = vmax.f32 %v3912_v61, %v3913_v26  ;;  %v21199_v33 = vrot.slane %v16653_v17, 6 }
 0x381   : > { %7623 = vmatprep.subr.bf16.mxu0 %v12968_v43  ;;  %7888 = vmatprep.subr.bf16.mxu1 %v12971_v10  ;;  %v3665_v44 = vrot.slane %v3664_v12, 1  ;;  %v4501_v43 = vsel %vm4428_vm11, %v16876_v42, %v4359_v22  ;;  %v12972_v10 = vld [vmem:[%s20412_s3 + $0x260] ss:$16 sps:$4 sm:$0xff]   ;;  %v4508_v48 = vsel %vm4428_vm11, %v21194_v11, %v4379_v29  ;;  %v12980_v42 = vld [vmem:[%s20412_s3 + $0x284] ss:$16 sps:$4 sm:$0xff]   ;;  %v2934_v22 = vmax.f32 %v2932_v28, %v2933_v9 }
 0x382   : > { %v4874_v61 = vmax.f32 %v4778_v55, 0.0  ;;  %v12983_v29 = vld [vmem:[%s20412_s3 + $0x28c] ss:$16 sps:$4 sm:$0xff]   ;;  %v21196_v28 = vld [vmem:[#allocation15_spill] sm:$0xff]  ;;  %v3579_v16 = vrot.slane %v3578_v62, 2  ;;  %v3915_v31 = vrot.slane %v3914_v14, 2 }
 0x383   : > { %v3666_v3 = vmax.f32 %v3664_v12, %v3665_v44  ;;  %v21197_v9 = vrot.slane %v21196_v28, 4  ;;  %v21198_v44 = vld [vmem:[#allocation125_spill] sm:$0xff] }
 0x384   : > { %7624 = vmatpush1.bf16.msra.mxu0 %v12966_v52  ;;  %7889 = vmatpush1.bf16.msra.mxu1 %v12969_v30  ;;  %v4385_v26 = vpop.permute.xlu0 %4384  ;;  %v5336_v52 = vrot.slane %v16714_v8, 3  ;;  %v21195_v30 = vld [vmem:[#allocation75_spill] sm:$0xff]  ;;  %v3580_v27 = vmax.f32 %v3578_v62, %v3579_v16  ;;  %v17300_v18 = vmax.f32 %v3914_v14, %v3915_v31  ;;  %v21214_v14 = vld [vmem:[#allocation21_spill] sm:$0xff] }
 0x385   : > { %7625 = vmatprep.subr.bf16.mxu0 %v12974_v4  ;;  %7890 = vmatprep.subr.bf16.mxu1 %v12977_v25  ;;  %v4693_v12 = vmax.f32 %v3666_v3, %v4501_v43  ;;  %v4510_v11 = vsel %vm4428_vm11, %v21195_v30, %v4385_v26  ;;  %v3305_v55 = vmax.f32 %v21196_v28, %v21197_v9  ;;  %v21200_v25 = vld [vmem:[#allocation22_spill] sm:$0xff]  ;;  %v21202_v43 = vmax.f32 %v16949_v63, 0.0  ;;  %v12978_v28 = vld [vmem:[%s20412_s3 + $0x280] ss:$16 sps:$4 sm:$0xff]  }
 0x386   : > { %v5331_v4 = vsel %vm4989_vm13, %v21199_v33, %v21198_v44  ;;  %v4700_v60 = vmax.f32 %v21200_v25, %v4508_v48  ;;  %v12981_v48 = vld [vmem:[%s20412_s3 + $0x288] ss:$16 sps:$4 sm:$0xff]   ;;  %v2935_v9 = vrot.slane %v2934_v22, 2  ;;  %v21203_v44 = vld [vmem:[#allocation85_spill] sm:$0xff]  ;;  %v12989_v25 = vld [vmem:[%s20412_s3 + $0x2ac] ss:$16 sps:$4 sm:$0xff]  }
 0x387   : > { %v5333_v3 = vsel %vm4992_vm14, %v21201_v49, %v5331_v4  ;;  %v17268_v26 = vsel %vm4986_vm12, %v5218_v1, %v21202_v43  ;;  %v4801_v30 = vadd.f32 %v15284_v21, %v4693_v12  ;;  %v21204_v49 = vrot.slane %v21203_v44, 4  ;;  %v12986_v4 = vld [vmem:[%s20412_s3 + $0x2a4] ss:$16 sps:$4 sm:$0xff]  }
 0x388   : > { %7626 = vmatpush1.bf16.msra.mxu0 %v12972_v10  ;;  %7891 = vmatpush1.bf16.msra.mxu1 %v12975_v6  ;;  %v5063_v1 = vsel %vm4986_vm12, %v17024_v54, %v4874_v61  ;;  %v4898_v12 = vmax.f32 %v17246_v47, 0.0  ;;  %v21205_v10 = vld [vmem:[#allocation115_spill] sm:$0xff]  ;;  %v4319_v33 = vpop.permute.xlu0 %4318  ;;  %v3306_v61 = vrot.slane %v3305_v55, 2  ;;  %v5364_v62 = vrot.slane %v21214_v14, 3 }
 0x389   : > { %v5335_v63 = vsel %vm4995_vm15, %v21204_v49, %v5333_v3  ;;  %v4702_v6 = vmax.f32 %v21205_v10, %v4510_v11  ;;  %7627 = vmatprep.subr.bf16.mxu0 %v12980_v42  ;;  %7892 = vmatprep.subr.bf16.mxu1 %v12983_v29  ;;  %v4897_v43 = vmax.f32 %v4801_v30, 0.0  ;;  %v21206_v49 = vld [vmem:[#allocation58_spill] sm:$0xff]  ;;  %v21207_v47 = vld [vmem:[#allocation35_spill] sm:$0xff]  ;;  %v4808_v29 = vadd.f32 %v21126_v46, %v4700_v60  ;;  %v21209_v10 = vld [vmem:[#allocation88_spill] sm:$0xff] }
 0x38a   : > { %v5337_v3 = vsel %vm4998_vm0, %v5336_v52, %v5335_v63  ;;  %v4488_v54 = vsel %vm4428_vm11, %v21206_v49, %v4319_v33  ;;  %v21208_v11 = vrot.slane %v21207_v47, 2  ;;  %v12984_v30 = vld [vmem:[%s20412_s3 + $0x2a0] ss:$16 sps:$4 sm:$0xff]   ;;  %v12987_v63 = vld [vmem:[%s20412_s3 + $0x2a8] ss:$16 sps:$4 sm:$0xff]   ;;  %v17310_v33 = vmax.f32 %v2934_v22, %v2935_v9 }
 0x38b   : > { %v4680_v53 = vmax.f32 %v21209_v10, %v4488_v54  ;;  %v5077_v52 = vsel %vm4986_vm12, %v21210_v57, %v4897_v43  ;;  %v21211_v60 = vld [vmem:[#allocation50_spill] sm:$0xff]  ;;  %v5092_v57 = vrot.slane %v17211_v20, 6  ;;  %v4810_v49 = vadd.f32 %v21126_v46, %v4702_v6  ;;  %v12992_v22 = vld [vmem:[%s20412_s3 + $0x2c4] ss:$16 sps:$4 sm:$0xff]  }
 0x38c   : > { %v17296_v42 = vsel %vm5001_vm1, %v21208_v11, %v5337_v3  ;;  %7628 = vmatpush1.bf16.msra.mxu0 %v12978_v28  ;;  %7893 = vmatpush1.bf16.msra.mxu1 %v12981_v48  ;;  %v21212_v3 = vld [vmem:[#allocation106_spill] sm:$0xff]  ;;  %v21215_v28 = vld [vmem:[#allocation89_spill] sm:$0xff]  ;;  %v17339_v47 = vmax.f32 %v4808_v29, 0.0 }
 0x38d   : > { %v21213_v16 = vrot.slane %v21212_v3, 6  ;;  %v21216_v48 = vrot.slane %v21215_v28, 6  ;;  %7629 = vmatprep.subr.bf16.mxu0 %v12986_v4  ;;  %7894 = vmatprep.subr.bf16.mxu1 %v12989_v25  ;;  %v12995_v9 = vld [vmem:[%s20412_s3 + $0x2cc] ss:$16 sps:$4 sm:$0xff]   ;;  %v21217_v54 = vld [vmem:[#allocation33_spill] sm:$0xff] }
 0x38e   : > { %v21218_v11 = vrot.slane %v21217_v54, 5  ;;  %v21219_v28 = vld [vmem:[#allocation17_spill] sm:$0xff]  ;;  %v21221_v25 = vld [vmem:[#allocation48_spill] sm:$0xff]  ;;  %21222 = vst [vmem:[#allocation101_spill] sm:$0xff] %v17339_v47 }
 0x38f   : > { %v5359_v31 = vsel %vm4989_vm13, %v21213_v16, %v21211_v60  ;;  %v17321_v43 = vsel %vm4989_vm13, %v21216_v48, %v5077_v52  ;;  %v4788_v60 = vadd.f32 %v21126_v46, %v4680_v53  ;;  %v4391_v52 = vpop.permute.xlu0 %4390  ;;  %v3307_v16 = vmax.f32 %v3305_v55, %v3306_v61 }
 0x390   : > { %v5361_v10 = vsel %vm4992_vm14, %v21218_v11, %v5359_v31  ;;  %v21220_v6 = vrot.slane %v21219_v28, 4  ;;  %v3310_v48 = vsel %vm2650_vm9, %v21221_v25, -inf  ;;  %v4512_v40 = vsel %vm4428_vm11, %v21223_v15, %v4391_v52  ;;  %v12990_v31 = vld [vmem:[%s20412_s3 + $0x2c0] ss:$16 sps:$4 sm:$0xff]   ;;  %7630 = vmatpush1.bf16.msra.mxu0 %v12984_v30  ;;  %7895 = vmatpush1.bf16.msra.mxu1 %v12987_v63  ;;  %v12998_v52 = vld [vmem:[%s20412_s3 + $0x2e4] ss:$16 sps:$4 sm:$0xff]  }
 0x391   : > { %v21224_v11 = vld [vmem:[#allocation25_spill] sm:$0xff]  ;;  %v21225_v55 = vrot.slane %v21094_v51, 6  ;;  %v17358_v15 = vmax.f32 %v4788_v60, 0.0  ;;  %7631 = vmatprep.subr.bf16.mxu0 %v12992_v22  ;;  %7896 = vmatprep.subr.bf16.mxu1 %v12995_v9  ;;  %v3917_v30 = vrot.slane %v17300_v18, 1  ;;  %v3311_v63 = vrot.slane %v3310_v48, 4  ;;  %v21230_v60 = vld [vmem:[#allocation118_spill] sm:$0xff] }
 0x392   : > { %v5363_v4 = vsel %vm4995_vm15, %v21220_v6, %v5361_v10  ;;  %v21226_v10 = vrot.slane %v17020_v37, 6  ;;  %v5091_v6 = vsel %vm4986_vm12, %v17029_v50, %v4898_v12  ;;  %v3581_v50 = vrot.slane %v3580_v27, 1  ;;  %v13001_v12 = vld [vmem:[%s20412_s3 + $0x2ec] ss:$16 sps:$4 sm:$0xff]  }
 0x393   : > { %v5365_v53 = vsel %vm4998_vm0, %v5364_v62, %v5363_v4  ;;  %v17351_v61 = vsel %vm4989_vm13, %v21225_v55, %v21224_v11  ;;  %21227 = vst [vmem:[#allocation66_spill] sm:$0xff] %v17358_v15  ;;  %v12993_v62 = vld [vmem:[%s20412_s3 + $0x2c8] ss:$16 sps:$4 sm:$0xff]   ;;  %v21228_v4 = vrot.slane %v16848_v38, 2  ;;  %v4704_v11 = vmax.f32 %v21230_v60, %v4512_v40 }
 0x394   : > { %v5065_v29 = vsel %vm4989_vm13, %v21226_v10, %v5063_v1  ;;  %v17371_v1 = vmax.f32 %v4810_v49, 0.0  ;;  %v2937_v55 = vrot.slane %v17310_v33, 1  ;;  %v5198_v22 = vrot.slane %v17174_v19, 3  ;;  %7632 = vmatpush1.bf16.msra.mxu0 %v12990_v31  ;;  %7897 = vmatpush1.bf16.msra.mxu1 %v12993_v62  ;;  %v13007_v31 = vld [vmem:[%s20412_s3 + $0x30c] ss:$16 sps:$4 sm:$0xff]  }
 0x395   : > { %v17369_v37 = vsel %vm5001_vm1, %v21228_v4, %v5365_v53  ;;  %v21231_v53 = vrot.slane %v17138_v13, 5  ;;  %v5220_v9 = vrot.slane %v17339_v47, 6  ;;  %v5370_v10 = vrot.slane %v17339_v47, 7  ;;  %7633 = vmatprep.subr.bf16.mxu0 %v12998_v52  ;;  %7898 = vmatprep.subr.bf16.mxu1 %v13001_v12  ;;  %v21233_v52 = vld [vmem:[#allocation51_spill] sm:$0xff] }
 0x396   : > { %21229 = vst [vmem:[#allocation63_spill] sm:$0xff] %v17369_v37  ;;  %v3308_v38 = vrot.slane %v3307_v16, 1  ;;  %v21232_v51 = vrot.slane %v17046_v35, 5  ;;  %v17393_v60 = vsel %vm4989_vm13, %v5092_v57, %v5091_v6  ;;  %v5196_v25 = vrot.slane %v17358_v15, 4  ;;  %v13004_v57 = vld [vmem:[%s20412_s3 + $0x304] ss:$16 sps:$4 sm:$0xff]  }
 0x397   : > { %v5195_v49 = vsel %vm4992_vm14, %v21231_v53, %v17136_v36  ;;  %v12996_v36 = vld [vmem:[%s20412_s3 + $0x2e0] ss:$16 sps:$4 sm:$0xff]   ;;  %v12999_v53 = vld [vmem:[%s20412_s3 + $0x2e8] ss:$16 sps:$4 sm:$0xff]   ;;  %v17404_v35 = vmax.f32 %v3580_v27, %v3581_v50  ;;  %v17413_v6 = vmax.f32 %v17300_v18, %v3917_v30  ;;  %v3312_v62 = vmax.f32 %v3310_v48, %v3311_v63 }
 0x398   : > { %v17390_v40 = vsel %vm4992_vm14, %v21232_v51, %v5065_v29  ;;  %v5222_v51 = vrot.slane %v17371_v1, 5  ;;  %v4397_v29 = vpop.permute.xlu0 %4396  ;;  %v4812_v41 = vadd.f32 %v21126_v46, %v4704_v11  ;;  %v17418_v27 = vmax.f32 %v17310_v33, %v2937_v55  ;;  %v13002_v48 = vld [vmem:[%s20412_s3 + $0x300] ss:$16 sps:$4 sm:$0xff]   ;;  %v21235_v11 = vld [vmem:[#allocation76_spill] sm:$0xff]  ;;  %7634 = vmatpush1.bf16.msra.mxu0 %v12996_v36  ;;  %7899 = vmatpush1.bf16.msra.mxu1 %v12999_v53  ;;  %v21241_v18 = vld [vmem:[#allocation122_spill] sm:$0xff] }
 0x399   : > { %v3268_v50 = vsel %vm2650_vm9, %v21233_v52, -inf  ;;  %v5221_v12 = vsel %vm4989_vm13, %v5220_v9, %v17268_v26  ;;  %v17426_v37 = vsel %vm4986_vm12, %v5370_v10, %v17211_v20  ;;  %v17432_v30 = vmax.f32 %v3307_v16, %v3308_v38  ;;  %v13005_v20 = vld [vmem:[%s20412_s3 + $0x308] ss:$16 sps:$4 sm:$0xff]   ;;  %v13010_v26 = vld [vmem:[%s20412_s3 + $0x324] ss:$16 sps:$4 sm:$0xff]   ;;  %7635 = vmatprep.subr.bf16.mxu0 %v13004_v57  ;;  %7900 = vmatprep.subr.bf16.mxu1 %v13007_v31 }
 0x39a   : > { %v4514_v55 = vsel %vm4428_vm11, %v21235_v11, %v4397_v29  ;;  %v5197_v38 = vsel %vm4995_vm15, %v5196_v25, %v5195_v49  ;;  %v13013_v9 = vld [vmem:[%s20412_s3 + $0x32c] ss:$16 sps:$4 sm:$0xff]   ;;  %v5223_v10 = vsel %vm4992_vm14, %v5222_v51, %v5221_v12  ;;  %v3313_v36 = vrot.slane %v3312_v62, 2  ;;  %v21238_v57 = vld [vmem:[#allocation31_spill] sm:$0xff] }
 0x39b   : > { %21234 = vst [vmem:[#allocation100_spill] sm:$0xff] %v17432_v30  ;;  %v5294_v53 = vrot.slane %v21098_v23, 3  ;;  %v3269_v29 = vrot.slane %v3268_v50, 4  ;;  %v17450_v52 = vmax.f32 %v4812_v41, 0.0  ;;  %v21236_v11 = vld [vmem:[#allocation110_spill] sm:$0xff]  ;;  %v21237_v25 = vrot.slane %v21101_v59, 5 }
 0x39c   : > { %v4403_v16 = vpop.permute.xlu0 %4402  ;;  %v21239_v31 = vrot.slane %v16144_v5, 6  ;;  %v21240_v51 = vld [vmem:[#allocation24_spill] sm:$0xff]  ;;  %v5199_v41 = vsel %vm4998_vm0, %v5198_v22, %v5197_v38  ;;  %v5322_v23 = vrot.slane %v16271_v2, 3  ;;  %7636 = vmatpush1.bf16.msra.mxu0 %v13002_v48  ;;  %7901 = vmatpush1.bf16.msra.mxu1 %v13005_v20  ;;  %v13016_v20 = vld [vmem:[%s20412_s3 + $0x344] ss:$16 sps:$4 sm:$0xff]   ;;  %v21250_v2 = vrot.slane %v17199_v34, 1 }
 0x39d   : > { %v4516_v63 = vsel %vm4428_vm11, %v21236_v11, %v4403_v16  ;;  %v5291_v49 = vsel %vm4992_vm14, %v21237_v25, %v17351_v61  ;;  %v4706_v12 = vmax.f32 %v21240_v51, %v4514_v55  ;;  %v13008_v61 = vld [vmem:[%s20412_s3 + $0x320] ss:$16 sps:$4 sm:$0xff]   ;;  %v13011_v55 = vld [vmem:[%s20412_s3 + $0x328] ss:$16 sps:$4 sm:$0xff]   ;;  %7637 = vmatprep.subr.bf16.mxu0 %v13010_v26  ;;  %7902 = vmatprep.subr.bf16.mxu1 %v13013_v9  ;;  %v21245_v26 = vrot.slane %v17191_v32, 2 }
 0x39e   : > { %v5317_v33 = vsel %vm4989_vm13, %v21239_v31, %v21238_v57  ;;  %v4708_v4 = vmax.f32 %v21241_v18, %v4516_v63  ;;  %v21242_v18 = vrot.slane %v21096_v45, 4  ;;  %v21243_v63 = vrot.slane %v16193_v7, 5  ;;  %v13019_v57 = vld [vmem:[%s20412_s3 + $0x34c] ss:$16 sps:$4 sm:$0xff]  }
 0x39f   : > { %v3314_v31 = vmax.f32 %v3312_v62, %v3313_v36  ;;  %v3270_v51 = vmax.f32 %v3268_v50, %v3269_v29  ;;  %v5201_v9 = vsel %vm5001_vm1, %v21245_v26, %v5199_v41  ;;  %v21246_v25 = vrot.slane %v16196_v58, 4  ;;  %v13014_v50 = vld [vmem:[%s20412_s3 + $0x340] ss:$16 sps:$4 sm:$0xff]   ;;  %v21247_v36 = vld [vmem:[#allocation70_spill] sm:$0xff] }
 0x3a0   : > { %v5293_v22 = vsel %vm4995_vm15, %v21242_v18, %v5291_v49  ;;  %v5319_v38 = vsel %vm4992_vm14, %v21243_v63, %v5317_v33  ;;  %v4339_v48 = vpop.permute.xlu0 %4338  ;;  %v5224_v18 = vrot.slane %v17450_v52, 4  ;;  %v21244_v33 = vld [vmem:[#allocation95_spill] sm:$0xff]  ;;  %v4814_v16 = vadd.f32 %v21126_v46, %v4706_v12  ;;  %7638 = vmatpush1.bf16.msra.mxu0 %v13008_v61  ;;  %7903 = vmatpush1.bf16.msra.mxu1 %v13011_v55  ;;  %v13017_v12 = vld [vmem:[%s20412_s3 + $0x348] ss:$16 sps:$4 sm:$0xff]   ;;  %v13025_v55 = vld [vmem:[%s20412_s3 + $0x36c] ss:$16 sps:$4 sm:$0xff]  }
 0x3a1   : > { %v5295_v49 = vsel %vm4998_vm0, %v5294_v53, %v5293_v22  ;;  %v4495_v63 = vsel %vm4428_vm11, %v4339_v48, %v21244_v33  ;;  %v5321_v11 = vsel %vm4995_vm15, %v21246_v25, %v5319_v38  ;;  %v4816_v62 = vadd.f32 %v21126_v46, %v4708_v4  ;;  %v13022_v4 = vld [vmem:[%s20412_s3 + $0x364] ss:$16 sps:$4 sm:$0xff]   ;;  %7639 = vmatprep.subr.bf16.mxu0 %v13016_v20 }
 0x3a2   : > { %v2236_v53 = vcombine.high %v21247_v36, %v21247_v36  ;;  %v5070_v29 = vrot.slane %v17358_v15, 3  ;;  %v21248_v38 = vld [vmem:[#allocation45_spill] sm:$0xff]  ;;  %v5323_v26 = vsel %vm4998_vm0, %v5322_v23, %v5321_v11  ;;  %v4687_v61 = vmax.f32 %v17404_v35, %v4495_v63  ;;  %7904 = vmatprep.subr.bf16.mxu1 %v13019_v57 }
 0x3a3   : > { %v21249_v25 = vrot.slane %v21248_v38, 2  ;;  %v3315_v41 = vrot.slane %v3314_v31, 1  ;;  %v3271_v22 = vrot.slane %v3270_v51, 2  ;;  %v17527_v38 = vsel %vm5004_vm2, %v21250_v2, %v5201_v9  ;;  %v21251_v23 = vld [vmem:[#allocation97_spill] sm:$0xff] }
 0x3a4   : > { %v21252_v11 = vrot.slane %v21251_v23, 2  ;;  %v21253_v20 = vrot.slane %v17138_v13, 4  ;;  %v17539_v63 = vmax.f32 %v4814_v16, 0.0  ;;  %v17544_v36 = vsel %vm2672_vm10, %v2236_v53, -inf  ;;  %7640 = vmatpush1.bf16.msra.mxu0 %v13014_v50  ;;  %7905 = vmatpush1.bf16.msra.mxu1 %v13017_v12 }
 0x3a5   : > { %v17516_v48 = vsel %vm5001_vm1, %v21249_v25, %v5295_v49  ;;  %v17530_v49 = vsel %vm4995_vm15, %v5224_v18, %v5223_v10  ;;  %v17541_v25 = vmax.f32 %v4816_v62, 0.0  ;;  %v13020_v10 = vld [vmem:[%s20412_s3 + $0x360] ss:$16 sps:$4 sm:$0xff]   ;;  %v13023_v18 = vld [vmem:[%s20412_s3 + $0x368] ss:$16 sps:$4 sm:$0xff]   ;;  %v5072_v9 = vrot.slane %v17174_v19, 2  ;;  %7641 = vmatprep.subr.bf16.mxu0 %v13022_v4  ;;  %7906 = vmatprep.subr.bf16.mxu1 %v13025_v55 }
 0x3a6   : > { %v5325_v35 = vsel %vm5001_vm1, %v21252_v11, %v5323_v26  ;;  %v5069_v57 = vsel %vm4995_vm15, %v21253_v20, %v17390_v40  ;;  %v21254_v40 = vrot.slane %v17201_v24, 1  ;;  %v21255_v62 = vld [vmem:[#allocation93_spill] sm:$0xff]  ;;  %v4795_v12 = vadd.f32 %v15284_v21, %v4687_v61  ;;  %v13031_v11 = vld [vmem:[%s20412_s3 + $0x38c] ss:$16 sps:$4 sm:$0xff]  }
 0x3a7   : > { %v5071_v2 = vsel %vm4998_vm0, %v5070_v29, %v5069_v57  ;;  %v21256_v53 = vrot.slane %v21255_v62, 5  ;;  %v5054_v29 = vrot.slane %v16653_v17, 4  ;;  %v13028_v26 = vld [vmem:[%s20412_s3 + $0x384] ss:$16 sps:$4 sm:$0xff]   ;;  %v17573_v20 = vmax.f32 %v3270_v51, %v3271_v22  ;;  %v4409_v57 = vpop.permute.xlu0 %4408  ;;  %v21257_v24 = vld [vmem:[#allocation86_spill] sm:$0xff] }
 0x3a8   : > { %v17556_v16 = vsel %vm5004_vm2, %v21254_v40, %v5325_v35  ;;  %v17571_v35 = vmax.f32 %v3314_v31, %v3315_v41  ;;  %v3626_v40 = vrot.slane %v17544_v36, 4  ;;  %v17578_v4 = vsel %vm5001_vm1, %v5072_v9, %v5071_v2  ;;  %v13026_v41 = vld [vmem:[%s20412_s3 + $0x380] ss:$16 sps:$4 sm:$0xff]   ;;  %7642 = vmatpush1.bf16.msra.mxu0 %v13020_v10  ;;  %7907 = vmatpush1.bf16.msra.mxu1 %v13023_v18  ;;  %v13029_v9 = vld [vmem:[%s20412_s3 + $0x388] ss:$16 sps:$4 sm:$0xff]  }
 0x3a9   : > { %v5053_v50 = vsel %vm4992_vm14, %v21256_v53, %v17061_v56  ;;  %v5056_v55 = vrot.slane %v16670_v0, 3  ;;  %v4518_v31 = vsel %vm4428_vm11, %v21257_v24, %v4409_v57  ;;  %v5226_v51 = vrot.slane %v17539_v63, 3  ;;  %v21258_v56 = vld [vmem:[#allocation26_spill] sm:$0xff]  ;;  %v13034_v24 = vld [vmem:[%s20412_s3 + $0x3a4] ss:$16 sps:$4 sm:$0xff]   ;;  %7643 = vmatprep.subr.bf16.mxu0 %v13028_v26  ;;  %7908 = vmatprep.subr.bf16.mxu1 %v13031_v11 }
 0x3aa   : > { %v5055_v61 = vsel %vm4995_vm15, %v5054_v29, %v5053_v50  ;;  %v5228_v22 = vrot.slane %v17541_v25, 2  ;;  %v4710_v2 = vmax.f32 %v21258_v56, %v4518_v31  ;;  %v5058_v29 = vrot.slane %v21203_v44, 2  ;;  %v13037_v10 = vld [vmem:[%s20412_s3 + $0x3ac] ss:$16 sps:$4 sm:$0xff]   ;;  %v21259_v56 = vld [vmem:[#allocation91_spill] sm:$0xff] }
 0x3ab   : > { %v5057_v50 = vsel %vm4998_vm0, %v5056_v55, %v5055_v61  ;;  %v5082_v57 = vrot.slane %v21212_v3, 4  ;;  %v17600_v53 = vmax.f32 %v4795_v12, 0.0  ;;  %v5060_v18 = vrot.slane %v16714_v8, 1  ;;  %v17612_v58 = vpop.permute.xlu0 %4412 }
 0x3ac   : > { %v21260_v31 = vrot.slane %v21259_v56, 5  ;;  %v5084_v61 = vrot.slane %v21217_v54, 3  ;;  %v4818_v55 = vadd.f32 %v21126_v46, %v4710_v2  ;;  %v5059_v12 = vsel %vm5001_vm1, %v5058_v29, %v5057_v50  ;;  %7644 = vmatpush1.bf16.msra.mxu0 %v13026_v41  ;;  %7909 = vmatpush1.bf16.msra.mxu1 %v13029_v9  ;;  %v13040_v41 = vld [vmem:[%s20412_s3 + $0x3c4] ss:$16 sps:$4 sm:$0xff]   ;;  %v13043_v9 = vld [vmem:[%s20412_s3 + $0x3cc] ss:$16 sps:$4 sm:$0xff]  }
 0x3ad   : > { %v5086_v11 = vrot.slane %v21219_v28, 2  ;;  %v4519_v7 = vsel %vm4428_vm11, %v17018_v39, %v17612_v58  ;;  %v13035_v39 = vld [vmem:[%s20412_s3 + $0x3a8] ss:$16 sps:$4 sm:$0xff]   ;;  %7645 = vmatprep.subr.bf16.mxu0 %v13034_v24  ;;  %7910 = vmatprep.subr.bf16.mxu1 %v13037_v10  ;;  %v5061_v24 = vsel %vm5004_vm2, %v5060_v18, %v5059_v12 }
 0x3ae   : > { %v5081_v23 = vsel %vm4992_vm14, %v21260_v31, %v17321_v43  ;;  %v5088_v43 = vrot.slane %v21214_v14, 1  ;;  %v21261_v31 = vld [vmem:[#allocation71_spill] sm:$0xff]  ;;  %v17624_v2 = vmax.f32 %v4818_v55, 0.0  ;;  %v4711_v5 = vmax.f32 %v17413_v6, %v4519_v7  ;;  %v21262_v10 = vld [vmem:[#allocation72_spill] sm:$0xff]  ;;  %v21264_v14 = vld [vmem:[#allocation38_spill] sm:$0xff] }
 0x3af   : > { %v5083_v26 = vsel %vm4995_vm15, %v5082_v57, %v5081_v23  ;;  %v3646_v8 = vsel %vm2650_vm9, %v21261_v31, -inf  ;;  %v13032_v23 = vld [vmem:[%s20412_s3 + $0x3a0] ss:$16 sps:$4 sm:$0xff]   ;;  %v3627_v7 = vmax.f32 %v17544_v36, %v3626_v40  ;;  %v4199_v55 = vpop.permute.xlu0 %4198  ;;  %v3604_v36 = vsel %vm2650_vm9, %v21262_v10, -inf  ;;  %v13041_v18 = vld [vmem:[%s20412_s3 + $0x3c8] ss:$16 sps:$4 sm:$0xff]  }
 0x3b0   : > { %v5085_v45 = vsel %vm4998_vm0, %v5084_v61, %v5083_v26  ;;  %v3647_v29 = vrot.slane %v3646_v8, 4  ;;  %v5227_v26 = vsel %vm4998_vm0, %v5226_v51, %v17530_v49  ;;  %v21263_v40 = vld [vmem:[#allocation123_spill] sm:$0xff]  ;;  %v5340_v57 = vrot.slane %v17600_v53, 1  ;;  %7646 = vmatpush1.bf16.msra.mxu0 %v13032_v23  ;;  %7911 = vmatpush1.bf16.msra.mxu1 %v13035_v39  ;;  %v21266_v23 = vld [vmem:[#allocation46_spill] sm:$0xff] }
 0x3b1   : > { %v5087_v50 = vsel %vm5001_vm1, %v5086_v11, %v5085_v45  ;;  %v4819_v45 = vadd.f32 %v15284_v21, %v4711_v5  ;;  %v4448_v11 = vsel %vm4428_vm11, %v21263_v40, %v4199_v55  ;;  %v5229_v49 = vsel %vm5001_vm1, %v5228_v22, %v5227_v26  ;;  %v13038_v51 = vld [vmem:[%s20412_s3 + $0x3c0] ss:$16 sps:$4 sm:$0xff]   ;;  %7647 = vmatprep.subr.bf16.mxu0 %v13040_v41  ;;  %v13046_v22 = vld [vmem:[%s20412_s3 + $0x3e4] ss:$16 sps:$4 sm:$0xff]   ;;  %v13049_v26 = vld [vmem:[%s20412_s3 + $0x3ec] ss:$16 sps:$4 sm:$0xff]  }
 0x3b2   : > { %v5089_v6 = vsel %vm5004_vm2, %v5088_v43, %v5087_v50  ;;  %v5230_v43 = vrot.slane %v17624_v2, 1  ;;  %v3648_v61 = vmax.f32 %v3646_v8, %v3647_v29  ;;  %v4640_v28 = vmax.f32 %v21264_v14, %v4448_v11  ;;  %7912 = vmatprep.subr.bf16.mxu1 %v13043_v9  ;;  %v21268_v40 = vld [vmem:[#allocation113_spill] sm:$0xff] }
 0x3b3   : > { %v17653_v50 = vpack.c.bf16 %v5089_v6, %v5061_v24  ;;  %v17656_v5 = vmax.f32 %v4819_v45, 0.0  ;;  %v3628_v12 = vrot.slane %v3627_v7, 2  ;;  %v21265_v29 = vrot.slane %v17339_v47, 5 }
 0x3b4   : > { %v5231_v8 = vsel %vm5004_vm2, %v5230_v43, %v5229_v49  ;;  %v1845_v39 = vcombine.high %v21266_v23, %v21266_v23  ;;  %v4748_v45 = vadd.f32 %v21126_v46, %v4640_v28  ;;  %v5098_v55 = vrot.slane %v17450_v52, 3  ;;  %v17691_v28 = vpop.permute.xlu0 %4202  ;;  %v21270_v23 = vld [vmem:[#allocation63_spill] sm:$0xff]  ;;  %7648 = vmatpush1.bf16.msra.mxu0 %v13038_v51  ;;  %7913 = vmatpush1.bf16.msra.mxu1 %v13041_v18 }
 0x3b5   : > { %v5095_v14 = vsel %vm4992_vm14, %v21265_v29, %v17393_v60  ;;  %v5368_v6 = vrot.slane %v17656_v5, 1  ;;  %v3605_v60 = vrot.slane %v3604_v36, 4  ;;  %v12744_v41 = vpack.i.bf16 %v5231_v8, %v17527_v38  ;;  %v13044_v38 = vld [vmem:[%s20412_s3 + $0x3e0] ss:$16 sps:$4 sm:$0xff]   ;;  %v13047_v8 = vld [vmem:[%s20412_s3 + $0x3e8] ss:$16 sps:$4 sm:$0xff]   ;;  %7649 = vmatprep.subr.bf16.mxu0 %v13046_v22  ;;  %7914 = vmatprep.subr.bf16.mxu1 %v13049_v26 }
 0x3b6   : > { %v21267_v9 = vrot.slane %v17371_v1, 4  ;;  %v3649_v10 = vrot.slane %v3648_v61, 2  ;;  %v21269_v11 = vrot.slane %v21268_v40, 4  ;;  %v17689_v49 = vmax.f32 %v4748_v45, 0.0  ;;  %v21271_v45 = vld [vmem:[#allocation23_spill] sm:$0xff] }
 0x3b7   : > { %v5341_v29 = vsel %vm5004_vm2, %v5340_v57, %v17296_v42  ;;  %v5369_v47 = vsel %vm5004_vm2, %v5368_v6, %v21270_v23  ;;  %12745 = vrot.lane.b32.xlu0 %v12744_v41, %s13723_s20  ;;  %v3273_v57 = vrot.slane %v17573_v20, 1  ;;  %v3629_v51 = vmax.f32 %v3627_v7, %v3628_v12  ;;  %v13055_v7 = vld [vmem:[%s20412_s3 + $0x40c] ss:$16 sps:$4 sm:$0xff]  }
 0x3b8   : > { %v5097_v24 = vsel %vm4995_vm15, %v21267_v9, %v5095_v14  ;;  %v3977_v43 = vmax.f32 %v21268_v40, %v21269_v11  ;;  %v2981_v14 = vsel %vm2672_vm10, %v1845_v39, -inf  ;;  %v4449_v9 = vsel %vm4428_vm11, %v21271_v45, %v17691_v28  ;;  %7650 = vmatpush1.bf16.msra.mxu0 %v13044_v38  ;;  %7915 = vmatpush1.bf16.msra.mxu1 %v13047_v8 }
 0x3b9   : > { %v12749_v42 = vpack.i.bf16 %v5369_v47, %v5341_v29  ;;  %v5298_v18 = vrot.slane %v17689_v49, 1  ;;  %v21272_v6 = vrot.slane %v17191_v32, 1  ;;  %v5099_v39 = vsel %vm4998_vm0, %v5098_v55, %v5097_v24  ;;  %v13052_v47 = vld [vmem:[%s20412_s3 + $0x404] ss:$16 sps:$4 sm:$0xff]   ;;  %v21276_v24 = vld [vmem:[#allocation120_spill] sm:$0xff]  ;;  %7937 = vmatprep.subr.bf16.mxu1 %v13055_v7 }
 0x3ba   : > { %v3606_v11 = vmax.f32 %v3604_v36, %v3605_v60  ;;  %v3650_v12 = vmax.f32 %v3648_v61, %v3649_v10  ;;  %v3978_v22 = vrot.slane %v3977_v43, 2  ;;  %v2982_v41 = vrot.slane %v2981_v14, 4  ;;  %v21273_v29 = vld [vmem:[#allocation37_spill] sm:$0xff]  ;;  %v17735_v10 = vpop.permute.xlu0 %4272  ;;  %7672 = vmatprep.subr.bf16.mxu0 %v13052_v47 }
 0x3bb   : > { %v17714_v40 = vsel %vm5004_vm2, %v21272_v6, %v17578_v4  ;;  %12750 = vrot.lane.b32.xlu1 %v12749_v42, %s13726_s11  ;;  %v21274_v4 = vld [vmem:[#allocation117_spill] sm:$0xff]  ;;  %v4641_v36 = vmax.f32 %v17418_v27, %v4449_v9  ;;  %v5299_v26 = vsel %vm5004_vm2, %v5298_v18, %v17516_v48  ;;  %v5100_v60 = vrot.slane %v17539_v63, 2  ;;  %4278 = vrot.lane.b32.xlu0 %v17432_v30, %s13725_s12 }
 0x3bc   : > { %v21275_v23 = vrot.slane %v21274_v4, 7  ;;  %v21277_v45 = vrot.slane %v21276_v24, 6  ;;  %v12754_v42 = vpack.i.bf16 %v17556_v16, %v5299_v26  ;;  %v3630_v6 = vrot.slane %v3629_v51, 1  ;;  %v21278_v9 = vld [vmem:[#allocation121_spill] sm:$0xff]  ;;  %v21285_v26 = vld [vmem:[#allocation67_spill] sm:$0xff] }
 0x3bd   : > { %v5102_v27 = vrot.slane %v17541_v25, 1  ;;  %v21279_v48 = vrot.slane %v21278_v9, 5  ;;  %v3607_v38 = vrot.slane %v3606_v11, 2  ;;  %v2983_v8 = vmax.f32 %v2981_v14, %v2982_v41  ;;  %v21283_v24 = vld [vmem:[#allocation53_spill] sm:$0xff]  ;;  %v21287_v14 = vld [vmem:[#allocation54_spill] sm:$0xff] }
 0x3be   : > { %v5426_v55 = vsel %vm4986_vm12, %v21275_v23, %v21273_v29  ;;  %v21280_v29 = vld [vmem:[#allocation104_spill] sm:$0xff]  ;;  %v21284_v4 = vrot.slane %v21283_v24, 7  ;;  %v3979_v16 = vmax.f32 %v3977_v43, %v3978_v22  ;;  %v21286_v9 = vrot.slane %v21285_v26, 3  ;;  %v21289_v7 = vld [vmem:[#allocation109_spill] sm:$0xff] }
 0x3bf   : > { %v5428_v61 = vsel %vm4989_vm13, %v21277_v45, %v5426_v55  ;;  %v21281_v23 = vrot.slane %v21280_v29, 4  ;;  %v21282_v45 = vld [vmem:[#allocation34_spill] sm:$0xff]  ;;  %4280 = vrot.lane.b32.xlu1 %v17571_v35, %s13725_s12  ;;  %v21288_v41 = vrot.slane %v21287_v14, 6  ;;  %v3651_v47 = vrot.slane %v3650_v12, 1  ;;  %v21291_v43 = vld [vmem:[#allocation12_spill] sm:$0xff]  ;;  %12755 = vrot.lane.b32.xlu0 %v12754_v42, %s13726_s11  ;;  %v17787_v42 = vpop.permute.xlu0 %12735 }
 0x3c0   : > { %v5430_v18 = vsel %vm4992_vm14, %v21279_v48, %v5428_v61  ;;  %v5454_v30 = vsel %vm4986_vm12, %v21284_v4, %v21282_v45  ;;  %v21290_v4 = vrot.slane %v21289_v7, 2  ;;  %v21292_v22 = vrot.slane %v21291_v43, 5  ;;  %v21297_v29 = vld [vmem:[#allocation14_spill] sm:$0xff] }
 0x3c1   : > { %v5432_v55 = vsel %vm4995_vm15, %v21281_v23, %v5430_v18  ;;  %v5456_v48 = vsel %vm4989_vm13, %v21288_v41, %v5454_v30  ;;  %v2253_v18 = vcombine.high %v21261_v31, %v21261_v31  ;;  %v17762_v23 = vadd.f32 %v15284_v21, %v4641_v36  ;;  %v21293_v36 = vld [vmem:[#allocation19_spill] sm:$0xff]  ;;  %v21309_v43 = vld [vmem:[#allocation102_spill] sm:$0xff] }
 0x3c2   : > { %v5434_v61 = vsel %vm4998_vm0, %v21286_v9, %v5432_v55  ;;  %v5458_v9 = vsel %vm4992_vm14, %v21292_v22, %v5456_v48  ;;  %v17775_v30 = vmax.f32 %v17573_v20, %v3273_v57  ;;  %v5101_v31 = vsel %vm5001_vm1, %v5100_v60, %v5099_v39  ;;  %v21298_v60 = vld [vmem:[#allocation69_spill] sm:$0xff] }
 0x3c3   : > { %v17767_v35 = vsel %vm5001_vm1, %v21290_v4, %v5434_v61  ;;  %v21294_v45 = vrot.slane %v21293_v36, 4  ;;  %v2984_v7 = vrot.slane %v2983_v8, 2  ;;  %v21295_v61 = vld [vmem:[#allocation64_spill] sm:$0xff]  ;;  %v3940_v48 = vsel %vm2650_vm9, %v21297_v29, -inf }
 0x3c4   : > { %v21296_v4 = vrot.slane %v21295_v61, 3  ;;  %v3653_v22 = vsel %vm2672_vm10, %v2253_v18, -inf  ;;  %v3631_v20 = vmax.f32 %v3629_v51, %v3630_v6  ;;  %v5103_v57 = vsel %vm5004_vm2, %v5102_v27, %v5101_v31  ;;  %v17796_v61 = vpop.permute.xlu1 %12730  ;;  %v21302_v31 = vld [vmem:[#allocation103_spill] sm:$0xff] }
 0x3c5   : > { %v5460_v41 = vsel %vm4995_vm15, %v21294_v45, %v5458_v9  ;;  %v3608_v39 = vmax.f32 %v3606_v11, %v3607_v38  ;;  %v21299_v55 = vrot.slane %v21298_v60, 2  ;;  %21300 = vst [vmem:[#allocation39_spill] sm:$0xff] %v17796_v61  ;;  %v3654_v29 = vrot.slane %v3653_v22, 4  ;;  %v21301_v11 = vld [vmem:[#allocation42_spill] sm:$0xff]  ;;  %v21303_v45 = vld [vmem:[#allocation105_spill] sm:$0xff] }
 0x3c6   : > { %v5462_v26 = vsel %vm4998_vm0, %v21296_v4, %v5460_v41  ;;  %v3652_v41 = vmax.f32 %v3650_v12, %v3651_v47  ;;  %v3980_v4 = vrot.slane %v3979_v16, 1  ;;  %v20688_v18 = vunpack.i.h.bf16 %v17796_v61  ;;  %4348 = vrot.lane.b32.xlu0 %v3631_v20, %s13725_s12 }
 0x3c7   : > { %v17793_v9 = vsel %vm5001_vm1, %v21299_v55, %v5462_v26  ;;  %v20689_v36 = vunpack.i.l.bf16 %v17796_v61  ;;  %v3941_v51 = vrot.slane %v3940_v48, 4  ;;  %v2960_v6 = vsel %vm2650_vm9, %v21301_v11, -inf }
 0x3c8   : > { %v2985_v26 = vmax.f32 %v2983_v8, %v2984_v7  ;;  %v3655_v55 = vmax.f32 %v3653_v22, %v3654_v29  ;;  %v5726_v47 = vsel %vm708_vm7, %v5103_v57, %v20688_v18  ;;  %v2440_v20 = vcombine.high %v21302_v31, %v21302_v31  ;;  %v21306_v18 = vld [vmem:[#allocation80_spill] sm:$0xff] }
 0x3c9   : > { %v5725_v12 = vsel %vm708_vm7, %v17714_v40, %v20689_v36  ;;  %v3982_v11 = vsel %vm2650_vm9, %v21303_v45, -inf  ;;  %v3609_v60 = vrot.slane %v3608_v39, 1  ;;  %v2961_v8 = vrot.slane %v2960_v6, 4 }
 0x3ca   : > { %v5750_v27 = vpack.c.bf16 %v5726_v47, %v5725_v12  ;;  %v3656_v38 = vrot.slane %v3655_v55, 2  ;;  %v21304_v7 = vmax.f32 %v17762_v23, 0.0  ;;  %4352 = vrot.lane.b32.xlu0 %v3652_v41, %s13725_s12  ;;  %v3961_v40 = vsel %vm2672_vm10, %v2440_v20, -inf }
 0x3cb   : > { %v3983_v29 = vrot.slane %v3982_v11, 4  ;;  %v17820_v57 = vmax.f32 %v3979_v16, %v3980_v4  ;;  %v3942_v31 = vmax.f32 %v3940_v48, %v3941_v51  ;;  %v21307_v36 = vrot.slane %v21306_v18, 4  ;;  %v21313_v4 = vld [vmem:[#allocation94_spill] sm:$0xff] }
 0x3cc   : > { %v5437_v22 = vrot.slane %v21304_v7, 1  ;;  %7608 = vmatprep.mubr.bf16.mxu0 %v5750_v27  ;;  %7873 = vmatprep.mubr.bf16.mxu1 %v5750_v27  ;;  %v3962_v47 = vrot.slane %v3961_v40, 4  ;;  %v21308_v61 = vunpack.i.l.bf16 %v17787_v42  ;;  %v21310_v7 = vunpack.i.l.bf16 %v21309_v43 }
 0x3cd   : > { %21305 = vst [vmem:[#allocation77_spill] sm:$0xff] %v17820_v57  ;;  %v3641_v12 = vmax.f32 %v21306_v18, %v21307_v36  ;;  %v21311_v14 = vunpack.i.h.bf16 %v17787_v42  ;;  %v21312_v20 = vunpack.i.h.bf16 %v21309_v43  ;;  %7609 = vmatmul.mubr.bf16.gmra.mrb[28].mxu0 %v17653_v50  ;;  %7874 = vmatmul.mubr.bf16.gmra.mrb[28].mxu1 %v17653_v50  ;;  %v2986_v16 = vrot.slane %v2985_v26, 1  ;;  %v17839_v18 = vpop.permute.xlu1 %4274 }
 0x3ce   : > { %v5248_v41 = vsel %vm708_vm7, %v21310_v7, %v21308_v61  ;;  %v3657_v48 = vmax.f32 %v3655_v55, %v3656_v38  ;;  %v17841_v51 = vmax.f32 %v3608_v39, %v3609_v60  ;;  %v2962_v61 = vmax.f32 %v2960_v6, %v2961_v8  ;;  %4422 = vrot.lane.b32.xlu0 %v17820_v57, %s13725_s12 }
 0x3cf   : > { %v5249_v27 = vsel %vm708_vm7, %v21312_v20, %v21311_v14  ;;  %v4473_v43 = vsel %vm4428_vm11, %v17735_v10, %v17839_v18  ;;  %v17850_v50 = vsel %vm5004_vm2, %v5437_v22, %v17767_v35  ;;  %v3963_v14 = vmax.f32 %v3961_v40, %v3962_v47  ;;  %v4343_v20 = vpop.permute.xlu0 %4342 }
 0x3d0   : > { %v3984_v38 = vmax.f32 %v3982_v11, %v3983_v29  ;;  %v5741_v55 = vpack.c.bf16 %v5249_v27, %v5248_v41  ;;  %v4665_v7 = vmax.f32 %v17775_v30, %v4473_v43  ;;  %v3943_v39 = vrot.slane %v3942_v31, 2  ;;  %v21315_v11 = vld [vmem:[#allocation90_spill] sm:$0xff] }
 0x3d1   : > { %v3642_v60 = vrot.slane %v3641_v12, 2  ;;  %v4496_v6 = vsel %vm4428_vm11, %v21244_v33, %v4343_v20  ;;  %v2987_v8 = vmax.f32 %v2985_v26, %v2986_v16  ;;  %v3658_v10 = vrot.slane %v3657_v48, 1  ;;  %v17863_v40 = vpop.permute.xlu1 %12740 }
 0x3d2   : > { %v21314_v36 = vrot.slane %v17138_v13, 6  ;;  %v17860_v35 = vadd.f32 %v15284_v21, %v4665_v7  ;;  %v4688_v22 = vmax.f32 %v21315_v11, %v4496_v6  ;;  %21316 = vst [vmem:[#allocation10_spill] sm:$0xff] %v17863_v40  ;;  %v2963_v30 = vrot.slane %v2962_v61, 2 }
 0x3d3   : > { %v21317_v29 = vrot.slane %v17358_v15, 5  ;;  %v20696_v33 = vunpack.i.h.bf16 %v17863_v40  ;;  %v20695_v26 = vunpack.i.l.bf16 %v17863_v40  ;;  %4210 = vrot.lane.b32.xlu0 %v2987_v8, %s13725_s12  ;;  %v3964_v41 = vrot.slane %v3963_v14, 2 }
 0x3d4   : > { %v5345_v57 = vsel %vm4989_vm13, %v21314_v36, %v21313_v4  ;;  %v3985_v27 = vrot.slane %v3984_v38, 2  ;;  %v20697_v16 = vmax.f32 %v17860_v35, 0.0  ;;  %v4796_v36 = vadd.f32 %v21126_v46, %v4688_v22  ;;  %v17873_v4 = vpop.permute.xlu0 %4346 }
 0x3d5   : > { %v5347_v47 = vsel %vm4992_vm14, %v21317_v29, %v5345_v57  ;;  %21318 = vst [vmem:[#allocation65_spill] sm:$0xff] %v17873_v4  ;;  %v3944_v43 = vmax.f32 %v3942_v31, %v3943_v39  ;;  %v3643_v7 = vmax.f32 %v3641_v12, %v3642_v60  ;;  %v21319_v57 = vunpack.i.l.bf16 %v17787_v42  ;;  %v4345_v12 = vpop.permute.xlu1 %4344 }
 0x3d6   : > { %v21320_v6 = vunpack.i.h.bf16 %v17787_v42  ;;  %v3659_v11 = vmax.f32 %v3657_v48, %v3658_v10  ;;  %v21321_v29 = vrot.slane %v17174_v19, 4  ;;  %v5465_v31 = vrot.slane %v20697_v16, 1  ;;  %v13053_v42 = vld [vmem:[%s20412_s3 + $0x408] ss:$16 sps:$4 sm:$0xff]  }
 0x3d7   : > { %v5727_v20 = vsel %vm5400_vm4, %v21319_v57, %v20695_v26  ;;  %v2964_v60 = vmax.f32 %v2962_v61, %v2963_v30  ;;  %v5350_v15 = vrot.slane %v17191_v32, 3  ;;  %v13050_v57 = vld [vmem:[%s20412_s3 + $0x400] ss:$16 sps:$4 sm:$0xff]   ;;  %v4497_v48 = vsel %vm4428_vm11, %v4345_v12, %v17873_v4  ;;  %v13058_v30 = vld [vmem:[%s20412_s3 + $0x424] ss:$16 sps:$4 sm:$0xff]  }
 0x3d8   : > { %v5728_v8 = vsel %vm5400_vm4, %v21320_v6, %v20696_v33  ;;  %v5349_v22 = vsel %vm4995_vm15, %v21321_v29, %v5347_v47  ;;  %4354 = vrot.lane.b32.xlu0 %v3659_v11, %s13725_s12  ;;  %v3965_v10 = vmax.f32 %v3963_v14, %v3964_v41  ;;  %v3986_v47 = vmax.f32 %v3984_v38, %v3985_v27  ;;  %v21322_v6 = vld [vmem:[#allocation48_spill] sm:$0xff]  ;;  %v17912_v41 = vpop.permute.xlu0 %4416 }
 0x3d9   : > { %v5742_v39 = vpack.c.bf16 %v5728_v8, %v5727_v20  ;;  %v2049_v61 = vcombine.high %v21322_v6, %v21322_v6  ;;  %v13061_v20 = vld [vmem:[%s20412_s3 + $0x42c] ss:$16 sps:$4 sm:$0xff]   ;;  %v17908_v8 = vmax.f32 %v4796_v36, 0.0  ;;  %v3945_v29 = vrot.slane %v3944_v43, 1 }
 0x3da   : > { %v3644_v12 = vrot.slane %v3643_v7, 1  ;;  %v5351_v14 = vsel %vm4998_vm0, %v5350_v15, %v5349_v22  ;;  %v4689_v38 = vmax.f32 %v17841_v51, %v4497_v48  ;;  %v5466_v27 = vsel %vm5004_vm2, %v5465_v31, %v17793_v9  ;;  %v13059_v9 = vld [vmem:[%s20412_s3 + $0x428] ss:$16 sps:$4 sm:$0xff]  }
 0x3db   : > { %7651 = vmatprep.mubr.bf16.mxu0 %v5742_v39  ;;  %7916 = vmatprep.mubr.bf16.mxu1 %v5742_v39  ;;  %v3317_v11 = vsel %vm2672_vm10, %v2049_v61, -inf  ;;  %v2457_v36 = vcombine.high %v21303_v45, %v21303_v45  ;;  %v13056_v39 = vld [vmem:[%s20412_s3 + $0x420] ss:$16 sps:$4 sm:$0xff]   ;;  %v12759_v15 = vpack.i.bf16 %v5466_v27, %v17850_v50  ;;  %v2965_v22 = vrot.slane %v2964_v60, 1  ;;  %v13064_v50 = vld [vmem:[%s20412_s3 + $0x444] ss:$16 sps:$4 sm:$0xff]  }
 0x3dc   : > { %7652 = vmatmul.mubr.bf16.vlgmr.msra.gmra.mrb[24].mxu0 %v5741_v55  ;;  %7917 = vmatmul.mubr.bf16.vlgmr.msra.gmra.mrb[24].mxu1 %v5741_v55  ;;  %v5378_v51 = vrot.slane %v17541_v25, 3  ;;  %v3318_v48 = vrot.slane %v3317_v11, 4  ;;  %v3966_v55 = vrot.slane %v3965_v10, 1  ;;  %v3987_v31 = vrot.slane %v3986_v47, 1 }
 0x3dd   : > { %7673 = vmatpush1.bf16.msra.mxu0 %v13050_v57  ;;  %7938 = vmatpush1.bf16.msra.mxu1 %v13053_v42  ;;  %v21323_v45 = vrot.slane %v17371_v1, 6  ;;  %v3989_v61 = vsel %vm2672_vm10, %v2457_v36, -inf  ;;  %v5354_v57 = vrot.slane %v17908_v8, 1  ;;  %v21324_v42 = vrot.slane %v17450_v52, 5 }
 0x3de   : > { %7674 = vmatprep.subr.bf16.mxu0 %v13058_v30  ;;  %7939 = vmatprep.subr.bf16.mxu1 %v13061_v20  ;;  %v3319_v26 = vmax.f32 %v3317_v11, %v3318_v48  ;;  %v3990_v33 = vrot.slane %v3989_v61, 4  ;;  %v17944_v30 = vadd.f32 %v15284_v21, %v4689_v38  ;;  %v17946_v20 = vmax.f32 %v3944_v43, %v3945_v29  ;;  %v13062_v43 = vld [vmem:[%s20412_s3 + $0x440] ss:$16 sps:$4 sm:$0xff]   ;;  %v4415_v29 = vpop.permute.xlu1 %4414 }
 0x3df   : > { %v5373_v6 = vsel %vm4989_vm13, %v21323_v45, %v17426_v37  ;;  %12760 = vrot.lane.b32.xlu1 %v12759_v15, %s13727_s30  ;;  %v13067_v37 = vld [vmem:[%s20412_s3 + $0x44c] ss:$16 sps:$4 sm:$0xff]   ;;  %v17948_v36 = vmax.f32 %v3643_v7, %v3644_v12  ;;  %v21326_v45 = vrot.slane %v17539_v63, 4  ;;  %v21327_v16 = vrot.slane %v17199_v34, 2  ;;  %v13065_v7 = vld [vmem:[%s20412_s3 + $0x448] ss:$16 sps:$4 sm:$0xff]   ;;  %v4205_v12 = vpop.permute.xlu0 %4204 }
 0x3e0   : > { %v5375_v27 = vsel %vm4992_vm14, %v21324_v42, %v5373_v6  ;;  %v3320_v6 = vrot.slane %v3319_v26, 2  ;;  %v3991_v42 = vmax.f32 %v3989_v61, %v3990_v33  ;;  %v17963_v38 = vmax.f32 %v2964_v60, %v2965_v22  ;;  %v21331_v61 = vld [vmem:[#allocation11_spill] sm:$0xff] }
 0x3e1   : > { %21325 = vst [vmem:[#allocation87_spill] sm:$0xff] %v17948_v36  ;;  %v5377_v15 = vsel %vm4995_vm15, %v21326_v45, %v5375_v27  ;;  %v5353_v11 = vsel %vm5001_vm1, %v21327_v16, %v5351_v14  ;;  %7675 = vmatpush1.bf16.msra.mxu0 %v13056_v39  ;;  %7940 = vmatpush1.bf16.msra.mxu1 %v13059_v9  ;;  %v21328_v14 = vrot.slane %v17624_v2, 2  ;;  %v13070_v39 = vld [vmem:[%s20412_s3 + $0x464] ss:$16 sps:$4 sm:$0xff]   ;;  %v20698_v22 = vmax.f32 %v17944_v30, 0.0 }
 0x3e2   : > { %v5379_v48 = vsel %vm4998_vm0, %v5378_v51, %v5377_v15  ;;  %v3967_v27 = vmax.f32 %v3965_v10, %v3966_v55  ;;  %v3988_v16 = vmax.f32 %v3986_v47, %v3987_v31  ;;  %7676 = vmatprep.subr.bf16.mxu0 %v13064_v50  ;;  %v4520_v51 = vsel %vm4428_vm11, %v17612_v58, %v4415_v29  ;;  %v13073_v47 = vld [vmem:[%s20412_s3 + $0x46c] ss:$16 sps:$4 sm:$0xff]  }
 0x3e3   : > { %v17968_v33 = vsel %vm5001_vm1, %v21328_v14, %v5379_v48  ;;  %v4450_v9 = vsel %vm4428_vm11, %v17691_v28, %v4205_v12  ;;  %4350 = vrot.lane.b32.xlu1 %v17948_v36, %s13725_s12  ;;  %v17980_v60 = vsel %vm5004_vm2, %v5354_v57, %v5353_v11  ;;  %v3992_v10 = vrot.slane %v3991_v42, 2  ;;  %7941 = vmatprep.subr.bf16.mxu1 %v13067_v37  ;;  %v21329_v55 = vld [vmem:[#allocation16_spill] sm:$0xff]  ;;  %v21354_v37 = vld [vmem:[#allocation35_spill] sm:$0xff] }
 0x3e4   : > { %v4712_v31 = vmax.f32 %v21329_v55, %v4520_v51  ;;  %v21330_v58 = vrot.slane %v16653_v17, 7  ;;  %v21332_v50 = vld [vmem:[#allocation32_spill] sm:$0xff]  ;;  %v3321_v15 = vmax.f32 %v3319_v26, %v3320_v6  ;;  %v21334_v11 = vrot.slane %v16670_v0, 6  ;;  %v18011_v55 = vpop.permute.xlu1 %4418 }
 0x3e5   : > { %v21333_v45 = vrot.slane %v21332_v50, 7  ;;  %v21335_v29 = vrot.slane %v21212_v3, 7  ;;  %7677 = vmatpush1.bf16.msra.mxu0 %v13062_v43  ;;  %7942 = vmatpush1.bf16.msra.mxu1 %v13065_v7  ;;  %v13071_v14 = vld [vmem:[%s20412_s3 + $0x468] ss:$16 sps:$4 sm:$0xff]   ;;  %21337 = vst [vmem:[#allocation82_spill] sm:$0xff] %v18011_v55  ;;  %vm8613_vm10 = vcmask 123904  }
 0x3e6   : > { %v5482_v28 = vsel %vm4986_vm12, %v21330_v58, %v21255_v62  ;;  %v13068_v62 = vld [vmem:[%s20412_s3 + $0x460] ss:$16 sps:$4 sm:$0xff]   ;;  %v4820_v26 = vadd.f32 %v21126_v46, %v4712_v31  ;;  %v21336_v6 = vld [vmem:[#allocation124_spill] sm:$0xff]  ;;  %v3993_v58 = vmax.f32 %v3991_v42, %v3992_v10  ;;  %7678 = vmatprep.subr.bf16.mxu0 %v13070_v39  ;;  %v13076_v43 = vld [vmem:[%s20412_s3 + $0x484] ss:$16 sps:$4 sm:$0xff]   ;;  %v21339_v31 = vmax.f32 %v17762_v23, 0.0  ;;  %7943 = vmatprep.subr.bf16.mxu1 %v13073_v47 }
 0x3e7   : > { %v5440_v57 = vsel %vm4986_vm12, %v21333_v45, %v21331_v61  ;;  %v5484_v48 = vsel %vm4989_vm13, %v21334_v11, %v5482_v28  ;;  %v5510_v12 = vsel %vm4986_vm12, %v21335_v29, %v21259_v56  ;;  %v4642_v51 = vmax.f32 %v21336_v6, %v4450_v9  ;;  %v13079_v7 = vld [vmem:[%s20412_s3 + $0x48c] ss:$16 sps:$4 sm:$0xff]   ;;  %4420 = vrot.lane.b32.xlu1 %v3967_v27, %s13725_s12 }
 0x3e8   : > { %v21338_v28 = vrot.slane %v21203_v44, 5  ;;  %v18024_v61 = vrot.slane %v21339_v31, 2  ;;  %v4521_v42 = vsel %vm4428_vm11, %v17912_v41, %v18011_v55  ;;  %v21340_v39 = vrot.slane %v21217_v54, 6  ;;  %v21343_v41 = vld [vmem:[#allocation74_spill] sm:$0xff]  ;;  %v21347_v31 = vld [vmem:[#allocation17_spill] sm:$0xff] }
 0x3e9   : > { %v21341_v10 = vrot.slane %v21101_v59, 6  ;;  %v5493_v23 = vrot.slane %v20698_v22, 1  ;;  %v18038_v45 = vmax.f32 %v4820_v26, 0.0  ;;  %v4713_v11 = vmax.f32 %v17946_v20, %v4521_v42  ;;  %7679 = vmatpush1.bf16.msra.mxu0 %v13068_v62  ;;  %7944 = vmatpush1.bf16.msra.mxu1 %v13071_v14  ;;  %v13074_v20 = vld [vmem:[%s20412_s3 + $0x480] ss:$16 sps:$4 sm:$0xff]  }
 0x3ea   : > { %v5486_v56 = vsel %vm4992_vm14, %v21338_v28, %v5484_v48  ;;  %v5512_v9 = vsel %vm4989_vm13, %v21340_v39, %v5510_v12  ;;  %v21342_v48 = vld [vmem:[#allocation98_spill] sm:$0xff]  ;;  %v21344_v29 = vrot.slane %v21343_v41, 7  ;;  %v3322_v6 = vrot.slane %v3321_v15, 1  ;;  %v21345_v28 = vld [vmem:[#allocation36_spill] sm:$0xff]  ;;  %7680 = vmatprep.subr.bf16.mxu0 %v13076_v43  ;;  %7945 = vmatprep.subr.bf16.mxu1 %v13079_v7  ;;  %v21356_v7 = vld [vmem:[#allocation21_spill] sm:$0xff] }
 0x3eb   : > { %v5442_v50 = vsel %vm4989_vm13, %v21341_v10, %v5440_v57  ;;  %v21346_v12 = vrot.slane %v21345_v28, 4  ;;  %v21348_v57 = vrot.slane %v21347_v31, 5  ;;  %v21349_v39 = vld [vmem:[#allocation44_spill] sm:$0xff]  ;;  %4424 = vrot.lane.b32.xlu1 %v3988_v16, %s13725_s12 }
 0x3ec   : > { %v5468_v27 = vsel %vm4986_vm12, %v21344_v29, %v21342_v48  ;;  %v21350_v10 = vrot.slane %v21349_v39, 5  ;;  %v13077_v42 = vld [vmem:[%s20412_s3 + $0x488] ss:$16 sps:$4 sm:$0xff]   ;;  %v18064_v48 = vadd.f32 %v21126_v46, %v4642_v51  ;;  %v4207_v29 = vpop.permute.xlu1 %4206  ;;  %v18078_v51 = vadd.f32 %v15284_v21, %v4713_v11 }
 0x3ed   : > { %v5488_v59 = vsel %vm4995_vm15, %v21346_v12, %v5486_v56  ;;  %v5514_v47 = vsel %vm4992_vm14, %v21348_v57, %v5512_v9  ;;  %v5382_v56 = vrot.slane %v18038_v45, 1  ;;  %v18066_v9 = vpop.permute.xlu0 %4208  ;;  %v21352_v12 = vld [vmem:[#allocation52_spill] sm:$0xff]  ;;  %v13082_v57 = vld [vmem:[%s20412_s3 + $0x4a4] ss:$16 sps:$4 sm:$0xff]   ;;  %v21358_v11 = vrot.slane %v17600_v53, 2  ;;  %7681 = vmatpush1.bf16.msra.mxu0 %v13074_v20  ;;  %7946 = vmatpush1.bf16.msra.mxu1 %v13077_v42 }
 0x3ee   : > { %v18054_v26 = vsel %vm4992_vm14, %v21350_v10, %v5442_v50  ;;  %21351 = vst [vmem:[#allocation84_spill] sm:$0xff] %v18066_v9  ;;  %v3994_v50 = vrot.slane %v3993_v58, 1  ;;  %v21353_v62 = vrot.slane %v21352_v12, 6  ;;  %v13085_v10 = vld [vmem:[%s20412_s3 + $0x4ac] ss:$16 sps:$4 sm:$0xff]   ;;  %v4451_v22 = vsel %vm4428_vm11, %v4207_v29, %v18066_v9  ;;  %7682 = vmatprep.subr.bf16.mxu0 %v13082_v57 }
 0x3ef   : > { %v4643_v55 = vmax.f32 %v17963_v38, %v4451_v22  ;;  %v5383_v40 = vsel %vm5004_vm2, %v5382_v56, %v17968_v33  ;;  %v21359_v29 = vld [vmem:[#allocation126_spill] sm:$0xff]  ;;  %v20705_v12 = vmax.f32 %v18078_v51, 0.0  ;;  %v13080_v38 = vld [vmem:[%s20412_s3 + $0x4a0] ss:$16 sps:$4 sm:$0xff]   ;;  %7947 = vmatprep.subr.bf16.mxu1 %v13085_v10  ;;  %v21363_v20 = vld [vmem:[#allocation120_spill] sm:$0xff] }
 0x3f0   : > { %v5470_v14 = vsel %vm4989_vm13, %v21353_v62, %v5468_v27  ;;  %v21355_v27 = vrot.slane %v21354_v37, 3  ;;  %v21357_v62 = vrot.slane %v21356_v7, 4  ;;  %v21360_v9 = vrot.slane %v21359_v29, 3  ;;  %v13083_v33 = vld [vmem:[%s20412_s3 + $0x4a8] ss:$16 sps:$4 sm:$0xff]   ;;  %v4277_v56 = vpop.permute.xlu1 %4276 }
 0x3f1   : > { %v4751_v22 = vadd.f32 %v15284_v21, %v4643_v55  ;;  %v4474_v55 = vsel %vm4428_vm11, %v17839_v18, %v4277_v56  ;;  %v21364_v42 = vrot.slane %v21363_v20, 7  ;;  %v21372_v20 = vmax.f32 %v17860_v35, 0.0  ;;  %7683 = vmatpush1.bf16.msra.mxu0 %v13080_v38  ;;  %7948 = vmatpush1.bf16.msra.mxu1 %v13083_v33 }
 0x3f2   : > { %v5490_v43 = vsel %vm4998_vm0, %v21355_v27, %v5488_v59  ;;  %v5516_v36 = vsel %vm4995_vm15, %v21357_v62, %v5514_v47  ;;  %v12764_v59 = vpack.i.bf16 %v5383_v40, %v17980_v60  ;;  %v3323_v27 = vmax.f32 %v3321_v15, %v3322_v6  ;;  %v13088_v15 = vld [vmem:[%s20412_s3 + $0x4c4] ss:$16 sps:$4 sm:$0xff]   ;;  %v21367_v62 = vld [vmem:[#allocation114_spill] sm:$0xff] }
 0x3f3   : > { %v5492_v4 = vsel %vm5001_vm1, %v21358_v11, %v5490_v43  ;;  %v5518_v16 = vsel %vm4998_vm0, %v21360_v9, %v5516_v36  ;;  %v4846_v36 = vmax.f32 %v18064_v48, 0.0  ;;  %v3995_v40 = vmax.f32 %v3993_v58, %v3994_v50  ;;  %v21362_v58 = vld [vmem:[#allocation117_spill] sm:$0xff]  ;;  %v21365_v50 = vld [vmem:[#allocation54_spill] sm:$0xff]  ;;  %7684 = vmatprep.subr.bf16.mxu0 %v13088_v15  ;;  %v21381_v15 = vld [vmem:[#allocation56_spill] sm:$0xff] }
 0x3f4   : > { %v18101_v47 = vsel %vm5004_vm2, %v5493_v23, %v5492_v4  ;;  %v21361_v60 = vrot.slane %v17656_v5, 2  ;;  %v13091_v23 = vld [vmem:[%s20412_s3 + $0x4cc] ss:$16 sps:$4 sm:$0xff]   ;;  %v5521_v6 = vrot.slane %v20705_v12, 1  ;;  %12765 = vrot.lane.b32.xlu0 %v12764_v59, %s13726_s11  ;;  %4282 = vrot.lane.b32.xlu1 %v3323_v27, %s13725_s12  ;;  %v5579_v9 = vsel %vm4986_vm12, %v21364_v42, %v21362_v58  ;;  %s13728_s11 = smov 64  }
 0x3f5   : > { %v21366_v57 = vrot.slane %v21365_v50, 7  ;;  %v4847_v43 = vmax.f32 %v4751_v22, 0.0  ;;  %v4666_v11 = vmax.f32 %v21367_v62, %v4474_v55  ;;  %v21370_v59 = vld [vmem:[#allocation12_spill] sm:$0xff]  ;;  %v5616_v12 = vrot.slane %v21372_v20, 2  ;;  %v21375_v50 = vld [vmem:[#allocation19_spill] sm:$0xff]  ;;  %7949 = vmatprep.subr.bf16.mxu1 %v13091_v23 }
 0x3f6   : > { %v5520_v4 = vsel %vm5001_vm1, %v21361_v60, %v5518_v16  ;;  %v21368_v16 = vld [vmem:[#allocation121_spill] sm:$0xff]  ;;  %v21371_v56 = vrot.slane %v21370_v59, 6  ;;  %v13089_v22 = vld [vmem:[%s20412_s3 + $0x4c8] ss:$16 sps:$4 sm:$0xff]   ;;  %v21377_v62 = vld [vmem:[#allocation67_spill] sm:$0xff]  ;;  %v21382_v23 = vrot.slane %v21381_v15, 5 }
 0x3f7   : > { %v5607_v10 = vsel %vm4986_vm12, %v21366_v57, %v21283_v24  ;;  %v21369_v60 = vrot.slane %v21368_v16, 6  ;;  %v5522_v58 = vsel %vm5004_vm2, %v5521_v6, %v5520_v4  ;;  %v13086_v24 = vld [vmem:[%s20412_s3 + $0x4c0] ss:$16 sps:$4 sm:$0xff]   ;;  %v21373_v55 = vld [vmem:[#allocation104_spill] sm:$0xff]  ;;  %v21376_v57 = vrot.slane %v21375_v50, 5  ;;  %7950 = vmatpush1.bf16.msra.mxu1 %v13089_v22 }
 0x3f8   : > { %v5609_v27 = vsel %vm4989_vm13, %v21371_v56, %v5607_v10  ;;  %v21374_v42 = vrot.slane %v21373_v55, 5  ;;  %v5590_v10 = vrot.slane %v4847_v43, 1  ;;  %v18157_v38 = vadd.f32 %v21126_v46, %v4666_v11  ;;  %v13094_v4 = vld [vmem:[%s20412_s3 + $0x4e4] ss:$16 sps:$4 sm:$0xff]   ;;  %v13097_v6 = vld [vmem:[%s20412_s3 + $0x4ec] ss:$16 sps:$4 sm:$0xff]   ;;  %4426 = vrot.lane.b32.xlu1 %v3995_v40, %s13725_s12  ;;  %7685 = vmatpush1.bf16.msra.mxu0 %v13086_v24 }
 0x3f9   : > { %v5581_v18 = vsel %vm4989_vm13, %v21369_v60, %v5579_v9  ;;  %v5611_v35 = vsel %vm4992_vm14, %v21376_v57, %v5609_v27  ;;  %v12769_v33 = vpack.i.bf16 %v5522_v58, %v18101_v47  ;;  %v21378_v16 = vrot.slane %v21377_v62, 4  ;;  %v21379_v43 = vld [vmem:[#allocation30_spill] sm:$0xff]  ;;  %v21383_v59 = vld [vmem:[#allocation109_spill] sm:$0xff]  ;;  %v21385_v20 = vld [vmem:[#allocation64_spill] sm:$0xff]  ;;  %7686 = vmatprep.subr.bf16.mxu0 %v13094_v4  ;;  %7951 = vmatprep.subr.bf16.mxu1 %v13097_v6 }
 0x3fa   : > { %v5583_v9 = vsel %vm4992_vm14, %v21374_v42, %v5581_v18  ;;  %v21380_v11 = vrot.slane %v21379_v43, 4  ;;  %v5472_v18 = vsel %vm4992_vm14, %v21382_v23, %v5470_v14  ;;  %v21384_v56 = vrot.slane %v21383_v59, 3  ;;  %v21389_v62 = vld [vmem:[#allocation62_spill] sm:$0xff] }
 0x3fb   : > { %v5585_v60 = vsel %vm4995_vm15, %v21378_v16, %v5583_v9  ;;  %v21386_v58 = vrot.slane %v21385_v20, 4  ;;  %v5451_v40 = vrot.slane %v4846_v36, 1  ;;  %v20706_v42 = vmax.f32 %v18157_v38, 0.0  ;;  %v21387_v9 = vld [vmem:[#allocation69_spill] sm:$0xff] }
 0x3fc   : > { %v5446_v47 = vsel %vm4995_vm15, %v21380_v11, %v18054_v26  ;;  %v5587_v27 = vsel %vm4998_vm0, %v21384_v56, %v5585_v60  ;;  %v21388_v50 = vrot.slane %v21387_v9, 3  ;;  %v5529_v57 = vrot.slane %v17541_v25, 4  ;;  %v21393_v56 = vld [vmem:[#allocation97_spill] sm:$0xff]  ;;  %12770 = vrot.lane.b32.xlu1 %v12769_v33, %s13727_s30  ;;  %v21398_v9 = vld [vmem:[#allocation68_spill] sm:$0xff] }
 0x3fd   : > { %v5613_v55 = vsel %vm4995_vm15, %v21386_v58, %v5611_v35  ;;  %v5589_v26 = vsel %vm5001_vm1, %v18024_v61, %v5587_v27  ;;  %v21390_v16 = vrot.slane %v21389_v62, 4  ;;  %v13092_v35 = vld [vmem:[%s20412_s3 + $0x4e0] ss:$16 sps:$4 sm:$0xff]   ;;  %v13095_v61 = vld [vmem:[%s20412_s3 + $0x4e8] ss:$16 sps:$4 sm:$0xff]   ;;  %v5479_v59 = vrot.slane %v20706_v42, 1 }
 0x3fe   : > { %v5615_v14 = vsel %vm4998_vm0, %v21388_v50, %v5613_v55  ;;  %v18202_v11 = vsel %vm5004_vm2, %v5590_v10, %v5589_v26  ;;  %v21394_v27 = vrot.slane %v21393_v56, 3  ;;  %v13100_v10 = vld [vmem:[%s20412_s3 + $0x504] ss:$16 sps:$4 sm:$0xff]   ;;  %v21395_v58 = vld [vmem:[#allocation112_spill] sm:$0xff]  ;;  %v21396_v55 = vrot.slane %v17138_v13, 7  ;;  %7687 = vmatpush1.bf16.msra.mxu0 %v13092_v35  ;;  %7952 = vmatpush1.bf16.msra.mxu1 %v13095_v61 }
 0x3ff   : > { %v5474_v60 = vsel %vm4995_vm15, %v21390_v16, %v5472_v18  ;;  %v18205_v23 = vsel %vm5001_vm1, %v5616_v12, %v5615_v14  ;;  %v21391_v18 = vld [vmem:[#allocation45_spill] sm:$0xff]  ;;  %v13103_v12 = vld [vmem:[%s20412_s3 + $0x50c] ss:$16 sps:$4 sm:$0xff]   ;;  %v21397_v4 = vrot.slane %v17689_v49, 2  ;;  %v21399_v50 = vrot.slane %v21398_v9, 2  ;;  %7688 = vmatprep.subr.bf16.mxu0 %v13100_v10 }
 0x400   : > { %v21392_v24 = vrot.slane %v21391_v18, 3  ;;  %v5476_v20 = vsel %vm4998_vm0, %v21394_v27, %v5474_v60  ;;  %v5496_v26 = vsel %vm4986_vm12, %v21396_v55, %v21395_v58  ;;  %v21400_v16 = vld [vmem:[#allocation66_spill] sm:$0xff]  ;;  %v5505_v27 = vrot.slane %v17908_v8, 2  ;;  %7953 = vmatprep.subr.bf16.mxu1 %v13103_v12  ;;  %v13106_v35 = vld [vmem:[%s20412_s3 + $0x524] ss:$16 sps:$4 sm:$0xff]  }
 0x401   : > { %v5478_v14 = vsel %vm5001_vm1, %v21399_v50, %v5476_v20  ;;  %v21401_v60 = vrot.slane %v21400_v16, 6  ;;  %v21402_v33 = vrot.slane %v17174_v19, 5  ;;  %v13098_v20 = vld [vmem:[%s20412_s3 + $0x500] ss:$16 sps:$4 sm:$0xff]   ;;  %v5533_v50 = vrot.slane %v18038_v45, 2 }
 0x402   : > { %v5448_v22 = vsel %vm4998_vm0, %v21392_v24, %v5446_v47  ;;  %v5480_v55 = vsel %vm5004_vm2, %v5479_v59, %v5478_v14  ;;  %v21403_v59 = vld [vmem:[#allocation101_spill] sm:$0xff]  ;;  %v13109_v61 = vld [vmem:[%s20412_s3 + $0x52c] ss:$16 sps:$4 sm:$0xff]   ;;  %v21405_v14 = vrot.slane %v17191_v32, 4  ;;  %v21407_v10 = vrot.slane %v17199_v34, 3  ;;  %7689 = vmatpush1.bf16.msra.mxu0 %v13098_v20 }
 0x403   : > { %v5450_v6 = vsel %vm5001_vm1, %v21397_v4, %v5448_v22  ;;  %v5498_v24 = vsel %vm4989_vm13, %v21401_v60, %v5496_v26  ;;  %v5642_v22 = vrot.slane %v17600_v53, 3  ;;  %v5531_v4 = vrot.slane %v17624_v2, 3  ;;  %7690 = vmatprep.subr.bf16.mxu0 %v13106_v35 }
 0x404   : > { %v5452_v58 = vsel %vm5004_vm2, %v5451_v40, %v5450_v6  ;;  %v5500_v47 = vsel %vm4992_vm14, %v21402_v33, %v5498_v24  ;;  %v13101_v40 = vld [vmem:[%s20412_s3 + $0x508] ss:$16 sps:$4 sm:$0xff]   ;;  %v21404_v26 = vrot.slane %v17371_v1, 7  ;;  %v5682_v53 = vrot.slane %v17624_v2, 4  ;;  %v13130_v2 = vld [vmem:[%s20412_s3 + $0x5a4] ss:$16 sps:$4 sm:$0xff]  }
 0x405   : > { %v12774_v42 = vpack.i.bf16 %v5480_v55, %v5452_v58  ;;  %v5502_v60 = vsel %vm4995_vm15, %v21405_v14, %v5500_v47  ;;  %v21406_v24 = vrot.slane %v17450_v52, 6  ;;  %v5670_v55 = vrot.slane %v17656_v5, 3  ;;  %7954 = vmatpush1.bf16.msra.mxu1 %v13101_v40 }
 0x406   : > { %v5524_v6 = vsel %vm4986_vm12, %v21404_v26, %v21403_v59  ;;  %v5504_v12 = vsel %vm4998_vm0, %v21407_v10, %v5502_v60  ;;  %v21408_v33 = vrot.slane %v17539_v63, 5  ;;  %v21409_v26 = vrot.slane %v16670_v0, 7  ;;  %v13107_v0 = vld [vmem:[%s20412_s3 + $0x528] ss:$16 sps:$4 sm:$0xff]   ;;  %7955 = vmatprep.subr.bf16.mxu1 %v13109_v61 }
 0x407   : > { %v5526_v58 = vsel %vm4989_vm13, %v21406_v24, %v5524_v6  ;;  %12775 = vrot.lane.b32.xlu0 %v12774_v42, %s13727_s30  ;;  %v21410_v14 = vmax.f32 %v17944_v30, 0.0  ;;  %v18283_v5 = vsel %vm5001_vm1, %v5505_v27, %v5504_v12  ;;  %v21411_v24 = vrot.slane %v21203_v44, 6 }
 0x408   : > { %v5528_v59 = vsel %vm4992_vm14, %v21408_v33, %v5526_v58  ;;  %v5635_v47 = vsel %vm4986_vm12, %v21409_v26, %v16653_v17  ;;  %v5600_v10 = vrot.slane %v17689_v49, 3  ;;  %v13104_v17 = vld [vmem:[%s20412_s3 + $0x520] ss:$16 sps:$4 sm:$0xff]   ;;  %v21413_v27 = vrot.slane %v21217_v54, 7  ;;  %v13112_v58 = vld [vmem:[%s20412_s3 + $0x544] ss:$16 sps:$4 sm:$0xff]  }
 0x409   : > { %v5644_v6 = vrot.slane %v21410_v14, 2  ;;  %v5530_v42 = vsel %vm4995_vm15, %v5529_v57, %v5528_v59  ;;  %v5637_v60 = vsel %vm4989_vm13, %v21411_v24, %v5635_v47  ;;  %v21412_v57 = vrot.slane %v21345_v28, 5  ;;  %v13115_v28 = vld [vmem:[%s20412_s3 + $0x54c] ss:$16 sps:$4 sm:$0xff]   ;;  %v21418_v26 = vld [vmem:[#allocation61_spill] sm:$0xff]  ;;  %7691 = vmatpush1.bf16.msra.mxu0 %v13104_v17  ;;  %7956 = vmatpush1.bf16.msra.mxu1 %v13107_v0 }
 0x40a   : > { %v5532_v30 = vsel %vm4998_vm0, %v5531_v4, %v5530_v42  ;;  %v5663_v49 = vsel %vm4986_vm12, %v21413_v27, %v21212_v3  ;;  %v21414_v20 = vmax.f32 %v18078_v51, 0.0  ;;  %v21415_v54 = vrot.slane %v21354_v37, 4  ;;  %v21423_v42 = vld [vmem:[#allocation52_spill] sm:$0xff]  ;;  %7692 = vmatprep.subr.bf16.mxu0 %v13112_v58  ;;  %7957 = vmatprep.subr.bf16.mxu1 %v13115_v28  ;;  %v13118_v0 = vld [vmem:[%s20412_s3 + $0x564] ss:$16 sps:$4 sm:$0xff]  }
 0x40b   : > { %v5639_v44 = vsel %vm4992_vm14, %v21412_v57, %v5637_v60  ;;  %v18313_v4 = vsel %vm5001_vm1, %v5533_v50, %v5532_v30  ;;  %v21416_v51 = vrot.slane %v21347_v31, 6  ;;  %v5602_v61 = vrot.slane %v4846_v36, 2 }
 0x40c   : > { %v5672_v40 = vrot.slane %v21414_v20, 2  ;;  %v5641_v3 = vsel %vm4995_vm15, %v21415_v54, %v5639_v44  ;;  %v21417_v33 = vrot.slane %v21356_v7, 5  ;;  %v21419_v50 = vrot.slane %v21349_v39, 6  ;;  %v13110_v39 = vld [vmem:[%s20412_s3 + $0x540] ss:$16 sps:$4 sm:$0xff]  }
 0x40d   : > { %v5665_v35 = vsel %vm4989_vm13, %v21416_v51, %v5663_v49  ;;  %v5643_v12 = vsel %vm4998_vm0, %v5642_v22, %v5641_v3  ;;  %v5656_v47 = vrot.slane %v17908_v8, 3  ;;  %v21420_v14 = vrot.slane %v21359_v29, 4  ;;  %v13113_v8 = vld [vmem:[%s20412_s3 + $0x548] ss:$16 sps:$4 sm:$0xff]   ;;  %7693 = vmatpush1.bf16.msra.mxu0 %v13110_v39  ;;  %v13140_v39 = vld [vmem:[%s20412_s3 + $0x5e0] ss:$16 sps:$4 sm:$0xff]  }
 0x40e   : > { %v5667_v59 = vsel %vm4992_vm14, %v21417_v33, %v5665_v35  ;;  %v5595_v37 = vsel %vm4989_vm13, %v21419_v50, %v21418_v26  ;;  %v18333_v31 = vsel %vm5001_vm1, %v5644_v6, %v5643_v12  ;;  %v21421_v36 = vrot.slane %v21379_v43, 5  ;;  %7958 = vmatpush1.bf16.msra.mxu1 %v13113_v8  ;;  %7694 = vmatprep.subr.bf16.mxu0 %v13118_v0  ;;  %v13124_v35 = vld [vmem:[%s20412_s3 + $0x584] ss:$16 sps:$4 sm:$0xff]   ;;  %v13125_v26 = vld [vmem:[%s20412_s3 + $0x588] ss:$16 sps:$4 sm:$0xff]  }
 0x40f   : > { %v5669_v48 = vsel %vm4995_vm15, %v21420_v14, %v5667_v59  ;;  %v5684_v22 = vrot.slane %v18038_v45, 3  ;;  %v21422_v6 = vrot.slane %v21391_v18, 4  ;;  %v21424_v24 = vrot.slane %v21423_v42, 7  ;;  %v13121_v18 = vld [vmem:[%s20412_s3 + $0x56c] ss:$16 sps:$4 sm:$0xff]  }
 0x410   : > { %v5597_v7 = vsel %vm4992_vm14, %v21421_v36, %v5595_v37  ;;  %v5671_v29 = vsel %vm4998_vm0, %v5670_v55, %v5669_v48  ;;  %v21425_v60 = vmax.f32 %v18157_v38, 0.0  ;;  %v21427_v44 = vrot.slane %v21389_v62, 5  ;;  %7959 = vmatprep.subr.bf16.mxu1 %v13121_v18  ;;  %v13122_v59 = vld [vmem:[%s20412_s3 + $0x580] ss:$16 sps:$4 sm:$0xff]   ;;  %v13131_v37 = vld [vmem:[%s20412_s3 + $0x5a8] ss:$16 sps:$4 sm:$0xff]  }
 0x411   : > { %v5599_v43 = vsel %vm4995_vm15, %v21422_v6, %v5597_v7  ;;  %v5621_v45 = vsel %vm4986_vm12, %v21424_v24, %v21343_v41  ;;  %v18365_v55 = vsel %vm5001_vm1, %v5672_v40, %v5671_v29  ;;  %v21426_v41 = vrot.slane %v21381_v15, 6  ;;  %v13128_v50 = vld [vmem:[%s20412_s3 + $0x5a0] ss:$16 sps:$4 sm:$0xff]   ;;  %v13139_v14 = vld [vmem:[%s20412_s3 + $0x5cc] ss:$16 sps:$4 sm:$0xff]  }
 0x412   : > { %v5630_v17 = vrot.slane %v21425_v60, 2  ;;  %v5601_v30 = vsel %vm4998_vm0, %v5600_v10, %v5599_v43  ;;  %v21428_v49 = vrot.slane %v21400_v16, 7  ;;  %v21429_v40 = vrot.slane %v17450_v52, 7  ;;  %v13134_v48 = vld [vmem:[%s20412_s3 + $0x5c0] ss:$16 sps:$4 sm:$0xff]  }
 0x413   : > { %v5623_v38 = vsel %vm4989_vm13, %v21426_v41, %v5621_v45  ;;  %v18372_v57 = vsel %vm5001_vm1, %v5602_v61, %v5601_v30  ;;  %v5654_v15 = vrot.slane %v17199_v34, 4  ;;  %v21430_v58 = vrot.slane %v21393_v56, 4  ;;  %v13119_v34 = vld [vmem:[%s20412_s3 + $0x568] ss:$16 sps:$4 sm:$0xff]   ;;  %v13142_v7 = vld [vmem:[%s20412_s3 + $0x5e4] ss:$16 sps:$4 sm:$0xff]  }
 0x414   : > { %v5625_v27 = vsel %vm4992_vm14, %v21427_v44, %v5623_v38  ;;  %v5649_v20 = vsel %vm4986_vm12, %v21428_v49, %v17138_v13  ;;  %v5677_v10 = vsel %vm4986_vm12, %v21429_v40, %v17371_v1  ;;  %v21431_v62 = vrot.slane %v17174_v19, 6  ;;  %v13116_v13 = vld [vmem:[%s20412_s3 + $0x560] ss:$16 sps:$4 sm:$0xff]   ;;  %7960 = vmatpush1.bf16.msra.mxu1 %v13119_v34  ;;  %v13137_v36 = vld [vmem:[%s20412_s3 + $0x5c8] ss:$16 sps:$4 sm:$0xff]  }
 0x415   : > { %v5627_v28 = vsel %vm4995_vm15, %v21430_v58, %v5625_v27  ;;  %v21432_v3 = vrot.slane %v17539_v63, 6  ;;  %v21433_v1 = vrot.slane %v21398_v9, 3  ;;  %v21434_v52 = vrot.slane %v17191_v32, 5  ;;  %v13127_v9 = vld [vmem:[%s20412_s3 + $0x58c] ss:$16 sps:$4 sm:$0xff]   ;;  %7695 = vmatpush1.bf16.msra.mxu0 %v13116_v13  ;;  %v21436_v43 = vld [vmem:[#allocation55_spill] sm:$0xff] }
 0x416   : > { %v5651_v54 = vsel %vm4989_vm13, %v21431_v62, %v5649_v20  ;;  %v21435_v56 = vrot.slane %v17541_v25, 5  ;;  %7696 = vmatprep.subr.bf16.mxu0 %v13124_v35  ;;  %7961 = vmatprep.subr.bf16.mxu1 %v13127_v9  ;;  %v13143_v8 = vld [vmem:[%s20412_s3 + $0x5e8] ss:$16 sps:$4 sm:$0xff]   ;;  %v13148_v29 = vld [vmem:[%s20412_s3 + $0x604] ss:$16 sps:$4 sm:$0xff]   ;;  %v3296_v42 = vsel %vm2650_vm9, %v21436_v43, -inf }
 0x417   : > { %v5679_v16 = vsel %vm4989_vm13, %v21432_v3, %v5677_v10  ;;  %v5629_v19 = vsel %vm4998_vm0, %v21433_v1, %v5627_v28  ;;  %v5653_v63 = vsel %vm4992_vm14, %v21434_v52, %v5651_v54  ;;  %v13151_v6 = vld [vmem:[%s20412_s3 + $0x60c] ss:$16 sps:$4 sm:$0xff]   ;;  %v3297_v24 = vrot.slane %v3296_v42, 4  ;;  %v21437_v20 = vld [vmem:[#allocation39_spill] sm:$0xff] }
 0x418   : > { %v5681_v51 = vsel %vm4992_vm14, %v21435_v56, %v5679_v16  ;;  %v18417_v61 = vsel %vm5001_vm1, %v5630_v17, %v5629_v19  ;;  %v5655_v32 = vsel %vm4995_vm15, %v5654_v15, %v5653_v63  ;;  %7962 = vmatpush1.bf16.msra.mxu1 %v13125_v26  ;;  %v21438_v40 = vunpack.i.l.bf16 %v21437_v20 }
 0x419   : > { %v5683_v25 = vsel %vm4995_vm15, %v5682_v53, %v5681_v51  ;;  %v18424_v12 = vsel %vm4998_vm0, %v5656_v47, %v5655_v32  ;;  %v13133_v53 = vld [vmem:[%s20412_s3 + $0x5ac] ss:$16 sps:$4 sm:$0xff]   ;;  %7697 = vmatpush1.bf16.msra.mxu0 %v13122_v59  ;;  %v13136_v47 = vld [vmem:[%s20412_s3 + $0x5c4] ss:$16 sps:$4 sm:$0xff]   ;;  %v3298_v45 = vmax.f32 %v3296_v42, %v3297_v24  ;;  %v21439_v15 = vunpack.i.h.bf16 %v21437_v20 }
 0x41a   : > { %v18427_v33 = vsel %vm4998_vm0, %v5684_v22, %v5683_v25  ;;  %7698 = vmatprep.subr.bf16.mxu0 %v13130_v2  ;;  %7963 = vmatprep.subr.bf16.mxu1 %v13133_v53  ;;  %v13145_v22 = vld [vmem:[%s20412_s3 + $0x5ec] ss:$16 sps:$4 sm:$0xff]   ;;  %v21440_v51 = vld [vmem:[#allocation73_spill] sm:$0xff] }
 0x41b   : > { %v3299_v60 = vrot.slane %v3298_v45, 2  ;;  %v3632_v35 = vsel %vm2650_vm9, %v21440_v51, -inf  ;;  %v21441_v53 = vld [vmem:[#allocation108_spill] sm:$0xff]  ;;  %v21443_v24 = vld [vmem:[#allocation10_spill] sm:$0xff] }
 0x41c   : > { %7964 = vmatpush1.bf16.msra.mxu1 %v13131_v37  ;;  %v3633_v59 = vrot.slane %v3632_v35, 4 }
 0x41d   : > { %7699 = vmatpush1.bf16.msra.mxu0 %v13128_v50  ;;  %7965 = vmatprep.subr.bf16.mxu1 %v13139_v14  ;;  %v3300_v17 = vmax.f32 %v3298_v45, %v3299_v60  ;;  %v3968_v50 = vsel %vm2650_vm9, %v21441_v53, -inf  ;;  %v21444_v45 = vunpack.i.h.bf16 %v21443_v24 }
 0x41e   : > { %7700 = vmatprep.subr.bf16.mxu0 %v13136_v47  ;;  %v3634_v26 = vmax.f32 %v3632_v35, %v3633_v59  ;;  %v3969_v47 = vrot.slane %v3968_v50, 4 }
 0x41f   : > { %v3301_v38 = vrot.slane %v3300_v17, 1 }
 0x420   : > { %7966 = vmatpush1.bf16.msra.mxu1 %v13137_v36  ;;  %v3635_v37 = vrot.slane %v3634_v26, 2  ;;  %v3970_v36 = vmax.f32 %v3968_v50, %v3969_v47  ;;  %v13160_v50 = vld [vmem:[%s20412_s3 + $0x644] ss:$16 sps:$4 sm:$0xff]  }
 0x421   : > { %7701 = vmatpush1.bf16.msra.mxu0 %v13134_v48  ;;  %7967 = vmatprep.subr.bf16.mxu1 %v13145_v22  ;;  %v3302_v54 = vmax.f32 %v3300_v17, %v3301_v38  ;;  %v21445_v17 = vunpack.i.l.bf16 %v21443_v24  ;;  %v21451_v24 = vld [vmem:[#allocation87_spill] sm:$0xff] }
 0x422   : > { %7702 = vmatprep.subr.bf16.mxu0 %v13142_v7  ;;  %v3636_v48 = vmax.f32 %v3634_v26, %v3635_v37  ;;  %v21449_v26 = vld [vmem:[#allocation82_spill] sm:$0xff] }
 0x423   : > { %v13163_v37 = vld [vmem:[%s20412_s3 + $0x64c] ss:$16 sps:$4 sm:$0xff]  }
 0x424   : > { %7968 = vmatpush1.bf16.msra.mxu1 %v13143_v8  ;;  %v3637_v8 = vrot.slane %v3636_v48, 1 }
 0x425   : > { %7703 = vmatpush1.bf16.msra.mxu0 %v13140_v39  ;;  %7990 = vmatprep.subr.bf16.mxu1 %v13151_v6 }
 0x426   : > { %7725 = vmatprep.subr.bf16.mxu0 %v13148_v29  ;;  %v3971_v29 = vrot.slane %v3970_v36, 2  ;;  %v3638_v20 = vmax.f32 %v3636_v48, %v3637_v8 }
 0x429   : > { %v12746_v0 = vpop.permute.xlu0 %12745 }
 0x42a   : > { %v12748_v18 = vunpack.i.h.bf16 %v12746_v0  ;;  %v12747_v30 = vunpack.i.l.bf16 %v12746_v0 }
 0x42c   : > { %v5250_v10 = vsel %vm708_vm7, %v21438_v40, %v12747_v30  ;;  %v5251_v58 = vsel %vm708_vm7, %v21439_v15, %v12748_v18  ;;  %v3972_v15 = vmax.f32 %v3970_v36, %v3971_v29  ;;  %v21450_v36 = vld [vmem:[#allocation78_spill] sm:$0xff]  ;;  %v13158_v29 = vld [vmem:[%s20412_s3 + $0x640] ss:$16 sps:$4 sm:$0xff]   ;;  %vm5706_vm7 = vcmask 523264  }
 0x42d   : > { %v18479_v41 = vpop.permute.xlu1 %12750  ;;  %v4279_v49 = vpop.permute.xlu0 %4278  ;;  %v5751_v34 = vpack.c.bf16 %v5251_v58, %v5250_v10  ;;  %v13146_v58 = vld [vmem:[%s20412_s3 + $0x600] ss:$16 sps:$4 sm:$0xff]  }
 0x42e   : > { %v12753_v44 = vunpack.i.h.bf16 %v18479_v41  ;;  %v12752_v27 = vunpack.i.l.bf16 %v18479_v41  ;;  %v13182_v41 = vld [vmem:[%s20412_s3 + $0x6c0] ss:$16 sps:$4 sm:$0xff]  }
 0x430   : > { %v5729_v28 = vsel %vm5400_vm4, %v12747_v30, %v12752_v27  ;;  %v5730_v62 = vsel %vm5400_vm4, %v12748_v18, %v12753_v44  ;;  %v21446_v18 = vld [vmem:[#allocation47_spill] sm:$0xff] }
 0x431   : > { %v18495_v3 = vpop.permute.xlu1 %4280  ;;  %v5752_v16 = vpack.c.bf16 %v5730_v62, %v5729_v28  ;;  %v12756_v52 = vpop.permute.xlu0 %12755  ;;  %v13149_v28 = vld [vmem:[%s20412_s3 + $0x608] ss:$16 sps:$4 sm:$0xff]  }
 0x432   : > { %v4475_v13 = vsel %vm4428_vm11, %v4279_v49, %v18495_v3  ;;  %v12758_v7 = vunpack.i.h.bf16 %v12756_v52  ;;  %v12757_v22 = vunpack.i.l.bf16 %v12756_v52 }
 0x433   : > { %v4667_v1 = vmax.f32 %v3302_v54, %v4475_v13  ;;  %7661 = vmatprep.mubr.bf16.mxu0 %v5752_v16  ;;  %7926 = vmatprep.mubr.bf16.mxu1 %v5752_v16  ;;  %v21447_v54 = vld [vmem:[#allocation84_spill] sm:$0xff] }
 0x434   : > { %7662 = vmatmul.mubr.bf16.gmra.mrb[28].mxu0 %v5751_v34  ;;  %7927 = vmatmul.mubr.bf16.gmra.mrb[28].mxu1 %v5751_v34  ;;  %v5402_v60 = vsel %vm5400_vm4, %v21444_v45, %v12758_v7  ;;  %v5401_v0 = vsel %vm5400_vm4, %v21445_v17, %v12757_v22  ;;  %v13154_v34 = vld [vmem:[%s20412_s3 + $0x624] ss:$16 sps:$4 sm:$0xff]  }
 0x435   : > { %v4775_v19 = vadd.f32 %v15284_v21, %v4667_v1  ;;  %v5743_v62 = vpack.c.bf16 %v5402_v60, %v5401_v0  ;;  %v13157_v1 = vld [vmem:[%s20412_s3 + $0x62c] ss:$16 sps:$4 sm:$0xff]   ;;  %v13166_v17 = vld [vmem:[%s20412_s3 + $0x664] ss:$16 sps:$4 sm:$0xff]  }
 0x436   : > { %v13169_v0 = vld [vmem:[%s20412_s3 + $0x66c] ss:$16 sps:$4 sm:$0xff]  }
 0x437   : > { %v4871_v63 = vmax.f32 %v4775_v19, 0.0 }
 0x438   : > { %v4349_v9 = vpop.permute.xlu0 %4348 }
 0x439   : > { %v5618_v56 = vrot.slane %v4871_v63, 1 }
 0x43b   : > { %v5619_v32 = vsel %vm5004_vm2, %v5618_v56, %v18205_v23  ;;  %v21442_v23 = vld [vmem:[#allocation65_spill] sm:$0xff]  ;;  %v21448_v56 = vld [vmem:[#allocation79_spill] sm:$0xff] }
 0x43c   : > { %v12779_v25 = vpack.i.bf16 %v5619_v32, %v18202_v11  ;;  %v4353_v2 = vpop.permute.xlu0 %4352  ;;  %v4498_v11 = vsel %vm4428_vm11, %v21442_v23, %v4349_v9  ;;  %v3973_v9 = vrot.slane %v3972_v15, 1  ;;  %v13152_v32 = vld [vmem:[%s20412_s3 + $0x620] ss:$16 sps:$4 sm:$0xff]  }
 0x43d   : > { %v4690_v30 = vmax.f32 %v21446_v18, %v4498_v11 }
 0x43e   : > { %12780 = vrot.lane.b32.xlu1 %v12779_v25, %s13728_s11  ;;  %v13155_v25 = vld [vmem:[%s20412_s3 + $0x628] ss:$16 sps:$4 sm:$0xff]   ;;  %v3974_v11 = vmax.f32 %v3972_v15, %v3973_v9 }
 0x43f   : > { %v18545_v19 = vadd.f32 %v21126_v46, %v4690_v30  ;;  %v13167_v15 = vld [vmem:[%s20412_s3 + $0x668] ss:$16 sps:$4 sm:$0xff]  }
 0x440   : > { %v18508_v14 = vpop.permute.xlu0 %4422 }
 0x441   : > { %v4894_v47 = vmax.f32 %v18545_v19, 0.0 }
 0x443   : > { %v5507_v18 = vrot.slane %v4894_v47, 1 }
 0x445   : > { %v4211_v42 = vpop.permute.xlu0 %4210 }
 0x446   : > { %v4452_v16 = vsel %vm4428_vm11, %v21447_v54, %v4211_v42  ;;  %v13161_v42 = vld [vmem:[%s20412_s3 + $0x648] ss:$16 sps:$4 sm:$0xff]  }
 0x447   : > { %v4644_v51 = vmax.f32 %v21448_v56, %v4452_v16 }
 0x44a   : > { %v4355_v63 = vpop.permute.xlu0 %4354 }
 0x44b   : > { %v4500_v48 = vsel %vm4428_vm11, %v4353_v2, %v4355_v63 }
 0x44c   : > { %v4692_v45 = vmax.f32 %v21451_v24, %v4500_v48  ;;  %v21453_v48 = vld [vmem:[#allocation77_spill] sm:$0xff] }
 0x451   : > { %v18512_v39 = vpop.permute.xlu1 %12760 }
 0x452   : > { %v12763_v6 = vunpack.i.h.bf16 %v18512_v39  ;;  %v12762_v43 = vunpack.i.l.bf16 %v18512_v39  ;;  %v13191_v39 = vld [vmem:[%s20412_s3 + $0x6e8] ss:$16 sps:$4 sm:$0xff]  }
 0x454   : > { %v5731_v38 = vsel %vm5553_vm6, %v12757_v22, %v12762_v43  ;;  %v5732_v49 = vsel %vm5553_vm6, %v12758_v7, %v12763_v6  ;;  %v4752_v22 = vadd.f32 %v21126_v46, %v4644_v51 }
 0x455   : > { %v4351_v40 = vpop.permute.xlu1 %4350  ;;  %v5744_v10 = vpack.c.bf16 %v5732_v49, %v5731_v38 }
 0x456   : > { %v4499_v13 = vsel %vm4428_vm11, %v4351_v40, %v4353_v2  ;;  %v4848_v49 = vmax.f32 %v4752_v22, 0.0  ;;  %v13181_v22 = vld [vmem:[%s20412_s3 + $0x6ac] ss:$16 sps:$4 sm:$0xff]  }
 0x457   : > { %v4691_v52 = vmax.f32 %v3638_v20, %v4499_v13  ;;  %7704 = vmatprep.mubr.bf16.mxu0 %v5744_v10  ;;  %7969 = vmatprep.mubr.bf16.mxu1 %v5744_v10  ;;  %v13164_v10 = vld [vmem:[%s20412_s3 + $0x660] ss:$16 sps:$4 sm:$0xff]   ;;  %v21452_v13 = vld [vmem:[#allocation100_spill] sm:$0xff] }
 0x458   : > { %7705 = vmatmul.mubr.bf16.vlgmr.msra.gmra.mrb[24].mxu0 %v5743_v62  ;;  %7970 = vmatmul.mubr.bf16.vlgmr.msra.gmra.mrb[24].mxu1 %v5743_v62  ;;  %v5604_v56 = vrot.slane %v4848_v49, 1 }
 0x459   : > { %v4421_v35 = vpop.permute.xlu1 %4420  ;;  %7726 = vmatpush1.bf16.msra.mxu0 %v13146_v58  ;;  %7991 = vmatpush1.bf16.msra.mxu1 %v13149_v28  ;;  %v4799_v59 = vadd.f32 %v15284_v21, %v4691_v52  ;;  %v4800_v28 = vadd.f32 %v21126_v46, %v4692_v45 }
 0x45a   : > { %v4522_v53 = vsel %vm4428_vm11, %v21449_v26, %v4421_v35  ;;  %7727 = vmatprep.subr.bf16.mxu0 %v13154_v34  ;;  %7992 = vmatprep.subr.bf16.mxu1 %v13157_v1  ;;  %v5508_v1 = vsel %vm5004_vm2, %v5507_v18, %v18283_v5  ;;  %v13173_v5 = vld [vmem:[%s20412_s3 + $0x688] ss:$16 sps:$4 sm:$0xff]  }
 0x45b   : > { %v4714_v7 = vmax.f32 %v21450_v36, %v4522_v53  ;;  %v4895_v2 = vmax.f32 %v4799_v59, 0.0  ;;  %v13178_v53 = vld [vmem:[%s20412_s3 + $0x6a4] ss:$16 sps:$4 sm:$0xff]  }
 0x45d   : > { %v18568_v23 = vadd.f32 %v21126_v46, %v4714_v7  ;;  %v4425_v8 = vpop.permute.xlu1 %4424  ;;  %7728 = vmatpush1.bf16.msra.mxu0 %v13152_v32  ;;  %7993 = vmatpush1.bf16.msra.mxu1 %v13155_v25  ;;  %v5646_v58 = vrot.slane %v4895_v2, 1  ;;  %v13170_v32 = vld [vmem:[%s20412_s3 + $0x680] ss:$16 sps:$4 sm:$0xff]   ;;  %v13179_v2 = vld [vmem:[%s20412_s3 + $0x6a8] ss:$16 sps:$4 sm:$0xff]  }
 0x45e   : > { %v4523_v60 = vsel %vm4428_vm11, %v18508_v14, %v4425_v8  ;;  %7729 = vmatprep.subr.bf16.mxu0 %v13160_v50  ;;  %7994 = vmatprep.subr.bf16.mxu1 %v13163_v37 }
 0x45f   : > { %v4918_v30 = vmax.f32 %v18568_v23, 0.0  ;;  %v4715_v38 = vmax.f32 %v3974_v11, %v4523_v60  ;;  %v5647_v26 = vsel %vm5004_vm2, %v5646_v58, %v18333_v31  ;;  %v5658_v31 = vrot.slane %v4894_v47, 2 }
 0x461   : > { %v5535_v20 = vrot.slane %v4918_v30, 1  ;;  %v4823_v14 = vadd.f32 %v15284_v21, %v4715_v38  ;;  %7730 = vmatpush1.bf16.msra.mxu0 %v13158_v29  ;;  %7995 = vmatpush1.bf16.msra.mxu1 %v13161_v42  ;;  %v13172_v21 = vld [vmem:[%s20412_s3 + $0x684] ss:$16 sps:$4 sm:$0xff]   ;;  %v5605_v42 = vsel %vm5004_vm2, %v5604_v56, %v18372_v57  ;;  %v5686_v47 = vrot.slane %v4918_v30, 2  ;;  %v13200_v56 = vld [vmem:[%s20412_s3 + $0x720] ss:$16 sps:$4 sm:$0xff]  }
 0x462   : > { %7731 = vmatprep.subr.bf16.mxu0 %v13166_v17  ;;  %7996 = vmatprep.subr.bf16.mxu1 %v13169_v0  ;;  %v13184_v57 = vld [vmem:[%s20412_s3 + $0x6c4] ss:$16 sps:$4 sm:$0xff]  }
 0x463   : > { %v4919_v54 = vmax.f32 %v4823_v14, 0.0  ;;  %v5536_v52 = vsel %vm5004_vm2, %v5535_v20, %v18313_v4  ;;  %v4896_v4 = vmax.f32 %v4800_v28, 0.0 }
 0x464   : > { %v12784_v63 = vpack.i.bf16 %v5536_v52, %v5508_v1  ;;  %v13194_v1 = vld [vmem:[%s20412_s3 + $0x700] ss:$16 sps:$4 sm:$0xff]   ;;  %v13197_v52 = vld [vmem:[%s20412_s3 + $0x708] ss:$16 sps:$4 sm:$0xff]  }
 0x465   : > { %v5674_v51 = vrot.slane %v4919_v54, 1  ;;  %7732 = vmatpush1.bf16.msra.mxu0 %v13164_v10  ;;  %7997 = vmatpush1.bf16.msra.mxu1 %v13167_v15  ;;  %v5660_v19 = vrot.slane %v4896_v4, 1  ;;  %v13185_v15 = vld [vmem:[%s20412_s3 + $0x6c8] ss:$16 sps:$4 sm:$0xff]   ;;  %v13214_v4 = vld [vmem:[%s20412_s3 + $0x764] ss:$16 sps:$4 sm:$0xff]  }
 0x466   : > { %v4283_v40 = vpop.permute.xlu1 %4282  ;;  %v12766_v16 = vpop.permute.xlu0 %12765  ;;  %12785 = vrot.lane.b32.xlu0 %v12784_v63, %s13727_s30  ;;  %7733 = vmatprep.subr.bf16.mxu0 %v13172_v21  ;;  %v13193_v21 = vld [vmem:[%s20412_s3 + $0x6ec] ss:$16 sps:$4 sm:$0xff]   ;;  %s354_s30 = sand.u32 1, %s13710_s14  }
 0x467   : > { %v4476_v62 = vsel %vm4428_vm11, %v18495_v3, %v4283_v40  ;;  %v13175_v3 = vld [vmem:[%s20412_s3 + $0x68c] ss:$16 sps:$4 sm:$0xff]   ;;  %v12768_v25 = vunpack.i.h.bf16 %v12766_v16  ;;  %v12767_v50 = vunpack.i.l.bf16 %v12766_v16  ;;  %v5675_v7 = vsel %vm5004_vm2, %v5674_v51, %v18365_v55  ;;  %v13176_v55 = vld [vmem:[%s20412_s3 + $0x6a0] ss:$16 sps:$4 sm:$0xff]   ;;  %v13203_v51 = vld [vmem:[%s20412_s3 + $0x728] ss:$16 sps:$4 sm:$0xff]  }
 0x468   : > { %v4668_v34 = vmax.f32 %v21452_v13, %v4476_v62  ;;  %7998 = vmatprep.subr.bf16.mxu1 %v13175_v3  ;;  %v12789_v23 = vpack.i.bf16 %v5675_v7, %v5647_v26  ;;  %v13190_v62 = vld [vmem:[%s20412_s3 + $0x6e4] ss:$16 sps:$4 sm:$0xff]   ;;  %v13205_v63 = vld [vmem:[%s20412_s3 + $0x72c] ss:$16 sps:$4 sm:$0xff]   ;;  %v13215_v26 = vld [vmem:[%s20412_s3 + $0x768] ss:$16 sps:$4 sm:$0xff]  }
 0x469   : > { %7734 = vmatpush1.bf16.msra.mxu0 %v13170_v32  ;;  %7999 = vmatpush1.bf16.msra.mxu1 %v13173_v5  ;;  %v5403_v17 = vsel %vm5400_vm4, %v12752_v27, %v12767_v50  ;;  %v5404_v0 = vsel %vm5400_vm4, %v12753_v44, %v12768_v25  ;;  %v5659_v27 = vsel %vm5001_vm1, %v5658_v31, %v18424_v12  ;;  %v13187_v44 = vld [vmem:[%s20412_s3 + $0x6cc] ss:$16 sps:$4 sm:$0xff]   ;;  %v13202_v3 = vld [vmem:[%s20412_s3 + $0x724] ss:$16 sps:$4 sm:$0xff]   ;;  %v13206_v32 = vld [vmem:[%s20412_s3 + $0x740] ss:$16 sps:$4 sm:$0xff]  }
 0x46a   : > { %v4776_v35 = vadd.f32 %v21126_v46, %v4668_v34  ;;  %v4427_v9 = vpop.permute.xlu1 %4426  ;;  %12790 = vrot.lane.b32.xlu1 %v12789_v23, %s13728_s11  ;;  %7735 = vmatprep.subr.bf16.mxu0 %v13178_v53  ;;  %v5753_v10 = vpack.c.bf16 %v5404_v0, %v5403_v17  ;;  %v5687_v12 = vsel %vm5001_vm1, %v5686_v47, %v18427_v33  ;;  %v13188_v34 = vld [vmem:[%s20412_s3 + $0x6e0] ss:$16 sps:$4 sm:$0xff]   ;;  %v13209_v5 = vld [vmem:[%s20412_s3 + $0x748] ss:$16 sps:$4 sm:$0xff]   ;;  %v13220_v53 = vld [vmem:[%s20412_s3 + $0x784] ss:$16 sps:$4 sm:$0xff]  }
 0x46b   : > { %v4524_v59 = vsel %vm4428_vm11, %v4425_v8, %v4427_v9  ;;  %8000 = vmatprep.subr.bf16.mxu1 %v13181_v22  ;;  %v5661_v58 = vsel %vm5004_vm2, %v5660_v19, %v5659_v27  ;;  %v13211_v9 = vld [vmem:[%s20412_s3 + $0x74c] ss:$16 sps:$4 sm:$0xff]   ;;  %v13224_v22 = vld [vmem:[%s20412_s3 + $0x7a0] ss:$16 sps:$4 sm:$0xff]   ;;  %v13227_v23 = vld [vmem:[%s20412_s3 + $0x7a8] ss:$16 sps:$4 sm:$0xff]  }
 0x46c   : > { %v4872_v37 = vmax.f32 %v4776_v35, 0.0  ;;  %v4716_v36 = vmax.f32 %v21453_v48, %v4524_v59  ;;  %v13208_v35 = vld [vmem:[%s20412_s3 + $0x744] ss:$16 sps:$4 sm:$0xff]   ;;  %v13212_v59 = vld [vmem:[%s20412_s3 + $0x760] ss:$16 sps:$4 sm:$0xff]   ;;  %vm9755_vm11 = vcmask 588800  }
 0x46d   : > { %7736 = vmatpush1.bf16.msra.mxu0 %v13176_v55  ;;  %8001 = vmatpush1.bf16.msra.mxu1 %v13179_v2  ;;  %v13221_v48 = vld [vmem:[%s20412_s3 + $0x788] ss:$16 sps:$4 sm:$0xff]   ;;  %v13229_v7 = vld [vmem:[%s20412_s3 + $0x7ac] ss:$16 sps:$4 sm:$0xff]   ;;  %v13232_v31 = vld [vmem:[%s20412_s3 + $0x7c4] ss:$16 sps:$4 sm:$0xff]  }
 0x46e   : > { %v5632_v11 = vrot.slane %v4872_v37, 1  ;;  %v4824_v8 = vadd.f32 %v21126_v46, %v4716_v36  ;;  %v18632_v29 = vpop.permute.xlu1 %12770  ;;  %7737 = vmatprep.subr.bf16.mxu0 %v13184_v57  ;;  %8002 = vmatprep.subr.bf16.mxu1 %v13187_v44  ;;  %v13218_v37 = vld [vmem:[%s20412_s3 + $0x780] ss:$16 sps:$4 sm:$0xff]   ;;  %v13226_v36 = vld [vmem:[%s20412_s3 + $0x7a4] ss:$16 sps:$4 sm:$0xff]   ;;  %s11611_s28 = sshll.u32 %s354_s30, 2 }
 0x46f   : > { %v12773_v24 = vunpack.i.h.bf16 %v18632_v29  ;;  %v12772_v46 = vunpack.i.l.bf16 %v18632_v29  ;;  %v13238_v55 = vld [vmem:[%s20412_s3 + $0x7e4] ss:$16 sps:$4 sm:$0xff]   ;;  %v13241_v2 = vld [vmem:[%s20412_s3 + $0x7ec] ss:$16 sps:$4 sm:$0xff]   ;;  %v13236_v19 = vld [vmem:[%s20412_s3 + $0x7e0] ss:$16 sps:$4 sm:$0xff]  }
 0x470   : > { %v4920_v45 = vmax.f32 %v4824_v8, 0.0  ;;  %v5633_v60 = vsel %vm5004_vm2, %v5632_v11, %v18417_v61  ;;  %v13235_v11 = vld [vmem:[%s20412_s3 + $0x7cc] ss:$16 sps:$4 sm:$0xff]   ;;  %v13230_v8 = vld [vmem:[%s20412_s3 + $0x7c0] ss:$16 sps:$4 sm:$0xff]   ;;  %s356_s12 = scalar_lea.vmem [#allocation2], %s11611_s28 }
 0x471   : > { %v12794_v18 = vpack.i.bf16 %v5633_v60, %v5605_v42  ;;  %v5733_v30 = vsel %vm5553_vm6, %v12767_v50, %v12772_v46  ;;  %v5734_v38 = vsel %vm5553_vm6, %v12768_v25, %v12773_v24  ;;  %7738 = vmatpush1.bf16.msra.mxu0 %v13182_v41  ;;  %8003 = vmatpush1.bf16.msra.mxu1 %v13185_v15  ;;  %v13217_v25 = vld [vmem:[%s20412_s3 + $0x76c] ss:$16 sps:$4 sm:$0xff]   ;;  %v13233_v42 = vld [vmem:[%s20412_s3 + $0x7c8] ss:$16 sps:$4 sm:$0xff]   ;;  %v13244_v57 = vld [vmem:[%s20412_s3 + $0x804] ss:$16 sps:$4 sm:$0xff]  }
 0x472   : > { %v5688_v49 = vrot.slane %v4920_v45, 1  ;;  %v5754_v20 = vpack.c.bf16 %v5734_v38, %v5733_v30  ;;  %7739 = vmatprep.subr.bf16.mxu0 %v13190_v62  ;;  %8004 = vmatprep.subr.bf16.mxu1 %v13193_v21  ;;  %v13223_v50 = vld [vmem:[%s20412_s3 + $0x78c] ss:$16 sps:$4 sm:$0xff]   ;;  %v13239_v47 = vld [vmem:[%s20412_s3 + $0x7e8] ss:$16 sps:$4 sm:$0xff]   ;;  %s11520_s20 = sshll.u32 %s356_s12, 4  ;;  %s20369_s20 = int_to_ptr.vmem [resolvable:$true] %s11520_s20 }
 0x473   : > { %12795 = vrot.lane.b32.xlu0 %v12794_v18, %s13728_s11  ;;  %v13247_v45 = vld [vmem:[%s20412_s3 + $0x80c] ss:$16 sps:$4 sm:$0xff]   ;;  %v13250_v27 = vld [vmem:[%s20412_s3 + $0x824] ss:$16 sps:$4 sm:$0xff]   ;;  %v13251_v44 = vld [vmem:[%s20412_s3 + $0x828] ss:$16 sps:$4 sm:$0xff]  }
 0x474   : > { %7714 = vmatprep.mubr.bf16.mxu0 %v5754_v20  ;;  %7979 = vmatprep.mubr.bf16.mxu1 %v5754_v20  ;;  %v5689_v28 = vsel %vm5004_vm2, %v5688_v49, %v5687_v12  ;;  %v13242_v49 = vld [vmem:[%s20412_s3 + $0x800] ss:$16 sps:$4 sm:$0xff]   ;;  %v13245_v20 = vld [vmem:[%s20412_s3 + $0x808] ss:$16 sps:$4 sm:$0xff]   ;;  %v13253_v41 = vld [vmem:[%s20412_s3 + $0x82c] ss:$16 sps:$4 sm:$0xff]  }
 0x475   : > { %7715 = vmatmul.mubr.bf16.gmra.mrb[28].mxu0 %v5753_v10  ;;  %7980 = vmatmul.mubr.bf16.gmra.mrb[28].mxu1 %v5753_v10  ;;  %v12799_v16 = vpack.i.bf16 %v5689_v28, %v5661_v58  ;;  %v13254_v10 = vld [vmem:[%s20412_s3 + $0x840] ss:$16 sps:$4 sm:$0xff]   ;;  %v13257_v12 = vld [vmem:[%s20412_s3 + $0x848] ss:$16 sps:$4 sm:$0xff]   ;;  %v13262_v15 = vld [vmem:[%s20412_s3 + $0x864] ss:$16 sps:$4 sm:$0xff]  }
 0x476   : > { %7740 = vmatpush1.bf16.msra.mxu0 %v13188_v34  ;;  %8005 = vmatpush1.bf16.msra.mxu1 %v13191_v39  ;;  %v13265_v58 = vld [vmem:[%s20412_s3 + $0x86c] ss:$16 sps:$4 sm:$0xff]   ;;  %v13260_v28 = vld [vmem:[%s20412_s3 + $0x860] ss:$16 sps:$4 sm:$0xff]   ;;  %v13263_v62 = vld [vmem:[%s20412_s3 + $0x868] ss:$16 sps:$4 sm:$0xff]  }
 0x477   : > { %12800 = vrot.lane.b32.xlu1 %v12799_v16, %s13728_s11  ;;  %v13268_v21 = vld [vmem:[%s20412_s3 + $0x884] ss:$16 sps:$4 sm:$0xff]   ;;  %v13269_v16 = vld [vmem:[%s20412_s3 + $0x888] ss:$16 sps:$4 sm:$0xff]   ;;  %v13277_v34 = vld [vmem:[%s20412_s3 + $0x8ac] ss:$16 sps:$4 sm:$0xff]  }
 0x478   : > { %v13272_v39 = vld [vmem:[%s20412_s3 + $0x8a0] ss:$16 sps:$4 sm:$0xff]   ;;  %s372_s11 = scalar_select %p371_p11, %s13806_s17, 1 }
 0x479   : > { %v18662_v61 = vpop.permute.xlu0 %12775  ;;  %s11502_s25 = scalar_lea.sflag [#allocation3], %s354_s30  ;;  %s13729_s17 = smov [#allocation2]  }
 0x47a   : > { %v12778_v14 = vunpack.i.h.bf16 %v18662_v61  ;;  %v12777_v40 = vunpack.i.l.bf16 %v18662_v61  ;;  %v13248_v61 = vld [vmem:[%s20412_s3 + $0x820] ss:$16 sps:$4 sm:$0xff]   ;;  %s12447_s21 = sshll.u32 %s372_s11, 4  ;;  %s13660_s28 = sshll.u32 %s13729_s17, 4  ;;  %s13661_s28 = int_to_ptr.vmem [resolvable:$false] %s13660_s28 }
 0x47b   : > { %s375_s27 = scalar_lea.vmem %s20419_s10, %s12447_s21  ;;  %s13662_s29 = scalar_lea.vmem %s13661_s28, 128 }
 0x47c   : > { %v5555_v33 = vsel %vm5553_vm6, %v12763_v6, %v12778_v14  ;;  %v5554_v54 = vsel %vm5553_vm6, %v12762_v43, %v12777_v40  ;;  %v13196_v6 = vld [vmem:[%s20412_s3 + $0x704] ss:$16 sps:$4 sm:$0xff]   ;;  %v13199_v43 = vld [vmem:[%s20412_s3 + $0x70c] ss:$16 sps:$4 sm:$0xff]   ;;  %p13663_p1 = scmp.lt.s32.totalorder %s20369_s20, %s13661_s28 }
 0x47d   : > { %v18698_v13 = vpack.c.bf16 %v5555_v33, %v5554_v54  ;;  %7741 = vmatprep.subr.bf16.mxu0 %v13196_v6  ;;  %8006 = vmatprep.subr.bf16.mxu1 %v13199_v43  ;;  %v13271_v33 = vld [vmem:[%s20412_s3 + $0x88c] ss:$16 sps:$4 sm:$0xff]   ;;  %v13266_v54 = vld [vmem:[%s20412_s3 + $0x880] ss:$16 sps:$4 sm:$0xff]   ;;  %v13275_v6 = vld [vmem:[%s20412_s3 + $0x8a8] ss:$16 sps:$4 sm:$0xff]  }
 0x47e   : > { %7742 = vmatpush1.bf16.msra.mxu0 %v13194_v1  ;;  %8007 = vmatpush1.bf16.msra.mxu1 %v13197_v52  ;;  %v13280_v43 = vld [vmem:[%s20412_s3 + $0x8c4] ss:$16 sps:$4 sm:$0xff]   ;;  %v13283_v1 = vld [vmem:[%s20412_s3 + $0x8cc] ss:$16 sps:$4 sm:$0xff]   ;;  %v13278_v52 = vld [vmem:[%s20412_s3 + $0x8c0] ss:$16 sps:$4 sm:$0xff]  }
 0x47f   : > { %7743 = vmatprep.subr.bf16.mxu0 %v13202_v3  ;;  %8008 = vmatprep.subr.bf16.mxu1 %v13205_v63  ;;  %v13281_v3 = vld [vmem:[%s20412_s3 + $0x8c8] ss:$16 sps:$4 sm:$0xff]   ;;  %v13286_v63 = vld [vmem:[%s20412_s3 + $0x8e4] ss:$16 sps:$4 sm:$0xff]  }
 0x482   : > { %7744 = vmatpush1.bf16.msra.mxu0 %v13200_v56  ;;  %8009 = vmatpush1.bf16.msra.mxu1 %v13203_v51  ;;  %v13289_v56 = vld [vmem:[%s20412_s3 + $0x8ec] ss:$16 sps:$4 sm:$0xff]   ;;  %v13284_v51 = vld [vmem:[%s20412_s3 + $0x8e0] ss:$16 sps:$4 sm:$0xff]  }
 0x483   : > { %7745 = vmatprep.subr.bf16.mxu0 %v13208_v35  ;;  %8010 = vmatprep.subr.bf16.mxu1 %v13211_v9  ;;  %v13287_v35 = vld [vmem:[%s20412_s3 + $0x8e8] ss:$16 sps:$4 sm:$0xff]   ;;  %v13292_v9 = vld [vmem:[%s20412_s3 + $0x904] ss:$16 sps:$4 sm:$0xff]  }
 0x486   : > { %7746 = vmatpush1.bf16.msra.mxu0 %v13206_v32  ;;  %8011 = vmatpush1.bf16.msra.mxu1 %v13209_v5  ;;  %v13295_v32 = vld [vmem:[%s20412_s3 + $0x90c] ss:$16 sps:$4 sm:$0xff]  }
 0x487   : > { %7747 = vmatprep.subr.bf16.mxu0 %v13214_v4  ;;  %8012 = vmatprep.subr.bf16.mxu1 %v13217_v25  ;;  %v13290_v4 = vld [vmem:[%s20412_s3 + $0x900] ss:$16 sps:$4 sm:$0xff]   ;;  %v13293_v25 = vld [vmem:[%s20412_s3 + $0x908] ss:$16 sps:$4 sm:$0xff]  }
 0x48a   : > { %7748 = vmatpush1.bf16.msra.mxu0 %v13212_v59  ;;  %8013 = vmatpush1.bf16.msra.mxu1 %v13215_v26 }
 0x48b   : > { %7749 = vmatprep.subr.bf16.mxu0 %v13220_v53  ;;  %8014 = vmatprep.subr.bf16.mxu1 %v13223_v50  ;;  %v13298_v53 = vld [vmem:[%s20412_s3 + $0x924] ss:$16 sps:$4 sm:$0xff]   ;;  %v13301_v50 = vld [vmem:[%s20412_s3 + $0x92c] ss:$16 sps:$4 sm:$0xff]  }
 0x48e   : > { %7750 = vmatpush1.bf16.msra.mxu0 %v13218_v37  ;;  %8015 = vmatpush1.bf16.msra.mxu1 %v13221_v48 }
 0x48f   : > { %7751 = vmatprep.subr.bf16.mxu0 %v13226_v36  ;;  %8016 = vmatprep.subr.bf16.mxu1 %v13229_v7  ;;  %v13296_v7 = vld [vmem:[%s20412_s3 + $0x920] ss:$16 sps:$4 sm:$0xff]  }
 0x492   : > { %7752 = vmatpush1.bf16.msra.mxu0 %v13224_v22  ;;  %8017 = vmatpush1.bf16.msra.mxu1 %v13227_v23  ;;  %v13299_v22 = vld [vmem:[%s20412_s3 + $0x928] ss:$16 sps:$4 sm:$0xff]  }
 0x493   : > { %7753 = vmatprep.subr.bf16.mxu0 %v13232_v31  ;;  %8018 = vmatprep.subr.bf16.mxu1 %v13235_v11 }
 0x496   : > { %7754 = vmatpush1.bf16.msra.mxu0 %v13230_v8  ;;  %8019 = vmatpush1.bf16.msra.mxu1 %v13233_v42 }
 0x497   : > { %7755 = vmatprep.subr.bf16.mxu0 %v13238_v55  ;;  %8020 = vmatprep.subr.bf16.mxu1 %v13241_v2  ;;  %v13304_v2 = vld [vmem:[%s20412_s3 + $0x944] ss:$16 sps:$4 sm:$0xff]  }
 0x49a   : > { %7756 = vmatpush1.bf16.msra.mxu0 %v13236_v19  ;;  %8021 = vmatpush1.bf16.msra.mxu1 %v13239_v47 }
 0x49b   : > { %7778 = vmatprep.subr.bf16.mxu0 %v13244_v57  ;;  %8043 = vmatprep.subr.bf16.mxu1 %v13247_v45  ;;  %v13305_v57 = vld [vmem:[%s20412_s3 + $0x948] ss:$16 sps:$4 sm:$0xff]  }
 0x4b0   : > { %v18809_v60 = vpop.permute.xlu1 %12780 }
 0x4b1   : > { %v12783_v17 = vunpack.i.h.bf16 %v18809_v60  ;;  %v12782_v0 = vunpack.i.l.bf16 %v18809_v60 }
 0x4b3   : > { %v5735_v18 = vsel %vm5706_vm7, %v12777_v40, %v12782_v0  ;;  %v5736_v30 = vsel %vm5706_vm7, %v12778_v14, %v12783_v17  ;;  %v13256_v14 = vld [vmem:[%s20412_s3 + $0x844] ss:$16 sps:$4 sm:$0xff]   ;;  %v13259_v40 = vld [vmem:[%s20412_s3 + $0x84c] ss:$16 sps:$4 sm:$0xff]  }
 0x4b4   : > { %v5746_v38 = vpack.c.bf16 %v5736_v30, %v5735_v18 }
 0x4b6   : > { %7757 = vmatprep.mubr.bf16.mxu0 %v5746_v38  ;;  %8022 = vmatprep.mubr.bf16.mxu1 %v5746_v38 }
 0x4b7   : > { %7758 = vmatmul.mubr.bf16.vlgmr.msra.gmra.mrb[24].mxu0 %v18698_v13  ;;  %8023 = vmatmul.mubr.bf16.vlgmr.msra.gmra.mrb[24].mxu1 %v18698_v13  ;;  %v13274_v13 = vld [vmem:[%s20412_s3 + $0x8a4] ss:$16 sps:$4 sm:$0xff]  }
 0x4b8   : > { %7779 = vmatpush1.bf16.msra.mxu0 %v13242_v49  ;;  %8044 = vmatpush1.bf16.msra.mxu1 %v13245_v20 }
 0x4b9   : > { %7780 = vmatprep.subr.bf16.mxu0 %v13250_v27  ;;  %8045 = vmatprep.subr.bf16.mxu1 %v13253_v41 }
 0x4bc   : > { %7781 = vmatpush1.bf16.msra.mxu0 %v13248_v61  ;;  %8046 = vmatpush1.bf16.msra.mxu1 %v13251_v44 }
 0x4bd   : > { %7782 = vmatprep.subr.bf16.mxu0 %v13256_v14  ;;  %8047 = vmatprep.subr.bf16.mxu1 %v13259_v40 }
 0x4c0   : > { %7783 = vmatpush1.bf16.msra.mxu0 %v13254_v10  ;;  %8048 = vmatpush1.bf16.msra.mxu1 %v13257_v12 }
 0x4c1   : > { %7784 = vmatprep.subr.bf16.mxu0 %v13262_v15  ;;  %8049 = vmatprep.subr.bf16.mxu1 %v13265_v58 }
 0x4c4   : > { %7785 = vmatpush1.bf16.msra.mxu0 %v13260_v28  ;;  %8050 = vmatpush1.bf16.msra.mxu1 %v13263_v62 }
 0x4c5   : > { %7786 = vmatprep.subr.bf16.mxu0 %v13268_v21  ;;  %8051 = vmatprep.subr.bf16.mxu1 %v13271_v33 }
 0x4c8   : > { %7787 = vmatpush1.bf16.msra.mxu0 %v13266_v54  ;;  %8052 = vmatpush1.bf16.msra.mxu1 %v13269_v16  ;;  %v21454_v54 = vld [vmem:[#allocation7_spill] sm:$0xff] }
 0x4c9   : > { %7788 = vmatprep.subr.bf16.mxu0 %v13274_v13  ;;  %8053 = vmatprep.subr.bf16.mxu1 %v13277_v34 }
 0x4cc   : > { %7789 = vmatpush1.bf16.msra.mxu0 %v13272_v39  ;;  %8054 = vmatpush1.bf16.msra.mxu1 %v13275_v6  ;;  %v13308_v6 = vld [vmem:[%s20414_s5 + $0x190] ss:$16 sps:$4 sm:$0xff]  }
 0x4cd   : > { %7790 = vmatprep.subr.bf16.mxu0 %v13280_v43  ;;  %8055 = vmatprep.subr.bf16.mxu1 %v13283_v1  ;;  %v13310_v43 = vld [vmem:[%s20414_s5 + $0x194] ss:$16 sps:$4 sm:$0xff]  }
 0x4d0   : > { %7791 = vmatpush1.bf16.msra.mxu0 %v13278_v52  ;;  %8056 = vmatpush1.bf16.msra.mxu1 %v13281_v3 }
 0x4d1   : > { %7792 = vmatprep.subr.bf16.mxu0 %v13286_v63  ;;  %8057 = vmatprep.subr.bf16.mxu1 %v13289_v56  ;;  %v13311_v56 = vld [vmem:[%s20414_s5 + $0x198] ss:$16 sps:$4 sm:$0xff]  }
 0x4d4   : > { %7793 = vmatpush1.bf16.msra.mxu0 %v13284_v51  ;;  %8058 = vmatpush1.bf16.msra.mxu1 %v13287_v35  ;;  %v13313_v51 = vld [vmem:[%s20414_s5 + $0x19c] ss:$16 sps:$4 sm:$0xff]  }
 0x4d5   : > { %7794 = vmatprep.subr.bf16.mxu0 %v13292_v9  ;;  %8059 = vmatprep.subr.bf16.mxu1 %v13295_v32 }
 0x4d8   : > { %v12786_v5 = vpop.permute.xlu0 %12785  ;;  %7795 = vmatpush1.bf16.msra.mxu0 %v13290_v4  ;;  %8060 = vmatpush1.bf16.msra.mxu1 %v13293_v25  ;;  %v13316_v4 = vld [vmem:[%s20414_s5 + $0x1b4] ss:$16 sps:$4 sm:$0xff]   ;;  %v13319_v25 = vld [vmem:[%s20414_s5 + $0x1bc] ss:$16 sps:$4 sm:$0xff]  }
 0x4d9   : > { %v12788_v59 = vunpack.i.h.bf16 %v12786_v5  ;;  %v12787_v26 = vunpack.i.l.bf16 %v12786_v5  ;;  %7796 = vmatprep.subr.bf16.mxu0 %v13298_v53  ;;  %8061 = vmatprep.subr.bf16.mxu1 %v13301_v50 }
 0x4db   : > { %v5556_v23 = vsel %vm5553_vm6, %v12772_v46, %v12787_v26  ;;  %v5557_v31 = vsel %vm5553_vm6, %v12773_v24, %v12788_v59  ;;  %v13307_v46 = vld [vmem:[%s20412_s3 + $0x94c] ss:$16 sps:$4 sm:$0xff]   ;;  %v13302_v24 = vld [vmem:[%s20412_s3 + $0x940] ss:$16 sps:$4 sm:$0xff]  }
 0x4dc   : > { %v12791_v37 = vpop.permute.xlu1 %12790  ;;  %v5755_v47 = vpack.c.bf16 %v5557_v31, %v5556_v23  ;;  %7797 = vmatpush1.bf16.msra.mxu0 %v13296_v7  ;;  %8062 = vmatpush1.bf16.msra.mxu1 %v13299_v22 }
 0x4dd   : > { %v12793_v48 = vunpack.i.h.bf16 %v12791_v37  ;;  %v12792_v36 = vunpack.i.l.bf16 %v12791_v37  ;;  %7798 = vmatprep.subr.bf16.mxu0 %v13304_v2  ;;  %8063 = vmatprep.subr.bf16.mxu1 %v13307_v46 }
 0x4df   : > { %v5737_v11 = vsel %vm5706_vm7, %v12787_v26, %v12792_v36  ;;  %v5738_v8 = vsel %vm5706_vm7, %v12788_v59, %v12793_v48 }
 0x4e0   : > { %v5756_v55 = vpack.c.bf16 %v5738_v8, %v5737_v11  ;;  %7799 = vmatpush1.bf16.msra.mxu0 %v13302_v24  ;;  %8064 = vmatpush1.bf16.msra.mxu1 %v13305_v57  ;;  %v13317_v8 = vld [vmem:[%s20414_s5 + $0x1b8] ss:$16 sps:$4 sm:$0xff]  }
 0x4e1   : > { %9771 = vmatprep.subr.bf16.mxu0 %v13310_v43  ;;  %9812 = vmatprep.subr.bf16.mxu1 %v13313_v51 }
 0x4e2   : > { %7767 = vmatprep.mubr.bf16.mxu0 %v5756_v55  ;;  %8032 = vmatprep.mubr.bf16.mxu1 %v5756_v55 }
 0x4e3   : > { %7768 = vmatmul.mubr.bf16.gmra.mrb[28].mxu0 %v5755_v47  ;;  %8033 = vmatmul.mubr.bf16.gmra.mrb[28].mxu1 %v5755_v47  ;;  %v13322_v47 = vld [vmem:[%s20414_s5 + $0x1d4] ss:$16 sps:$4 sm:$0xff]  }
 0x4e5   : > { %v12796_v42 = vpop.permute.xlu0 %12795 }
 0x4e6   : > { %v12798_v19 = vunpack.i.h.bf16 %v12796_v42  ;;  %v12797_v29 = vunpack.i.l.bf16 %v12796_v42 }
 0x4e8   : > { %v5748_v45 = vpack.c.bf16 %v12798_v19, %v12797_v29  ;;  %v5708_v30 = vsel %vm5706_vm7, %v12783_v17, %v12798_v19  ;;  %v5707_v38 = vsel %vm5706_vm7, %v12782_v0, %v12797_v29 }
 0x4e9   : > { %v12801_v18 = vpop.permute.xlu1 %12800  ;;  %v5747_v27 = vpack.c.bf16 %v5708_v30, %v5707_v38 }
 0x4ea   : > { %12015 = vmatprep.mubr.msk.bf16.mxu0 %vm7559_vm8, %v5748_v45  ;;  %12017 = vmatprep.mubr.msk.bf16.mxu1 %vm7559_vm8, %v5748_v45  ;;  %v12803_v49 = vunpack.i.h.bf16 %v12801_v18  ;;  %v12802_v20 = vunpack.i.l.bf16 %v12801_v18 }
 0x4eb   : > { %7811 = vmatmul.mubr.bf16.vlgmr.msra.gmra.mrb[24].mxu0 %v5747_v27  ;;  %8076 = vmatmul.mubr.bf16.vlgmr.msra.gmra.mrb[24].mxu1 %v5747_v27 }
 0x4ec   : > { %v5758_v41 = vpack.c.bf16 %v12803_v49, %v12802_v20  ;;  %v5709_v61 = vsel %vm5706_vm7, %v12792_v36, %v12802_v20  ;;  %v5710_v17 = vsel %vm5706_vm7, %v12793_v48, %v12803_v49  ;;  %9772 = vmatpush1.bf16.msra.mxu0 %v13308_v6  ;;  %v13314_v48 = vld [vmem:[%s20414_s5 + $0x1b0] ss:$16 sps:$4 sm:$0xff]   ;;  %9813 = vmatpush1.bf16.msra.mxu1 %v13311_v56  ;;  %v13325_v49 = vld [vmem:[%s20414_s5 + $0x1dc] ss:$16 sps:$4 sm:$0xff]  }
 0x4ed   : > { %v5757_v44 = vpack.c.bf16 %v5710_v17, %v5709_v61  ;;  %9773 = vmatprep.subr.bf16.mxu0 %v13316_v4  ;;  %9814 = vmatprep.subr.bf16.mxu1 %v13319_v25  ;;  %v13320_v17 = vld [vmem:[%s20414_s5 + $0x1d0] ss:$16 sps:$4 sm:$0xff]  }
 0x4ee   : > { %12016 = vmatprep.mubr.msk.bf16.mxu0 %vm7559_vm8, %v5758_v41  ;;  %12018 = vmatprep.mubr.msk.bf16.mxu1 %vm7559_vm8, %v5758_v41 }
 0x4f0   : > { %9774 = vmatpush1.bf16.msra.mxu0 %v13314_v48  ;;  %9815 = vmatpush1.bf16.msra.mxu1 %v13317_v8 }
 0x4f1   : > { %9775 = vmatprep.subr.bf16.mxu0 %v13322_v47  ;;  %9816 = vmatprep.subr.bf16.mxu1 %v13325_v49 }
 0x4f3   : > { %7821 = vmatmul.mubr.bf16.gmra.mrb[28].mxu0 %v5757_v44  ;;  %8086 = vmatmul.mubr.bf16.gmra.mrb[28].mxu1 %v5757_v44 }
 0x4f4   : > { %9776 = vmatpush1.bf16.msra.mxu0 %v13320_v17 }
 0x5be   : > { %v7812_v60 = vpop.f32.mrb[24].mxu0  ;;  %v8077_v0 = vpop.f32.mrb[24].mxu1 }
 0x5bf   : > { %v7814_v14 = vpop.f32.mrb[25].mxu0  ;;  %v8079_v40 = vpop.f32.mrb[25].mxu1 }
 0x5c0   : > { %v8112_v10 = vcombine.low %v7812_v60, %v7814_v14  ;;  %v8113_v12 = vcombine.high %v7812_v60, %v7814_v14  ;;  %v8114_v15 = vcombine.low %v8077_v0, %v8079_v40  ;;  %v8115_v58 = vcombine.high %v8077_v0, %v8079_v40  ;;  %v7816_v28 = vpop.f32.mrb[26].mxu0  ;;  %v8081_v62 = vpop.f32.mrb[26].mxu1  ;;  %v13323_v40 = vld [vmem:[%s20414_s5 + $0x1d8] ss:$16 sps:$4 sm:$0xff]  }
 0x5c1   : > { %v7818_v21 = vpop.f32.mrb[27].mxu0  ;;  %v8083_v33 = vpop.f32.mrb[27].mxu1  ;;  %9817 = vmatpush1.bf16.msra.mxu1 %v13323_v40 }
 0x5c2   : > { %v8122_v16 = vrot.slane %v8112_v10, %v21454_v54  ;;  %v18973_v13 = vrot.slane %v8113_v12, %v21454_v54  ;;  %v8136_v34 = vrot.slane %v8114_v15, %v21454_v54  ;;  %v18977_v39 = vrot.slane %v8115_v58, %v21454_v54 }
 0x5c3   : > { %v8148_v1 = vcombine.low %v7816_v28, %v7818_v21  ;;  %v8149_v52 = vcombine.high %v7816_v28, %v7818_v21  ;;  %v8150_v3 = vcombine.low %v8081_v62, %v8083_v33  ;;  %v8151_v63 = vcombine.high %v8081_v62, %v8083_v33  ;;  %v13328_v28 = vld [vmem:[%s20414_s5 + $0x1f4] ss:$16 sps:$4 sm:$0xff]  }
 0x5c4   : > { %v8144_v35 = vcombine.low %v8122_v16, %v8136_v34  ;;  %v8145_v9 = vcombine.high %v8122_v16, %v8136_v34  ;;  %v8146_v32 = vcombine.low %v18973_v13, %v18977_v39  ;;  %v12019_v59 = vcombine.low %v8136_v34, %v8136_v34  ;;  %9777 = vmatprep.subr.bf16.mxu0 %v13328_v28  ;;  %v13335_v28 = vld [vmem:[%s20414_s5 + $0x210] ss:$16 sps:$4 sm:$0xff]  }
 0x5c5   : > { %v12020_v26 = vcombine.high %v8136_v34, %v8136_v34  ;;  %v12021_v53 = vcombine.low %v18977_v39, %v18977_v39  ;;  %v12022_v23 = vcombine.high %v18977_v39, %v18977_v39  ;;  %v8158_v42 = vrot.slane %v8148_v1, %v21454_v54  ;;  %v13331_v34 = vld [vmem:[%s20414_s5 + $0x1fc] ss:$16 sps:$4 sm:$0xff]  }
 0x5c6   : > { %v7822_v50 = vpop.f32.mrb[28].mxu0  ;;  %v8087_v37 = vpop.f32.mrb[28].mxu1  ;;  %v19007_v36 = vrot.slane %v8144_v35, %v21454_v54  ;;  %v19010_v7 = vrot.slane %v8145_v9, %v21454_v54  ;;  %v19013_v22 = vrot.slane %v8146_v32, %v21454_v54  ;;  %v8165_v55 = vrot.slane %v8149_v52, %v21454_v54  ;;  %v13329_v9 = vld [vmem:[%s20414_s5 + $0x1f8] ss:$16 sps:$4 sm:$0xff]   ;;  %9818 = vmatprep.subr.bf16.mxu1 %v13331_v34 }
 0x5c7   : > { %v7824_v31 = vpop.f32.mrb[29].mxu0  ;;  %v8089_v11 = vpop.f32.mrb[29].mxu1  ;;  %v8172_v2 = vrot.slane %v8150_v3, %v21454_v54  ;;  %v8179_v46 = vrot.slane %v8151_v63, %v21454_v54  ;;  %v19042_v44 = vrot.slane %v12019_v59, %v21454_v54  ;;  %v19045_v60 = vrot.slane %v12020_v26, %v21454_v54  ;;  %v13326_v3 = vld [vmem:[%s20414_s5 + $0x1f0] ss:$16 sps:$4 sm:$0xff]   ;;  %9819 = vmatpush1.bf16.msra.mxu1 %v13329_v9 }
 0x5c8   : > { %v19024_v19 = vpop.f32.mrb[30].mxu0  ;;  %v19026_v29 = vpop.f32.mrb[30].mxu1  ;;  %v8184_v24 = vcombine.low %v7822_v50, %v7824_v31  ;;  %v8185_v57 = vcombine.high %v7822_v50, %v7824_v31  ;;  %v8186_v45 = vcombine.low %v8087_v37, %v8089_v11  ;;  %v8187_v18 = vcombine.high %v8087_v37, %v8089_v11  ;;  %9778 = vmatpush1.bf16.msra.mxu0 %v13326_v3 }
 0x5c9   : > { %v19031_v30 = vpop.f32.mrb[31].mxu0  ;;  %v19033_v38 = vpop.f32.mrb[31].mxu1  ;;  %v8180_v20 = vcombine.low %v8158_v42, %v8172_v2  ;;  %v8181_v27 = vcombine.high %v8158_v42, %v8172_v2  ;;  %v8182_v41 = vcombine.low %v8165_v55, %v8179_v46  ;;  %v8183_v61 = vcombine.high %v8165_v55, %v8179_v46 }
 0x5ca   : > { %v19048_v0 = vrot.slane %v12021_v53, %v21454_v54  ;;  %v19051_v14 = vrot.slane %v12022_v23, %v21454_v54  ;;  %v12023_v10 = vcombine.low %v8172_v2, %v8172_v2  ;;  %v12024_v12 = vcombine.high %v8172_v2, %v8172_v2 }
 0x5cb   : > { %v12025_v15 = vcombine.low %v8179_v46, %v8179_v46  ;;  %v12026_v58 = vcombine.high %v8179_v46, %v8179_v46  ;;  %v19060_v62 = vrot.slane %v8180_v20, %v21454_v54  ;;  %v19063_v21 = vrot.slane %v8181_v27, %v21454_v54 }
 0x5cc   : > { %v19066_v33 = vrot.slane %v8182_v41, %v21454_v54  ;;  %v19069_v16 = vrot.slane %v8183_v61, %v21454_v54  ;;  %v8194_v6 = vrot.slane %v8184_v24, %v21454_v54  ;;  %v8201_v43 = vrot.slane %v8185_v57, %v21454_v54 }
 0x5cd   : > { %v8208_v1 = vrot.slane %v8186_v45, %v21454_v54  ;;  %v8215_v52 = vrot.slane %v8187_v18, %v21454_v54  ;;  %v8220_v63 = vcombine.low %v19024_v19, %v19031_v30  ;;  %v8221_v56 = vcombine.high %v19024_v19, %v19031_v30 }
 0x5ce   : > { %v8222_v51 = vcombine.low %v19026_v29, %v19033_v38  ;;  %v8223_v35 = vcombine.high %v19026_v29, %v19033_v38  ;;  %v19093_v26 = vrot.slane %v12023_v10, %v21454_v54  ;;  %v8355_v53 = vrot.slane %v12024_v12, %v21454_v54 }
 0x5cf   : > { %v8216_v32 = vcombine.low %v8194_v6, %v8208_v1  ;;  %v8217_v4 = vcombine.high %v8194_v6, %v8208_v1  ;;  %v8218_v25 = vcombine.low %v8201_v43, %v8215_v52  ;;  %v8219_v59 = vcombine.high %v8201_v43, %v8215_v52 }
 0x5d0   : > { %v12027_v50 = vcombine.low %v8208_v1, %v8208_v1  ;;  %v12028_v37 = vcombine.high %v8208_v1, %v8208_v1  ;;  %v19097_v48 = vrot.slane %v12025_v15, %v21454_v54  ;;  %v19100_v23 = vrot.slane %v12026_v58, %v21454_v54  ;;  %v13332_v58 = vld [vmem:[%s20414_s5 + $0x218] ss:$16 sps:$4 sm:$0xff]  }
 0x5d1   : > { %v12029_v31 = vcombine.low %v8215_v52, %v8215_v52  ;;  %v12030_v11 = vcombine.high %v8215_v52, %v8215_v52  ;;  %v19103_v8 = vrot.slane %v8216_v32, %v21454_v54  ;;  %v19106_v42 = vrot.slane %v8217_v4, %v21454_v54  ;;  %v13337_v52 = vld [vmem:[%s20414_s5 + $0x214] ss:$16 sps:$4 sm:$0xff]  }
 0x5d2   : > { %v19109_v55 = vrot.slane %v8218_v25, %v21454_v54  ;;  %v19112_v2 = vrot.slane %v8219_v59, %v21454_v54  ;;  %v8230_v46 = vrot.slane %v8220_v63, %v21454_v54  ;;  %v19116_v19 = vrot.slane %v8221_v56, %v21454_v54  ;;  %9779 = vmatprep.subr.bf16.mxu0 %v13337_v52 }
 0x5d3   : > { %v8244_v29 = vrot.slane %v8222_v51, %v21454_v54  ;;  %v19120_v47 = vrot.slane %v8223_v35, %v21454_v54  ;;  %v19123_v24 = vrot.slane %v12027_v50, %v21454_v54  ;;  %v8423_v57 = vrot.slane %v12028_v37, %v21454_v54  ;;  %9780 = vmatpush1.bf16.msra.mxu0 %v13335_v28 }
 0x5d4   : > { %v8357_v45 = vcombine.high %v8355_v53, %v8355_v53  ;;  %v8289_v18 = vcombine.high %v19045_v60, %v19045_v60  ;;  %v8635_v61 = vsel %vm2650_vm9, %v19045_v60, -inf  ;;  %v8747_v17 = vsel %vm2650_vm9, %v8355_v53, -inf  ;;  %v13334_v60 = vld [vmem:[%s20414_s5 + $0x21c] ss:$16 sps:$4 sm:$0xff]  }
 0x5d5   : > { %v8252_v30 = vcombine.low %v8230_v46, %v8244_v29  ;;  %v8253_v38 = vcombine.high %v8230_v46, %v8244_v29  ;;  %v8254_v49 = vcombine.low %v19116_v19, %v19120_v47  ;;  %v12031_v27 = vcombine.low %v8244_v29, %v8244_v29  ;;  %9820 = vmatprep.subr.bf16.mxu1 %v13334_v60 }
 0x5d6   : > { %v12032_v41 = vcombine.high %v8244_v29, %v8244_v29  ;;  %v19136_v40 = vrot.slane %v12029_v31, %v21454_v54  ;;  %v19139_v10 = vrot.slane %v12030_v11, %v21454_v54  ;;  %v12033_v12 = vcombine.low %v19120_v47, %v19120_v47  ;;  %9821 = vmatpush1.bf16.msra.mxu1 %v13332_v58 }
 0x5d7   : > { %v19155_v34 = vrot.slane %v8252_v30, %v21454_v54  ;;  %v19158_v6 = vrot.slane %v12031_v27, %v21454_v54  ;;  %v19161_v43 = vrot.slane %v8253_v38, %v21454_v54  ;;  %v8636_v3 = vrot.slane %v8635_v61, 4 }
 0x5d8   : > { %v19164_v1 = vrot.slane %v12032_v41, %v21454_v54  ;;  %v8748_v63 = vrot.slane %v8747_v17, 4  ;;  %v8754_v56 = vsel %vm8613_vm10, %v8357_v45, -inf  ;;  %v8642_v51 = vsel %vm8613_vm10, %v8289_v18, -inf }
 0x5d9   : > { %v8755_v35 = vrot.slane %v8754_v56, 4  ;;  %v8643_v9 = vrot.slane %v8642_v51, 4  ;;  %v8859_v32 = vsel %vm2650_vm9, %v8423_v57, -inf  ;;  %v8356_v4 = vcombine.high %v19063_v21, %v19063_v21 }
 0x5da   : > { %v8637_v25 = vmax.f32 %v8635_v61, %v8636_v3  ;;  %v8749_v59 = vmax.f32 %v8747_v17, %v8748_v63  ;;  %v8860_v53 = vrot.slane %v8859_v32, 4  ;;  %v8424_v50 = vcombine.high %v19106_v42, %v19106_v42 }
 0x5db   : > { %v8756_v37 = vmax.f32 %v8754_v56, %v8755_v35  ;;  %v8644_v31 = vmax.f32 %v8642_v51, %v8643_v9  ;;  %v8740_v11 = vsel %vm2650_vm9, %v8356_v4, -inf  ;;  %v8425_v46 = vcombine.high %v8423_v57, %v8423_v57 }
 0x5dc   : > { %v8638_v29 = vrot.slane %v8637_v25, 2  ;;  %v8750_v45 = vrot.slane %v8749_v59, 2  ;;  %v8861_v18 = vmax.f32 %v8859_v32, %v8860_v53  ;;  %v8741_v30 = vrot.slane %v8740_v11, 4 }
 0x5dd   : > { %v8757_v38 = vrot.slane %v8756_v37, 2  ;;  %v8645_v27 = vrot.slane %v8644_v31, 2  ;;  %v8852_v41 = vsel %vm2650_vm9, %v8424_v50, -inf  ;;  %v8866_v61 = vsel %vm8613_vm10, %v8425_v46, -inf }
 0x5de   : > { %v8639_v17 = vmax.f32 %v8637_v25, %v8638_v29  ;;  %v8751_v58 = vmax.f32 %v8749_v59, %v8750_v45  ;;  %v8862_v60 = vrot.slane %v8861_v18, 2  ;;  %v8742_v52 = vmax.f32 %v8740_v11, %v8741_v30 }
 0x5df   : > { %v8758_v28 = vmax.f32 %v8756_v37, %v8757_v38  ;;  %v8646_v3 = vmax.f32 %v8644_v31, %v8645_v27  ;;  %v8853_v63 = vrot.slane %v8852_v41, 4  ;;  %v8867_v56 = vrot.slane %v8866_v61, 4 }
 0x5e0   : > { %v8640_v51 = vrot.slane %v8639_v17, 1  ;;  %v8752_v57 = vrot.slane %v8751_v58, 1  ;;  %v8863_v35 = vmax.f32 %v8861_v18, %v8862_v60  ;;  %v8743_v9 = vrot.slane %v8742_v52, 2 }
 0x5e1   : > { %v8759_v32 = vrot.slane %v8758_v28, 1  ;;  %v8647_v4 = vrot.slane %v8646_v3, 1  ;;  %v8854_v53 = vmax.f32 %v8852_v41, %v8853_v63  ;;  %v8868_v5 = vmax.f32 %v8866_v61, %v8867_v56 }
 0x5e2   : > { %v8641_v15 = vmax.f32 %v8639_v17, %v8640_v51  ;;  %v8753_v50 = vmax.f32 %v8751_v58, %v8752_v57  ;;  %v8864_v20 = vrot.slane %v8863_v35, 1  ;;  %v8744_v46 = vmax.f32 %v8742_v52, %v8743_v9 }
 0x5e3   : > { %v8760_v25 = vmax.f32 %v8758_v28, %v8759_v32  ;;  %v8648_v59 = vmax.f32 %v8646_v3, %v8647_v4  ;;  %v8855_v29 = vrot.slane %v8854_v53, 2  ;;  %v8869_v11 = vrot.slane %v8868_v5, 2  ;;  %v13341_v4 = vld [vmem:[%s20414_s5 + $0x230] ss:$16 sps:$4 sm:$0xff]  }
 0x5e4   : > { %9097 = vrot.lane.b32.xlu1 %v8641_v15, %s13722_s22  ;;  %9121 = vrot.lane.b32.xlu0 %v8753_v50, %s13722_s22  ;;  %v8865_v37 = vmax.f32 %v8863_v35, %v8864_v20  ;;  %v8745_v31 = vrot.slane %v8744_v46, 1  ;;  %v8493_v45 = vcombine.high %v19164_v1, %v19164_v1  ;;  %v8971_v18 = vsel %vm2650_vm9, %v19164_v1, -inf  ;;  %v13338_v1 = vld [vmem:[%s20414_s5 + $0x238] ss:$16 sps:$4 sm:$0xff]  }
 0x5e5   : > { %v8856_v30 = vmax.f32 %v8854_v53, %v8855_v29  ;;  %v8870_v38 = vmax.f32 %v8868_v5, %v8869_v11  ;;  %v8972_v27 = vrot.slane %v8971_v18, 4  ;;  %v8492_v41 = vcombine.high %v19161_v43, %v19161_v43  ;;  %v13340_v5 = vld [vmem:[%s20414_s5 + $0x23c] ss:$16 sps:$4 sm:$0xff]   ;;  %v13343_v53 = vld [vmem:[%s20414_s5 + $0x234] ss:$16 sps:$4 sm:$0xff]  }
 0x5e6   : > { %v19187_v61 = vmax.f32 %v8744_v46, %v8745_v31  ;;  %v8978_v15 = vsel %vm8613_vm10, %v8493_v45, -inf  ;;  %v8288_v20 = vcombine.high %v19010_v7, %v19010_v7  ;;  %v8340_v17 = vcombine.high %v19093_v26, %v19093_v26  ;;  %9822 = vmatprep.subr.bf16.mxu1 %v13340_v5  ;;  %9781 = vmatprep.subr.bf16.mxu0 %v13343_v53 }
 0x5e7   : > { %v8857_v58 = vrot.slane %v8856_v30, 1  ;;  %v8871_v60 = vrot.slane %v8870_v38, 1  ;;  %v8979_v52 = vrot.slane %v8978_v15, 4  ;;  %v8973_v28 = vmax.f32 %v8971_v18, %v8972_v27  ;;  %9823 = vmatpush1.bf16.msra.mxu1 %v13338_v1  ;;  %v13347_v18 = vld [vmem:[%s20414_s5 + $0x258] ss:$16 sps:$4 sm:$0xff]   ;;  %9782 = vmatpush1.bf16.msra.mxu0 %v13341_v4 }
 0x5e8   : > { %9123 = vrot.lane.b32.xlu1 %v8760_v25, %s13722_s22  ;;  %9099 = vrot.lane.b32.xlu0 %v8648_v59, %s13722_s22  ;;  %v8964_v3 = vsel %vm2650_vm9, %v8492_v41, -inf  ;;  %v8628_v63 = vsel %vm2650_vm9, %v8288_v20, -inf  ;;  %v8726_v56 = vsel %vm8613_vm10, %v8340_v17, -inf  ;;  %v8719_v51 = vsel %vm2650_vm9, %v19093_v26, -inf  ;;  %v13346_v26 = vld [vmem:[%s20414_s5 + $0x254] ss:$16 sps:$4 sm:$0xff]  }
 0x5e9   : > { %v19207_v57 = vmax.f32 %v8856_v30, %v8857_v58  ;;  %v8872_v35 = vmax.f32 %v8870_v38, %v8871_v60  ;;  %v8980_v9 = vmax.f32 %v8978_v15, %v8979_v52  ;;  %v8974_v32 = vrot.slane %v8973_v28, 2  ;;  %v13349_v30 = vld [vmem:[%s20414_s5 + $0x25c] ss:$16 sps:$4 sm:$0xff]   ;;  %v13344_v58 = vld [vmem:[%s20414_s5 + $0x250] ss:$16 sps:$4 sm:$0xff]   ;;  %9783 = vmatprep.subr.bf16.mxu0 %v13346_v26 }
 0x5ea   : > { %v8965_v50 = vrot.slane %v8964_v3, 4  ;;  %v8629_v46 = vrot.slane %v8628_v63, 4  ;;  %v8727_v25 = vrot.slane %v8726_v56, 4  ;;  %v8720_v59 = vrot.slane %v8719_v51, 4  ;;  %9824 = vmatprep.subr.bf16.mxu1 %v13349_v30 }
 0x5eb   : > { %v8981_v29 = vrot.slane %v8980_v9, 2  ;;  %v8975_v11 = vmax.f32 %v8973_v28, %v8974_v32  ;;  %v8831_v31 = vsel %vm2650_vm9, %v19123_v24, -inf  ;;  %v8339_v45 = vcombine.high %v19060_v62, %v19060_v62  ;;  %9825 = vmatpush1.bf16.msra.mxu1 %v13347_v18  ;;  %9784 = vmatpush1.bf16.msra.mxu0 %v13344_v58 }
 0x5ec   : > { %9145 = vrot.lane.b32.xlu1 %v8865_v37, %s13722_s22  ;;  %9119 = vrot.lane.b32.xlu0 %v19187_v61, %s13722_s22  ;;  %v8966_v38 = vmax.f32 %v8964_v3, %v8965_v50  ;;  %v8630_v27 = vmax.f32 %v8628_v63, %v8629_v46  ;;  %v8728_v41 = vmax.f32 %v8726_v56, %v8727_v25  ;;  %v8832_v15 = vrot.slane %v8831_v31, 4  ;;  %v13353_v46 = vld [vmem:[%s20414_s5 + $0x278] ss:$16 sps:$4 sm:$0xff]   ;;  %v13355_v25 = vld [vmem:[%s20414_s5 + $0x27c] ss:$16 sps:$4 sm:$0xff]  }
 0x5ed   : > { %v8982_v20 = vmax.f32 %v8980_v9, %v8981_v29  ;;  %v8976_v17 = vrot.slane %v8975_v11, 1  ;;  %v8721_v1 = vmax.f32 %v8719_v51, %v8720_v59  ;;  %v8712_v5 = vsel %vm2650_vm9, %v8339_v45, -inf  ;;  %v13352_v51 = vld [vmem:[%s20414_s5 + $0x274] ss:$16 sps:$4 sm:$0xff]   ;;  %9826 = vmatprep.subr.bf16.mxu1 %v13355_v25  ;;  %v13365_v25 = vld [vmem:[%s20414_s5 + $0x2b8] ss:$16 sps:$4 sm:$0xff]  }
 0x5ee   : > { %v8967_v60 = vrot.slane %v8966_v38, 2  ;;  %v8631_v37 = vrot.slane %v8630_v27, 2  ;;  %v8729_v52 = vrot.slane %v8728_v41, 2  ;;  %v8833_v28 = vmax.f32 %v8831_v31, %v8832_v15  ;;  %v13358_v31 = vld [vmem:[%s20414_s5 + $0x294] ss:$16 sps:$4 sm:$0xff]   ;;  %9785 = vmatprep.subr.bf16.mxu0 %v13352_v51 }
 0x5ef   : > { %v8983_v3 = vrot.slane %v8982_v20, 1  ;;  %v8977_v63 = vmax.f32 %v8975_v11, %v8976_v17  ;;  %v8722_v56 = vrot.slane %v8721_v1, 2  ;;  %v8713_v9 = vrot.slane %v8712_v5, 4  ;;  %9827 = vmatpush1.bf16.msra.mxu1 %v13353_v46 }
 0x5f0   : > { %9143 = vrot.lane.b32.xlu1 %v19207_v57, %s13722_s22  ;;  %9147 = vrot.lane.b32.xlu0 %v8872_v35, %s13722_s22  ;;  %v8968_v32 = vmax.f32 %v8966_v38, %v8967_v60  ;;  %v8632_v4 = vmax.f32 %v8630_v27, %v8631_v37  ;;  %v8730_v53 = vmax.f32 %v8728_v41, %v8729_v52  ;;  %v8834_v50 = vrot.slane %v8833_v28, 2  ;;  %v13350_v35 = vld [vmem:[%s20414_s5 + $0x270] ss:$16 sps:$4 sm:$0xff]   ;;  %v13359_v27 = vld [vmem:[%s20414_s5 + $0x298] ss:$16 sps:$4 sm:$0xff]  }
 0x5f1   : > { %v8984_v59 = vmax.f32 %v8982_v20, %v8983_v3  ;;  %v8723_v26 = vmax.f32 %v8721_v1, %v8722_v56  ;;  %v8714_v29 = vmax.f32 %v8712_v5, %v8713_v9  ;;  %v8606_v11 = vsel %vm2650_vm9, %v19042_v44, -inf  ;;  %v13361_v1 = vld [vmem:[%s20414_s5 + $0x29c] ss:$16 sps:$4 sm:$0xff]   ;;  %9786 = vmatpush1.bf16.msra.mxu0 %v13350_v35 }
 0x5f2   : > { %v8969_v45 = vrot.slane %v8968_v32, 1  ;;  %v8633_v18 = vrot.slane %v8632_v4, 1  ;;  %v8731_v30 = vrot.slane %v8730_v53, 1  ;;  %v8835_v38 = vmax.f32 %v8833_v28, %v8834_v50  ;;  %9828 = vmatprep.subr.bf16.mxu1 %v13361_v1  ;;  %9787 = vmatprep.subr.bf16.mxu0 %v13358_v31 }
 0x5f3   : > { %v8724_v41 = vrot.slane %v8723_v26, 1  ;;  %v8715_v15 = vrot.slane %v8714_v29, 2  ;;  %v8607_v20 = vrot.slane %v8606_v11, 4  ;;  %v8408_v17 = vcombine.high %v19123_v24, %v19123_v24  ;;  %9829 = vmatpush1.bf16.msra.mxu1 %v13359_v27 }
 0x5f4   : > { %v19267_v5 = vrot.slane %v8254_v49, %v21454_v54  ;;  %9171 = vrot.lane.b32.xlu1 %v8984_v59, %s13722_s22  ;;  %9169 = vrot.lane.b32.xlu0 %v8977_v63, %s13722_s22  ;;  %v19271_v58 = vmax.f32 %v8968_v32, %v8969_v45  ;;  %v19273_v60 = vmax.f32 %v8632_v4, %v8633_v18  ;;  %v8836_v24 = vrot.slane %v8835_v38, 1  ;;  %v13356_v49 = vld [vmem:[%s20414_s5 + $0x290] ss:$16 sps:$4 sm:$0xff]   ;;  %v13364_v32 = vld [vmem:[%s20414_s5 + $0x2b4] ss:$16 sps:$4 sm:$0xff]  }
 0x5f5   : > { %v8732_v37 = vmax.f32 %v8730_v53, %v8731_v30  ;;  %v8716_v52 = vmax.f32 %v8714_v29, %v8715_v15  ;;  %v8608_v28 = vmax.f32 %v8606_v11, %v8607_v20  ;;  %v8838_v3 = vsel %vm8613_vm10, %v8408_v17, -inf  ;;  %9788 = vmatpush1.bf16.msra.mxu0 %v13356_v49  ;;  %v13362_v18 = vld [vmem:[%s20414_s5 + $0x2b0] ss:$16 sps:$4 sm:$0xff]   ;;  %v13370_v15 = vld [vmem:[%s20414_s5 + $0x2d4] ss:$16 sps:$4 sm:$0xff]  }
 0x5f6   : > { %v8725_v56 = vmax.f32 %v8723_v26, %v8724_v41  ;;  %v8839_v9 = vrot.slane %v8838_v3, 4  ;;  %v8407_v63 = vcombine.high %v19103_v8, %v19103_v8  ;;  %v8272_v51 = vcombine.high %v19042_v44, %v19042_v44  ;;  %9789 = vmatprep.subr.bf16.mxu0 %v13364_v32  ;;  %v13373_v20 = vld [vmem:[%s20414_s5 + $0x2dc] ss:$16 sps:$4 sm:$0xff]  }
 0x5f7   : > { %v8837_v4 = vmax.f32 %v8835_v38, %v8836_v24  ;;  %v8609_v53 = vrot.slane %v8608_v28, 2  ;;  %v8476_v50 = vcombine.high %v19158_v6, %v19158_v6  ;;  %v8943_v46 = vsel %vm2650_vm9, %v19158_v6, -inf  ;;  %v13367_v6 = vld [vmem:[%s20414_s5 + $0x2bc] ss:$16 sps:$4 sm:$0xff]  }
 0x5f8   : > { %9167 = vrot.lane.b32.xlu1 %v19271_v58, %s13722_s22  ;;  %9095 = vrot.lane.b32.xlu0 %v19273_v60, %s13722_s22  ;;  %v8840_v44 = vmax.f32 %v8838_v3, %v8839_v9  ;;  %v8824_v59 = vsel %vm2650_vm9, %v8407_v63, -inf  ;;  %v8614_v26 = vsel %vm8613_vm10, %v8272_v51, -inf  ;;  %v8944_v29 = vrot.slane %v8943_v46, 4  ;;  %v13371_v3 = vld [vmem:[%s20414_s5 + $0x2d8] ss:$16 sps:$4 sm:$0xff]  }
 0x5f9   : > { %v8717_v11 = vrot.slane %v8716_v52, 1  ;;  %v8610_v35 = vmax.f32 %v8608_v28, %v8609_v53  ;;  %v8825_v31 = vrot.slane %v8824_v59, 4  ;;  %v8615_v45 = vrot.slane %v8614_v26, 4  ;;  %9830 = vmatprep.subr.bf16.mxu1 %v13367_v6  ;;  %9790 = vmatpush1.bf16.msra.mxu0 %v13362_v18 }
 0x5fa   : > { %v8841_v30 = vrot.slane %v8840_v44, 2  ;;  %v8950_v38 = vsel %vm8613_vm10, %v8476_v50, -inf  ;;  %v8945_v27 = vmax.f32 %v8943_v46, %v8944_v29  ;;  %v8475_v41 = vcombine.high %v19155_v34, %v19155_v34  ;;  %9831 = vmatpush1.bf16.msra.mxu1 %v13365_v25  ;;  %v13368_v25 = vld [vmem:[%s20414_s5 + $0x2d0] ss:$16 sps:$4 sm:$0xff]   ;;  %9791 = vmatprep.subr.bf16.mxu0 %v13370_v15 }
 0x5fb   : > { %v8611_v17 = vrot.slane %v8610_v35, 1  ;;  %v8826_v1 = vmax.f32 %v8824_v59, %v8825_v31  ;;  %v8616_v24 = vmax.f32 %v8614_v26, %v8615_v45  ;;  %v8951_v28 = vrot.slane %v8950_v38, 4  ;;  %9832 = vmatprep.subr.bf16.mxu1 %v13373_v20  ;;  %v13377_v45 = vld [vmem:[%s20414_s5 + $0x2f8] ss:$16 sps:$4 sm:$0xff]  }
 0x5fc   : > { %9117 = vrot.lane.b32.xlu1 %v8732_v37, %s13722_s22  ;;  %9115 = vrot.lane.b32.xlu0 %v8725_v56, %s13722_s22  ;;  %v8842_v49 = vmax.f32 %v8840_v44, %v8841_v30  ;;  %v8946_v9 = vrot.slane %v8945_v27, 2  ;;  %v8936_v63 = vsel %vm2650_vm9, %v8475_v41, -inf  ;;  %v8271_v51 = vcombine.high %v19007_v36, %v19007_v36  ;;  %v13379_v37 = vld [vmem:[%s20414_s5 + $0x2fc] ss:$16 sps:$4 sm:$0xff]  }
 0x5fd   : > { %v19322_v32 = vmax.f32 %v8716_v52, %v8717_v11  ;;  %v8827_v53 = vrot.slane %v8826_v1, 2  ;;  %v8617_v50 = vrot.slane %v8616_v24, 2  ;;  %v8952_v46 = vmax.f32 %v8950_v38, %v8951_v28  ;;  %v13376_v52 = vld [vmem:[%s20414_s5 + $0x2f4] ss:$16 sps:$4 sm:$0xff]   ;;  %9792 = vmatpush1.bf16.msra.mxu0 %v13368_v25 }
 0x5fe   : > { %v8843_v56 = vrot.slane %v8842_v49, 1  ;;  %v8947_v44 = vmax.f32 %v8945_v27, %v8946_v9  ;;  %v8937_v59 = vrot.slane %v8936_v63, 4  ;;  %v8599_v26 = vsel %vm2650_vm9, %v8271_v51, -inf  ;;  %9833 = vmatpush1.bf16.msra.mxu1 %v13371_v3  ;;  %9793 = vmatprep.subr.bf16.mxu0 %v13376_v52 }
 0x5ff   : > { %v8828_v29 = vmax.f32 %v8826_v1, %v8827_v53  ;;  %v8618_v6 = vmax.f32 %v8616_v24, %v8617_v50  ;;  %v8953_v11 = vrot.slane %v8952_v46, 2  ;;  %v8600_v31 = vrot.slane %v8599_v26, 4  ;;  %v13374_v24 = vld [vmem:[%s20414_s5 + $0x2f0] ss:$16 sps:$4 sm:$0xff]   ;;  %9834 = vmatprep.subr.bf16.mxu1 %v13379_v37 }
 0x600   : > { %9139 = vrot.lane.b32.xlu1 %v8837_v4, %s13722_s22  ;;  %9113 = vrot.lane.b32.xlu0 %v19322_v32, %s13722_s22  ;;  %v8612_v18 = vmax.f32 %v8610_v35, %v8611_v17  ;;  %v8948_v30 = vrot.slane %v8947_v44, 1  ;;  %v8938_v38 = vmax.f32 %v8936_v63, %v8937_v59  ;;  %v8374_v27 = vcombine.high %v19097_v48, %v19097_v48 }
 0x601   : > { %v8844_v41 = vmax.f32 %v8842_v49, %v8843_v56  ;;  %v8829_v15 = vrot.slane %v8828_v29, 1  ;;  %v8954_v20 = vmax.f32 %v8952_v46, %v8953_v11  ;;  %v8601_v1 = vmax.f32 %v8599_v26, %v8600_v31  ;;  %9794 = vmatpush1.bf16.msra.mxu0 %v13374_v24 }
 0x602   : > { %v8619_v4 = vrot.slane %v8618_v6, 1  ;;  %v8939_v28 = vrot.slane %v8938_v38, 2  ;;  %v8782_v3 = vsel %vm8613_vm10, %v8374_v27, -inf  ;;  %v8775_v35 = vsel %vm2650_vm9, %v19097_v48, -inf  ;;  %9835 = vmatpush1.bf16.msra.mxu1 %v13377_v45 }
 0x603   : > { %v19352_v17 = vrot.slane %v12033_v12, %v21454_v54  ;;  %v8955_v49 = vrot.slane %v8954_v20, 1  ;;  %v8949_v9 = vmax.f32 %v8947_v44, %v8948_v30  ;;  %v8602_v63 = vrot.slane %v8601_v1, 2 }
 0x604   : > { %9091 = vrot.lane.b32.xlu1 %v8612_v18, %s13722_s22  ;;  %9141 = vrot.lane.b32.xlu0 %v8844_v41, %s13722_s22  ;;  %v8940_v51 = vmax.f32 %v8938_v38, %v8939_v28  ;;  %v8783_v53 = vrot.slane %v8782_v3, 4  ;;  %v8776_v50 = vrot.slane %v8775_v35, 4  ;;  %v8887_v48 = vsel %vm2650_vm9, %v19136_v40, -inf }
 0x605   : > { %v19358_v46 = vmax.f32 %v8828_v29, %v8829_v15  ;;  %v8603_v25 = vmax.f32 %v8601_v1, %v8602_v63  ;;  %v8888_v37 = vrot.slane %v8887_v48, 4  ;;  %v8373_v12 = vcombine.high %v19066_v33, %v19066_v33 }
 0x606   : > { %v8620_v56 = vmax.f32 %v8618_v6, %v8619_v4  ;;  %v8784_v44 = vmax.f32 %v8782_v3, %v8783_v53  ;;  %v8777_v59 = vmax.f32 %v8775_v35, %v8776_v50  ;;  %v8663_v26 = vsel %vm2650_vm9, %v19048_v0, -inf }
 0x607   : > { %v8956_v52 = vmax.f32 %v8954_v20, %v8955_v49  ;;  %v8889_v11 = vmax.f32 %v8887_v48, %v8888_v37  ;;  %v8768_v31 = vsel %vm2650_vm9, %v8373_v12, -inf  ;;  %v8664_v45 = vrot.slane %v8663_v26, 4 }
 0x608   : > { %9137 = vrot.lane.b32.xlu1 %v19358_v46, %s13722_s22  ;;  %9093 = vrot.lane.b32.xlu0 %v8620_v56, %s13722_s22  ;;  %v8941_v29 = vrot.slane %v8940_v51, 1  ;;  %v8785_v18 = vrot.slane %v8784_v44, 2  ;;  %v8778_v30 = vrot.slane %v8777_v59, 2  ;;  %v8769_v38 = vrot.slane %v8768_v31, 4 }
 0x609   : > { %v8604_v6 = vrot.slane %v8603_v25, 1  ;;  %v8890_v27 = vrot.slane %v8889_v11, 2  ;;  %v8665_v41 = vmax.f32 %v8663_v26, %v8664_v45  ;;  %v8442_v15 = vcombine.high %v19136_v40, %v19136_v40 }
 0x60a   : > { %v8786_v20 = vmax.f32 %v8784_v44, %v8785_v18  ;;  %v8779_v1 = vmax.f32 %v8777_v59, %v8778_v30  ;;  %v8770_v24 = vmax.f32 %v8768_v31, %v8769_v38  ;;  %v8441_v4 = vcombine.high %v19109_v55, %v19109_v55 }
 0x60b   : > { %v8891_v28 = vmax.f32 %v8889_v11, %v8890_v27  ;;  %v8666_v3 = vrot.slane %v8665_v41, 2  ;;  %v8894_v35 = vsel %vm8613_vm10, %v8442_v15, -inf  ;;  %v8306_v49 = vcombine.high %v19048_v0, %v19048_v0 }
 0x60c   : > { %9165 = vrot.lane.b32.xlu1 %v8956_v52, %s13722_s22  ;;  %9163 = vrot.lane.b32.xlu0 %v8949_v9, %s13722_s22  ;;  %v8787_v63 = vrot.slane %v8786_v20, 1  ;;  %v8780_v53 = vrot.slane %v8779_v1, 1  ;;  %v8771_v40 = vrot.slane %v8770_v24, 2  ;;  %v8895_v50 = vrot.slane %v8894_v35, 4 }
 0x60d   : > { %v8892_v48 = vrot.slane %v8891_v28, 1  ;;  %v8667_v37 = vmax.f32 %v8665_v41, %v8666_v3  ;;  %v8880_v12 = vsel %vm2650_vm9, %v8441_v4, -inf  ;;  %v8670_v56 = vsel %vm8613_vm10, %v8306_v49, -inf }
 0x60e   : > { %v19379_v44 = vmax.f32 %v8940_v51, %v8941_v29  ;;  %v19381_v59 = vmax.f32 %v8603_v25, %v8604_v6  ;;  %v8772_v26 = vmax.f32 %v8770_v24, %v8771_v40  ;;  %v8896_v0 = vmax.f32 %v8894_v35, %v8895_v50 }
 0x60f   : > { %v8788_v11 = vmax.f32 %v8786_v20, %v8787_v63  ;;  %v8781_v52 = vmax.f32 %v8779_v1, %v8780_v53  ;;  %v8881_v31 = vrot.slane %v8880_v12, 4  ;;  %v8671_v9 = vrot.slane %v8670_v56, 4 }
 0x610   : > { %9161 = vrot.lane.b32.xlu1 %v19379_v44, %s13722_s22  ;;  %9089 = vrot.lane.b32.xlu0 %v19381_v59, %s13722_s22  ;;  %v8893_v45 = vmax.f32 %v8891_v28, %v8892_v48  ;;  %v8897_v18 = vrot.slane %v8896_v0, 2  ;;  %v8510_v51 = vcombine.high %v19352_v17, %v19352_v17  ;;  %v8999_v25 = vsel %vm2650_vm9, %v19352_v17, -inf }
 0x611   : > { %v8668_v29 = vrot.slane %v8667_v37, 1  ;;  %v8882_v30 = vmax.f32 %v8880_v12, %v8881_v31  ;;  %v8672_v38 = vmax.f32 %v8670_v56, %v8671_v9  ;;  %v9000_v6 = vrot.slane %v8999_v25, 4 }
 0x612   : > { %v8773_v27 = vrot.slane %v8772_v26, 1  ;;  %v8898_v41 = vmax.f32 %v8896_v0, %v8897_v18  ;;  %v9006_v15 = vsel %vm8613_vm10, %v8510_v51, -inf  ;;  %v8509_v20 = vcombine.high %v19267_v5, %v19267_v5 }
 0x613   : > { %v8883_v1 = vrot.slane %v8882_v30, 2  ;;  %v8673_v24 = vrot.slane %v8672_v38, 2  ;;  %v9007_v4 = vrot.slane %v9006_v15, 4  ;;  %v9001_v28 = vmax.f32 %v8999_v25, %v9000_v6 }
 0x614   : > { %9129 = vrot.lane.b32.xlu1 %v8788_v11, %s13722_s22  ;;  %9127 = vrot.lane.b32.xlu0 %v8781_v52, %s13722_s22  ;;  %v8899_v17 = vrot.slane %v8898_v41, 1  ;;  %v8992_v3 = vsel %vm2650_vm9, %v8509_v20, -inf  ;;  %v8305_v35 = vcombine.high %v19013_v22, %v19013_v22  ;;  %v8391_v49 = vcombine.high %v19100_v23, %v19100_v23 }
 0x615   : > { %v8884_v63 = vmax.f32 %v8882_v30, %v8883_v1  ;;  %v8674_v53 = vmax.f32 %v8672_v38, %v8673_v24  ;;  %v9008_v40 = vmax.f32 %v9006_v15, %v9007_v4  ;;  %v9002_v50 = vrot.slane %v9001_v28, 2 }
 0x616   : > { %v19401_v48 = vmax.f32 %v8772_v26, %v8773_v27  ;;  %v8993_v12 = vrot.slane %v8992_v3, 4  ;;  %v8656_v56 = vsel %vm2650_vm9, %v8305_v35, -inf  ;;  %v8810_v0 = vsel %vm8613_vm10, %v8391_v49, -inf }
 0x617   : > { %v8885_v11 = vrot.slane %v8884_v63, 1  ;;  %v8675_v52 = vrot.slane %v8674_v53, 1  ;;  %v9009_v31 = vrot.slane %v9008_v40, 2  ;;  %v9003_v9 = vmax.f32 %v9001_v28, %v9002_v50 }
 0x618   : > { %9151 = vrot.lane.b32.xlu1 %v8893_v45, %s13722_s22  ;;  %9125 = vrot.lane.b32.xlu0 %v19401_v48, %s13722_s22  ;;  %v8994_v18 = vmax.f32 %v8992_v3, %v8993_v12  ;;  %v8657_v51 = vrot.slane %v8656_v56, 4  ;;  %v8811_v25 = vrot.slane %v8810_v0, 4  ;;  %v8803_v26 = vsel %vm2650_vm9, %v19100_v23, -inf }
 0x619   : > { %v8669_v30 = vmax.f32 %v8667_v37, %v8668_v29  ;;  %v8900_v38 = vmax.f32 %v8898_v41, %v8899_v17  ;;  %v19410_v6 = vmax.f32 %v8884_v63, %v8885_v11  ;;  %v9010_v27 = vmax.f32 %v9008_v40, %v9009_v31 }
 0x61a   : > { %v8995_v15 = vrot.slane %v8994_v18, 2  ;;  %v8658_v20 = vmax.f32 %v8656_v56, %v8657_v51  ;;  %v8812_v1 = vmax.f32 %v8810_v0, %v8811_v25  ;;  %v8804_v24 = vrot.slane %v8803_v26, 4 }
 0x61b   : > { %v8676_v4 = vmax.f32 %v8674_v53, %v8675_v52  ;;  %v9004_v45 = vrot.slane %v9003_v9, 1  ;;  %v8915_v28 = vsel %vm2650_vm9, %v19139_v10, -inf  ;;  %v8390_v3 = vcombine.high %v19069_v16, %v19069_v16 }
 0x61c   : > { %9103 = vrot.lane.b32.xlu1 %v8669_v30, %s13722_s22  ;;  %9153 = vrot.lane.b32.xlu0 %v8900_v38, %s13722_s22  ;;  %v8996_v23 = vmax.f32 %v8994_v18, %v8995_v15  ;;  %v8659_v37 = vrot.slane %v8658_v20, 2  ;;  %v8813_v29 = vrot.slane %v8812_v1, 2  ;;  %v8805_v41 = vmax.f32 %v8803_v26, %v8804_v24 }
 0x61d   : > { %v9011_v17 = vrot.slane %v9010_v27, 1  ;;  %v8916_v35 = vrot.slane %v8915_v28, 4  ;;  %v8796_v49 = vsel %vm2650_vm9, %v8390_v3, -inf  ;;  %v8691_v63 = vsel %vm2650_vm9, %v19051_v14, -inf }
 0x61e   : > { %v8997_v53 = vrot.slane %v8996_v23, 1  ;;  %v8660_v40 = vmax.f32 %v8658_v20, %v8659_v37  ;;  %v8814_v50 = vmax.f32 %v8812_v1, %v8813_v29  ;;  %v8806_v12 = vrot.slane %v8805_v41, 2 }
 0x61f   : > { %v8917_v56 = vmax.f32 %v8915_v28, %v8916_v35  ;;  %v8797_v0 = vrot.slane %v8796_v49, 4  ;;  %v8692_v11 = vrot.slane %v8691_v63, 4  ;;  %v8459_v52 = vcombine.high %v19139_v10, %v19139_v10 }
 0x620   : > { %v21455_v31 = vcombine.high %v19116_v19, %v19120_v47  ;;  %v21456_v51 = vcombine.high %v19120_v47, %v19120_v47  ;;  %9149 = vrot.lane.b32.xlu1 %v19410_v6, %s13722_s22  ;;  %9105 = vrot.lane.b32.xlu0 %v8676_v4, %s13722_s22  ;;  %v8661_v26 = vrot.slane %v8660_v40, 1  ;;  %v8807_v30 = vmax.f32 %v8805_v41, %v8806_v12 }
 0x621   : > { %v8918_v38 = vrot.slane %v8917_v56, 2  ;;  %v8798_v10 = vmax.f32 %v8796_v49, %v8797_v0  ;;  %v8693_v15 = vmax.f32 %v8691_v63, %v8692_v11  ;;  %v8922_v20 = vsel %vm8613_vm10, %v8459_v52, -inf }
 0x622   : > { %v19427_v18 = vrot.slane %v21455_v31, %v21454_v54  ;;  %v8525_v25 = vrot.slane %v21456_v51, %v21454_v54  ;;  %v9012_v19 = vmax.f32 %v9010_v27, %v9011_v17  ;;  %v9005_v1 = vmax.f32 %v9003_v9, %v9004_v45 }
 0x623   : > { %v19437_v24 = vmax.f32 %v8996_v23, %v8997_v53  ;;  %v8923_v28 = vrot.slane %v8922_v20, 4  ;;  %v8815_v3 = vrot.slane %v8814_v50, 1  ;;  %v8919_v47 = vmax.f32 %v8917_v56, %v8918_v38 }
 0x624   : > { %v8799_v37 = vrot.slane %v8798_v10, 2  ;;  %v8458_v29 = vcombine.high %v19112_v2, %v19112_v2  ;;  %9177 = vrot.lane.b32.xlu1 %v9012_v19, %s13722_s22  ;;  %9175 = vrot.lane.b32.xlu0 %v9005_v1, %s13722_s22  ;;  %v19443_v4 = vmax.f32 %v8660_v40, %v8661_v26  ;;  %v8694_v41 = vrot.slane %v8693_v15, 2 }
 0x625   : > { %v8924_v35 = vmax.f32 %v8922_v20, %v8923_v28  ;;  %v8323_v9 = vcombine.high %v19051_v14, %v19051_v14  ;;  %v8808_v27 = vrot.slane %v8807_v30, 1  ;;  %v9027_v17 = vsel %vm2650_vm9, %v8525_v25, -inf }
 0x626   : > { %v8800_v45 = vmax.f32 %v8798_v10, %v8799_v37  ;;  %v8908_v23 = vsel %vm2650_vm9, %v8458_v29, -inf  ;;  %v8527_v12 = vcombine.high %v8525_v25, %v8525_v25  ;;  %v21457_v40 = vcombine.high %v18973_v13, %v18977_v39 }
 0x627   : > { %v8925_v49 = vrot.slane %v8924_v35, 2  ;;  %v8909_v63 = vrot.slane %v8908_v23, 4  ;;  %v8698_v53 = vsel %vm8613_vm10, %v8323_v9, -inf  ;;  %v8816_v0 = vmax.f32 %v8814_v50, %v8815_v3 }
 0x628   : > { %v19454_v56 = vrot.slane %v21457_v40, %v21454_v54  ;;  %v8920_v11 = vrot.slane %v8919_v47, 1  ;;  %v8699_v14 = vrot.slane %v8698_v53, 4  ;;  %9173 = vrot.lane.b32.xlu1 %v19437_v24, %s13722_s22  ;;  %9101 = vrot.lane.b32.xlu0 %v19443_v4, %s13722_s22  ;;  %v8695_v52 = vmax.f32 %v8693_v15, %v8694_v41 }
 0x629   : > { %v8910_v31 = vmax.f32 %v8908_v23, %v8909_v63  ;;  %v9034_v51 = vsel %vm8613_vm10, %v8527_v12, -inf  ;;  %v9028_v25 = vrot.slane %v9027_v17, 4  ;;  %v8809_v26 = vmax.f32 %v8807_v30, %v8808_v27 }
 0x62a   : > { %v8801_v38 = vrot.slane %v8800_v45, 1  ;;  %v8700_v10 = vmax.f32 %v8698_v53, %v8699_v14  ;;  %v9035_v13 = vrot.slane %v9034_v51, 4  ;;  %v8926_v54 = vmax.f32 %v8924_v35, %v8925_v49 }
 0x62b   : > { %v8911_v39 = vrot.slane %v8910_v31, 2  ;;  %v9029_v50 = vmax.f32 %v9027_v17, %v9028_v25  ;;  %v8526_v20 = vcombine.high %v19427_v18, %v19427_v18  ;;  %v8322_v28 = vcombine.high %v19454_v56, %v19454_v56 }
 0x62c   : > { %v8701_v19 = vrot.slane %v8700_v10, 2  ;;  %v9036_v1 = vmax.f32 %v9034_v51, %v9035_v13  ;;  %9135 = vrot.lane.b32.xlu1 %v8816_v0, %s13722_s22  ;;  %9133 = vrot.lane.b32.xlu0 %v8809_v26, %s13722_s22  ;;  %v8921_v15 = vmax.f32 %v8919_v47, %v8920_v11  ;;  %v8696_v30 = vrot.slane %v8695_v52, 1 }
 0x62d   : > { %v8912_v3 = vmax.f32 %v8910_v31, %v8911_v39  ;;  %v9020_v37 = vsel %vm2650_vm9, %v8526_v20, -inf  ;;  %v9030_v41 = vrot.slane %v9029_v50, 2  ;;  %v8684_v9 = vsel %vm2650_vm9, %v8322_v28, -inf }
 0x62e   : > { %v8702_v29 = vmax.f32 %v8700_v10, %v8701_v19  ;;  %v9021_v35 = vrot.slane %v9020_v37, 4  ;;  %v19469_v27 = vmax.f32 %v8800_v45, %v8801_v38  ;;  %v8927_v23 = vrot.slane %v8926_v54, 1  ;;  %v12083_v45 = vld [vmem:[%s20414_s5 + $0x310] sm:$0xff] }
 0x62f   : > { %v9037_v17 = vrot.slane %v9036_v1, 2  ;;  %v8685_v49 = vrot.slane %v8684_v9, 4  ;;  %v8697_v53 = vmax.f32 %v8695_v52, %v8696_v30  ;;  %v8913_v12 = vrot.slane %v8912_v3, 1  ;;  %v12084_v52 = vld [vmem:[%s20414_s5 + $0x318] sm:$0xff] }
 0x630   : > { %v9022_v63 = vmax.f32 %v9020_v37, %v9021_v35  ;;  %9157 = vrot.lane.b32.xlu1 %v8921_v15, %s13722_s22  ;;  %9131 = vrot.lane.b32.xlu0 %v19469_v27, %s13722_s22  ;;  %v8703_v40 = vrot.slane %v8702_v29, 1  ;;  %v9031_v0 = vmax.f32 %v9029_v50, %v9030_v41  ;;  %v8928_v11 = vmax.f32 %v8926_v54, %v8927_v23  ;;  %v13389_v37 = vld [vmem:[%s20414_s5 + $0xc] ss:$16 sps:$4 sm:$0xff]  }
 0x631   : > { %v8686_v47 = vmax.f32 %v8684_v9, %v8685_v49  ;;  %v9038_v14 = vmax.f32 %v9036_v1, %v9037_v17  ;;  %v19479_v25 = vmax.f32 %v8912_v3, %v8913_v12  ;;  %v12134_v39 = vcombine.high %v12083_v45, %v12083_v45  ;;  %v13386_v3 = vld [vmem:[%s20414_s5 + $0x4] ss:$16 sps:$4 sm:$0xff]  }
 0x632   : > { %v9023_v31 = vrot.slane %v9022_v63, 2  ;;  %v8704_v26 = vmax.f32 %v8702_v29, %v8703_v40  ;;  %v9032_v38 = vrot.slane %v9031_v0, 1  ;;  %v12136_v50 = vcombine.high %v12084_v52, %v12084_v52 }
 0x633   : > { %v8687_v51 = vrot.slane %v8686_v47, 2  ;;  %v9039_v10 = vrot.slane %v9038_v14, 1  ;;  %12137 = vmatprep.subr.msk.bf16.mxu0 %vm604_vm3, %v12134_v39  ;;  %v12133_v19 = vcombine.low %v12083_v45, %v12083_v45  ;;  %v12135_v30 = vcombine.low %v12084_v52, %v12084_v52  ;;  %v21458_v52 = vld [vmem:[#allocation96_spill] sm:$0xff] }
 0x634   : > { %9109 = vrot.lane.b32.xlu1 %v8697_v53, %s13722_s22  ;;  %9159 = vrot.lane.b32.xlu0 %v8928_v11, %s13722_s22  ;;  %v9024_v13 = vmax.f32 %v9022_v63, %v9023_v31  ;;  %v9033_v20 = vmax.f32 %v9031_v0, %v9032_v38  ;;  %v8733_v23 = vsel %vm2650_vm9, %v19063_v21, -inf  ;;  %v8845_v49 = vsel %vm2650_vm9, %v19106_v42, -inf  ;;  %v9281_v42 = vld [vmem:[%s20413_s4] sm:$0x3] }
 0x635   : > { %v8688_v54 = vmax.f32 %v8686_v47, %v8687_v51  ;;  %v9040_v1 = vmax.f32 %v9038_v14, %v9039_v10  ;;  %12139 = vmatprep.subr.msk.bf16.mxu1 %vm604_vm3, %v12136_v50  ;;  %v9760_v29 = vsel %vm604_vm3, %v12133_v19, 0  ;;  %v9766_v41 = vsel %vm604_vm3, %v12135_v30, 0 }
 0x636   : > { %v9025_v28 = vrot.slane %v9024_v13, 1  ;;  %9796 = vmatpush1.bf16.msra.mxu0 %v9760_v29  ;;  %9837 = vmatpush1.bf16.msra.mxu1 %v9766_v41  ;;  %v8734_v17 = vrot.slane %v8733_v23, 4  ;;  %v8846_v47 = vrot.slane %v8845_v49, 4  ;;  %v8957_v40 = vsel %vm2650_vm9, %v19161_v43, -inf  ;;  %v21459_v41 = vld [vmem:[#allocation81_spill] sm:$0xff] }
 0x637   : > { %v8689_v15 = vrot.slane %v8688_v54, 1  ;;  %10149 = vmatprep.subr.bf16.mxu0 %v13386_v3  ;;  %10190 = vmatprep.subr.bf16.mxu1 %v13389_v37  ;;  %v8621_v0 = vsel %vm2650_vm9, %v19010_v7, -inf  ;;  %v8958_v14 = vrot.slane %v8957_v40, 4  ;;  %v19521_v10 = vrot.slane %v9281_v42, %v21458_v52 }
 0x638   : > { %9155 = vrot.lane.b32.xlu1 %v19479_v25, %s13722_s22  ;;  %9111 = vrot.lane.b32.xlu0 %v8704_v26, %s13722_s22  ;;  %v19499_v35 = vmax.f32 %v9024_v13, %v9025_v28  ;;  %v8735_v63 = vmax.f32 %v8733_v23, %v8734_v17  ;;  %v8847_v12 = vmax.f32 %v8845_v49, %v8846_v47  ;;  %v8622_v45 = vrot.slane %v8621_v0, 4 }
 0x639   : > { %v19501_v9 = vmax.f32 %v8688_v54, %v8689_v15  ;;  %v8959_v38 = vmax.f32 %v8957_v40, %v8958_v14  ;;  %v19530_v23 = vrot.slane %v9281_v42, %v21459_v41 }
 0x63a   : > { %v8736_v53 = vrot.slane %v8735_v63, 2  ;;  %v8848_v21 = vrot.slane %v8847_v12, 2  ;;  %v8623_v7 = vmax.f32 %v8621_v0, %v8622_v45 }
 0x63c   : > { %9183 = vrot.lane.b32.xlu1 %v9040_v1, %s13722_s22  ;;  %9181 = vrot.lane.b32.xlu0 %v9033_v20, %s13722_s22  ;;  %v8737_v11 = vmax.f32 %v8735_v63, %v8736_v53  ;;  %v8849_v54 = vmax.f32 %v8847_v12, %v8848_v21  ;;  %v8960_v1 = vrot.slane %v8959_v38, 2  ;;  %v8624_v29 = vrot.slane %v8623_v7, 2 }
 0x63e   : > { %v8738_v26 = vrot.slane %v8737_v11, 1  ;;  %v8850_v37 = vrot.slane %v8849_v54, 1  ;;  %v8961_v63 = vmax.f32 %v8959_v38, %v8960_v1  ;;  %v8625_v0 = vmax.f32 %v8623_v7, %v8624_v29 }
 0x640   : > { %9179 = vrot.lane.b32.xlu1 %v19499_v35, %s13722_s22  ;;  %9107 = vrot.lane.b32.xlu0 %v19501_v9, %s13722_s22  ;;  %v8739_v19 = vmax.f32 %v8737_v11, %v8738_v26  ;;  %v8851_v53 = vmax.f32 %v8849_v54, %v8850_v37  ;;  %v8962_v42 = vrot.slane %v8961_v63, 1  ;;  %v8626_v54 = vrot.slane %v8625_v0, 1 }
 0x642   : > { %v8627_v29 = vmax.f32 %v8625_v0, %v8626_v54 }
 0x656   : > { %v19515_v31 = vpop.permute.xlu1 %9097  ;;  %v9122_v51 = vpop.permute.xlu0 %9121 }
 0x65a   : > { %v9124_v43 = vpop.permute.xlu1 %9123  ;;  %v9100_v13 = vpop.permute.xlu0 %9099 }
 0x65b   : > { %v9196_v39 = vsel %vm682_vm5, %v9122_v51, %v9124_v43  ;;  %v9188_v50 = vsel %vm682_vm5, %v19515_v31, %v9100_v13 }
 0x65c   : > { %v9260_v20 = vmax.f32 %v19187_v61, %v9196_v39  ;;  %v9252_v15 = vmax.f32 %v19273_v60, %v9188_v50 }
 0x65e   : > { %v9304_v28 = vadd.f32 %v19521_v10, %v9260_v20  ;;  %v9146_v30 = vpop.permute.xlu1 %9145  ;;  %v9120_v3 = vpop.permute.xlu0 %9119  ;;  %v9296_v61 = vadd.f32 %v19521_v10, %v9252_v15 }
 0x65f   : > { %v9195_v17 = vsel %vm682_vm5, %v9120_v3, %v9122_v51 }
 0x660   : > { %v9259_v49 = vmax.f32 %v8739_v19, %v9195_v17  ;;  %v9336_v47 = vmax.f32 %v9304_v28, 0.0  ;;  %v9328_v26 = vmax.f32 %v9296_v61, 0.0  ;;  %v8963_v28 = vmax.f32 %v8961_v63, %v8962_v42 }
 0x661   : > { %v8817_v42 = vsel %vm2650_vm9, %v19103_v8, -inf }
 0x662   : > { %v9144_v12 = vpop.permute.xlu1 %9143  ;;  %v9148_v40 = vpop.permute.xlu0 %9147  ;;  %v9303_v60 = vadd.f32 %v19530_v23, %v9259_v49  ;;  %v9418_v51 = vpack.c.bf16 %v9336_v47, %v9336_v47 }
 0x663   : > { %v9203_v11 = vsel %vm682_vm5, %v9144_v12, %v9146_v30  ;;  %v9204_v14 = vsel %vm682_vm5, %v9146_v30, %v9148_v40  ;;  %v9416_v30 = vpack.c.bf16 %v9328_v26, %v9328_v26 }
 0x664   : > { %v9267_v21 = vmax.f32 %v8851_v53, %v9203_v11  ;;  %v9268_v45 = vmax.f32 %v19207_v57, %v9204_v14  ;;  %v9335_v39 = vmax.f32 %v9303_v60, 0.0  ;;  %v8705_v57 = vsel %vm2650_vm9, %v19060_v62, -inf }
 0x665   : > { %v9485_v15 = vunpack.c.l.b16 %v9418_v51  ;;  %v8706_v62 = vrot.slane %v8705_v57, 4  ;;  %v9483_v26 = vunpack.c.l.b16 %v9416_v30 }
 0x666   : > { %v9311_v38 = vadd.f32 %v19530_v23, %v9267_v21  ;;  %v9172_v43 = vpop.permute.xlu1 %9171  ;;  %v9170_v13 = vpop.permute.xlu0 %9169  ;;  %v9312_v7 = vadd.f32 %v19521_v10, %v9268_v45  ;;  %v9417_v49 = vpack.c.bf16 %v9335_v39, %v9335_v39 }
 0x667   : > { %v9212_v50 = vsel %vm682_vm5, %v9170_v13, %v9172_v43  ;;  %v9496_v51 = vrot.slane %v9485_v15, 7 }
 0x668   : > { %v9276_v20 = vmax.f32 %v19271_v58, %v9212_v50  ;;  %v9343_v19 = vmax.f32 %v9311_v38, 0.0  ;;  %v9344_v1 = vmax.f32 %v9312_v7, 0.0  ;;  %v19556_v50 = vmax.f32 %v8705_v57, %v8706_v62 }
 0x669   : > { %v8592_v57 = vsel %vm2650_vm9, %v19007_v36, -inf }
 0x66a   : > { %v9320_v3 = vadd.f32 %v19521_v10, %v9276_v20  ;;  %v9168_v37 = vpop.permute.xlu1 %9167  ;;  %v9096_v17 = vpop.permute.xlu0 %9095  ;;  %v9420_v47 = vpack.c.bf16 %v9344_v1, %v9344_v1  ;;  %v9419_v40 = vpack.c.bf16 %v9343_v19, %v9343_v19  ;;  %v8818_v20 = vrot.slane %v8817_v42, 4 }
 0x66b   : > { %v9211_v61 = vsel %vm682_vm5, %v9168_v37, %v9170_v13  ;;  %v9187_v58 = vsel %vm682_vm5, %v9096_v17, %v19515_v31  ;;  %v9484_v31 = vunpack.c.l.b16 %v9417_v49  ;;  %v8929_v37 = vsel %vm2650_vm9, %v19155_v34, -inf }
 0x66c   : > { %v9352_v53 = vmax.f32 %v9320_v3, 0.0  ;;  %v9275_v12 = vmax.f32 %v8963_v28, %v9211_v61  ;;  %v9251_v63 = vmax.f32 %v8627_v29, %v9187_v58  ;;  %v9487_v60 = vunpack.c.l.b16 %v9420_v47 }
 0x66d   : > { %v9486_v7 = vunpack.c.l.b16 %v9419_v40  ;;  %v9497_v3 = vsel %vm4986_vm12, %v9496_v51, %v9483_v26  ;;  %v8761_v29 = vsel %vm2650_vm9, %v19066_v33, -inf  ;;  %v9490_v17 = vrot.slane %v9484_v31, 7 }
 0x66e   : > { %v9422_v11 = vpack.c.bf16 %v9352_v53, %v9352_v53  ;;  %v9319_v14 = vadd.f32 %v19530_v23, %v9275_v12  ;;  %v9295_v21 = vadd.f32 %v19530_v23, %v9251_v63  ;;  %v9118_v0 = vpop.permute.xlu1 %9117  ;;  %v19550_v45 = vpop.permute.xlu0 %9115  ;;  %v9498_v43 = vrot.slane %v9487_v60, 6 }
 0x66f   : > { %v9194_v38 = vsel %vm682_vm5, %v19550_v45, %v9118_v0  ;;  %v9492_v61 = vrot.slane %v9486_v7, 6  ;;  %v8819_v53 = vmax.f32 %v8817_v42, %v8818_v20  ;;  %v8873_v12 = vsel %vm2650_vm9, %v19109_v55, -inf  ;;  %v13384_v55 = vld [vmem:[%s20414_s5] ss:$16 sps:$4 sm:$0xff]   ;;  %v13387_v42 = vld [vmem:[%s20414_s5 + $0x8] ss:$16 sps:$4 sm:$0xff]  }
 0x670   : > { %v9489_v13 = vunpack.c.l.b16 %v9422_v11  ;;  %v9351_v54 = vmax.f32 %v9319_v14, 0.0  ;;  %v9327_v39 = vmax.f32 %v9295_v21, 0.0  ;;  %v9258_v8 = vmax.f32 %v19322_v32, %v9194_v38  ;;  %v13395_v38 = vld [vmem:[%s20414_s5 + $0x2c] ss:$16 sps:$4 sm:$0xff]  }
 0x671   : > { %v9499_v32 = vsel %vm4989_vm13, %v9498_v43, %v9497_v3  ;;  %v8762_v60 = vrot.slane %v8761_v29, 4  ;;  %v8930_v21 = vrot.slane %v8929_v37, 4  ;;  %v8593_v26 = vrot.slane %v8592_v57, 4 }
 0x672   : > { %v9500_v19 = vrot.slane %v9489_v13, 5  ;;  %v9421_v1 = vpack.c.bf16 %v9351_v54, %v9351_v54  ;;  %v9415_v28 = vpack.c.bf16 %v9327_v39, %v9327_v39  ;;  %v19559_v15 = vpop.permute.xlu1 %9139  ;;  %v19561_v30 = vpop.permute.xlu0 %9113  ;;  %v9302_v36 = vadd.f32 %v19521_v10, %v9258_v8 }
 0x673   : > { %v8874_v43 = vrot.slane %v8873_v12, 4  ;;  %v8985_v13 = vsel %vm2650_vm9, %v19267_v5, -inf  ;;  %v8931_v3 = vmax.f32 %v8929_v37, %v8930_v21  ;;  %v13390_v5 = vld [vmem:[%s20414_s5 + $0x20] ss:$16 sps:$4 sm:$0xff]   ;;  %v13398_v37 = vld [vmem:[%s20414_s5 + $0x44] ss:$16 sps:$4 sm:$0xff]  }
 0x674   : > { %v9488_v49 = vunpack.c.l.b16 %v9421_v1  ;;  %v9482_v47 = vunpack.c.l.b16 %v9415_v28  ;;  %v9501_v58 = vsel %vm4992_vm14, %v9500_v19, %v9499_v32  ;;  %v9334_v54 = vmax.f32 %v9302_v36, 0.0 }
 0x675   : > { %v9503_v14 = vpack.c.b16 %v9501_v58, %v9501_v58  ;;  %v8763_v19 = vmax.f32 %v8761_v29, %v8762_v60  ;;  %v8708_v1 = vrot.slane %v19556_v50, 2  ;;  %v8820_v28 = vrot.slane %v8819_v53, 2  ;;  %v13393_v29 = vld [vmem:[%s20414_s5 + $0x28] ss:$16 sps:$4 sm:$0xff]  }
 0x676   : > { %v9494_v63 = vrot.slane %v9488_v49, 5  ;;  %v9491_v34 = vsel %vm4986_vm12, %v9490_v17, %v9482_v47  ;;  %v19576_v40 = vpop.permute.xlu1 %9091  ;;  %v9142_v33 = vpop.permute.xlu0 %9141  ;;  %v8594_v49 = vmax.f32 %v8592_v57, %v8593_v26  ;;  %v8986_v47 = vrot.slane %v8985_v13, 4 }
 0x677   : > { %v9493_v62 = vsel %vm4989_vm13, %v9492_v61, %v9491_v34  ;;  %v9202_v11 = vsel %vm682_vm5, %v19559_v15, %v9142_v33  ;;  %12138 = vmatprep.mubr.msk.bf16.mxu0 %vm9755_vm11, %v9503_v14  ;;  %12140 = vmatprep.mubr.msk.bf16.mxu1 %vm9755_vm11, %v9503_v14  ;;  %v8875_v61 = vmax.f32 %v8873_v12, %v8874_v43  ;;  %v8649_v58 = vsel %vm2650_vm9, %v19013_v22, -inf  ;;  %v13396_v22 = vld [vmem:[%s20414_s5 + $0x40] ss:$16 sps:$4 sm:$0xff]  }
 0x678   : > { %v9266_v0 = vmax.f32 %v19358_v46, %v9202_v11  ;;  %v9495_v51 = vsel %vm4992_vm14, %v9494_v63, %v9493_v62  ;;  %v13392_v46 = vld [vmem:[%s20414_s5 + $0x24] ss:$16 sps:$4 sm:$0xff]   ;;  %v9360_v63 = vpack.c.bf16 %v9334_v54, %v9334_v54  ;;  %v8764_v33 = vrot.slane %v8763_v19, 2 }
 0x679   : > { %v9502_v31 = vpack.c.b16 %v9495_v51, %v9495_v51  ;;  %v8789_v60 = vsel %vm2650_vm9, %v19069_v16, -inf  ;;  %v8709_v62 = vmax.f32 %v19556_v50, %v8708_v1  ;;  %v8821_v11 = vmax.f32 %v8819_v53, %v8820_v28  ;;  %v13399_v16 = vld [vmem:[%s20414_s5 + $0x48] ss:$16 sps:$4 sm:$0xff]   ;;  %v13404_v50 = vld [vmem:[%s20414_s5 + $0x64] ss:$16 sps:$4 sm:$0xff]  }
 0x67a   : > { %v9310_v39 = vadd.f32 %v19521_v10, %v9266_v0  ;;  %v19600_v7 = vpop.permute.xlu1 %9137  ;;  %v9094_v20 = vpop.permute.xlu0 %9093  ;;  %v8932_v12 = vrot.slane %v8931_v3, 2  ;;  %v8987_v53 = vmax.f32 %v8985_v13, %v8986_v47  ;;  %v13407_v51 = vld [vmem:[%s20414_s5 + $0x6c] ss:$16 sps:$4 sm:$0xff]   ;;  %v8650_v26 = vrot.slane %v8649_v58, 4  ;;  %v13405_v47 = vld [vmem:[%s20414_s5 + $0x68] ss:$16 sps:$4 sm:$0xff]  }
 0x67b   : > { %v9186_v8 = vsel %vm682_vm5, %v19576_v40, %v9094_v20  ;;  %9804 = vmatmul.mubr.bf16.vlgmr.msra.gmra.mrb[32].mxu0 %v9502_v31  ;;  %9845 = vmatmul.mubr.bf16.vlgmr.msra.gmra.mrb[32].mxu1 %v9502_v31  ;;  %v8790_v31 = vrot.slane %v8789_v60, 4  ;;  %v8765_v20 = vmax.f32 %v8763_v19, %v8764_v33  ;;  %v8710_v1 = vrot.slane %v8709_v62, 1  ;;  %v13410_v19 = vld [vmem:[%s20414_s5 + $0x84] ss:$16 sps:$4 sm:$0xff]  }
 0x67c   : > { %v9250_v17 = vmax.f32 %v19381_v59, %v9186_v8  ;;  %10150 = vmatpush1.bf16.msra.mxu0 %v13384_v55  ;;  %10191 = vmatpush1.bf16.msra.mxu1 %v13387_v42  ;;  %v9342_v32 = vmax.f32 %v9310_v39, 0.0  ;;  %v13401_v59 = vld [vmem:[%s20414_s5 + $0x4c] ss:$16 sps:$4 sm:$0xff]   ;;  %v8595_v55 = vrot.slane %v8594_v49, 2  ;;  %v8822_v13 = vrot.slane %v8821_v11, 1 }
 0x67d   : > { %10151 = vmatprep.subr.bf16.mxu0 %v13392_v46  ;;  %10192 = vmatprep.subr.bf16.mxu1 %v13395_v38  ;;  %v9864_v46 = vunpack.c.l.b16 %v9360_v63  ;;  %v8933_v28 = vmax.f32 %v8931_v3, %v8932_v12  ;;  %v13413_v3 = vld [vmem:[%s20414_s5 + $0x8c] ss:$16 sps:$4 sm:$0xff]   ;;  %v8791_v12 = vmax.f32 %v8789_v60, %v8790_v31  ;;  %v13411_v60 = vld [vmem:[%s20414_s5 + $0x88] ss:$16 sps:$4 sm:$0xff]  }
 0x67e   : > { %v9294_v34 = vadd.f32 %v19521_v10, %v9250_v17  ;;  %v9166_v57 = vpop.permute.xlu1 %9165  ;;  %v19621_v36 = vpop.permute.xlu0 %9163  ;;  %v9362_v42 = vpack.c.bf16 %v9342_v32, %v9342_v32  ;;  %v8988_v32 = vrot.slane %v8987_v53, 2 }
 0x67f   : > { %v9210_v14 = vsel %vm682_vm5, %v19621_v36, %v9166_v57  ;;  %v9875_v63 = vrot.slane %v9864_v46, 7 }
 0x680   : > { %v9326_v21 = vmax.f32 %v9294_v34, 0.0  ;;  %v9274_v0 = vmax.f32 %v19379_v44, %v9210_v14  ;;  %10152 = vmatpush1.bf16.msra.mxu0 %v13390_v5  ;;  %10193 = vmatpush1.bf16.msra.mxu1 %v13393_v29  ;;  %v8876_v44 = vrot.slane %v8875_v61, 2  ;;  %v8596_v5 = vmax.f32 %v8594_v49, %v8595_v55  ;;  %v13402_v29 = vld [vmem:[%s20414_s5 + $0x60] ss:$16 sps:$4 sm:$0xff]  }
 0x681   : > { %10153 = vmatprep.subr.bf16.mxu0 %v13398_v37  ;;  %10194 = vmatprep.subr.bf16.mxu1 %v13401_v59  ;;  %v9866_v37 = vunpack.c.l.b16 %v9362_v42  ;;  %v8651_v59 = vmax.f32 %v8649_v58, %v8650_v26  ;;  %v8766_v14 = vrot.slane %v8765_v20, 1  ;;  %v8934_v55 = vrot.slane %v8933_v28, 1 }
 0x682   : > { %v9358_v38 = vpack.c.bf16 %v9326_v21, %v9326_v21  ;;  %v9318_v43 = vadd.f32 %v19521_v10, %v9274_v0  ;;  %v19642_v54 = vpop.permute.xlu1 %9161  ;;  %v9090_v39 = vpop.permute.xlu0 %9089  ;;  %v19656_v49 = vmax.f32 %v8875_v61, %v8876_v44  ;;  %v9193_v21 = vsel %vm682_vm5, %v19561_v30, %v19550_v45  ;;  %v13408_v61 = vld [vmem:[%s20414_s5 + $0x80] ss:$16 sps:$4 sm:$0xff]   ;;  %v13416_v45 = vld [vmem:[%s20414_s5 + $0xa4] ss:$16 sps:$4 sm:$0xff]  }
 0x683   : > { %v19661_v0 = vmax.f32 %v8821_v11, %v8822_v13  ;;  %v8989_v30 = vmax.f32 %v8987_v53, %v8988_v32  ;;  %v13419_v11 = vld [vmem:[%s20414_s5 + $0xac] ss:$16 sps:$4 sm:$0xff]   ;;  %v8901_v44 = vsel %vm2650_vm9, %v19112_v2, -inf  ;;  %v8792_v53 = vrot.slane %v8791_v12, 2  ;;  %v19693_v2 = vld [vmem:[%s20414_s5 + $0x180] sm:$0xff] }
 0x684   : > { %v9862_v8 = vunpack.c.l.b16 %v9358_v38  ;;  %v9350_v17 = vmax.f32 %v9318_v43, 0.0  ;;  %10154 = vmatpush1.bf16.msra.mxu0 %v13396_v22  ;;  %10195 = vmatpush1.bf16.msra.mxu1 %v13399_v16  ;;  %v8711_v22 = vmax.f32 %v8709_v62, %v8710_v1  ;;  %v9877_v62 = vrot.slane %v9866_v37, 6  ;;  %v13422_v32 = vld [vmem:[%s20414_s5 + $0xc4] ss:$16 sps:$4 sm:$0xff]   ;;  %v13425_v37 = vld [vmem:[%s20414_s5 + $0xcc] ss:$16 sps:$4 sm:$0xff]  }
 0x685   : > { %10155 = vmatprep.subr.bf16.mxu0 %v13404_v50  ;;  %10196 = vmatprep.subr.bf16.mxu1 %v13407_v51  ;;  %v8597_v50 = vrot.slane %v8596_v5, 1  ;;  %v8878_v42 = vrot.slane %v19656_v49, 1  ;;  %v8652_v51 = vrot.slane %v8651_v59, 2  ;;  %v19679_v38 = vmax.f32 %v8765_v20, %v8766_v14 }
 0x686   : > { %v9364_v34 = vpack.c.bf16 %v9350_v17, %v9350_v17  ;;  %v9130_v57 = vpop.permute.xlu1 %9129  ;;  %v9128_v33 = vpop.permute.xlu0 %9127  ;;  %v9876_v58 = vsel %vm4986_vm12, %v9875_v63, %v9862_v8  ;;  %v9257_v26 = vmax.f32 %v8711_v22, %v9193_v21  ;;  %v9201_v1 = vsel %vm682_vm5, %v19600_v7, %v19559_v15  ;;  %v13414_v15 = vld [vmem:[%s20414_s5 + $0xa0] ss:$16 sps:$4 sm:$0xff]   ;;  %v19715_v63 = vld [vmem:[%s20414_s5 + $0x188] sm:$0xff] }
 0x687   : > { %v9185_v13 = vsel %vm682_vm5, %v9090_v39, %v19576_v40  ;;  %v9878_v17 = vsel %vm4989_vm13, %v9877_v62, %v9876_v58  ;;  %v8598_v20 = vmax.f32 %v8596_v5, %v8597_v50  ;;  %v13417_v40 = vld [vmem:[%s20414_s5 + $0xa8] ss:$16 sps:$4 sm:$0xff]   ;;  %v8990_v39 = vrot.slane %v8989_v30, 1 }
 0x688   : > { %v9868_v16 = vunpack.c.l.b16 %v9364_v34  ;;  %10156 = vmatpush1.bf16.msra.mxu0 %v13402_v29  ;;  %10197 = vmatpush1.bf16.msra.mxu1 %v13405_v47  ;;  %v19704_v47 = vmax.f32 %v8933_v28, %v8934_v55  ;;  %v9265_v28 = vmax.f32 %v19661_v0, %v9201_v1  ;;  %v9198_v14 = vsel %vm682_vm5, %v9128_v33, %v9130_v57  ;;  %v13423_v0 = vld [vmem:[%s20414_s5 + $0xc8] ss:$16 sps:$4 sm:$0xff]  }
 0x689   : > { %10157 = vmatprep.subr.bf16.mxu0 %v13410_v19  ;;  %10198 = vmatprep.subr.bf16.mxu1 %v13413_v3  ;;  %v8653_v19 = vmax.f32 %v8651_v59, %v8652_v51  ;;  %v8902_v3 = vrot.slane %v8901_v44, 4  ;;  %v9249_v34 = vmax.f32 %v8598_v20, %v9185_v13  ;;  %v12190_v55 = vcombine.high %v19693_v2, %v19693_v2  ;;  %v13426_v13 = vld [vmem:[%s20414_s5 + $0xe0] ss:$16 sps:$4 sm:$0xff]  }
 0x68a   : > { %v9879_v31 = vrot.slane %v9868_v16, 5  ;;  %v9152_v46 = vpop.permute.xlu1 %9151  ;;  %v9126_v43 = vpop.permute.xlu0 %9125  ;;  %v8879_v59 = vmax.f32 %v19656_v49, %v8878_v42  ;;  %v19727_v58 = vmax.f32 %v8791_v12, %v8792_v53  ;;  %v9209_v57 = vsel %vm682_vm5, %v19642_v54, %v19621_v36  ;;  %v13428_v36 = vld [vmem:[%s20414_s5 + $0xe4] ss:$16 sps:$4 sm:$0xff]   ;;  %v13431_v54 = vld [vmem:[%s20414_s5 + $0xec] ss:$16 sps:$4 sm:$0xff]  }
 0x68b   : > { %v19687_v8 = vsel %vm682_vm5, %v9126_v43, %v9128_v33  ;;  %v13420_v33 = vld [vmem:[%s20414_s5 + $0xc0] ss:$16 sps:$4 sm:$0xff]   ;;  %v19738_v16 = vmax.f32 %v8989_v30, %v8990_v39  ;;  %v12192_v49 = vcombine.high %v19715_v63, %v19715_v63  ;;  %v9262_v12 = vmax.f32 %v19401_v48, %v9198_v14 }
 0x68c   : > { %v9261_v29 = vmax.f32 %v19679_v38, %v19687_v8  ;;  %10158 = vmatpush1.bf16.msra.mxu0 %v13408_v61  ;;  %10199 = vmatpush1.bf16.msra.mxu1 %v13411_v60  ;;  %v9880_v7 = vsel %vm4992_vm14, %v9879_v31, %v9878_v17  ;;  %v9301_v61 = vadd.f32 %v19530_v23, %v9257_v26  ;;  %v8654_v60 = vrot.slane %v8653_v19, 1  ;;  %v13429_v8 = vld [vmem:[%s20414_s5 + $0xe8] ss:$16 sps:$4 sm:$0xff]  }
 0x68d   : > { %10159 = vmatprep.subr.bf16.mxu0 %v13416_v45  ;;  %10200 = vmatprep.subr.bf16.mxu1 %v13419_v11  ;;  %v9882_v5 = vpack.c.b16 %v9880_v7, %v9880_v7  ;;  %v8903_v45 = vmax.f32 %v8901_v44, %v8902_v3  ;;  %v9309_v30 = vadd.f32 %v19530_v23, %v9265_v28 }
 0x68e   : > { %v19719_v22 = vpop.permute.xlu1 %9103  ;;  %v9154_v21 = vpop.permute.xlu0 %9153  ;;  %v9293_v62 = vadd.f32 %v19530_v23, %v9249_v34  ;;  %v12189_v42 = vcombine.low %v19693_v2, %v19693_v2  ;;  %v12191_v51 = vcombine.low %v19715_v63, %v19715_v63  ;;  %v9333_v26 = vmax.f32 %v9301_v61, 0.0  ;;  %v13435_v61 = vld [vmem:[%s20414_s5 + $0x108] ss:$16 sps:$4 sm:$0xff]  }
 0x68f   : > { %12194 = vmatprep.mubr.msk.bf16.mxu0 %vm9755_vm11, %v9882_v5  ;;  %12196 = vmatprep.mubr.msk.bf16.mxu1 %vm9755_vm11, %v9882_v5  ;;  %v9206_v50 = vsel %vm682_vm5, %v9152_v46, %v9154_v21  ;;  %v9273_v31 = vmax.f32 %v19704_v47, %v9209_v57  ;;  %v9306_v17 = vadd.f32 %v19521_v10, %v9262_v12  ;;  %v9341_v7 = vmax.f32 %v9309_v30, 0.0 }
 0x690   : > { %10160 = vmatpush1.bf16.msra.mxu0 %v13414_v15  ;;  %10201 = vmatpush1.bf16.msra.mxu1 %v13417_v40  ;;  %v9270_v43 = vmax.f32 %v19410_v6, %v9206_v50  ;;  %v9305_v20 = vadd.f32 %v19530_v23, %v9261_v29  ;;  %v13434_v6 = vld [vmem:[%s20414_s5 + $0x104] ss:$16 sps:$4 sm:$0xff]   ;;  %v8904_v15 = vrot.slane %v8903_v45, 2  ;;  %v9013_v40 = vsel %vm2650_vm9, %v19427_v18, -inf }
 0x691   : > { %10161 = vmatprep.subr.bf16.mxu0 %v13422_v32  ;;  %10202 = vmatprep.subr.bf16.mxu1 %v13425_v37  ;;  %v9325_v39 = vmax.f32 %v9293_v62, 0.0  ;;  %v8655_v32 = vmax.f32 %v8653_v19, %v8654_v60  ;;  %v9359_v37 = vpack.c.bf16 %v9333_v26, %v9333_v26  ;;  %v19784_v34 = vsel %vm2650_vm9, %v19454_v56, -inf  ;;  %v13432_v19 = vld [vmem:[%s20414_s5 + $0x100] ss:$16 sps:$4 sm:$0xff]  }
 0x692   : > { %v9150_v11 = vpop.permute.xlu1 %9149  ;;  %v9106_v48 = vpop.permute.xlu0 %9105  ;;  %v9317_v14 = vadd.f32 %v19530_v23, %v9273_v31  ;;  %v9314_v18 = vadd.f32 %v19521_v10, %v9270_v43  ;;  %v9338_v57 = vmax.f32 %v9306_v17, 0.0  ;;  %v9337_v56 = vmax.f32 %v9305_v20, 0.0 }
 0x693   : > { %v9205_v38 = vsel %vm682_vm5, %v9150_v11, %v9152_v46  ;;  %v9190_v44 = vsel %vm682_vm5, %v19719_v22, %v9106_v48  ;;  %v8794_v46 = vrot.slane %v19727_v58, 1  ;;  %v19804_v12 = vmax.f32 %v8903_v45, %v8904_v15 }
 0x694   : > { %v9269_v53 = vmax.f32 %v8879_v59, %v9205_v38  ;;  %v9254_v1 = vmax.f32 %v19443_v4, %v9190_v44  ;;  %10162 = vmatpush1.bf16.msra.mxu0 %v13420_v33  ;;  %10203 = vmatpush1.bf16.msra.mxu1 %v13423_v0  ;;  %v13437_v4 = vld [vmem:[%s20414_s5 + $0x10c] ss:$16 sps:$4 sm:$0xff]   ;;  %v9014_v59 = vrot.slane %v9013_v40, 4  ;;  %v13440_v33 = vld [vmem:[%s20414_s5 + $0x124] ss:$16 sps:$4 sm:$0xff]   ;;  %v9361_v50 = vpack.c.bf16 %v9341_v7, %v9341_v7 }
 0x695   : > { %10163 = vmatprep.subr.bf16.mxu0 %v13428_v36  ;;  %10204 = vmatprep.subr.bf16.mxu1 %v13431_v54  ;;  %v19802_v0 = vmax.f32 %v19727_v58, %v8794_v46  ;;  %v9357_v36 = vpack.c.bf16 %v9325_v39, %v9325_v39  ;;  %v9863_v11 = vunpack.c.l.b16 %v9359_v37  ;;  %v13438_v58 = vld [vmem:[%s20414_s5 + $0x120] ss:$16 sps:$4 sm:$0xff]   ;;  %v9349_v45 = vmax.f32 %v9317_v14, 0.0  ;;  %v13449_v46 = vld [vmem:[%s20414_s5 + $0x14c] ss:$16 sps:$4 sm:$0xff]  }
 0x696   : > { %v9313_v47 = vadd.f32 %v19530_v23, %v9269_v53  ;;  %v9178_v5 = vpop.permute.xlu1 %9177  ;;  %v9176_v29 = vpop.permute.xlu0 %9175  ;;  %v9298_v3 = vadd.f32 %v19521_v10, %v9254_v1  ;;  %v9346_v38 = vmax.f32 %v9314_v18, 0.0  ;;  %v13441_v53 = vld [vmem:[%s20414_s5 + $0x128] ss:$16 sps:$4 sm:$0xff]   ;;  %v10234_v1 = vpack.c.bf16 %v9338_v57, %v9338_v57  ;;  %v13444_v14 = vld [vmem:[%s20414_s5 + $0x140] ss:$16 sps:$4 sm:$0xff]  }
 0x697   : > { %v9214_v28 = vsel %vm682_vm5, %v9176_v29, %v9178_v5  ;;  %v9865_v17 = vunpack.c.l.b16 %v9361_v50  ;;  %v9861_v20 = vunpack.c.l.b16 %v9357_v36  ;;  %v9363_v37 = vpack.c.bf16 %v9349_v45, %v9349_v45  ;;  %v13447_v18 = vld [vmem:[%s20414_s5 + $0x148] ss:$16 sps:$4 sm:$0xff]  }
 0x698   : > { %v9278_v21 = vmax.f32 %v19437_v24, %v9214_v28  ;;  %10164 = vmatpush1.bf16.msra.mxu0 %v13426_v13  ;;  %10205 = vmatpush1.bf16.msra.mxu1 %v13429_v8  ;;  %v13443_v24 = vld [vmem:[%s20414_s5 + $0x12c] ss:$16 sps:$4 sm:$0xff]   ;;  %v9345_v54 = vmax.f32 %v9313_v47, 0.0  ;;  %v9330_v48 = vmax.f32 %v9298_v3, 0.0  ;;  %v10233_v13 = vpack.c.bf16 %v9337_v56, %v9337_v56  ;;  %v13453_v45 = vld [vmem:[%s20414_s5 + $0x168] ss:$16 sps:$4 sm:$0xff]  }
 0x699   : > { %10165 = vmatprep.subr.bf16.mxu0 %v13434_v6  ;;  %10206 = vmatprep.subr.bf16.mxu1 %v13437_v4  ;;  %v10236_v3 = vpack.c.bf16 %v9346_v38, %v9346_v38  ;;  %v9871_v56 = vrot.slane %v9865_v17, 6 }
 0x69a   : > { %v9322_v60 = vadd.f32 %v19521_v10, %v9278_v21  ;;  %v9174_v30 = vpop.permute.xlu1 %9173  ;;  %v9102_v62 = vpop.permute.xlu0 %9101  ;;  %v10235_v6 = vpack.c.bf16 %v9345_v54, %v9345_v54  ;;  %v10232_v39 = vpack.c.bf16 %v9330_v48, %v9330_v48  ;;  %v10301_v21 = vunpack.c.l.b16 %v10234_v1 }
 0x69b   : > { %v9213_v26 = vsel %vm682_vm5, %v9174_v30, %v9176_v29  ;;  %v9189_v31 = vsel %vm682_vm5, %v9102_v62, %v19719_v22  ;;  %v13446_v22 = vld [vmem:[%s20414_s5 + $0x144] ss:$16 sps:$4 sm:$0xff]   ;;  %v19830_v29 = vmax.f32 %v9013_v40, %v9014_v59  ;;  %v13455_v59 = vld [vmem:[%s20414_s5 + $0x16c] ss:$16 sps:$4 sm:$0xff]   ;;  %v9867_v48 = vunpack.c.l.b16 %v9363_v37 }
 0x69c   : > { %v9354_v44 = vmax.f32 %v9322_v60, 0.0  ;;  %v9277_v43 = vmax.f32 %v19738_v16, %v9213_v26  ;;  %10166 = vmatpush1.bf16.msra.mxu0 %v13432_v19  ;;  %10207 = vmatpush1.bf16.msra.mxu1 %v13435_v61  ;;  %v9253_v8 = vmax.f32 %v8655_v32, %v9189_v31  ;;  %v8678_v16 = vrot.slane %v19784_v34, 4  ;;  %v13452_v40 = vld [vmem:[%s20414_s5 + $0x164] ss:$16 sps:$4 sm:$0xff]  }
 0x69d   : > { %10167 = vmatprep.subr.bf16.mxu0 %v13440_v33  ;;  %10208 = vmatprep.subr.bf16.mxu1 %v13443_v24  ;;  %v9869_v32 = vrot.slane %v9863_v11, 7  ;;  %v10300_v19 = vunpack.c.l.b16 %v10233_v13  ;;  %v10302_v24 = vunpack.c.l.b16 %v10235_v6  ;;  %v10299_v60 = vunpack.c.l.b16 %v10232_v39  ;;  %v13462_v37 = vld [vmem:[%s20414_s5 + $0x324] ss:$16 sps:$4 sm:$0xff]  }
 0x69e   : > { %v9321_v4 = vadd.f32 %v19530_v23, %v9277_v43  ;;  %v19825_v15 = vpop.permute.xlu1 %9135  ;;  %v19827_v7 = vpop.permute.xlu0 %9133  ;;  %v10238_v47 = vpack.c.bf16 %v9354_v44, %v9354_v44  ;;  %v9297_v5 = vadd.f32 %v19530_v23, %v9253_v8  ;;  %v8679_v57 = vmax.f32 %v19784_v34, %v8678_v16  ;;  %v13450_v34 = vld [vmem:[%s20414_s5 + $0x160] ss:$16 sps:$4 sm:$0xff]  }
 0x69f   : > { %v9870_v33 = vsel %vm4986_vm12, %v9869_v32, %v9861_v20  ;;  %v10303_v26 = vunpack.c.l.b16 %v10236_v3  ;;  %v10312_v38 = vrot.slane %v10301_v21, 7  ;;  %v10306_v44 = vrot.slane %v10300_v19, 7 }
 0x6a0   : > { %v9353_v28 = vmax.f32 %v9321_v4, 0.0  ;;  %10168 = vmatpush1.bf16.msra.mxu0 %v13438_v58  ;;  %10209 = vmatpush1.bf16.msra.mxu1 %v13441_v53  ;;  %v9329_v61 = vmax.f32 %v9297_v5, 0.0  ;;  %v10305_v30 = vunpack.c.l.b16 %v10238_v47  ;;  %v8906_v53 = vrot.slane %v19804_v12, 1 }
 0x6a1   : > { %10169 = vmatprep.subr.bf16.mxu0 %v13446_v22  ;;  %10210 = vmatprep.subr.bf16.mxu1 %v13449_v46  ;;  %v10308_v1 = vrot.slane %v10302_v24, 6  ;;  %v9872_v8 = vsel %vm4989_vm13, %v9871_v56, %v9870_v33  ;;  %v9016_v22 = vrot.slane %v19830_v29, 2  ;;  %v8680_v46 = vrot.slane %v8679_v57, 2 }
 0x6a2   : > { %v10237_v50 = vpack.c.bf16 %v9353_v28, %v9353_v28  ;;  %v19846_v36 = vpop.permute.xlu1 %9157  ;;  %v9132_v54 = vpop.permute.xlu0 %9131  ;;  %v10231_v62 = vpack.c.bf16 %v9329_v61, %v9329_v61  ;;  %v10313_v16 = vsel %vm4986_vm12, %v10312_v38, %v10299_v60  ;;  %v10316_v17 = vrot.slane %v10305_v30, 5  ;;  %v13466_v30 = vld [vmem:[%s20414_s5 + $0x340] ss:$16 sps:$4 sm:$0xff]  }
 0x6a3   : > { %v9199_v11 = vsel %vm682_vm5, %v9132_v54, %v19827_v7  ;;  %v9873_v4 = vrot.slane %v9867_v48, 5  ;;  %v10314_v39 = vrot.slane %v10303_v26, 6  ;;  %v10138_v5 = vsel %vm604_vm3, %v12189_v42, 0  ;;  %v13471_v54 = vld [vmem:[%s20414_s5 + $0x34c] ss:$16 sps:$4 sm:$0xff]  }
 0x6a4   : > { %v10304_v31 = vunpack.c.l.b16 %v10237_v50  ;;  %v9263_v58 = vmax.f32 %v19802_v0, %v9199_v11  ;;  %10170 = vmatpush1.bf16.msra.mxu0 %v13444_v14  ;;  %10211 = vmatpush1.bf16.msra.mxu1 %v13447_v18  ;;  %v10298_v43 = vunpack.c.l.b16 %v10231_v62  ;;  %v10144_v32 = vsel %vm604_vm3, %v12191_v51, 0  ;;  %v13468_v50 = vld [vmem:[%s20414_s5 + $0x344] ss:$16 sps:$4 sm:$0xff]   ;;  %v13469_v11 = vld [vmem:[%s20414_s5 + $0x348] ss:$16 sps:$4 sm:$0xff]  }
 0x6a5   : > { %10171 = vmatprep.subr.bf16.mxu0 %v13452_v40  ;;  %10212 = vmatprep.subr.bf16.mxu1 %v13455_v59  ;;  %v8907_v2 = vmax.f32 %v19804_v12, %v8906_v53  ;;  %v9874_v63 = vsel %vm4992_vm14, %v9873_v4, %v9872_v8  ;;  %v10315_v51 = vsel %vm4989_vm13, %v10314_v39, %v10313_v16  ;;  %v13460_v12 = vld [vmem:[%s20414_s5 + $0x320] ss:$16 sps:$4 sm:$0xff]   ;;  %v13474_v48 = vld [vmem:[%s20414_s5 + $0x364] ss:$16 sps:$4 sm:$0xff]  }
 0x6a6   : > { %v19858_v13 = vpop.permute.xlu1 %9109  ;;  %v19860_v0 = vpop.permute.xlu0 %9159  ;;  %v10310_v20 = vrot.slane %v10304_v31, 5  ;;  %v10307_v6 = vsel %vm4986_vm12, %v10306_v44, %v10298_v43  ;;  %v9017_v28 = vmax.f32 %v19830_v29, %v9016_v22  ;;  %v10317_v18 = vsel %vm4992_vm14, %v10316_v17, %v10315_v51  ;;  %v13463_v29 = vld [vmem:[%s20414_s5 + $0x328] ss:$16 sps:$4 sm:$0xff]   ;;  %v13480_v16 = vld [vmem:[%s20414_s5 + $0x384] ss:$16 sps:$4 sm:$0xff]  }
 0x6a7   : > { %v10309_v47 = vsel %vm4989_vm13, %v10308_v1, %v10307_v6  ;;  %v8681_v21 = vmax.f32 %v8679_v57, %v8680_v46  ;;  %v9307_v61 = vadd.f32 %v19530_v23, %v9263_v58  ;;  %v9881_v40 = vpack.c.b16 %v9874_v63, %v9874_v63  ;;  %v13472_v1 = vld [vmem:[%s20414_s5 + $0x360] ss:$16 sps:$4 sm:$0xff]   ;;  %v13475_v46 = vld [vmem:[%s20414_s5 + $0x368] ss:$16 sps:$4 sm:$0xff]   ;;  %v13483_v6 = vld [vmem:[%s20414_s5 + $0x38c] ss:$16 sps:$4 sm:$0xff]  }
 0x6a8   : > { %10172 = vmatpush1.bf16.msra.mxu0 %v13450_v34  ;;  %10213 = vmatpush1.bf16.msra.mxu1 %v13453_v45  ;;  %v10319_v33 = vpack.c.b16 %v10317_v18, %v10317_v18  ;;  %v9018_v24 = vrot.slane %v9017_v28, 1  ;;  %v13477_v45 = vld [vmem:[%s20414_s5 + $0x36c] ss:$16 sps:$4 sm:$0xff]  }
 0x6a9   : > { %12193 = vmatprep.subr.msk.bf16.mxu0 %vm604_vm3, %v12190_v55  ;;  %12195 = vmatprep.subr.msk.bf16.mxu1 %vm604_vm3, %v12192_v49  ;;  %v13465_v55 = vld [vmem:[%s20414_s5 + $0x32c] ss:$16 sps:$4 sm:$0xff]   ;;  %v19890_v49 = vsel %vm4992_vm14, %v10310_v20, %v10309_v47  ;;  %v8682_v60 = vrot.slane %v8681_v21, 1  ;;  %v9339_v62 = vmax.f32 %v9307_v61, 0.0  ;;  %v13478_v47 = vld [vmem:[%s20414_s5 + $0x380] ss:$16 sps:$4 sm:$0xff]  }
 0x6aa   : > { %v9156_v3 = vpop.permute.xlu1 %9155  ;;  %v19893_v42 = vpop.permute.xlu0 %9111  ;;  %v9019_v31 = vmax.f32 %v9017_v28, %v9018_v24  ;;  %v13484_v28 = vld [vmem:[%s20414_s5 + $0x3a0] ss:$16 sps:$4 sm:$0xff]   ;;  %v13495_v61 = vld [vmem:[%s20414_s5 + $0x3cc] ss:$16 sps:$4 sm:$0xff]   ;;  %v13493_v24 = vld [vmem:[%s20414_s5 + $0x3c8] ss:$16 sps:$4 sm:$0xff]  }
 0x6ab   : > { %v9207_v14 = vsel %vm682_vm5, %v9156_v3, %v19846_v36  ;;  %v8683_v44 = vmax.f32 %v8681_v21, %v8682_v60  ;;  %v10674_v8 = vpack.c.bf16 %v9339_v62, %v9339_v62  ;;  %v13489_v3 = vld [vmem:[%s20414_s5 + $0x3ac] ss:$16 sps:$4 sm:$0xff]   ;;  %v13487_v21 = vld [vmem:[%s20414_s5 + $0x3a8] ss:$16 sps:$4 sm:$0xff]   ;;  %v13496_v62 = vld [vmem:[%s20414_s5 + $0x3e0] ss:$16 sps:$4 sm:$0xff]  }
 0x6ac   : > { %v9271_v19 = vmax.f32 %v8907_v2, %v9207_v14  ;;  %10174 = vmatpush1.bf16.msra.mxu0 %v10138_v5  ;;  %10215 = vmatpush1.bf16.msra.mxu1 %v10144_v32  ;;  %v13501_v60 = vld [vmem:[%s20414_s5 + $0x3ec] ss:$16 sps:$4 sm:$0xff]  }
 0x6ad   : > { %10586 = vmatprep.subr.bf16.mxu0 %v13462_v37  ;;  %10627 = vmatprep.subr.bf16.mxu1 %v13465_v55  ;;  %v10741_v5 = vunpack.c.l.b16 %v10674_v8  ;;  %v13481_v37 = vld [vmem:[%s20414_s5 + $0x388] ss:$16 sps:$4 sm:$0xff]   ;;  %v13486_v55 = vld [vmem:[%s20414_s5 + $0x3a4] ss:$16 sps:$4 sm:$0xff]  }
 0x6ae   : > { %v9315_v59 = vadd.f32 %v19530_v23, %v9271_v19  ;;  %v19909_v56 = vpop.permute.xlu1 %9183  ;;  %v19911_v57 = vpop.permute.xlu0 %9181  ;;  %v13492_v19 = vld [vmem:[%s20414_s5 + $0x3c4] ss:$16 sps:$4 sm:$0xff]  }
 0x6af   : > { %10182 = vmatmul.mubr.bf16.vlgmr.msra.gmra.mrb[36].mxu0 %v9881_v40  ;;  %10223 = vmatmul.mubr.bf16.vlgmr.msra.gmra.mrb[36].mxu1 %v9881_v40  ;;  %v10747_v14 = vrot.slane %v10741_v5, 7  ;;  %v13523_v5 = vld [vmem:[%s20414_s5 + $0x468] ss:$16 sps:$4 sm:$0xff]  }
 0x6b0   : > { %10587 = vmatpush1.bf16.msra.mxu0 %v13460_v12  ;;  %12300 = vmatprep.mubr.msk.bf16.mxu0 %vm9755_vm11, %v10319_v33  ;;  %v9347_v26 = vmax.f32 %v9315_v59, 0.0  ;;  %v13490_v59 = vld [vmem:[%s20414_s5 + $0x3c0] ss:$16 sps:$4 sm:$0xff]  }
 0x6b1   : > { %10628 = vmatpush1.bf16.msra.mxu1 %v13463_v29  ;;  %12302 = vmatprep.mubr.msk.bf16.mxu1 %vm9755_vm11, %v10319_v33 }
 0x6b2   : > { %v9180_v58 = vpop.permute.xlu1 %9179  ;;  %v9108_v34 = vpop.permute.xlu0 %9107  ;;  %10588 = vmatprep.subr.bf16.mxu0 %v13468_v50  ;;  %10629 = vmatprep.subr.bf16.mxu1 %v13471_v54  ;;  %v10676_v17 = vpack.c.bf16 %v9347_v26, %v9347_v26  ;;  %v13498_v50 = vld [vmem:[%s20414_s5 + $0x3e4] ss:$16 sps:$4 sm:$0xff]   ;;  %v13499_v26 = vld [vmem:[%s20414_s5 + $0x3e8] ss:$16 sps:$4 sm:$0xff]  }
 0x6b3   : > { %v9215_v38 = vsel %vm682_vm5, %v9180_v58, %v19911_v57  ;;  %v9191_v43 = vsel %vm682_vm5, %v9108_v34, %v19858_v13  ;;  %v13508_v34 = vld [vmem:[%s20414_s5 + $0x420] ss:$16 sps:$4 sm:$0xff]  }
 0x6b4   : > { %v9279_v53 = vmax.f32 %v9019_v31, %v9215_v38  ;;  %10589 = vmatpush1.bf16.msra.mxu0 %v13466_v30  ;;  %v9255_v22 = vmax.f32 %v8683_v44, %v9191_v43  ;;  %v10743_v2 = vunpack.c.l.b16 %v10676_v17  ;;  %v9200_v30 = vsel %vm682_vm5, %v19827_v7, %v19825_v15  ;;  %v13504_v15 = vld [vmem:[%s20414_s5 + $0x404] ss:$16 sps:$4 sm:$0xff]   ;;  %v13502_v31 = vld [vmem:[%s20414_s5 + $0x400] ss:$16 sps:$4 sm:$0xff]   ;;  %v13511_v38 = vld [vmem:[%s20414_s5 + $0x428] ss:$16 sps:$4 sm:$0xff]  }
 0x6b5   : > { %10630 = vmatpush1.bf16.msra.mxu1 %v13469_v11  ;;  %10590 = vmatprep.subr.bf16.mxu0 %v13474_v48  ;;  %v9192_v11 = vsel %vm682_vm5, %v19858_v13, %v19893_v42  ;;  %v9216_v48 = vsel %vm682_vm5, %v19911_v57, %v19909_v56  ;;  %v9264_v7 = vmax.f32 %v19469_v27, %v9200_v30  ;;  %v13507_v42 = vld [vmem:[%s20414_s5 + $0x40c] ss:$16 sps:$4 sm:$0xff]   ;;  %v13516_v44 = vld [vmem:[%s20414_s5 + $0x444] ss:$16 sps:$4 sm:$0xff]  }
 0x6b6   : > { %v9323_v20 = vadd.f32 %v19530_v23, %v9279_v53  ;;  %10631 = vmatprep.subr.bf16.mxu1 %v13477_v45  ;;  %v9299_v4 = vadd.f32 %v19530_v23, %v9255_v22  ;;  %v10749_v12 = vrot.slane %v10743_v2, 6  ;;  %v9208_v13 = vsel %vm682_vm5, %v19846_v36, %v19860_v0  ;;  %v13505_v36 = vld [vmem:[%s20414_s5 + $0x408] ss:$16 sps:$4 sm:$0xff]   ;;  %v13510_v0 = vld [vmem:[%s20414_s5 + $0x424] ss:$16 sps:$4 sm:$0xff]  }
 0x6b7   : > { %v9256_v56 = vmax.f32 %v19501_v9, %v9192_v11  ;;  %v9280_v57 = vmax.f32 %v19499_v35, %v9216_v48  ;;  %v9272_v27 = vmax.f32 %v19479_v25, %v9208_v13  ;;  %v9308_v9 = vadd.f32 %v19521_v10, %v9264_v7  ;;  %v13513_v35 = vld [vmem:[%s20414_s5 + $0x42c] ss:$16 sps:$4 sm:$0xff]   ;;  %v12245_v2 = vld [vmem:[%s20414_s5 + $0x4a0] sm:$0xff] }
 0x6b8   : > { %v9355_v39 = vmax.f32 %v9323_v20, 0.0  ;;  %10591 = vmatpush1.bf16.msra.mxu0 %v13472_v1  ;;  %v9331_v32 = vmax.f32 %v9299_v4, 0.0  ;;  %v13519_v53 = vld [vmem:[%s20414_s5 + $0x44c] ss:$16 sps:$4 sm:$0xff]   ;;  %v10318_v48 = vpack.c.b16 %v19890_v49, %v19890_v49  ;;  %v13542_v49 = vld [vmem:[%s20414_s5 + $0x4d0] ss:$16 sps:$4 sm:$0xff]  }
 0x6b9   : > { %10632 = vmatpush1.bf16.msra.mxu1 %v13475_v46  ;;  %10592 = vmatprep.subr.bf16.mxu0 %v13480_v16  ;;  %v9300_v58 = vadd.f32 %v19521_v10, %v9256_v56  ;;  %v9324_v25 = vadd.f32 %v19521_v10, %v9280_v57  ;;  %v9316_v45 = vadd.f32 %v19521_v10, %v9272_v27  ;;  %v9340_v43 = vmax.f32 %v9308_v9, 0.0  ;;  %v13514_v10 = vld [vmem:[%s20414_s5 + $0x440] ss:$16 sps:$4 sm:$0xff]   ;;  %v13517_v46 = vld [vmem:[%s20414_s5 + $0x448] ss:$16 sps:$4 sm:$0xff]  }
 0x6ba   : > { %v10678_v23 = vpack.c.bf16 %v9355_v39, %v9355_v39  ;;  %10633 = vmatprep.subr.bf16.mxu1 %v13483_v6  ;;  %v10672_v63 = vpack.c.bf16 %v9331_v32, %v9331_v32  ;;  %v13522_v16 = vld [vmem:[%s20414_s5 + $0x464] ss:$16 sps:$4 sm:$0xff]   ;;  %v13525_v20 = vld [vmem:[%s20414_s5 + $0x46c] ss:$16 sps:$4 sm:$0xff]   ;;  %v13520_v39 = vld [vmem:[%s20414_s5 + $0x460] ss:$16 sps:$4 sm:$0xff]  }
 0x6bb   : > { %v9332_v1 = vmax.f32 %v9300_v58, 0.0  ;;  %v9356_v8 = vmax.f32 %v9324_v25, 0.0  ;;  %v9348_v22 = vmax.f32 %v9316_v45, 0.0  ;;  %v10675_v17 = vpack.c.bf16 %v9340_v43, %v9340_v43  ;;  %v13528_v32 = vld [vmem:[%s20414_s5 + $0x484] ss:$16 sps:$4 sm:$0xff]  }
 0x6bc   : > { %v10745_v51 = vunpack.c.l.b16 %v10678_v23  ;;  %10593 = vmatpush1.bf16.msra.mxu0 %v13478_v47  ;;  %v10739_v18 = vunpack.c.l.b16 %v10672_v63  ;;  %v12246_v23 = vld [vmem:[%s20414_s5 + $0x4a8] sm:$0xff]  ;;  %v13550_v56 = vld [vmem:[%s20414_s5 + $0x4f4] ss:$16 sps:$4 sm:$0xff]   ;;  %v13554_v9 = vld [vmem:[%s20414_s5 + $0x510] ss:$16 sps:$4 sm:$0xff]  }
 0x6bd   : > { %10634 = vmatpush1.bf16.msra.mxu1 %v13481_v37  ;;  %10594 = vmatprep.subr.bf16.mxu0 %v13486_v55  ;;  %v10673_v6 = vpack.c.bf16 %v9332_v1, %v9332_v1  ;;  %v10679_v4 = vpack.c.bf16 %v9356_v8, %v9356_v8  ;;  %v10677_v47 = vpack.c.bf16 %v9348_v22, %v9348_v22  ;;  %v10742_v37 = vunpack.c.l.b16 %v10675_v17  ;;  %v13531_v55 = vld [vmem:[%s20414_s5 + $0x48c] ss:$16 sps:$4 sm:$0xff]   ;;  %v13551_v27 = vld [vmem:[%s20414_s5 + $0x4f8] ss:$16 sps:$4 sm:$0xff]   ;;  %v13562_v58 = vld [vmem:[%s20414_s5 + $0x534] ss:$16 sps:$4 sm:$0xff]  }
 0x6be   : > { %10635 = vmatprep.subr.bf16.mxu1 %v13489_v3  ;;  %v10751_v40 = vrot.slane %v10745_v51, 5  ;;  %v10748_v29 = vsel %vm4986_vm12, %v10747_v14, %v10739_v18  ;;  %v13526_v51 = vld [vmem:[%s20414_s5 + $0x480] ss:$16 sps:$4 sm:$0xff]   ;;  %v13529_v14 = vld [vmem:[%s20414_s5 + $0x488] ss:$16 sps:$4 sm:$0xff]   ;;  %v12296_v18 = vcombine.high %v12245_v2, %v12245_v2 }
 0x6bf   : > { %v10750_v33 = vsel %vm4989_vm13, %v10749_v12, %v10748_v29  ;;  %v10740_v3 = vunpack.c.l.b16 %v10673_v6  ;;  %v10746_v63 = vunpack.c.l.b16 %v10679_v4  ;;  %v12298_v12 = vcombine.high %v12246_v23, %v12246_v23  ;;  %v13547_v13 = vld [vmem:[%s20414_s5 + $0x4dc] ss:$16 sps:$4 sm:$0xff]   ;;  %v13563_v45 = vld [vmem:[%s20414_s5 + $0x538] ss:$16 sps:$4 sm:$0xff]   ;;  %v13566_v43 = vld [vmem:[%s20414_s5 + $0x550] ss:$16 sps:$4 sm:$0xff]  }
 0x6c0   : > { %10595 = vmatpush1.bf16.msra.mxu0 %v13484_v28  ;;  %v19987_v54 = vsel %vm4992_vm14, %v10751_v40, %v10750_v33  ;;  %v10744_v28 = vunpack.c.l.b16 %v10677_v47  ;;  %v13553_v57 = vld [vmem:[%s20414_s5 + $0x4fc] ss:$16 sps:$4 sm:$0xff]   ;;  %v13574_v1 = vld [vmem:[%s20414_s5 + $0x574] ss:$16 sps:$4 sm:$0xff]   ;;  %v13575_v22 = vld [vmem:[%s20414_s5 + $0x578] ss:$16 sps:$4 sm:$0xff]  }
 0x6c1   : > { %10636 = vmatpush1.bf16.msra.mxu1 %v13487_v21  ;;  %10596 = vmatprep.subr.bf16.mxu0 %v13492_v19  ;;  %v12295_v21 = vcombine.low %v12245_v2, %v12245_v2  ;;  %v10753_v19 = vrot.slane %v10742_v37, 7  ;;  %v10757_v29 = vrot.slane %v10746_v63, 5  ;;  %v13565_v25 = vld [vmem:[%s20414_s5 + $0x53c] ss:$16 sps:$4 sm:$0xff]   ;;  %v13578_v17 = vld [vmem:[%s20414_s5 + $0x590] ss:$16 sps:$4 sm:$0xff]  }
 0x6c2   : > { %10637 = vmatprep.subr.bf16.mxu1 %v13495_v61  ;;  %v12297_v61 = vcombine.low %v12246_v23, %v12246_v23  ;;  %v13577_v8 = vld [vmem:[%s20414_s5 + $0x57c] ss:$16 sps:$4 sm:$0xff]   ;;  %v13586_v6 = vld [vmem:[%s20414_s5 + $0x5b4] ss:$16 sps:$4 sm:$0xff]   ;;  %v13587_v47 = vld [vmem:[%s20414_s5 + $0x5b8] ss:$16 sps:$4 sm:$0xff]  }
 0x6c3   : > { %v10754_v40 = vsel %vm4986_vm12, %v10753_v19, %v10740_v3  ;;  %v10575_v33 = vsel %vm604_vm3, %v12295_v21, 0  ;;  %v13589_v4 = vld [vmem:[%s20414_s5 + $0x5bc] ss:$16 sps:$4 sm:$0xff]   ;;  %v13590_v37 = vld [vmem:[%s20414_s5 + $0x5d0] ss:$16 sps:$4 sm:$0xff]  }
 0x6c4   : > { %10597 = vmatpush1.bf16.msra.mxu0 %v13490_v59  ;;  %v10755_v59 = vrot.slane %v10744_v28, 6  ;;  %v13598_v2 = vld [vmem:[%s20414_s5 + $0x5f4] ss:$16 sps:$4 sm:$0xff]   ;;  %v13601_v23 = vld [vmem:[%s20414_s5 + $0x5fc] ss:$16 sps:$4 sm:$0xff]  }
 0x6c5   : > { %10638 = vmatpush1.bf16.msra.mxu1 %v13493_v24  ;;  %10598 = vmatprep.subr.bf16.mxu0 %v13498_v50  ;;  %v13538_v24 = vld [vmem:[%s20414_s5 + $0x4b4] ss:$16 sps:$4 sm:$0xff]   ;;  %v10581_v50 = vsel %vm604_vm3, %v12297_v61, 0  ;;  %v13596_v3 = vld [vmem:[%s20414_s5 + $0x5f0] ss:$16 sps:$4 sm:$0xff]  }
 0x6c6   : > { %10639 = vmatprep.subr.bf16.mxu1 %v13501_v60  ;;  %v13541_v60 = vld [vmem:[%s20414_s5 + $0x4bc] ss:$16 sps:$4 sm:$0xff]   ;;  %v10756_v30 = vsel %vm4989_vm13, %v10755_v59, %v10754_v40  ;;  %v13599_v63 = vld [vmem:[%s20414_s5 + $0x5f8] ss:$16 sps:$4 sm:$0xff]   ;;  %v13602_v21 = vld [vmem:[%s20414_s5 + $0x610] ss:$16 sps:$4 sm:$0xff]  }
 0x6c7   : > { %v10758_v11 = vsel %vm4992_vm14, %v10757_v29, %v10756_v30  ;;  %v13607_v28 = vld [vmem:[%s20414_s5 + $0x61c] ss:$16 sps:$4 sm:$0xff]   ;;  %v13605_v19 = vld [vmem:[%s20414_s5 + $0x618] ss:$16 sps:$4 sm:$0xff]   ;;  %v13614_v30 = vld [vmem:[%s20416_s7] sm:$0xff]  }
 0x6c8   : > { %10599 = vmatpush1.bf16.msra.mxu0 %v13496_v62  ;;  %v13536_v62 = vld [vmem:[%s20414_s5 + $0x4b0] ss:$16 sps:$4 sm:$0xff]   ;;  %v10760_v7 = vpack.c.b16 %v10758_v11, %v10758_v11  ;;  %v13617_v11 = vld [vmem:[%s20416_s7 + $0xc8] sm:$0xff]  }
 0x6c9   : > { %10640 = vmatpush1.bf16.msra.mxu1 %v13499_v26  ;;  %10600 = vmatprep.subr.bf16.mxu0 %v13504_v15  ;;  %v13539_v26 = vld [vmem:[%s20414_s5 + $0x4b8] ss:$16 sps:$4 sm:$0xff]   ;;  %v13544_v15 = vld [vmem:[%s20414_s5 + $0x4d4] ss:$16 sps:$4 sm:$0xff]  }
 0x6ca   : > { %10641 = vmatprep.subr.bf16.mxu1 %v13507_v42  ;;  %v13545_v42 = vld [vmem:[%s20414_s5 + $0x4d8] ss:$16 sps:$4 sm:$0xff]  }
 0x6cc   : > { %10601 = vmatpush1.bf16.msra.mxu0 %v13502_v31  ;;  %v13548_v31 = vld [vmem:[%s20414_s5 + $0x4f0] ss:$16 sps:$4 sm:$0xff]  }
 0x6cd   : > { %10642 = vmatpush1.bf16.msra.mxu1 %v13505_v36  ;;  %10602 = vmatprep.subr.bf16.mxu0 %v13510_v0  ;;  %v13556_v36 = vld [vmem:[%s20414_s5 + $0x514] ss:$16 sps:$4 sm:$0xff]   ;;  %v13559_v0 = vld [vmem:[%s20414_s5 + $0x51c] ss:$16 sps:$4 sm:$0xff]  }
 0x6ce   : > { %10643 = vmatprep.subr.bf16.mxu1 %v13513_v35  ;;  %v13557_v35 = vld [vmem:[%s20414_s5 + $0x518] ss:$16 sps:$4 sm:$0xff]  }
 0x6d0   : > { %10603 = vmatpush1.bf16.msra.mxu0 %v13508_v34  ;;  %v13560_v34 = vld [vmem:[%s20414_s5 + $0x530] ss:$16 sps:$4 sm:$0xff]  }
 0x6d1   : > { %10644 = vmatpush1.bf16.msra.mxu1 %v13511_v38  ;;  %10604 = vmatprep.subr.bf16.mxu0 %v13516_v44  ;;  %v13568_v38 = vld [vmem:[%s20414_s5 + $0x554] ss:$16 sps:$4 sm:$0xff]   ;;  %v13571_v44 = vld [vmem:[%s20414_s5 + $0x55c] ss:$16 sps:$4 sm:$0xff]  }
 0x6d2   : > { %10645 = vmatprep.subr.bf16.mxu1 %v13519_v53  ;;  %v13569_v53 = vld [vmem:[%s20414_s5 + $0x558] ss:$16 sps:$4 sm:$0xff]  }
 0x6d4   : > { %10605 = vmatpush1.bf16.msra.mxu0 %v13514_v10  ;;  %v13572_v10 = vld [vmem:[%s20414_s5 + $0x570] ss:$16 sps:$4 sm:$0xff]  }
 0x6d5   : > { %10646 = vmatpush1.bf16.msra.mxu1 %v13517_v46  ;;  %10606 = vmatprep.subr.bf16.mxu0 %v13522_v16  ;;  %v13580_v46 = vld [vmem:[%s20414_s5 + $0x594] ss:$16 sps:$4 sm:$0xff]   ;;  %v13583_v16 = vld [vmem:[%s20414_s5 + $0x59c] ss:$16 sps:$4 sm:$0xff]  }
 0x6d6   : > { %10647 = vmatprep.subr.bf16.mxu1 %v13525_v20  ;;  %v13581_v20 = vld [vmem:[%s20414_s5 + $0x598] ss:$16 sps:$4 sm:$0xff]  }
 0x6d8   : > { %10607 = vmatpush1.bf16.msra.mxu0 %v13520_v39  ;;  %v13584_v39 = vld [vmem:[%s20414_s5 + $0x5b0] ss:$16 sps:$4 sm:$0xff]  }
 0x6d9   : > { %10648 = vmatpush1.bf16.msra.mxu1 %v13523_v5  ;;  %10608 = vmatprep.subr.bf16.mxu0 %v13528_v32  ;;  %v13592_v5 = vld [vmem:[%s20414_s5 + $0x5d4] ss:$16 sps:$4 sm:$0xff]   ;;  %v13595_v32 = vld [vmem:[%s20414_s5 + $0x5dc] ss:$16 sps:$4 sm:$0xff]  }
 0x6da   : > { %10649 = vmatprep.subr.bf16.mxu1 %v13531_v55  ;;  %v13593_v55 = vld [vmem:[%s20414_s5 + $0x5d8] ss:$16 sps:$4 sm:$0xff]  }
 0x6dc   : > { %10609 = vmatpush1.bf16.msra.mxu0 %v13526_v51  ;;  %v13604_v51 = vld [vmem:[%s20414_s5 + $0x614] ss:$16 sps:$4 sm:$0xff]  }
 0x6dd   : > { %10650 = vmatpush1.bf16.msra.mxu1 %v13529_v14  ;;  %12299 = vmatprep.subr.msk.bf16.mxu0 %vm604_vm3, %v12296_v18  ;;  %v12351_v14 = vld [vmem:[%s20414_s5 + $0x630] sm:$0xff]  ;;  %v12352_v18 = vld [vmem:[%s20414_s5 + $0x638] sm:$0xff] }
 0x6de   : > { %12301 = vmatprep.subr.msk.bf16.mxu1 %vm604_vm3, %v12298_v12  ;;  %v12402_v12 = vcombine.high %v12351_v14, %v12351_v14  ;;  %v12401_v61 = vcombine.low %v12351_v14, %v12351_v14  ;;  %v12404_v40 = vcombine.high %v12352_v18, %v12352_v18  ;;  %v12403_v29 = vcombine.low %v12352_v18, %v12352_v18 }
 0x6e0   : > { %10611 = vmatpush1.bf16.msra.mxu0 %v10575_v33  ;;  %v11016_v59 = vsel %vm604_vm3, %v12401_v61, 0  ;;  %v11022_v33 = vsel %vm604_vm3, %v12403_v29, 0 }
 0x6e1   : > { %10652 = vmatpush1.bf16.msra.mxu1 %v10581_v50  ;;  %11027 = vmatprep.subr.bf16.mxu0 %v13538_v24  ;;  %v10759_v24 = vpack.c.b16 %v19987_v54, %v19987_v54  ;;  %v13612_v50 = vld [vmem:[%s20416_s7 + $0x40] sm:$0xff]   ;;  %v13616_v54 = vld [vmem:[%s20416_s7 + $0x48] sm:$0xff]  }
 0x6e2   : > { %11068 = vmatprep.subr.bf16.mxu1 %v13541_v60  ;;  %v13613_v60 = vld [vmem:[%s20416_s7 + $0xc0] sm:$0xff]  }
 0x6e3   : > { %10619 = vmatmul.mubr.bf16.vlgmr.msra.gmra.mrb[40].mxu0 %v10318_v48 }
 0x6e4   : > { %10660 = vmatmul.mubr.bf16.vlgmr.msra.gmra.mrb[40].mxu1 %v10318_v48  ;;  %11028 = vmatpush1.bf16.msra.mxu0 %v13536_v62  ;;  %v13615_v62 = vld [vmem:[%s20416_s7 + $0x80] sm:$0xff]   ;;  %v13618_v48 = vld [vmem:[%s20416_s7 + $0x8] sm:$0xff]  }
 0x6e5   : > { %12406 = vmatprep.mubr.msk.bf16.mxu0 %vm9755_vm11, %v10760_v7  ;;  %11069 = vmatpush1.bf16.msra.mxu1 %v13539_v26  ;;  %v13619_v26 = vld [vmem:[%s20416_s7 + $0x88] sm:$0xff]  }
 0x6e6   : > { %12408 = vmatprep.mubr.msk.bf16.mxu1 %vm9755_vm11, %v10760_v7  ;;  %11029 = vmatprep.subr.bf16.mxu0 %v13544_v15  ;;  %v13620_v15 = vld [vmem:[%s20416_s7 + $0x50] sm:$0xff]  }
 0x6e7   : > { %11070 = vmatprep.subr.bf16.mxu1 %v13547_v13  ;;  %v13621_v7 = vld [vmem:[%s20416_s7 + $0xd0] sm:$0xff]  }
 0x6e8   : > { %11030 = vmatpush1.bf16.msra.mxu0 %v13542_v49  ;;  %v13622_v13 = vld [vmem:[%s20416_s7 + $0x10] sm:$0xff]  }
 0x6e9   : > { %11071 = vmatpush1.bf16.msra.mxu1 %v13545_v42  ;;  %11031 = vmatprep.subr.bf16.mxu0 %v13550_v56  ;;  %v13623_v49 = vld [vmem:[%s20416_s7 + $0x90] sm:$0xff]   ;;  %v13624_v42 = vld [vmem:[%s20416_s7 + $0x58] sm:$0xff]  }
 0x6ea   : > { %11072 = vmatprep.subr.bf16.mxu1 %v13553_v57  ;;  %v13625_v56 = vld [vmem:[%s20416_s7 + $0xd8] sm:$0xff]  }
 0x6eb   : > { %v13626_v57 = vld [vmem:[%s20416_s7 + $0x18] sm:$0xff]  }
 0x6ec   : > { %11032 = vmatpush1.bf16.msra.mxu0 %v13548_v31  ;;  %v13627_v31 = vld [vmem:[%s20416_s7 + $0x98] sm:$0xff]  }
 0x6ed   : > { %11073 = vmatpush1.bf16.msra.mxu1 %v13551_v27  ;;  %11033 = vmatprep.subr.bf16.mxu0 %v13556_v36  ;;  %v13628_v27 = vld [vmem:[%s20416_s7 + $0x60] sm:$0xff]  }
 0x6ee   : > { %11074 = vmatprep.subr.bf16.mxu1 %v13559_v0  ;;  %v13629_v36 = vld [vmem:[%s20416_s7 + $0xe0] sm:$0xff]  }
 0x6ef   : > { %v13630_v0 = vld [vmem:[%s20416_s7 + $0x20] sm:$0xff]  }
 0x6f0   : > { %11034 = vmatpush1.bf16.msra.mxu0 %v13554_v9  ;;  %v13631_v9 = vld [vmem:[%s20416_s7 + $0xa0] sm:$0xff]  }
 0x6f1   : > { %11075 = vmatpush1.bf16.msra.mxu1 %v13557_v35  ;;  %11035 = vmatprep.subr.bf16.mxu0 %v13562_v58  ;;  %v13632_v35 = vld [vmem:[%s20416_s7 + $0x68] sm:$0xff]  }
 0x6f2   : > { %11076 = vmatprep.subr.bf16.mxu1 %v13565_v25  ;;  %v13633_v58 = vld [vmem:[%s20416_s7 + $0xe8] sm:$0xff]  }
 0x6f4   : > { %11036 = vmatpush1.bf16.msra.mxu0 %v13560_v34 }
 0x6f5   : > { %11077 = vmatpush1.bf16.msra.mxu1 %v13563_v45  ;;  %11037 = vmatprep.subr.bf16.mxu0 %v13568_v38 }
 0x6f6   : > { %11078 = vmatprep.subr.bf16.mxu1 %v13571_v44 }
 0x6f8   : > { %11038 = vmatpush1.bf16.msra.mxu0 %v13566_v43 }
 0x6f9   : > { %11079 = vmatpush1.bf16.msra.mxu1 %v13569_v53  ;;  %11039 = vmatprep.subr.bf16.mxu0 %v13574_v1 }
 0x6fa   : > { %11080 = vmatprep.subr.bf16.mxu1 %v13577_v8  ;;  %v13634_v8 = vld [vmem:[%s20416_s7 + $0x28] sm:$0xff]  }
 0x6fc   : > { %11040 = vmatpush1.bf16.msra.mxu0 %v13572_v10  ;;  %v13635_v10 = vld [vmem:[%s20416_s7 + $0xa8] sm:$0xff]  }
 0x6fd   : > { %11081 = vmatpush1.bf16.msra.mxu1 %v13575_v22  ;;  %11041 = vmatprep.subr.bf16.mxu0 %v13580_v46  ;;  %v13636_v22 = vld [vmem:[%s20416_s7 + $0x70] sm:$0xff]  }
 0x6fe   : > { %11082 = vmatprep.subr.bf16.mxu1 %v13583_v16  ;;  %v13637_v46 = vld [vmem:[%s20416_s7 + $0xf0] sm:$0xff]  }
 0x6ff   : > { %v13638_v16 = vld [vmem:[%s20416_s7 + $0x30] sm:$0xff]  }
 0x700   : > { %11042 = vmatpush1.bf16.msra.mxu0 %v13578_v17  ;;  %v13639_v17 = vld [vmem:[%s20416_s7 + $0xb0] sm:$0xff]  }
 0x701   : > { %11083 = vmatpush1.bf16.msra.mxu1 %v13581_v20  ;;  %11043 = vmatprep.subr.bf16.mxu0 %v13586_v6  ;;  %v13640_v20 = vld [vmem:[%s20416_s7 + $0x78] sm:$0xff]  }
 0x702   : > { %11084 = vmatprep.subr.bf16.mxu1 %v13589_v4  ;;  %v13641_v6 = vld [vmem:[%s20416_s7 + $0xf8] sm:$0xff]  }
 0x703   : > { %v13642_v4 = vld [vmem:[%s20416_s7 + $0x38] sm:$0xff]  }
 0x704   : > { %11044 = vmatpush1.bf16.msra.mxu0 %v13584_v39  ;;  %v13643_v39 = vld [vmem:[%s20416_s7 + $0xb8] sm:$0xff]  }
 0x705   : > { %11085 = vmatpush1.bf16.msra.mxu1 %v13587_v47  ;;  %11045 = vmatprep.subr.bf16.mxu0 %v13592_v5 }
 0x706   : > { %11086 = vmatprep.subr.bf16.mxu1 %v13595_v32 }
 0x708   : > { %11046 = vmatpush1.bf16.msra.mxu0 %v13590_v37 }
 0x709   : > { %11087 = vmatpush1.bf16.msra.mxu1 %v13593_v55  ;;  %11047 = vmatprep.subr.bf16.mxu0 %v13598_v2 }
 0x70a   : > { %11088 = vmatprep.subr.bf16.mxu1 %v13601_v23 }
 0x70c   : > { %11048 = vmatpush1.bf16.msra.mxu0 %v13596_v3 }
 0x70d   : > { %11089 = vmatpush1.bf16.msra.mxu1 %v13599_v63  ;;  %11049 = vmatprep.subr.bf16.mxu0 %v13604_v51 }
 0x70e   : > { %11090 = vmatprep.subr.bf16.mxu1 %v13607_v28 }
 0x710   : > { %11050 = vmatpush1.bf16.msra.mxu0 %v13602_v21 }
 0x711   : > { %11091 = vmatpush1.bf16.msra.mxu1 %v13605_v19  ;;  %12405 = vmatprep.subr.msk.bf16.mxu0 %vm604_vm3, %v12402_v12 }
 0x712   : > { %12407 = vmatprep.subr.msk.bf16.mxu1 %vm604_vm3, %v12404_v40 }
 0x714   : > { %11052 = vmatpush1.bf16.msra.mxu0 %v11016_v59 }
 0x715   : > { %11093 = vmatpush1.bf16.msra.mxu1 %v11022_v33  ;;  %12448 = vmatprep.subr.bf16.mxu0 %v13612_v50 }
 0x716   : > { %12470 = vmatprep.subr.bf16.mxu1 %v13613_v60 }
 0x717   : > { %11060 = vmatmul.mubr.bf16.vlgmr.msra.gmra.mrb[44].mxu0 %v10759_v24 }
 0x718   : > { %11101 = vmatmul.mubr.bf16.vlgmr.msra.gmra.mrb[44].mxu1 %v10759_v24  ;;  %12449 = vmatpush3.bf16.msra.mxu0 %v13614_v30  ;;  %v11113_v30 = vld [vmem:[%s20415_s6] sm:$0xf] }
 0x719   : > { %12471 = vmatpush3.bf16.msra.mxu1 %v13615_v62  ;;  %12450 = vmatprep.subr.bf16.mxu0 %v13616_v54  ;;  %v21460_v62 = vld [vmem:[#allocation6_spill] sm:$0xff] }
 0x71a   : > { %12472 = vmatprep.subr.bf16.mxu1 %v13617_v11  ;;  %v11125_v54 = vsub.s32 2, %v21460_v62  ;;  %v11129_v11 = vsub.s32 3, %v21460_v62 }
 0x71c   : > { %12451 = vmatpush3.bf16.msra.mxu0 %v13618_v48  ;;  %v11118_v48 = vrot.slane %v11113_v30, %v21459_v41 }
 0x71d   : > { %12473 = vmatpush3.bf16.msra.mxu1 %v13619_v26  ;;  %12452 = vmatprep.subr.bf16.mxu0 %v13620_v15  ;;  %v11126_v15 = vrot.slane %v11113_v30, %v11125_v54 }
 0x71e   : > { %12474 = vmatprep.subr.bf16.mxu1 %v13621_v7  ;;  %v11122_v7 = vrot.slane %v11113_v30, %v21458_v52 }
 0x720   : > { %12453 = vmatpush3.bf16.msra.mxu0 %v13622_v13 }
 0x721   : > { %12475 = vmatpush3.bf16.msra.mxu1 %v13623_v49  ;;  %12454 = vmatprep.subr.bf16.mxu0 %v13624_v42 }
 0x722   : > { %12476 = vmatprep.subr.bf16.mxu1 %v13625_v56  ;;  %v11130_v56 = vrot.slane %v11113_v30, %v11129_v11 }
 0x724   : > { %12455 = vmatpush3.bf16.msra.mxu0 %v13626_v57 }
 0x725   : > { %12477 = vmatpush3.bf16.msra.mxu1 %v13627_v31  ;;  %12456 = vmatprep.subr.bf16.mxu0 %v13628_v27 }
 0x726   : > { %12478 = vmatprep.subr.bf16.mxu1 %v13629_v36 }
 0x728   : > { %12457 = vmatpush3.bf16.msra.mxu0 %v13630_v0 }
 0x729   : > { %12479 = vmatpush3.bf16.msra.mxu1 %v13631_v9  ;;  %12458 = vmatprep.subr.bf16.mxu0 %v13632_v35 }
 0x72a   : > { %12480 = vmatprep.subr.bf16.mxu1 %v13633_v58 }
 0x72c   : > { %12459 = vmatpush3.bf16.msra.mxu0 %v13634_v8 }
 0x72d   : > { %12481 = vmatpush3.bf16.msra.mxu1 %v13635_v10  ;;  %12460 = vmatprep.subr.bf16.mxu0 %v13636_v22 }
 0x72e   : > { %12482 = vmatprep.subr.bf16.mxu1 %v13637_v46 }
 0x730   : > { %12461 = vmatpush3.bf16.msra.mxu0 %v13638_v16 }
 0x731   : > { %12483 = vmatpush3.bf16.msra.mxu1 %v13639_v17  ;;  %12462 = vmatprep.subr.bf16.mxu0 %v13640_v20  ;;  %v12409_v20 = vld [vmem:[%s20417_s8] ss:$0 sm:$0xff] }
 0x732   : > { %12484 = vmatprep.subr.bf16.mxu1 %v13641_v6 }
 0x734   : > { %12463 = vmatpush3.bf16.msra.mxu0 %v13642_v4 }
 0x735   : > { %12485 = vmatpush3.bf16.msra.mxu1 %v13643_v39 }
 0x74e   : > { %v9805_v25 = vpop.f32.mrb[32].mxu0  ;;  %v9846_v34 = vpop.f32.mrb[32].mxu1 }
 0x74f   : > { %v9807_v45 = vpop.f32.mrb[33].mxu0  ;;  %v9848_v38 = vpop.f32.mrb[33].mxu1 }
 0x750   : > { %v9809_v44 = vpop.f32.mrb[34].mxu0  ;;  %v9850_v43 = vpop.f32.mrb[34].mxu1 }
 0x751   : > { %v9810_v53 = vpop.f32.mrb[35].mxu0  ;;  %v9851_v1 = vpop.f32.mrb[35].mxu1 }
 0x782   : > { %v10183_v47 = vpop.f32.mrb[36].mxu0  ;;  %v10224_v5 = vpop.f32.mrb[36].mxu1 }
 0x783   : > { %v10184_v32 = vadd.f32 %v10183_v47, %v9805_v25  ;;  %v10225_v37 = vadd.f32 %v10224_v5, %v9846_v34  ;;  %v10185_v55 = vpop.f32.mrb[37].mxu0  ;;  %v10226_v2 = vpop.f32.mrb[37].mxu1 }
 0x784   : > { %v10186_v23 = vadd.f32 %v10185_v55, %v9807_v45  ;;  %v10227_v3 = vadd.f32 %v10226_v2, %v9848_v38  ;;  %v10187_v63 = vpop.f32.mrb[38].mxu0  ;;  %v10228_v51 = vpop.f32.mrb[38].mxu1 }
 0x785   : > { %v10188_v28 = vpop.f32.mrb[39].mxu0  ;;  %v10229_v14 = vpop.f32.mrb[39].mxu1 }
 0x7b6   : > { %v10620_v18 = vpop.f32.mrb[40].mxu0 }
 0x7b7   : > { %v10668_v21 = vadd.f32 %v10620_v18, %v10184_v32  ;;  %v10661_v19 = vpop.f32.mrb[40].mxu1  ;;  %v10622_v12 = vpop.f32.mrb[41].mxu0 }
 0x7b8   : > { %v10670_v61 = vadd.f32 %v10661_v19, %v10225_v37  ;;  %v10669_v40 = vadd.f32 %v10622_v12, %v10186_v23  ;;  %v10663_v29 = vpop.f32.mrb[41].mxu1  ;;  %v10624_v59 = vpop.f32.mrb[42].mxu0 }
 0x7b9   : > { %v10671_v33 = vadd.f32 %v10663_v29, %v10227_v3  ;;  %v10665_v24 = vpop.f32.mrb[42].mxu1  ;;  %v10625_v50 = vpop.f32.mrb[43].mxu0 }
 0x7ba   : > { %v10666_v60 = vpop.f32.mrb[43].mxu1 }
 0x7ea   : > { %v11061_v26 = vpop.f32.mrb[44].mxu0 }
 0x7eb   : > { %v11109_v13 = vadd.f32 %v11061_v26, %v10668_v21  ;;  %v11102_v49 = vpop.f32.mrb[44].mxu1  ;;  %v11063_v42 = vpop.f32.mrb[45].mxu0 }
 0x7ec   : > { %v11111_v57 = vadd.f32 %v11102_v49, %v10670_v61  ;;  %v11110_v31 = vadd.f32 %v11063_v42, %v10669_v40  ;;  %v11104_v27 = vpop.f32.mrb[45].mxu1  ;;  %v11065_v36 = vpop.f32.mrb[46].mxu0 }
 0x7ed   : > { %v11135_v0 = vadd.f32 %v11118_v48, %v11109_v13  ;;  %v11112_v9 = vadd.f32 %v11104_v27, %v10671_v33  ;;  %v11106_v35 = vpop.f32.mrb[46].mxu1  ;;  %v11066_v58 = vpop.f32.mrb[47].mxu0 }
 0x7ee   : > { %v11137_v25 = vadd.f32 %v11126_v15, %v11111_v57  ;;  %v11136_v41 = vadd.f32 %v11122_v7, %v11110_v31  ;;  %v11107_v34 = vpop.f32.mrb[47].mxu1 }
 0x7ef   : > { %v11139_v45 = vmax.f32 %v11135_v0, 0.0  ;;  %v11138_v38 = vadd.f32 %v11130_v56, %v11112_v9 }
 0x7f0   : > { %v11141_v44 = vmax.f32 %v11137_v25, 0.0  ;;  %v11140_v52 = vmax.f32 %v11136_v41, 0.0 }
 0x7f1   : > { %v11142_v43 = vmax.f32 %v11138_v38, 0.0  ;;  %v11143_v8 = vpack.c.bf16 %v11139_v45, %v11139_v45 }
 0x7f2   : > { %v11494_v53 = vcombine.low %v11139_v45, %v11140_v52  ;;  %v11144_v1 = vpack.c.bf16 %v11140_v52, %v11140_v52  ;;  %v11145_v46 = vpack.c.bf16 %v11141_v44, %v11141_v44 }
 0x7f3   : > { %v11495_v10 = vcombine.low %v11141_v44, %v11142_v43  ;;  %v11146_v22 = vpack.c.bf16 %v11142_v43, %v11142_v43 }
 0x7f4   : > { %11498 = vst [vmem:[%s375_s27] sm:$0xff] %v11494_v53  ;;  %11442 = vmatprep.mubr.bf16.mxu0 %v11144_v1 }
 0x7f5   : > { %11499 = vst [vmem:[%s375_s27 + $0x8] sm:$0xff] %v11495_v10  ;;  %11482 = vmatprep.mubr.bf16.mxu1 %v11146_v22  ;;  %11443 = vmatmul.mubr.bf16.vlgmr.msra.gmra.mrb[48].mxu0 %v11143_v8  ;;  %s13656_s27 = scalar_lea.vmem %s20369_s20, 64 }
 0x7f6   : > { %11483 = vmatmul.mubr.bf16.vlgmr.msra.gmra.mrb[48].mxu1 %v11145_v46  ;;  %p13657_p12 = scmp.ne.s32.totalorder %s20369_s20, %s13656_s27  ;;  %p13664_p2 = scmp.lt.s32.totalorder %s13662_s29, %s13656_s27 }
 0x7f8   : > { %p13658_p13 = pnand %p13657_p12, %p13823_p5  ;;  %p13665_p3 = por %p13664_p2, %p13663_p1 }
 0x7fa   : > { %p13659_p0 = pneg %p13658_p13 }
 0x7fc   : > { %p13666_p4 = pnand %p13665_p3, %p13659_p0 }
 0x8c8   : > { %v12464_v16 = vpop.f32.mrb[48].mxu0 }
 0x8c9   : > { %v12486_v17 = vpop.f32.mrb[48].mxu1  ;;  %v12465_v6 = vpop.f32.mrb[49].mxu0 }
 0x8ca   : > { %v12466_v4 = vadd.f32 %v12465_v6, %v12464_v16  ;;  %v12487_v39 = vpop.f32.mrb[49].mxu1  ;;  %v12467_v47 = vpop.f32.mrb[50].mxu0 }
 0x8cb   : > { %v12488_v5 = vadd.f32 %v12487_v39, %v12486_v17  ;;  %v12489_v32 = vpop.f32.mrb[50].mxu1  ;;  %v12468_v37 = vpop.f32.mrb[51].mxu0 }
 0x8cc   : > { %v11445_v55 = vadd.f32 %v12466_v4, %v12409_v20  ;;  %v12490_v2 = vpop.f32.mrb[51].mxu1 }
 0x8ce   : > { %v11485_v23 = vadd.f32 %v12488_v5, %v11445_v55 }
 0x8d0   : > { %11500 = vst [vmem:[%s356_s12] sm:$0xf] %v11485_v23 }
 0x8d1   : > { %13669 = shalt.err (!%p13666_p4)
}
 0x8d2   : > { %s13670_s30 = scalar_lea.hbm %s20367_s26, 64  ;;  %s13674_s12 = scalar_lea.hbm %s20418_s9, 128 }
 0x8d3   : > { %p13671_p7 = scmp.ne.s32.totalorder %s20367_s26, %s13670_s30  ;;  %p13675_p10 = scmp.lt.u32.totalorder %s20367_s26, %s20418_s9 }
 0x8d4   : > { %p13676_p11 = scmp.lt.u32.totalorder %s13674_s12, %s13670_s30  ;;  %p13678_p13 = scmp.lt.u32.totalorder %s13670_s30, %s20367_s26 }
 0x8d5   : > { %p13672_p8 = pnand %p13671_p7, %p13823_p5 }
 0x8d6   : > { %p13677_p12 = por %p13676_p11, %p13675_p10 }
 0x8d7   : > { %p13673_p9 = pneg %p13672_p8 }
 0x8d8   : > { %p13679_p0 = por %p13678_p13, %p13677_p12 }
 0x8da   : > { %p13680_p1 = pnand %p13679_p0, %p13673_p9 }
 0x8dc   : > { %13683 = shalt.err (!%p13680_p1)
}
 0x8dd   : > { %12556 = dma.vmem_to_hbm [thread:$0]  (%p13823_p5), %s20369_s20, 64, %s20367_s26, %s11502_s25  }
 0x8de PF: > { %p12562_p2 = scmp.ge.s32.totalorder %s13718_s16, 2  ;;  %s11535_s27 = sand.u32 1, %s13706_s13  }
 0x8df   : > { %s11536_s17 = scalar_lea.sflag [#allocation3], %s11535_s27 }
 0x8e0   : > { %p12559_p3 = pnand %p12562_p2, %p13827_p6 }
 0x8e2   : > { %13701 = dma.done.wait (!%p12559_p3), %s11536_s17, 64  }
 0x8e3   : > { %13703 = vsyncadd (!%p12559_p3), %s11536_s17, 4294967232  ;;  %s21461_s28 = sld [smem:[#allocation5_spill]]  ;;  %p21_p4 = scmp.ge.s32.totalorder %s13810_s19, 4  }
 0x8e4   : > { %s21462_s13 = smov %s13710_s14  ;;  %s21463_s14 = smov %s13714_s15 }
 0x8e5   : > { %s21465_s16 = smov %s13810_s19  ;;  %23 = sbr.rel (!%p21_p4) target bundleno = 3 (0x3), region = 106 }
 0x8e9   : > { %s21464_s15 = smov %s21461_s28 }
 0x8ec   :  { %11549 = vsyncpa [#allocation3], 1 }
 0x8ed   :  { %11551 = vsyncpa [#allocation3 + $0x1], 1 }

</bundles_post_ra>
